<compile_context>
chip_gen: v5e
topology: v5e:2x2
jax: 0.10.0
libtpu: 0.0.40
codegen_flags: <defaults>
</compile_context>

<pallas_src>
import functools

import jax
import jax.numpy as jnp
from jax.experimental import pallas as pl
from jax.experimental.pallas import tpu as pltpu


# ----------------------------------------------------------------------------
# VMEM budget: ~half the chip's VMEM (32 MiB on v7x, 64 MiB on v5e/v6e)
# ----------------------------------------------------------------------------
def _default_vmem_limit():
    try:
        cap = int(pltpu.get_tpu_info().vmem_capacity_bytes)
    except Exception:
        cap = 64 * 1024 * 1024            # conservative (v7x-sized) fallback
    return max(16 * 1024 * 1024, min(cap // 2, 64 * 1024 * 1024))


_VMEM_LIMIT = _default_vmem_limit()
_TILE_BUDGET = _VMEM_LIMIT // 8           # target combined A+out bytes per step


# ----------------------------------------------------------------------------
# Single-buffering of revisited constant blocks (probe once, fall back clean)
# ----------------------------------------------------------------------------
def _probe_buffered1():
    try:
        buf = pl.Buffered(1)

        def _k(x_ref, o_ref):
            o_ref[...] = x_ref[...] + 1.0

        f = pl.pallas_call(
            _k,
            out_shape=jax.ShapeDtypeStruct((8, 128), jnp.float32),
            grid=(2,),
            in_specs=[pl.BlockSpec((8, 128), lambda i: (0, 0),
                                   pipeline_mode=buf)],
            out_specs=pl.BlockSpec((8, 128), lambda i: (0, 0)))
        jax.block_until_ready(f(jnp.zeros((8, 128), jnp.float32)))
        return True
    except Exception:
        return False


_BUFFERED1_OK = _probe_buffered1()


def _const_spec(block_shape, index_map):
    """BlockSpec for a block whose index_map is constant over the whole grid:
    single-buffer it (double-buffering a revisited block only burns VMEM)."""
    if _BUFFERED1_OK:
        return pl.BlockSpec(block_shape, index_map, pipeline_mode=pl.Buffered(1))
    return pl.BlockSpec(block_shape, index_map)


# ----------------------------------------------------------------------------
# Pallas kernels
# ----------------------------------------------------------------------------
def _act_matmul_kernel(x_ref, s_ref, b_ref, w_ref, o_ref, *, act):
    """Fused prologue (previous layer's BN scale/shift + activation) + MXU
    matmul.  A is upcast to f32 for the affine/act, cast to bf16 for the MXU,
    accumulated in f32 and stored bf16 (halves HBM writeback)."""
    a = act(x_ref[...].astype(jnp.float32) * s_ref[...] + b_ref[...])
    acc = jnp.dot(a.astype(jnp.bfloat16), w_ref[...],
                  preferred_element_type=jnp.float32)
    o_ref[...] = acc.astype(o_ref.dtype)


def _channel_sums_kernel(x_ref, sum_ref, sq_ref):
    """Per-lane sum / sum-of-squares.  Grid = (parallel partials, arbitrary M
    tiles); each partial accumulates (in f32) into row 0 of its (8, C) block."""
    @pl.when(pl.program_id(1) == 0)
    def _():
        sum_ref[...] = jnp.zeros_like(sum_ref)
        sq_ref[...] = jnp.zeros_like(sq_ref)

    x = x_ref[...].astype(jnp.float32)    # bf16 activation -> f32 accumulation
    sum_ref[0:1, :] += jnp.sum(x, axis=0, keepdims=True)
    sq_ref[0:1, :] += jnp.sum(x * x, axis=0, keepdims=True)


# ----------------------------------------------------------------------------
# Tile pickers (byte-targeted, VMEM-aware)
# ----------------------------------------------------------------------------
def _pick_tm(m, bytes_per_row, budget=_TILE_BUDGET, cap=8192):
    """Largest M tile (multiple of 8, dividing m) whose per-step bytes fit the
    budget; the full m if it already fits (no gratuitous splitting)."""
    ideal = min(cap, max(8, budget // max(bytes_per_row, 1)))
    if m <= ideal:
        return m
    start = ideal - ideal % 8
    for tm in range(start, 7, -8):
        if m % tm == 0:
            return tm
    return m            # no aligned divisor: single full block (always legal)


def _pick_tn(cn, cap=2048):
    """Tile cn (= Cout*k*k) only when it is large, in lane-aligned chunks."""
    if cn <= cap:
        return cn
    for tn in range(cap - cap % 128, 127, -128):
        if cn % tn == 0:
            return tn
    return cn


# ----------------------------------------------------------------------------
# Pallas wrappers
# ----------------------------------------------------------------------------
def pallas_act_matmul(x, scale, shift, w_mat, act):
    """x: (M, Cin) f32/bf16; scale/shift: (1, Cin) f32; w_mat: (Cin, Cn) bf16.
    Returns the activation-prologue'd GEMM output (M, Cn) in bf16."""
    m, k = x.shape
    _, cn = w_mat.shape
    tn = _pick_tn(cn)
    bytes_per_row = k * x.dtype.itemsize + tn * 2      # A row + bf16 out row
    tm = _pick_tm(m, bytes_per_row)
    gi, gj = m // tm, cn // tn

    # Weight block is constant only when cn is not tiled; then single-buffer it.
    w_spec = (_const_spec((k, tn), lambda i, j: (0, j)) if gj == 1
              else pl.BlockSpec((k, tn), lambda i, j: (0, j)))

    kernel = functools.partial(_act_matmul_kernel, act=act)
    return pl.pallas_call(
        kernel,
        out_shape=jax.ShapeDtypeStruct((m, cn), jnp.bfloat16),
        grid=(gi, gj),
        in_specs=[pl.BlockSpec((tm, k), lambda i, j: (i, 0)),
                  _const_spec((1, k), lambda i, j: (0, 0)),
                  _const_spec((1, k), lambda i, j: (0, 0)),
                  w_spec],
        out_specs=pl.BlockSpec((tm, tn), lambda i, j: (i, j)),
        compiler_params=pltpu.CompilerParams(
            dimension_semantics=("parallel", "parallel"),
            vmem_limit_bytes=_VMEM_LIMIT),
    )(x, scale, shift, w_mat)


def pallas_channel_sums(view):
    """view: (M, C) lane-dense activation (bf16/f32).  Returns f32 partial
    sums of shape (n_par*8, C) for sum and sum-of-squares (reduce axis 0)."""
    m, c = view.shape
    tm = _pick_tm(m, c * view.dtype.itemsize)
    nsteps = m // tm
    n_par = 2 if (nsteps >= 2 and nsteps % 2 == 0) else 1   # v7x megacore split
    steps = nsteps // n_par

    def in_map(p, i):
        return (p * steps + i, 0)

    def out_map(p, i):
        return (p, 0)

    return pl.pallas_call(
        _channel_sums_kernel,
        out_shape=(jax.ShapeDtypeStruct((n_par * 8, c), jnp.float32),
                   jax.ShapeDtypeStruct((n_par * 8, c), jnp.float32)),
        grid=(n_par, steps),
        in_specs=[pl.BlockSpec((tm, c), in_map)],
        out_specs=(pl.BlockSpec((8, c), out_map),
                   pl.BlockSpec((8, c), out_map)),
        compiler_params=pltpu.CompilerParams(
            dimension_semantics=("parallel", "arbitrary"),
            vmem_limit_bytes=_VMEM_LIMIT),
    )(view)


# ----------------------------------------------------------------------------
# col2im glue (scatter-free sub-pixel recombination) for stride=2, pad=1, k=4
# ----------------------------------------------------------------------------
# TODO(synk): the col2im interleave is pure data movement (pad/slice/stack/
# reshape) with no clean rectangular-tile Pallas mapping; it stays in XLA.
def _shift_plus(x, axis):
    """y[q] = x[q-1] along `axis`, zero at q == 0."""
    pad = [(0, 0)] * x.ndim
    pad[axis] = (1, 0)
    return jax.lax.slice_in_dim(jnp.pad(x, pad), 0, x.shape[axis], axis=axis)


def _shift_minus(x, axis):
    """y[q] = x[q+1] along `axis`, zero at q == last."""
    pad = [(0, 0)] * x.ndim
    pad[axis] = (0, 1)
    return jax.lax.slice_in_dim(jnp.pad(x, pad), 1, x.shape[axis] + 1, axis=axis)


def _col2im_s2p1k4(y, n, hi, wi, cout, k=4):
    """y: (n*hi*wi, cout*k*k) from the input-driven GEMM, inner order
    (cout, kh, kw).  Returns NHWC output (n, 2*hi, 2*wi, cout) (same dtype).
    For stride=2, pad=1:  ho = 2*q   -> (kh=1, hi=q) + (kh=3, hi=q-1)
                          ho = 2*q+1 -> (kh=2, hi=q) + (kh=0, hi=q+1)."""
    y = y.reshape(n, hi, wi, cout, k, k)
    # combine along W (wi axis = 2, kw is the last axis)
    even = y[..., 1] + _shift_plus(y[..., 3], axis=2)
    odd = y[..., 2] + _shift_minus(y[..., 0], axis=2)
    yw = jnp.stack([even, odd], axis=3).reshape(n, hi, 2 * wi, cout, k)
    # combine along H (hi axis = 1, kh is the last axis)
    even = yw[..., 1] + _shift_plus(yw[..., 3], axis=1)
    odd = yw[..., 2] + _shift_minus(yw[..., 0], axis=1)
    return jnp.stack([even, odd], axis=2).reshape(n, 2 * hi, 2 * wi, cout)


# ----------------------------------------------------------------------------
# BatchNorm statistics -> scale/shift (applied in the next matmul's prologue)
# ----------------------------------------------------------------------------
def _lane_view(flat):
    """Reinterpret (M, C) as (M*C/128, 128) when C divides 128 (lane-dense)."""
    m, c = flat.shape
    if c < 128 and 128 % c == 0 and (m * c) % 128 == 0:
        return flat.reshape(m * c // 128, 128), 128 // c
    return flat, 1


def batchnorm_scale_shift(flat, gamma, beta, eps=1e-5):
    """Training-mode BatchNorm2d batch statistics on a (M, C) flattened NHWC
    activation; returns per-channel (1, C) f32 scale/shift for the prologue."""
    m, c = flat.shape
    view, fold = _lane_view(flat)
    s, sq = pallas_channel_sums(view)
    s = s.sum(axis=0)                       # reduce megacore partials / rows
    sq = sq.sum(axis=0)
    if fold > 1:
        s = s.reshape(fold, c).sum(axis=0)
        sq = sq.reshape(fold, c).sum(axis=0)
    mean = s / m
    var = jnp.maximum(sq / m - mean * mean, 0.0)   # clamp: no negative variance
    scale = gamma / jnp.sqrt(var + eps)
    shift = beta - mean * scale
    return scale.reshape(1, c), shift.reshape(1, c)


# ----------------------------------------------------------------------------
# Parameters (weights pre-transformed to matmul layout + bf16 at init)
# ----------------------------------------------------------------------------
def init_params(key, nz, ngf, nc, k=4):
    chans = [(nz, ngf * 8), (ngf * 8, ngf * 4), (ngf * 4, ngf * 2),
             (ngf * 2, ngf), (ngf, nc)]
    params = {}
    for li, (cin, cout) in enumerate(chans):
        key, kw, kg, kb = jax.random.split(key, 4)
        # PyTorch ConvTranspose2d weight layout: (Cin, Cout, kh, kw)
        w = 0.02 * jax.random.normal(kw, (cin, cout, k, k), jnp.float32)
        # Pre-transform once: matmul layout (Cin, Cout*k*k), bf16 for the MXU.
        params[f"w{li}"] = w.reshape(cin, cout * k * k).astype(jnp.bfloat16)
        if li < 4:  # BatchNorm affine params for the first four blocks
            params[f"gamma{li}"] = 1.0 + 0.02 * jax.random.normal(
                kg, (cout,), jnp.float32)
            params[f"beta{li}"] = 0.01 * jax.random.normal(
                kb, (cout,), jnp.float32)
    return params


# ----------------------------------------------------------------------------
# Full generator forward (NCHW in, NCHW out; NHWC / (M, C) bf16 internally)
# ----------------------------------------------------------------------------
@jax.jit
def generator_forward(x_nchw, params):
    n, nz = x_nchw.shape[0], x_nchw.shape[1]
    x = x_nchw.reshape(n, nz).astype(jnp.float32)       # 1x1 spatial -> (N, nz)

    scale = jnp.ones((1, nz), jnp.float32)               # identity prologue L0
    shift = jnp.zeros((1, nz), jnp.float32)
    act = lambda v: v

    hw = 1
    img = None
    for li in range(5):
        w_mat = params[f"w{li}"]
        cout = w_mat.shape[1] // 16

        # Input-driven ConvTranspose2d GEMM (fused BN+ReLU prologue of the
        # previous layer); output stored bf16.
        y = pallas_act_matmul(x, scale, shift, w_mat, act)   # (M_in, Cout*16)

        # col2im (XLA glue, stays bf16) -> pre-BN NHWC activation
        if li == 0:     # 1x1 input, stride 1, pad 0: output IS the GEMM result
            a = y.reshape(n, cout, 4, 4).transpose(0, 2, 3, 1)
            hw = 4
        else:           # stride 2, pad 1, k 4
            a = _col2im_s2p1k4(y, n, hw, hw, cout)
            hw = hw * 2

        if li < 4:
            flat = a.reshape(n * hw * hw, cout)               # bf16
            # BN batch stats now; normalize+affine+ReLU is fused into the next
            # layer's matmul prologue (activation never re-written to HBM).
            scale, shift = batchnorm_scale_shift(
                flat, params[f"gamma{li}"], params[f"beta{li}"])
            x = flat
            act = lambda v: jnp.maximum(v, 0.0)
        else:
            # Final Tanh fused into the XLA col2im epilogue (no extra pass).
            img = jnp.tanh(a.astype(jnp.float32))

    return jnp.transpose(img, (0, 3, 1, 2))               # NHWC -> NCHW, f32


if __name__ == "__main__":
    nz, ngf, nc, batch = 16, 16, 3, 2
    key = jax.random.PRNGKey(0)
    key, knoise = jax.random.split(key)
    params = init_params(key, nz, ngf, nc)

    x = jax.random.normal(knoise, (batch, nz, 1, 1), jnp.float32)  # noise, NCHW
    out = generator_forward(x, params)
    out = jax.block_until_ready(out)

    assert out.shape == (batch, nc, 64, 64), out.shape
    assert bool(jnp.all(jnp.isfinite(out)))
    assert bool(jnp.max(jnp.abs(out)) <= 1.0 + 1e-6)   # Tanh range
    print("KERNEL_OK")
</pallas_src>

<mosaic_0001>
module attributes {stable_mosaic.version = 11 : i64} {
  func.func @_k(%arg0: i32, %arg1: memref<8x128xf32, #tpu.memory_space<vmem>>, %arg2: memref<8x128xf32, #tpu.memory_space<vmem>>) attributes {dimension_semantics = [#tpu.dimension_semantics<arbitrary>], iteration_bounds = array<i64: 2>, scalar_prefetch = 0 : i64, scratch_operands = 0 : i64, tpu.core_type = #tpu.core_type<tc>, window_params = [{pipeline_mode = #tpu.pipeline_mode<synchronous>, transform_indices = @transform_0, window_bounds = array<i64: 8, 128>}, {pipeline_mode = #tpu.pipeline_mode<synchronous>, transform_indices = @transform_1, window_bounds = array<i64: 8, 128>}]} {
    %c0 = arith.constant 0 : index
    %c0_0 = arith.constant 0 : index
    %0 = vector.load %arg1[%c0, %c0_0] : memref<8x128xf32, #tpu.memory_space<vmem>>, vector<8x128xf32>
    %cst = arith.constant 1.000000e+00 : f32
    %1 = vector.broadcast %cst : f32 to vector<8x128xf32>
    %2 = arith.addf %0, %1 : vector<8x128xf32>
    %c0_1 = arith.constant 0 : index
    %c0_2 = arith.constant 0 : index
    %3 = vector.load %arg2[%c0_1, %c0_2] : memref<8x128xf32, #tpu.memory_space<vmem>>, vector<8x128xf32>
    tpu.vector_store %arg2[%c0_1, %c0_2], %2 {strides = array<i32>} : memref<8x128xf32, #tpu.memory_space<vmem>>, vector<8x128xf32>,
    return
  }
  func.func @transform_0(%arg0: i32) -> (i32, i32) {
    %c0_i32 = arith.constant 0 : i32
    %c0_i32_0 = arith.constant 0 : i32
    %c0_i32_1 = arith.constant 0 : i32
    return %c0_i32, %c0_i32_0 : i32, i32
  }
  func.func @transform_1(%arg0: i32) -> (i32, i32) {
    %c0_i32 = arith.constant 0 : i32
    %c0_i32_0 = arith.constant 0 : i32
    %c0_i32_1 = arith.constant 0 : i32
    return %c0_i32, %c0_i32_0 : i32, i32
  }
}

module attributes {stable_mosaic.version = 11 : i64} {
  func.func @_channel_sums_kernel(%arg0: i32, %arg1: i32, %arg2: memref<32x128xbf16, #tpu.memory_space<vmem>>, %arg3: memref<8x128xf32, #tpu.memory_space<vmem>>, %arg4: memref<8x128xf32, #tpu.memory_space<vmem>>) attributes {dimension_semantics = [#tpu.dimension_semantics<parallel>, #tpu.dimension_semantics<arbitrary>], iteration_bounds = array<i64: 1, 1>, scalar_prefetch = 0 : i64, scratch_operands = 0 : i64, tpu.core_type = #tpu.core_type<tc>, window_params = [{transform_indices = @transform_0, window_bounds = array<i64: 32, 128>}, {transform_indices = @transform_1, window_bounds = array<i64: 8, 128>}, {transform_indices = @transform_2, window_bounds = array<i64: 8, 128>}]} {
    %c0_i32 = arith.constant 0 : i32
    %0 = arith.cmpi eq, %arg1, %c0_i32 : i32
    %1 = arith.extui %0 : i1 to i32
    %c0_i32_0 = arith.constant 0 : i32
    %2 = arith.cmpi ne, %1, %c0_i32_0 : i32
    scf.if %2 {
      %cst_11 = arith.constant 0.000000e+00 : f32
      %16 = vector.broadcast %cst_11 : f32 to vector<8x128xf32>
      %c0_12 = arith.constant 0 : index
      %c0_13 = arith.constant 0 : index
      %17 = vector.load %arg3[%c0_12, %c0_13] : memref<8x128xf32, #tpu.memory_space<vmem>>, vector<8x128xf32>
      tpu.vector_store %arg3[%c0_12, %c0_13], %16 {strides = array<i32>} : memref<8x128xf32, #tpu.memory_space<vmem>>, vector<8x128xf32>,
      %cst_14 = arith.constant 0.000000e+00 : f32
      %18 = vector.broadcast %cst_14 : f32 to vector<8x128xf32>
      %c0_15 = arith.constant 0 : index
      %c0_16 = arith.constant 0 : index
      %19 = vector.load %arg4[%c0_15, %c0_16] : memref<8x128xf32, #tpu.memory_space<vmem>>, vector<8x128xf32>
      tpu.vector_store %arg4[%c0_15, %c0_16], %18 {strides = array<i32>} : memref<8x128xf32, #tpu.memory_space<vmem>>, vector<8x128xf32>,
    } else {
    }
    %c0 = arith.constant 0 : index
    %c0_1 = arith.constant 0 : index
    %3 = vector.load %arg2[%c0, %c0_1] : memref<32x128xbf16, #tpu.memory_space<vmem>>, vector<32x128xbf16>
    %4 = arith.extf %3 : vector<32x128xbf16> to vector<32x128xf32>
    %c0_2 = arith.constant 0 : index
    %c0_3 = arith.constant 0 : index
    %5 = vector.load %arg3[%c0_2, %c0_3] : memref<8x128xf32, #tpu.memory_space<vmem>>, vector<1x128xf32>
    %cst = arith.constant dense<0.000000e+00> : vector<128xf32>
    %6 = vector.multi_reduction <add>, %4, %cst [0] : vector<32x128xf32> to vector<128xf32>
    %7 = vector.shape_cast %6 : vector<128xf32> to vector<1x128xf32>
    %8 = arith.addf %5, %7 : vector<1x128xf32>
    %c0_4 = arith.constant 0 : index
    %c0_5 = arith.constant 0 : index
    %9 = vector.load %arg3[%c0_4, %c0_5] : memref<8x128xf32, #tpu.memory_space<vmem>>, vector<1x128xf32>
    tpu.vector_store %arg3[%c0_4, %c0_5], %8 {strides = array<i32>} : memref<8x128xf32, #tpu.memory_space<vmem>>, vector<1x128xf32>,
    %c0_6 = arith.constant 0 : index
    %c0_7 = arith.constant 0 : index
    %10 = vector.load %arg4[%c0_6, %c0_7] : memref<8x128xf32, #tpu.memory_space<vmem>>, vector<1x128xf32>
    %11 = arith.mulf %4, %4 : vector<32x128xf32>
    %cst_8 = arith.constant dense<0.000000e+00> : vector<128xf32>
    %12 = vector.multi_reduction <add>, %11, %cst_8 [0] : vector<32x128xf32> to vector<128xf32>
    %13 = vector.shape_cast %12 : vector<128xf32> to vector<1x128xf32>
    %14 = arith.addf %10, %13 : vector<1x128xf32>
    %c0_9 = arith.constant 0 : index
    %c0_10 = arith.constant 0 : index
    %15 = vector.load %arg4[%c0_9, %c0_10] : memref<8x128xf32, #tpu.memory_space<vmem>>, vector<1x128xf32>
    tpu.vector_store %arg4[%c0_9, %c0_10], %14 {strides = array<i32>} : memref<8x128xf32, #tpu.memory_space<vmem>>, vector<1x128xf32>,
    return
  }
  func.func @transform_0(%arg0: i32, %arg1: i32) -> (i32, i32) {
    %c1_i32 = arith.constant 1 : i32
    %0 = arith.muli %arg0, %c1_i32 : i32
    %1 = arith.addi %0, %arg1 : i32
    %c0_i32 = arith.constant 0 : i32
    %c0_i32_0 = arith.constant 0 : i32
    return %1, %c0_i32 : i32, i32
  }
  func.func @transform_1(%arg0: i32, %arg1: i32) -> (i32, i32) {
    %c0_i32 = arith.constant 0 : i32
    %c0_i32_0 = arith.constant 0 : i32
    return %arg0, %c0_i32 : i32, i32
  }
  func.func @transform_2(%arg0: i32, %arg1: i32) -> (i32, i32) {
    %c0_i32 = arith.constant 0 : i32
    %c0_i32_0 = arith.constant 0 : i32
    return %arg0, %c0_i32 : i32, i32
  }
}

module attributes {stable_mosaic.version = 11 : i64} {
  func.func @_act_matmul_kernel(%arg0: i32, %arg1: i32, %arg2: memref<2x16xf32, #tpu.memory_space<vmem>>, %arg3: memref<1x16xf32, #tpu.memory_space<vmem>>, %arg4: memref<1x16xf32, #tpu.memory_space<vmem>>, %arg5: memref<16x2048xbf16, #tpu.memory_space<vmem>>, %arg6: memref<2x2048xbf16, #tpu.memory_space<vmem>>) attributes {dimension_semantics = [#tpu.dimension_semantics<parallel>, #tpu.dimension_semantics<parallel>], iteration_bounds = array<i64: 1, 1>, scalar_prefetch = 0 : i64, scratch_operands = 0 : i64, tpu.core_type = #tpu.core_type<tc>, window_params = [{transform_indices = @transform_0, window_bounds = array<i64: 2, 16>}, {pipeline_mode = #tpu.pipeline_mode<synchronous>, transform_indices = @transform_1, window_bounds = array<i64: 1, 16>}, {pipeline_mode = #tpu.pipeline_mode<synchronous>, transform_indices = @transform_2, window_bounds = array<i64: 1, 16>}, {transform_indices = @transform_3, window_bounds = array<i64: 16, 2048>}, {transform_indices = @transform_4, window_bounds = array<i64: 2, 2048>}]} {
    %c0 = arith.constant 0 : index
    %c0_0 = arith.constant 0 : index
    %0 = vector.load %arg2[%c0, %c0_0] : memref<2x16xf32, #tpu.memory_space<vmem>>, vector<2x16xf32>
    %c0_1 = arith.constant 0 : index
    %c0_2 = arith.constant 0 : index
    %1 = vector.load %arg3[%c0_1, %c0_2] : memref<1x16xf32, #tpu.memory_space<vmem>>, vector<1x16xf32>
    %2 = vector.broadcast %1 : vector<1x16xf32> to vector<2x16xf32>
    %3 = arith.mulf %0, %2 : vector<2x16xf32>
    %c0_3 = arith.constant 0 : index
    %c0_4 = arith.constant 0 : index
    %4 = vector.load %arg4[%c0_3, %c0_4] : memref<1x16xf32, #tpu.memory_space<vmem>>, vector<1x16xf32>
    %5 = vector.broadcast %4 : vector<1x16xf32> to vector<2x16xf32>
    %6 = arith.addf %3, %5 : vector<2x16xf32>
    %7 = arith.truncf %6 : vector<2x16xf32> to vector<2x16xbf16>
    %c0_5 = arith.constant 0 : index
    %c0_6 = arith.constant 0 : index
    %8 = vector.load %arg5[%c0_5, %c0_6] : memref<16x2048xbf16, #tpu.memory_space<vmem>>, vector<16x2048xbf16>
    %cst = arith.constant dense<0.000000e+00> : vector<2x2048xf32>
    %9 = tpu.matmul %7, %8, %cst {dimension_numbers = #tpu.dot_dimension_numbers<[1], [0], [0], [1], [0, 0, 1, 1], [], []>} : vector<2x16xbf16>, vector<16x2048xbf16>, vector<2x2048xf32> -> vector<2x2048xf32>
    %10 = arith.truncf %9 : vector<2x2048xf32> to vector<2x2048xbf16>
    %c0_7 = arith.constant 0 : index
    %c0_8 = arith.constant 0 : index
    %11 = vector.load %arg6[%c0_7, %c0_8] : memref<2x2048xbf16, #tpu.memory_space<vmem>>, vector<2x2048xbf16>
    tpu.vector_store %arg6[%c0_7, %c0_8], %10 {strides = array<i32>} : memref<2x2048xbf16, #tpu.memory_space<vmem>>, vector<2x2048xbf16>,
    return
  }
  func.func @transform_0(%arg0: i32, %arg1: i32) -> (i32, i32) {
    %c0_i32 = arith.constant 0 : i32
    %c0_i32_0 = arith.constant 0 : i32
    return %arg0, %c0_i32 : i32, i32
  }
  func.func @transform_1(%arg0: i32, %arg1: i32) -> (i32, i32) {
    %c0_i32 = arith.constant 0 : i32
    %c0_i32_0 = arith.constant 0 : i32
    %c0_i32_1 = arith.constant 0 : i32
    return %c0_i32, %c0_i32_0 : i32, i32
  }
  func.func @transform_2(%arg0: i32, %arg1: i32) -> (i32, i32) {
    %c0_i32 = arith.constant 0 : i32
    %c0_i32_0 = arith.constant 0 : i32
    %c0_i32_1 = arith.constant 0 : i32
    return %c0_i32, %c0_i32_0 : i32, i32
  }
  func.func @transform_3(%arg0: i32, %arg1: i32) -> (i32, i32) {
    %c0_i32 = arith.constant 0 : i32
    %c0_i32_0 = arith.constant 0 : i32
    return %c0_i32, %arg1 : i32, i32
  }
  func.func @transform_4(%arg0: i32, %arg1: i32) -> (i32, i32) {
    %c0_i32 = arith.constant 0 : i32
    return %arg0, %arg1 : i32, i32
  }
}

module attributes {stable_mosaic.version = 11 : i64} {
  func.func @_act_matmul_kernel(%arg0: i32, %arg1: i32, %arg2: memref<32x128xbf16, #tpu.memory_space<vmem>>, %arg3: memref<1x128xf32, #tpu.memory_space<vmem>>, %arg4: memref<1x128xf32, #tpu.memory_space<vmem>>, %arg5: memref<128x1024xbf16, #tpu.memory_space<vmem>>, %arg6: memref<32x1024xbf16, #tpu.memory_space<vmem>>) attributes {dimension_semantics = [#tpu.dimension_semantics<parallel>, #tpu.dimension_semantics<parallel>], iteration_bounds = array<i64: 1, 1>, scalar_prefetch = 0 : i64, scratch_operands = 0 : i64, tpu.core_type = #tpu.core_type<tc>, window_params = [{transform_indices = @transform_0, window_bounds = array<i64: 32, 128>}, {pipeline_mode = #tpu.pipeline_mode<synchronous>, transform_indices = @transform_1, window_bounds = array<i64: 1, 128>}, {pipeline_mode = #tpu.pipeline_mode<synchronous>, transform_indices = @transform_2, window_bounds = array<i64: 1, 128>}, {transform_indices = @transform_3, window_bounds = array<i64: 128, 1024>}, {transform_indices = @transform_4, window_bounds = array<i64: 32, 1024>}]} {
    %c0 = arith.constant 0 : index
    %c0_0 = arith.constant 0 : index
    %0 = vector.load %arg2[%c0, %c0_0] : memref<32x128xbf16, #tpu.memory_space<vmem>>, vector<32x128xbf16>
    %1 = arith.extf %0 : vector<32x128xbf16> to vector<32x128xf32>
    %c0_1 = arith.constant 0 : index
    %c0_2 = arith.constant 0 : index
    %2 = vector.load %arg3[%c0_1, %c0_2] : memref<1x128xf32, #tpu.memory_space<vmem>>, vector<1x128xf32>
    %3 = vector.broadcast %2 : vector<1x128xf32> to vector<32x128xf32>
    %4 = arith.mulf %1, %3 : vector<32x128xf32>
    %c0_3 = arith.constant 0 : index
    %c0_4 = arith.constant 0 : index
    %5 = vector.load %arg4[%c0_3, %c0_4] : memref<1x128xf32, #tpu.memory_space<vmem>>, vector<1x128xf32>
    %6 = vector.broadcast %5 : vector<1x128xf32> to vector<32x128xf32>
    %7 = arith.addf %4, %6 : vector<32x128xf32>
    %cst = arith.constant 0.000000e+00 : f32
    %8 = vector.broadcast %cst : f32 to vector<32x128xf32>
    %9 = arith.maximumf %7, %8 : vector<32x128xf32>
    %10 = arith.truncf %9 : vector<32x128xf32> to vector<32x128xbf16>
    %c0_5 = arith.constant 0 : index
    %c0_6 = arith.constant 0 : index
    %11 = vector.load %arg5[%c0_5, %c0_6] : memref<128x1024xbf16, #tpu.memory_space<vmem>>, vector<128x1024xbf16>
    %cst_7 = arith.constant dense<0.000000e+00> : vector<32x1024xf32>
    %12 = tpu.matmul %10, %11, %cst_7 {dimension_numbers = #tpu.dot_dimension_numbers<[1], [0], [0], [1], [0, 0, 1, 1], [], []>} : vector<32x128xbf16>, vector<128x1024xbf16>, vector<32x1024xf32> -> vector<32x1024xf32>
    %13 = arith.truncf %12 : vector<32x1024xf32> to vector<32x1024xbf16>
    %c0_8 = arith.constant 0 : index
    %c0_9 = arith.constant 0 : index
    %14 = vector.load %arg6[%c0_8, %c0_9] : memref<32x1024xbf16, #tpu.memory_space<vmem>>, vector<32x1024xbf16>
    tpu.vector_store %arg6[%c0_8, %c0_9], %13 {strides = array<i32>} : memref<32x1024xbf16, #tpu.memory_space<vmem>>, vector<32x1024xbf16>,
    return
  }
  func.func @transform_0(%arg0: i32, %arg1: i32) -> (i32, i32) {
    %c0_i32 = arith.constant 0 : i32
    %c0_i32_0 = arith.constant 0 : i32
    return %arg0, %c0_i32 : i32, i32
  }
  func.func @transform_1(%arg0: i32, %arg1: i32) -> (i32, i32) {
    %c0_i32 = arith.constant 0 : i32
    %c0_i32_0 = arith.constant 0 : i32
    %c0_i32_1 = arith.constant 0 : i32
    return %c0_i32, %c0_i32_0 : i32, i32
  }
  func.func @transform_2(%arg0: i32, %arg1: i32) -> (i32, i32) {
    %c0_i32 = arith.constant 0 : i32
    %c0_i32_0 = arith.constant 0 : i32
    %c0_i32_1 = arith.constant 0 : i32
    return %c0_i32, %c0_i32_0 : i32, i32
  }
  func.func @transform_3(%arg0: i32, %arg1: i32) -> (i32, i32) {
    %c0_i32 = arith.constant 0 : i32
    %c0_i32_0 = arith.constant 0 : i32
    return %c0_i32, %arg1 : i32, i32
  }
  func.func @transform_4(%arg0: i32, %arg1: i32) -> (i32, i32) {
    %c0_i32 = arith.constant 0 : i32
    return %arg0, %arg1 : i32, i32
  }
}

module attributes {stable_mosaic.version = 11 : i64} {
  func.func @_channel_sums_kernel(%arg0: i32, %arg1: i32, %arg2: memref<64x128xbf16, #tpu.memory_space<vmem>>, %arg3: memref<8x128xf32, #tpu.memory_space<vmem>>, %arg4: memref<8x128xf32, #tpu.memory_space<vmem>>) attributes {dimension_semantics = [#tpu.dimension_semantics<parallel>, #tpu.dimension_semantics<arbitrary>], iteration_bounds = array<i64: 1, 1>, scalar_prefetch = 0 : i64, scratch_operands = 0 : i64, tpu.core_type = #tpu.core_type<tc>, window_params = [{transform_indices = @transform_0, window_bounds = array<i64: 64, 128>}, {transform_indices = @transform_1, window_bounds = array<i64: 8, 128>}, {transform_indices = @transform_2, window_bounds = array<i64: 8, 128>}]} {
    %c0_i32 = arith.constant 0 : i32
    %0 = arith.cmpi eq, %arg1, %c0_i32 : i32
    %1 = arith.extui %0 : i1 to i32
    %c0_i32_0 = arith.constant 0 : i32
    %2 = arith.cmpi ne, %1, %c0_i32_0 : i32
    scf.if %2 {
      %cst_11 = arith.constant 0.000000e+00 : f32
      %16 = vector.broadcast %cst_11 : f32 to vector<8x128xf32>
      %c0_12 = arith.constant 0 : index
      %c0_13 = arith.constant 0 : index
      %17 = vector.load %arg3[%c0_12, %c0_13] : memref<8x128xf32, #tpu.memory_space<vmem>>, vector<8x128xf32>
      tpu.vector_store %arg3[%c0_12, %c0_13], %16 {strides = array<i32>} : memref<8x128xf32, #tpu.memory_space<vmem>>, vector<8x128xf32>,
      %cst_14 = arith.constant 0.000000e+00 : f32
      %18 = vector.broadcast %cst_14 : f32 to vector<8x128xf32>
      %c0_15 = arith.constant 0 : index
      %c0_16 = arith.constant 0 : index
      %19 = vector.load %arg4[%c0_15, %c0_16] : memref<8x128xf32, #tpu.memory_space<vmem>>, vector<8x128xf32>
      tpu.vector_store %arg4[%c0_15, %c0_16], %18 {strides = array<i32>} : memref<8x128xf32, #tpu.memory_space<vmem>>, vector<8x128xf32>,
    } else {
    }
    %c0 = arith.constant 0 : index
    %c0_1 = arith.constant 0 : index
    %3 = vector.load %arg2[%c0, %c0_1] : memref<64x128xbf16, #tpu.memory_space<vmem>>, vector<64x128xbf16>
    %4 = arith.extf %3 : vector<64x128xbf16> to vector<64x128xf32>
    %c0_2 = arith.constant 0 : index
    %c0_3 = arith.constant 0 : index
    %5 = vector.load %arg3[%c0_2, %c0_3] : memref<8x128xf32, #tpu.memory_space<vmem>>, vector<1x128xf32>
    %cst = arith.constant dense<0.000000e+00> : vector<128xf32>
    %6 = vector.multi_reduction <add>, %4, %cst [0] : vector<64x128xf32> to vector<128xf32>
    %7 = vector.shape_cast %6 : vector<128xf32> to vector<1x128xf32>
    %8 = arith.addf %5, %7 : vector<1x128xf32>
    %c0_4 = arith.constant 0 : index
    %c0_5 = arith.constant 0 : index
    %9 = vector.load %arg3[%c0_4, %c0_5] : memref<8x128xf32, #tpu.memory_space<vmem>>, vector<1x128xf32>
    tpu.vector_store %arg3[%c0_4, %c0_5], %8 {strides = array<i32>} : memref<8x128xf32, #tpu.memory_space<vmem>>, vector<1x128xf32>,
    %c0_6 = arith.constant 0 : index
    %c0_7 = arith.constant 0 : index
    %10 = vector.load %arg4[%c0_6, %c0_7] : memref<8x128xf32, #tpu.memory_space<vmem>>, vector<1x128xf32>
    %11 = arith.mulf %4, %4 : vector<64x128xf32>
    %cst_8 = arith.constant dense<0.000000e+00> : vector<128xf32>
    %12 = vector.multi_reduction <add>, %11, %cst_8 [0] : vector<64x128xf32> to vector<128xf32>
    %13 = vector.shape_cast %12 : vector<128xf32> to vector<1x128xf32>
    %14 = arith.addf %10, %13 : vector<1x128xf32>
    %c0_9 = arith.constant 0 : index
    %c0_10 = arith.constant 0 : index
    %15 = vector.load %arg4[%c0_9, %c0_10] : memref<8x128xf32, #tpu.memory_space<vmem>>, vector<1x128xf32>
    tpu.vector_store %arg4[%c0_9, %c0_10], %14 {strides = array<i32>} : memref<8x128xf32, #tpu.memory_space<vmem>>, vector<1x128xf32>,
    return
  }
  func.func @transform_0(%arg0: i32, %arg1: i32) -> (i32, i32) {
    %c1_i32 = arith.constant 1 : i32
    %0 = arith.muli %arg0, %c1_i32 : i32
    %1 = arith.addi %0, %arg1 : i32
    %c0_i32 = arith.constant 0 : i32
    %c0_i32_0 = arith.constant 0 : i32
    return %1, %c0_i32 : i32, i32
  }
  func.func @transform_1(%arg0: i32, %arg1: i32) -> (i32, i32) {
    %c0_i32 = arith.constant 0 : i32
    %c0_i32_0 = arith.constant 0 : i32
    return %arg0, %c0_i32 : i32, i32
  }
  func.func @transform_2(%arg0: i32, %arg1: i32) -> (i32, i32) {
    %c0_i32 = arith.constant 0 : i32
    %c0_i32_0 = arith.constant 0 : i32
    return %arg0, %c0_i32 : i32, i32
  }
}

module attributes {stable_mosaic.version = 11 : i64} {
  func.func @_act_matmul_kernel(%arg0: i32, %arg1: i32, %arg2: memref<128x64xbf16, #tpu.memory_space<vmem>>, %arg3: memref<1x64xf32, #tpu.memory_space<vmem>>, %arg4: memref<1x64xf32, #tpu.memory_space<vmem>>, %arg5: memref<64x512xbf16, #tpu.memory_space<vmem>>, %arg6: memref<128x512xbf16, #tpu.memory_space<vmem>>) attributes {dimension_semantics = [#tpu.dimension_semantics<parallel>, #tpu.dimension_semantics<parallel>], iteration_bounds = array<i64: 1, 1>, scalar_prefetch = 0 : i64, scratch_operands = 0 : i64, tpu.core_type = #tpu.core_type<tc>, window_params = [{transform_indices = @transform_0, window_bounds = array<i64: 128, 64>}, {pipeline_mode = #tpu.pipeline_mode<synchronous>, transform_indices = @transform_1, window_bounds = array<i64: 1, 64>}, {pipeline_mode = #tpu.pipeline_mode<synchronous>, transform_indices = @transform_2, window_bounds = array<i64: 1, 64>}, {transform_indices = @transform_3, window_bounds = array<i64: 64, 512>}, {transform_indices = @transform_4, window_bounds = array<i64: 128, 512>}]} {
    %c0 = arith.constant 0 : index
    %c0_0 = arith.constant 0 : index
    %0 = vector.load %arg2[%c0, %c0_0] : memref<128x64xbf16, #tpu.memory_space<vmem>>, vector<128x64xbf16>
    %1 = arith.extf %0 : vector<128x64xbf16> to vector<128x64xf32>
    %c0_1 = arith.constant 0 : index
    %c0_2 = arith.constant 0 : index
    %2 = vector.load %arg3[%c0_1, %c0_2] : memref<1x64xf32, #tpu.memory_space<vmem>>, vector<1x64xf32>
    %3 = vector.broadcast %2 : vector<1x64xf32> to vector<128x64xf32>
    %4 = arith.mulf %1, %3 : vector<128x64xf32>
    %c0_3 = arith.constant 0 : index
    %c0_4 = arith.constant 0 : index
    %5 = vector.load %arg4[%c0_3, %c0_4] : memref<1x64xf32, #tpu.memory_space<vmem>>, vector<1x64xf32>
    %6 = vector.broadcast %5 : vector<1x64xf32> to vector<128x64xf32>
    %7 = arith.addf %4, %6 : vector<128x64xf32>
    %cst = arith.constant 0.000000e+00 : f32
    %8 = vector.broadcast %cst : f32 to vector<128x64xf32>
    %9 = arith.maximumf %7, %8 : vector<128x64xf32>
    %10 = arith.truncf %9 : vector<128x64xf32> to vector<128x64xbf16>
    %c0_5 = arith.constant 0 : index
    %c0_6 = arith.constant 0 : index
    %11 = vector.load %arg5[%c0_5, %c0_6] : memref<64x512xbf16, #tpu.memory_space<vmem>>, vector<64x512xbf16>
    %cst_7 = arith.constant dense<0.000000e+00> : vector<128x512xf32>
    %12 = tpu.matmul %10, %11, %cst_7 {dimension_numbers = #tpu.dot_dimension_numbers<[1], [0], [0], [1], [0, 0, 1, 1], [], []>} : vector<128x64xbf16>, vector<64x512xbf16>, vector<128x512xf32> -> vector<128x512xf32>
    %13 = arith.truncf %12 : vector<128x512xf32> to vector<128x512xbf16>
    %c0_8 = arith.constant 0 : index
    %c0_9 = arith.constant 0 : index
    %14 = vector.load %arg6[%c0_8, %c0_9] : memref<128x512xbf16, #tpu.memory_space<vmem>>, vector<128x512xbf16>
    tpu.vector_store %arg6[%c0_8, %c0_9], %13 {strides = array<i32>} : memref<128x512xbf16, #tpu.memory_space<vmem>>, vector<128x512xbf16>,
    return
  }
  func.func @transform_0(%arg0: i32, %arg1: i32) -> (i32, i32) {
    %c0_i32 = arith.constant 0 : i32
    %c0_i32_0 = arith.constant 0 : i32
    return %arg0, %c0_i32 : i32, i32
  }
  func.func @transform_1(%arg0: i32, %arg1: i32) -> (i32, i32) {
    %c0_i32 = arith.constant 0 : i32
    %c0_i32_0 = arith.constant 0 : i32
    %c0_i32_1 = arith.constant 0 : i32
    return %c0_i32, %c0_i32_0 : i32, i32
  }
  func.func @transform_2(%arg0: i32, %arg1: i32) -> (i32, i32) {
    %c0_i32 = arith.constant 0 : i32
    %c0_i32_0 = arith.constant 0 : i32
    %c0_i32_1 = arith.constant 0 : i32
    return %c0_i32, %c0_i32_0 : i32, i32
  }
  func.func @transform_3(%arg0: i32, %arg1: i32) -> (i32, i32) {
    %c0_i32 = arith.constant 0 : i32
    %c0_i32_0 = arith.constant 0 : i32
    return %c0_i32, %arg1 : i32, i32
  }
  func.func @transform_4(%arg0: i32, %arg1: i32) -> (i32, i32) {
    %c0_i32 = arith.constant 0 : i32
    return %arg0, %arg1 : i32, i32
  }
}

module attributes {stable_mosaic.version = 11 : i64} {
  func.func @_channel_sums_kernel(%arg0: i32, %arg1: i32, %arg2: memref<128x128xbf16, #tpu.memory_space<vmem>>, %arg3: memref<8x128xf32, #tpu.memory_space<vmem>>, %arg4: memref<8x128xf32, #tpu.memory_space<vmem>>) attributes {dimension_semantics = [#tpu.dimension_semantics<parallel>, #tpu.dimension_semantics<arbitrary>], iteration_bounds = array<i64: 1, 1>, scalar_prefetch = 0 : i64, scratch_operands = 0 : i64, tpu.core_type = #tpu.core_type<tc>, window_params = [{transform_indices = @transform_0, window_bounds = array<i64: 128, 128>}, {transform_indices = @transform_1, window_bounds = array<i64: 8, 128>}, {transform_indices = @transform_2, window_bounds = array<i64: 8, 128>}]} {
    %c0_i32 = arith.constant 0 : i32
    %0 = arith.cmpi eq, %arg1, %c0_i32 : i32
    %1 = arith.extui %0 : i1 to i32
    %c0_i32_0 = arith.constant 0 : i32
    %2 = arith.cmpi ne, %1, %c0_i32_0 : i32
    scf.if %2 {
      %cst_11 = arith.constant 0.000000e+00 : f32
      %16 = vector.broadcast %cst_11 : f32 to vector<8x128xf32>
      %c0_12 = arith.constant 0 : index
      %c0_13 = arith.constant 0 : index
      %17 = vector.load %arg3[%c0_12, %c0_13] : memref<8x128xf32, #tpu.memory_space<vmem>>, vector<8x128xf32>
      tpu.vector_store %arg3[%c0_12, %c0_13], %16 {strides = array<i32>} : memref<8x128xf32, #tpu.memory_space<vmem>>, vector<8x128xf32>,
      %cst_14 = arith.constant 0.000000e+00 : f32
      %18 = vector.broadcast %cst_14 : f32 to vector<8x128xf32>
      %c0_15 = arith.constant 0 : index
      %c0_16 = arith.constant 0 : index
      %19 = vector.load %arg4[%c0_15, %c0_16] : memref<8x128xf32, #tpu.memory_space<vmem>>, vector<8x128xf32>
      tpu.vector_store %arg4[%c0_15, %c0_16], %18 {strides = array<i32>} : memref<8x128xf32, #tpu.memory_space<vmem>>, vector<8x128xf32>,
    } else {
    }
    %c0 = arith.constant 0 : index
    %c0_1 = arith.constant 0 : index
    %3 = vector.load %arg2[%c0, %c0_1] : memref<128x128xbf16, #tpu.memory_space<vmem>>, vector<128x128xbf16>
    %4 = arith.extf %3 : vector<128x128xbf16> to vector<128x128xf32>
    %c0_2 = arith.constant 0 : index
    %c0_3 = arith.constant 0 : index
    %5 = vector.load %arg3[%c0_2, %c0_3] : memref<8x128xf32, #tpu.memory_space<vmem>>, vector<1x128xf32>
    %cst = arith.constant dense<0.000000e+00> : vector<128xf32>
    %6 = vector.multi_reduction <add>, %4, %cst [0] : vector<128x128xf32> to vector<128xf32>
    %7 = vector.shape_cast %6 : vector<128xf32> to vector<1x128xf32>
    %8 = arith.addf %5, %7 : vector<1x128xf32>
    %c0_4 = arith.constant 0 : index
    %c0_5 = arith.constant 0 : index
    %9 = vector.load %arg3[%c0_4, %c0_5] : memref<8x128xf32, #tpu.memory_space<vmem>>, vector<1x128xf32>
    tpu.vector_store %arg3[%c0_4, %c0_5], %8 {strides = array<i32>} : memref<8x128xf32, #tpu.memory_space<vmem>>, vector<1x128xf32>,
    %c0_6 = arith.constant 0 : index
    %c0_7 = arith.constant 0 : index
    %10 = vector.load %arg4[%c0_6, %c0_7] : memref<8x128xf32, #tpu.memory_space<vmem>>, vector<1x128xf32>
    %11 = arith.mulf %4, %4 : vector<128x128xf32>
    %cst_8 = arith.constant dense<0.000000e+00> : vector<128xf32>
    %12 = vector.multi_reduction <add>, %11, %cst_8 [0] : vector<128x128xf32> to vector<128xf32>
    %13 = vector.shape_cast %12 : vector<128xf32> to vector<1x128xf32>
    %14 = arith.addf %10, %13 : vector<1x128xf32>
    %c0_9 = arith.constant 0 : index
    %c0_10 = arith.constant 0 : index
    %15 = vector.load %arg4[%c0_9, %c0_10] : memref<8x128xf32, #tpu.memory_space<vmem>>, vector<1x128xf32>
    tpu.vector_store %arg4[%c0_9, %c0_10], %14 {strides = array<i32>} : memref<8x128xf32, #tpu.memory_space<vmem>>, vector<1x128xf32>,
    return
  }
  func.func @transform_0(%arg0: i32, %arg1: i32) -> (i32, i32) {
    %c1_i32 = arith.constant 1 : i32
    %0 = arith.muli %arg0, %c1_i32 : i32
    %1 = arith.addi %0, %arg1 : i32
    %c0_i32 = arith.constant 0 : i32
    %c0_i32_0 = arith.constant 0 : i32
    return %1, %c0_i32 : i32, i32
  }
  func.func @transform_1(%arg0: i32, %arg1: i32) -> (i32, i32) {
    %c0_i32 = arith.constant 0 : i32
    %c0_i32_0 = arith.constant 0 : i32
    return %arg0, %c0_i32 : i32, i32
  }
  func.func @transform_2(%arg0: i32, %arg1: i32) -> (i32, i32) {
    %c0_i32 = arith.constant 0 : i32
    %c0_i32_0 = arith.constant 0 : i32
    return %arg0, %c0_i32 : i32, i32
  }
}

module attributes {stable_mosaic.version = 11 : i64} {
  func.func @_act_matmul_kernel(%arg0: i32, %arg1: i32, %arg2: memref<512x32xbf16, #tpu.memory_space<vmem>>, %arg3: memref<1x32xf32, #tpu.memory_space<vmem>>, %arg4: memref<1x32xf32, #tpu.memory_space<vmem>>, %arg5: memref<32x256xbf16, #tpu.memory_space<vmem>>, %arg6: memref<512x256xbf16, #tpu.memory_space<vmem>>) attributes {dimension_semantics = [#tpu.dimension_semantics<parallel>, #tpu.dimension_semantics<parallel>], iteration_bounds = array<i64: 1, 1>, scalar_prefetch = 0 : i64, scratch_operands = 0 : i64, tpu.core_type = #tpu.core_type<tc>, window_params = [{transform_indices = @transform_0, window_bounds = array<i64: 512, 32>}, {pipeline_mode = #tpu.pipeline_mode<synchronous>, transform_indices = @transform_1, window_bounds = array<i64: 1, 32>}, {pipeline_mode = #tpu.pipeline_mode<synchronous>, transform_indices = @transform_2, window_bounds = array<i64: 1, 32>}, {transform_indices = @transform_3, window_bounds = array<i64: 32, 256>}, {transform_indices = @transform_4, window_bounds = array<i64: 512, 256>}]} {
    %c0 = arith.constant 0 : index
    %c0_0 = arith.constant 0 : index
    %0 = vector.load %arg2[%c0, %c0_0] : memref<512x32xbf16, #tpu.memory_space<vmem>>, vector<512x32xbf16>
    %1 = arith.extf %0 : vector<512x32xbf16> to vector<512x32xf32>
    %c0_1 = arith.constant 0 : index
    %c0_2 = arith.constant 0 : index
    %2 = vector.load %arg3[%c0_1, %c0_2] : memref<1x32xf32, #tpu.memory_space<vmem>>, vector<1x32xf32>
    %3 = vector.broadcast %2 : vector<1x32xf32> to vector<512x32xf32>
    %4 = arith.mulf %1, %3 : vector<512x32xf32>
    %c0_3 = arith.constant 0 : index
    %c0_4 = arith.constant 0 : index
    %5 = vector.load %arg4[%c0_3, %c0_4] : memref<1x32xf32, #tpu.memory_space<vmem>>, vector<1x32xf32>
    %6 = vector.broadcast %5 : vector<1x32xf32> to vector<512x32xf32>
    %7 = arith.addf %4, %6 : vector<512x32xf32>
    %cst = arith.constant 0.000000e+00 : f32
    %8 = vector.broadcast %cst : f32 to vector<512x32xf32>
    %9 = arith.maximumf %7, %8 : vector<512x32xf32>
    %10 = arith.truncf %9 : vector<512x32xf32> to vector<512x32xbf16>
    %c0_5 = arith.constant 0 : index
    %c0_6 = arith.constant 0 : index
    %11 = vector.load %arg5[%c0_5, %c0_6] : memref<32x256xbf16, #tpu.memory_space<vmem>>, vector<32x256xbf16>
    %cst_7 = arith.constant dense<0.000000e+00> : vector<512x256xf32>
    %12 = tpu.matmul %10, %11, %cst_7 {dimension_numbers = #tpu.dot_dimension_numbers<[1], [0], [0], [1], [0, 0, 1, 1], [], []>} : vector<512x32xbf16>, vector<32x256xbf16>, vector<512x256xf32> -> vector<512x256xf32>
    %13 = arith.truncf %12 : vector<512x256xf32> to vector<512x256xbf16>
    %c0_8 = arith.constant 0 : index
    %c0_9 = arith.constant 0 : index
    %14 = vector.load %arg6[%c0_8, %c0_9] : memref<512x256xbf16, #tpu.memory_space<vmem>>, vector<512x256xbf16>
    tpu.vector_store %arg6[%c0_8, %c0_9], %13 {strides = array<i32>} : memref<512x256xbf16, #tpu.memory_space<vmem>>, vector<512x256xbf16>,
    return
  }
  func.func @transform_0(%arg0: i32, %arg1: i32) -> (i32, i32) {
    %c0_i32 = arith.constant 0 : i32
    %c0_i32_0 = arith.constant 0 : i32
    return %arg0, %c0_i32 : i32, i32
  }
  func.func @transform_1(%arg0: i32, %arg1: i32) -> (i32, i32) {
    %c0_i32 = arith.constant 0 : i32
    %c0_i32_0 = arith.constant 0 : i32
    %c0_i32_1 = arith.constant 0 : i32
    return %c0_i32, %c0_i32_0 : i32, i32
  }
  func.func @transform_2(%arg0: i32, %arg1: i32) -> (i32, i32) {
    %c0_i32 = arith.constant 0 : i32
    %c0_i32_0 = arith.constant 0 : i32
    %c0_i32_1 = arith.constant 0 : i32
    return %c0_i32, %c0_i32_0 : i32, i32
  }
  func.func @transform_3(%arg0: i32, %arg1: i32) -> (i32, i32) {
    %c0_i32 = arith.constant 0 : i32
    %c0_i32_0 = arith.constant 0 : i32
    return %c0_i32, %arg1 : i32, i32
  }
  func.func @transform_4(%arg0: i32, %arg1: i32) -> (i32, i32) {
    %c0_i32 = arith.constant 0 : i32
    return %arg0, %arg1 : i32, i32
  }
}

module attributes {stable_mosaic.version = 11 : i64} {
  func.func @_channel_sums_kernel(%arg0: i32, %arg1: i32, %arg2: memref<256x128xbf16, #tpu.memory_space<vmem>>, %arg3: memref<8x128xf32, #tpu.memory_space<vmem>>, %arg4: memref<8x128xf32, #tpu.memory_space<vmem>>) attributes {dimension_semantics = [#tpu.dimension_semantics<parallel>, #tpu.dimension_semantics<arbitrary>], iteration_bounds = array<i64: 1, 1>, scalar_prefetch = 0 : i64, scratch_operands = 0 : i64, tpu.core_type = #tpu.core_type<tc>, window_params = [{transform_indices = @transform_0, window_bounds = array<i64: 256, 128>}, {transform_indices = @transform_1, window_bounds = array<i64: 8, 128>}, {transform_indices = @transform_2, window_bounds = array<i64: 8, 128>}]} {
    %c0_i32 = arith.constant 0 : i32
    %0 = arith.cmpi eq, %arg1, %c0_i32 : i32
    %1 = arith.extui %0 : i1 to i32
    %c0_i32_0 = arith.constant 0 : i32
    %2 = arith.cmpi ne, %1, %c0_i32_0 : i32
    scf.if %2 {
      %cst_11 = arith.constant 0.000000e+00 : f32
      %16 = vector.broadcast %cst_11 : f32 to vector<8x128xf32>
      %c0_12 = arith.constant 0 : index
      %c0_13 = arith.constant 0 : index
      %17 = vector.load %arg3[%c0_12, %c0_13] : memref<8x128xf32, #tpu.memory_space<vmem>>, vector<8x128xf32>
      tpu.vector_store %arg3[%c0_12, %c0_13], %16 {strides = array<i32>} : memref<8x128xf32, #tpu.memory_space<vmem>>, vector<8x128xf32>,
      %cst_14 = arith.constant 0.000000e+00 : f32
      %18 = vector.broadcast %cst_14 : f32 to vector<8x128xf32>
      %c0_15 = arith.constant 0 : index
      %c0_16 = arith.constant 0 : index
      %19 = vector.load %arg4[%c0_15, %c0_16] : memref<8x128xf32, #tpu.memory_space<vmem>>, vector<8x128xf32>
      tpu.vector_store %arg4[%c0_15, %c0_16], %18 {strides = array<i32>} : memref<8x128xf32, #tpu.memory_space<vmem>>, vector<8x128xf32>,
    } else {
    }
    %c0 = arith.constant 0 : index
    %c0_1 = arith.constant 0 : index
    %3 = vector.load %arg2[%c0, %c0_1] : memref<256x128xbf16, #tpu.memory_space<vmem>>, vector<256x128xbf16>
    %4 = arith.extf %3 : vector<256x128xbf16> to vector<256x128xf32>
    %c0_2 = arith.constant 0 : index
    %c0_3 = arith.constant 0 : index
    %5 = vector.load %arg3[%c0_2, %c0_3] : memref<8x128xf32, #tpu.memory_space<vmem>>, vector<1x128xf32>
    %cst = arith.constant dense<0.000000e+00> : vector<128xf32>
    %6 = vector.multi_reduction <add>, %4, %cst [0] : vector<256x128xf32> to vector<128xf32>
    %7 = vector.shape_cast %6 : vector<128xf32> to vector<1x128xf32>
    %8 = arith.addf %5, %7 : vector<1x128xf32>
    %c0_4 = arith.constant 0 : index
    %c0_5 = arith.constant 0 : index
    %9 = vector.load %arg3[%c0_4, %c0_5] : memref<8x128xf32, #tpu.memory_space<vmem>>, vector<1x128xf32>
    tpu.vector_store %arg3[%c0_4, %c0_5], %8 {strides = array<i32>} : memref<8x128xf32, #tpu.memory_space<vmem>>, vector<1x128xf32>,
    %c0_6 = arith.constant 0 : index
    %c0_7 = arith.constant 0 : index
    %10 = vector.load %arg4[%c0_6, %c0_7] : memref<8x128xf32, #tpu.memory_space<vmem>>, vector<1x128xf32>
    %11 = arith.mulf %4, %4 : vector<256x128xf32>
    %cst_8 = arith.constant dense<0.000000e+00> : vector<128xf32>
    %12 = vector.multi_reduction <add>, %11, %cst_8 [0] : vector<256x128xf32> to vector<128xf32>
    %13 = vector.shape_cast %12 : vector<128xf32> to vector<1x128xf32>
    %14 = arith.addf %10, %13 : vector<1x128xf32>
    %c0_9 = arith.constant 0 : index
    %c0_10 = arith.constant 0 : index
    %15 = vector.load %arg4[%c0_9, %c0_10] : memref<8x128xf32, #tpu.memory_space<vmem>>, vector<1x128xf32>
    tpu.vector_store %arg4[%c0_9, %c0_10], %14 {strides = array<i32>} : memref<8x128xf32, #tpu.memory_space<vmem>>, vector<1x128xf32>,
    return
  }
  func.func @transform_0(%arg0: i32, %arg1: i32) -> (i32, i32) {
    %c1_i32 = arith.constant 1 : i32
    %0 = arith.muli %arg0, %c1_i32 : i32
    %1 = arith.addi %0, %arg1 : i32
    %c0_i32 = arith.constant 0 : i32
    %c0_i32_0 = arith.constant 0 : i32
    return %1, %c0_i32 : i32, i32
  }
  func.func @transform_1(%arg0: i32, %arg1: i32) -> (i32, i32) {
    %c0_i32 = arith.constant 0 : i32
    %c0_i32_0 = arith.constant 0 : i32
    return %arg0, %c0_i32 : i32, i32
  }
  func.func @transform_2(%arg0: i32, %arg1: i32) -> (i32, i32) {
    %c0_i32 = arith.constant 0 : i32
    %c0_i32_0 = arith.constant 0 : i32
    return %arg0, %c0_i32 : i32, i32
  }
}

module attributes {stable_mosaic.version = 11 : i64} {
  func.func @_act_matmul_kernel(%arg0: i32, %arg1: i32, %arg2: memref<2048x16xbf16, #tpu.memory_space<vmem>>, %arg3: memref<1x16xf32, #tpu.memory_space<vmem>>, %arg4: memref<1x16xf32, #tpu.memory_space<vmem>>, %arg5: memref<16x48xbf16, #tpu.memory_space<vmem>>, %arg6: memref<2048x48xbf16, #tpu.memory_space<vmem>>) attributes {dimension_semantics = [#tpu.dimension_semantics<parallel>, #tpu.dimension_semantics<parallel>], iteration_bounds = array<i64: 1, 1>, scalar_prefetch = 0 : i64, scratch_operands = 0 : i64, tpu.core_type = #tpu.core_type<tc>, window_params = [{transform_indices = @transform_0, window_bounds = array<i64: 2048, 16>}, {pipeline_mode = #tpu.pipeline_mode<synchronous>, transform_indices = @transform_1, window_bounds = array<i64: 1, 16>}, {pipeline_mode = #tpu.pipeline_mode<synchronous>, transform_indices = @transform_2, window_bounds = array<i64: 1, 16>}, {transform_indices = @transform_3, window_bounds = array<i64: 16, 48>}, {transform_indices = @transform_4, window_bounds = array<i64: 2048, 48>}]} {
    %c0 = arith.constant 0 : index
    %c0_0 = arith.constant 0 : index
    %0 = vector.load %arg2[%c0, %c0_0] : memref<2048x16xbf16, #tpu.memory_space<vmem>>, vector<2048x16xbf16>
    %1 = arith.extf %0 : vector<2048x16xbf16> to vector<2048x16xf32>
    %c0_1 = arith.constant 0 : index
    %c0_2 = arith.constant 0 : index
    %2 = vector.load %arg3[%c0_1, %c0_2] : memref<1x16xf32, #tpu.memory_space<vmem>>, vector<1x16xf32>
    %3 = vector.broadcast %2 : vector<1x16xf32> to vector<2048x16xf32>
    %4 = arith.mulf %1, %3 : vector<2048x16xf32>
    %c0_3 = arith.constant 0 : index
    %c0_4 = arith.constant 0 : index
    %5 = vector.load %arg4[%c0_3, %c0_4] : memref<1x16xf32, #tpu.memory_space<vmem>>, vector<1x16xf32>
    %6 = vector.broadcast %5 : vector<1x16xf32> to vector<2048x16xf32>
    %7 = arith.addf %4, %6 : vector<2048x16xf32>
    %cst = arith.constant 0.000000e+00 : f32
    %8 = vector.broadcast %cst : f32 to vector<2048x16xf32>
    %9 = arith.maximumf %7, %8 : vector<2048x16xf32>
    %10 = arith.truncf %9 : vector<2048x16xf32> to vector<2048x16xbf16>
    %c0_5 = arith.constant 0 : index
    %c0_6 = arith.constant 0 : index
    %11 = vector.load %arg5[%c0_5, %c0_6] : memref<16x48xbf16, #tpu.memory_space<vmem>>, vector<16x48xbf16>
    %cst_7 = arith.constant dense<0.000000e+00> : vector<2048x48xf32>
    %12 = tpu.matmul %10, %11, %cst_7 {dimension_numbers = #tpu.dot_dimension_numbers<[1], [0], [0], [1], [0, 0, 1, 1], [], []>} : vector<2048x16xbf16>, vector<16x48xbf16>, vector<2048x48xf32> -> vector<2048x48xf32>
    %13 = arith.truncf %12 : vector<2048x48xf32> to vector<2048x48xbf16>
    %c0_8 = arith.constant 0 : index
    %c0_9 = arith.constant 0 : index
    %14 = vector.load %arg6[%c0_8, %c0_9] : memref<2048x48xbf16, #tpu.memory_space<vmem>>, vector<2048x48xbf16>
    tpu.vector_store %arg6[%c0_8, %c0_9], %13 {strides = array<i32>} : memref<2048x48xbf16, #tpu.memory_space<vmem>>, vector<2048x48xbf16>,
    return
  }
  func.func @transform_0(%arg0: i32, %arg1: i32) -> (i32, i32) {
    %c0_i32 = arith.constant 0 : i32
    %c0_i32_0 = arith.constant 0 : i32
    return %arg0, %c0_i32 : i32, i32
  }
  func.func @transform_1(%arg0: i32, %arg1: i32) -> (i32, i32) {
    %c0_i32 = arith.constant 0 : i32
    %c0_i32_0 = arith.constant 0 : i32
    %c0_i32_1 = arith.constant 0 : i32
    return %c0_i32, %c0_i32_0 : i32, i32
  }
  func.func @transform_2(%arg0: i32, %arg1: i32) -> (i32, i32) {
    %c0_i32 = arith.constant 0 : i32
    %c0_i32_0 = arith.constant 0 : i32
    %c0_i32_1 = arith.constant 0 : i32
    return %c0_i32, %c0_i32_0 : i32, i32
  }
  func.func @transform_3(%arg0: i32, %arg1: i32) -> (i32, i32) {
    %c0_i32 = arith.constant 0 : i32
    %c0_i32_0 = arith.constant 0 : i32
    return %c0_i32, %arg1 : i32, i32
  }
  func.func @transform_4(%arg0: i32, %arg1: i32) -> (i32, i32) {
    %c0_i32 = arith.constant 0 : i32
    return %arg0, %arg1 : i32, i32
  }
}

</mosaic_0001>

<bundles_post_ra>
// kernel: tpu_custom_call.1
= control target key start
LH: loop header
LB: loop body
LE: loop exit
PB: predicated region body
PF: predicated region fallthrough
CT: control target
= control target key end

     0   :  { %6 = vsyncpa [#allocation3], 0  ;;  %s287_s0 = inlined_call_operand.hbm [shape: f32[8,128], index: 0, kind: input, shape index: {}]   ;;  %s288_s1 = inlined_call_operand.hbm [shape: f32[8,128], index: 1, kind: output, shape index: {}]  }
   0x1   :  { %7 = vsyncpa [#allocation4], 0  ;;  %s270_s6 = smov 0  }
   0x2 LB: > { %s149_s7 = sadd.s32 4294967295, %s256_s6   ;;  %p150_p0 = scmp.ge.s32.totalorder %s256_s6, 1  ;;  %s256_s6 = sphi %s270_s6, %s13_s6  }
   0x3   : > { %p60_p1 = scmp.lt.s32.totalorder %s256_s6, 3  ;;  %s72_s10 = sshll.u32 %s287_s0, 4  ;;  %s73_s10 = int_to_ptr.hbm [resolvable:$true] %s72_s10 }
   0x4   : > { %p170_p3 = scmp.eq.s32.totalorder %s149_s7, 0  ;;  %s258_s11 = smov [#allocation2]  }
   0x5   : > { %p61_p2 = pnand %p150_p0, %p60_p1  ;;  %s74_s12 = sshll.u32 %s258_s11, 4  ;;  %s75_s12 = int_to_ptr.vmem [resolvable:$true] %s74_s12 }
   0x7   : > { %p166_p4 = pneg %p61_p2  ;;  %87 = sbr.rel (%p61_p2) target bundleno = 20 (0x14), region = 24 }
   0x9   : > { %p167_p5 = pnand %p170_p3, %p166_p4 }
   0xb   : > { %169 = dma.hbm_to_vmem [thread:$0]  (!%p167_p5), %s73_s10, 128, %s75_s12, [#allocation3]  }
   0xc   : > { %247 = dma.done.wait (%p170_p3), [#allocation3], 128  }
   0xd   : > { %249 = vsyncadd (%p170_p3), [#allocation3], 4294967168  ;;  %s259_s13 = smov [#allocation5]   ;;  %s109_s17 = sshll.u32 %s288_s1, 4  ;;  %v98_v0 = vld [vmem:[#allocation2] sm:$0xff]  ;;  %s110_s17 = int_to_ptr.hbm [resolvable:$true] %s109_s17 }
   0xe   : > { %s107_s14 = sshll.u32 %s259_s13, 4  ;;  %p172_p6 = scmp.eq.s32.totalorder %s149_s7, 1  ;;  %v99_v1 = vadd.f32 1.0, %v98_v0  ;;  %s108_s14 = int_to_ptr.vmem [resolvable:$true] %s107_s14 }
  0x10   : > { %100 = vst [vmem:[#allocation5] sm:$0xff] %v99_v1 }
  0x11   : > { %163 = dma.vmem_to_hbm [thread:$0]  (%p172_p6), %s108_s14, 128, %s110_s17, [#allocation4]  }
  0x12   : > { %251 = dma.done.wait (%p172_p6), [#allocation4], 128  }
  0x13   : > { %253 = vsyncadd (%p172_p6), [#allocation4], 4294967168 }
  0x14 PF: > { %s13_s6 = sadd.s32 1, %s256_s6  }
  0x15   : > { %p10_p7 = scmp.ge.s32.totalorder %s13_s6, 4  }
  0x17   :  { %12 = sbr.rel (!%p10_p7) target bundleno = 2 (0x2), region = 53 }
  0x1c   :  { %123 = vsyncpa [#allocation3], 1 }
  0x1d   :  { %125 = vsyncpa [#allocation3 + $0x1], 1 }
  0x1e   :  { %126 = vsyncpa [#allocation4], 1 }
  0x1f   :  { %128 = vsyncpa [#allocation4 + $0x1], 1 }

// kernel: generator_forward.10
= control target key start
LH: loop header
LB: loop body
LE: loop exit
PB: predicated region body
PF: predicated region fallthrough
CT: control target
= control target key end

     0   :  { %v98_v0 = vmov 0.0   ;;  %s138_s1 = inlined_call_operand.vmem [shape: f32[8,128], index: 1, kind: output, shape index: {0}]   ;;  %s139_s2 = inlined_call_operand.vmem [shape: f32[8,128], index: 2, kind: output, shape index: {1}]   ;;  %s140_s0 = inlined_call_operand.vmem [shape: bf16[32,128], index: 0, kind: input, shape index: {}]  }
   0x1   :  { %36 = vst [vmem:[%s138_s1] sm:$0xff] %v98_v0  ;;  %v89_v1 = vld [vmem:[%s140_s0] sm:$0xff]   ;;  %v96_v2 = vld [vmem:[%s140_s0 + $0x8] sm:$0xff]  }
   0x2   :  { %37 = vst [vmem:[%s139_s2] sm:$0xff] %v98_v0  ;;  %v90_v3 = vunpack.c.l.bf16 %v89_v1  ;;  %v91_v4 = vunpack.c.h.bf16 %v89_v1  ;;  %v94_v5 = vunpack.c.l.bf16 %v96_v2  ;;  %v95_v6 = vunpack.c.h.bf16 %v96_v2 }
   0x4   :  { %v47_v7 = vadd.f32 %v91_v4, %v90_v3  ;;  %v59_v8 = vmul.f32 %v90_v3, %v90_v3  ;;  %v60_v9 = vmul.f32 %v91_v4, %v91_v4  ;;  %v61_v10 = vmul.f32 %v94_v5, %v94_v5 }
   0x5   :  { %v62_v12 = vmul.f32 %v95_v6, %v95_v6 }
   0x6   :  { %v48_v11 = vadd.f32 %v94_v5, %v47_v7  ;;  %v63_v13 = vadd.f32 %v60_v9, %v59_v8 }
   0x8   :  { %v49_v14 = vadd.f32 %v95_v6, %v48_v11  ;;  %v64_v15 = vadd.f32 %v63_v13, %v61_v10  ;;  %v46_v26 = vld [vmem:[%s138_s1] sm:$0x1] }
   0x9   :  { %v58_v29 = vld [vmem:[%s139_s2] sm:$0x1] }
   0xa   :  { %v50_v16 = vrot.slane %v49_v14, 4  ;;  %v65_v17 = vadd.f32 %v64_v15, %v62_v12 }
   0xc   :  { %v51_v18 = vadd.f32 %v50_v16, %v49_v14  ;;  %v66_v19 = vrot.slane %v65_v17, 4 }
   0xe   :  { %v52_v20 = vrot.slane %v51_v18, 2  ;;  %v67_v21 = vadd.f32 %v66_v19, %v65_v17 }
  0x10   :  { %v53_v22 = vadd.f32 %v52_v20, %v51_v18  ;;  %v68_v23 = vrot.slane %v67_v21, 2 }
  0x12   :  { %v54_v24 = vrot.slane %v53_v22, 1  ;;  %v69_v25 = vadd.f32 %v68_v23, %v67_v21 }
  0x14   :  { %v55_v27 = vadd.f32 %v54_v24, %v53_v22  ;;  %v70_v28 = vrot.slane %v69_v25, 1 }
  0x16   :  { %v56_v30 = vadd.f32 %v55_v27, %v46_v26  ;;  %v71_v31 = vadd.f32 %v70_v28, %v69_v25 }
  0x18   :  { %57 = vst [vmem:[%s138_s1] sm:$0x1] %v56_v30  ;;  %v72_v32 = vadd.f32 %v71_v31, %v58_v29 }
  0x1a   :  { %73 = vst [vmem:[%s139_s2] sm:$0x1] %v72_v32 }

// kernel: generator_forward.9
= control target key start
LH: loop header
LB: loop body
LE: loop exit
PB: predicated region body
PF: predicated region fallthrough
CT: control target
= control target key end

     0   :  { %9 = vsyncpa [#allocation3], 0  ;;  %s676_s0 = inlined_call_operand.hbm [shape: f32[2,16], index: 0, kind: input, shape index: {}]   ;;  %s677_s1 = inlined_call_operand.vmem [shape: f32[1,16], index: 1, kind: input, shape index: {}]   ;;  %s678_s2 = inlined_call_operand.vmem [shape: f32[1,16], index: 2, kind: input, shape index: {}]   ;;  %s679_s3 = inlined_call_operand.hbm [shape: bf16[16,2048], index: 3, kind: input, shape index: {}]   ;;  %s680_s4 = inlined_call_operand.vmem [shape: bf16[2,2048], index: 4, kind: output, shape index: {}]  }
   0x1   :  { %s16_s17 = sshll.u32 %s676_s0, 4  ;;  %s17_s17 = int_to_ptr.hbm [resolvable:$true] %s16_s17 }
   0x2   :  { %10 = vsyncpa [#allocation5], 0  ;;  %s599_s18 = smov [#allocation2]   ;;  %s30_s22 = sshll.u32 %s679_s3, 4  ;;  %s31_s22 = int_to_ptr.hbm [resolvable:$true] %s30_s22 }
   0x3   :  { %s18_s19 = sshll.u32 %s599_s18, 4  ;;  %s600_s23 = smov [#allocation4]   ;;  %s19_s19 = int_to_ptr.vmem [resolvable:$true] %s18_s19 }
   0x4   :  { %21 = dma.hbm_to_vmem [thread:$0]  %s17_s17, 32, %s19_s19, [#allocation3]  }
   0x5   :  { %s32_s24 = sshll.u32 %s600_s23, 4  ;;  %s601_s25 = smov 1024   ;;  %s33_s24 = int_to_ptr.vmem [resolvable:$true] %s32_s24 }
   0x6   :  { %s602_s26 = smov 64  }
   0x7   :  { %38 = dma.hbm_to_vmem [thread:$0]  %s31_s22, 2048, %s33_s24, [#allocation5], %s601_s25, %s601_s25, %s602_s26  }
   0x8   :  { %595 = dma.done.wait [#allocation3], 32  }
   0x9   :  { %596 = vsyncadd [#allocation3], 4294967264 }
   0xa   :  { %597 = dma.done.wait [#allocation5], 2048  }
   0xb   :  { %598 = vsyncadd [#allocation5], 4294965248  ;;  %v447_v0 = vld [vmem:[#allocation4] sm:$0xf]  ;;  %v525_v2 = vld [vmem:[#allocation4 + $0x4] sm:$0xf] }
   0xc   :  { %v533_v1 = vld [vmem:[#allocation4 + $0x3c] sm:$0xf0]  ;;  %vm156_vm0 = vcmask 130048   ;;  %v449_v4 = vld [vmem:[#allocation4 + $0x40] sm:$0xf0]  ;;  %vm402_vm1 = vcmask 1042434  }
   0xd   :  { %v448_v3 = vor.u32 %v533_v1, %v447_v0  ;;  %v455_v5 = vld [vmem:[#allocation4 + $0x8] sm:$0xf]  ;;  %v452_v7 = vor.u32 %v525_v2, %v449_v4  ;;  %v526_v9 = vld [vmem:[#allocation4 + $0xc] sm:$0xf]  ;;  %v48_v11 = vld [vmem:[#allocation2] sm:$0x3] }
   0xe   :  { %v534_v6 = vld [vmem:[#allocation4 + $0x44] sm:$0xf0]  ;;  %v457_v10 = vld [vmem:[#allocation4 + $0x48] sm:$0xf0]  ;;  %v545_v13 = vld [vmem:[%s677_s1] ss:$0 sm:$0xff] }
   0xf   :  { %v456_v8 = vor.u32 %v534_v6, %v455_v5  ;;  %167 = vmatpush.bf16.msra.mxu0 %v448_v3  ;;  %v460_v12 = vor.u32 %v526_v9, %v457_v10  ;;  %180 = vmatpush.bf16.msra.mxu1 %v452_v7  ;;  %v546_v14 = vld [vmem:[%s678_s2] ss:$0 sm:$0xff]  ;;  %v471_v15 = vld [vmem:[#allocation4 + $0x18] sm:$0xf]  ;;  %v53_v17 = vmul.f32 %v545_v13, %v48_v11  ;;  %v463_v21 = vld [vmem:[#allocation4 + $0x10] sm:$0xf] }
  0x10   :  { %v536_v16 = vld [vmem:[#allocation4 + $0x54] sm:$0xf0]  ;;  %v528_v19 = vld [vmem:[#allocation4 + $0x1c] sm:$0xf]  ;;  %v535_v23 = vld [vmem:[#allocation4 + $0x4c] sm:$0xf0] }
  0x11   :  { %193 = vmatpush.bf16.msra.mxu2 %v456_v8  ;;  %206 = vmatpush.bf16.msra.mxu3 %v460_v12  ;;  %v472_v18 = vor.u32 %v536_v16, %v471_v15  ;;  %v473_v20 = vld [vmem:[#allocation4 + $0x58] sm:$0xf0]  ;;  %v527_v24 = vld [vmem:[#allocation4 + $0x14] sm:$0xf]  ;;  %v58_v26 = vadd.f32 %v546_v14, %v53_v17  ;;  %v464_v27 = vor.u32 %v535_v23, %v463_v21  ;;  %v487_v29 = vld [vmem:[#allocation4 + $0x28] sm:$0xf] }
  0x12   :  { %v476_v22 = vor.u32 %v528_v19, %v473_v20  ;;  %v465_v25 = vld [vmem:[#allocation4 + $0x50] sm:$0xf0]  ;;  %v538_v30 = vld [vmem:[#allocation4 + $0x64] sm:$0xf0]  ;;  %v530_v31 = vld [vmem:[#allocation4 + $0x2c] sm:$0xf] }
  0x13   :  { %v468_v28 = vor.u32 %v527_v24, %v465_v25  ;;  %v489_v32 = vld [vmem:[#allocation4 + $0x68] sm:$0xf0]  ;;  %v479_v33 = vld [vmem:[#allocation4 + $0x20] sm:$0xf]  ;;  %v59_v35 = vpack.c.bf16 %v58_v26, %v58_v26  ;;  %219 = vmatpush.bf16.msrb.mxu0 %v464_v27  ;;  %v488_v36 = vor.u32 %v538_v30, %v487_v29  ;;  %v529_v38 = vld [vmem:[#allocation4 + $0x24] sm:$0xf] }
  0x14   :  { %v537_v34 = vld [vmem:[#allocation4 + $0x5c] sm:$0xf0]  ;;  %v492_v37 = vor.u32 %v530_v31, %v489_v32  ;;  %v481_v39 = vld [vmem:[#allocation4 + $0x60] sm:$0xf0]  ;;  %v503_v42 = vld [vmem:[#allocation4 + $0x38] sm:$0xf] }
  0x15   :  { %245 = vmatpush.bf16.msrb.mxu2 %v472_v18  ;;  %258 = vmatpush.bf16.msrb.mxu3 %v476_v22  ;;  %v480_v40 = vor.u32 %v537_v34, %v479_v33  ;;  %v484_v41 = vor.u32 %v529_v38, %v481_v39  ;;  %v540_v43 = vld [vmem:[#allocation4 + $0x74] sm:$0xf0]  ;;  %v532_v44 = vld [vmem:[#allocation4 + $0x3c] sm:$0xf]  ;;  %v495_v46 = vld [vmem:[#allocation4 + $0x30] sm:$0xf] }
  0x16   :  { %232 = vmatpush.bf16.msrb.mxu1 %v468_v28  ;;  %509 = vmatmul.msk.bf16.vlgmr.msra.gmra.mxu0 %vm156_vm0, %v59_v35  ;;  %v505_v45 = vld [vmem:[#allocation4 + $0x78] sm:$0xf0]  ;;  %v539_v47 = vld [vmem:[#allocation4 + $0x6c] sm:$0xf0]  ;;  %v531_v48 = vld [vmem:[#allocation4 + $0x34] sm:$0xf]  ;;  %v504_v50 = vor.u32 %v540_v43, %v503_v42 }
  0x17   :  { %510 = vmatmul.msk.bf16.vlgmr.msra.gmra.mxu1 %vm156_vm0, %v59_v35  ;;  %511 = vmatmul.msk.bf16.vlgmr.msra.gmra.mxu2 %vm156_vm0, %v59_v35  ;;  %v497_v49 = vld [vmem:[#allocation4 + $0x70] sm:$0xf0]  ;;  %v508_v51 = vor.u32 %v532_v44, %v505_v45  ;;  %v496_v52 = vor.u32 %v539_v47, %v495_v46  ;;  %vm408_vm2 = vcmask 1044484   ;;  %vm398_vm3 = vcmask 1040384  }
  0x18   :  { %512 = vmatmul.msk.bf16.vlgmr.msra.gmra.mxu3 %vm156_vm0, %v59_v35  ;;  %271 = vmatpush.bf16.msra.mxu0 %v480_v40  ;;  %v500_v53 = vor.u32 %v531_v48, %v497_v49  ;;  %vm406_vm4 = vcmask 1041408   ;;  %vm412_vm5 = vcmask 1046534   ;;  %vm416_vm6 = vcmask 1045508  }
  0x19   :  { %297 = vmatpush.bf16.msra.mxu2 %v488_v36  ;;  %310 = vmatpush.bf16.msra.mxu3 %v492_v37  ;;  %vm418_vm7 = vcmask 1043456  }
  0x1a   :  { %284 = vmatpush.bf16.msra.mxu1 %v484_v41 }
  0x26   :  { %513 = vmatmul.msk.bf16.vlgmr.msrb.gmra.mxu0 %vm156_vm0, %v59_v35 }
  0x27   :  { %514 = vmatmul.msk.bf16.vlgmr.msrb.gmra.mxu1 %vm156_vm0, %v59_v35  ;;  %515 = vmatmul.msk.bf16.vlgmr.msrb.gmra.mxu2 %vm156_vm0, %v59_v35 }
  0x28   :  { %516 = vmatmul.msk.bf16.vlgmr.msrb.gmra.mxu3 %vm156_vm0, %v59_v35  ;;  %349 = vmatpush.bf16.msrb.mxu2 %v504_v50 }
  0x29   :  { %362 = vmatpush.bf16.msrb.mxu3 %v508_v51  ;;  %323 = vmatpush.bf16.msrb.mxu0 %v496_v52 }
  0x2a   :  { %336 = vmatpush.bf16.msrb.mxu1 %v500_v53 }
  0x36   :  { %517 = vmatmul.msk.bf16.vlgmr.msra.gmra.mxu0 %vm156_vm0, %v59_v35 }
  0x37   :  { %518 = vmatmul.msk.bf16.vlgmr.msra.gmra.mxu1 %vm156_vm0, %v59_v35  ;;  %519 = vmatmul.msk.bf16.vlgmr.msra.gmra.mxu2 %vm156_vm0, %v59_v35 }
  0x38   :  { %520 = vmatmul.msk.bf16.vlgmr.msra.gmra.mxu3 %vm156_vm0, %v59_v35 }
  0x46   :  { %521 = vmatmul.msk.bf16.vlgmr.msrb.gmra.mxu0 %vm156_vm0, %v59_v35 }
  0x47   :  { %522 = vmatmul.msk.bf16.vlgmr.msrb.gmra.mxu1 %vm156_vm0, %v59_v35  ;;  %523 = vmatmul.msk.bf16.vlgmr.msrb.gmra.mxu2 %vm156_vm0, %v59_v35 }
  0x48   :  { %524 = vmatmul.msk.bf16.vlgmr.msrb.gmra.mxu3 %vm156_vm0, %v59_v35 }
  0x93   :  { %v169_v54 = vpop.f32.mrf.mxu0 }
  0x94   :  { %v182_v55 = vpop.f32.mrf.mxu1 }
  0x95   :  { %v368_v2 = vpack.c.bf16 %v182_v55, %v169_v54 }
  0x97   :  { %v384_v9 = vrot.slane %v368_v2, 3 }
  0x99   :  { %v401_v17 = vsel %vm398_vm3, %v368_v2, %v384_v9 }
  0x9a   :  { %v195_v56 = vpop.f32.mrf.mxu2 }
  0x9b   :  { %v208_v57 = vpop.f32.mrf.mxu3  ;;  %v171_v58 = vpop.f32.mrf.mxu0 }
  0x9c   :  { %v184_v59 = vpop.f32.mrf.mxu1  ;;  %v369_v0 = vpack.c.bf16 %v208_v57, %v195_v56 }
  0x9e   :  { %v385_v3 = vrot.slane %v369_v0, 6  ;;  %v386_v4 = vrot.slane %v369_v0, 1 }
  0xa0   :  { %v405_v13 = vsel %vm402_vm1, %v385_v3, %v386_v4 }
  0xa1   :  { %v407_v19 = vsel %vm406_vm4, %v401_v17, %v405_v13 }
  0xa2   :  { %v197_v60 = vpop.f32.mrf.mxu2 }
  0xa3   :  { %v210_v61 = vpop.f32.mrf.mxu3  ;;  %v221_v62 = vpop.f32.mrf.mxu0 }
  0xa4   :  { %v234_v63 = vpop.f32.mrf.mxu1 }
  0xa5   :  { %v370_v1 = vpack.c.bf16 %v234_v63, %v221_v62 }
  0xa7   :  { %v387_v5 = vrot.slane %v370_v1, 4  ;;  %v388_v6 = vrot.slane %v370_v1, 7 }
  0xa9   :  { %v411_v14 = vsel %vm408_vm2, %v387_v5, %v388_v6 }
  0xaa   :  { %v247_v7 = vpop.f32.mrf.mxu2 }
  0xab   :  { %v260_v8 = vpop.f32.mrf.mxu3  ;;  %v223_v11 = vpop.f32.mrf.mxu0 }
  0xac   :  { %v371_v10 = vpack.c.bf16 %v260_v8, %v247_v7  ;;  %v236_v12 = vpop.f32.mrf.mxu1 }
  0xae   :  { %v389_v15 = vrot.slane %v371_v10, 2  ;;  %v390_v16 = vrot.slane %v371_v10, 5 }
  0xb0   :  { %v415_v18 = vsel %vm412_vm5, %v389_v15, %v390_v16 }
  0xb1   :  { %v417_v20 = vsel %vm416_vm6, %v411_v14, %v415_v18 }
  0xb2   :  { %v419_v21 = vsel %vm418_vm7, %v407_v19, %v417_v20  ;;  %v249_v22 = vpop.f32.mrf.mxu2 }
  0xb3   :  { %437 = vst [vmem:[%s680_s4] sm:$0xff] %v419_v21  ;;  %v262_v23 = vpop.f32.mrf.mxu3  ;;  %v273_v24 = vpop.f32.mrf.mxu0 }
  0xb4   :  { %v286_v25 = vpop.f32.mrf.mxu1 }
  0xb5   :  { %v372_v36 = vpack.c.bf16 %v286_v25, %v273_v24 }
  0xb7   :  { %v391_v43 = vrot.slane %v372_v36, 3 }
  0xb9   :  { %v422_v51 = vsel %vm398_vm3, %v372_v36, %v391_v43 }
  0xba   :  { %v299_v26 = vpop.f32.mrf.mxu2 }
  0xbb   :  { %v312_v27 = vpop.f32.mrf.mxu3  ;;  %v275_v28 = vpop.f32.mrf.mxu0 }
  0xbc   :  { %v288_v29 = vpop.f32.mrf.mxu1  ;;  %v373_v34 = vpack.c.bf16 %v312_v27, %v299_v26 }
  0xbe   :  { %v392_v37 = vrot.slane %v373_v34, 6  ;;  %v393_v38 = vrot.slane %v373_v34, 1 }
  0xc0   :  { %v425_v47 = vsel %vm402_vm1, %v392_v37, %v393_v38 }
  0xc1   :  { %v426_v53 = vsel %vm406_vm4, %v422_v51, %v425_v47 }
  0xc2   :  { %v301_v30 = vpop.f32.mrf.mxu2 }
  0xc3   :  { %v314_v31 = vpop.f32.mrf.mxu3  ;;  %v325_v32 = vpop.f32.mrf.mxu0 }
  0xc4   :  { %v338_v33 = vpop.f32.mrf.mxu1 }
  0xc5   :  { %v374_v35 = vpack.c.bf16 %v338_v33, %v325_v32 }
  0xc7   :  { %v394_v39 = vrot.slane %v374_v35, 4  ;;  %v395_v40 = vrot.slane %v374_v35, 7 }
  0xc9   :  { %v429_v48 = vsel %vm408_vm2, %v394_v39, %v395_v40 }
  0xca   :  { %v351_v41 = vpop.f32.mrf.mxu2 }
  0xcb   :  { %v364_v42 = vpop.f32.mrf.mxu3  ;;  %v327_v45 = vpop.f32.mrf.mxu0 }
  0xcc   :  { %v375_v44 = vpack.c.bf16 %v364_v42, %v351_v41  ;;  %v340_v46 = vpop.f32.mrf.mxu1 }
  0xce   :  { %v396_v49 = vrot.slane %v375_v44, 2  ;;  %v397_v50 = vrot.slane %v375_v44, 5 }
  0xd0   :  { %v432_v52 = vsel %vm412_vm5, %v396_v49, %v397_v50 }
  0xd1   :  { %v433_v54 = vsel %vm416_vm6, %v429_v48, %v432_v52 }
  0xd2   :  { %v434_v55 = vsel %vm418_vm7, %v426_v53, %v433_v54  ;;  %v353_v56 = vpop.f32.mrf.mxu2 }
  0xd3   :  { %438 = vst [vmem:[%s680_s4 + $0x8] sm:$0xff] %v434_v55  ;;  %v366_v57 = vpop.f32.mrf.mxu3 }
  0xd4   :  { %443 = vsyncpa [#allocation3], 1 }
  0xd5   :  { %444 = vsyncpa [#allocation5], 1 }

// kernel: generator_forward.11
= control target key start
LH: loop header
LB: loop body
LE: loop exit
PB: predicated region body
PF: predicated region fallthrough
CT: control target
= control target key end

     0   :  { %9 = vsyncpa [#allocation3], 0  ;;  %s996_s18 = smov [#allocation2]   ;;  %s997_s20 = smov 512   ;;  %s1119_s0 = inlined_call_operand.vmem [shape: bf16[32,128], index: 0, kind: input, shape index: {}]   ;;  %s1120_s1 = inlined_call_operand.vmem [shape: f32[1,128], index: 1, kind: input, shape index: {}]   ;;  %s1121_s2 = inlined_call_operand.vmem [shape: f32[1,128], index: 2, kind: input, shape index: {}]   ;;  %s1122_s3 = inlined_call_operand.hbm [shape: bf16[128,1024], index: 3, kind: input, shape index: {}]   ;;  %s1123_s4 = inlined_call_operand.vmem [shape: bf16[32,1024], index: 4, kind: output, shape index: {}]  }
   0x1   :  { %s20_s17 = sshll.u32 %s1122_s3, 4  ;;  %s22_s19 = sshll.u32 %s996_s18, 4  ;;  %s21_s17 = int_to_ptr.hbm [resolvable:$true] %s20_s17  ;;  %s23_s19 = int_to_ptr.vmem [resolvable:$true] %s22_s19 }
   0x2   :  { %s998_s21 = smov 32  }
   0x3   :  { %28 = dma.hbm_to_vmem [thread:$0]  %s21_s17, 8192, %s23_s19, [#allocation3], %s997_s20, %s997_s20, %s998_s21  }
   0x4   :  { %994 = dma.done.wait [#allocation3], 8192  }
   0x5   :  { %995 = vsyncadd [#allocation3], 4294959104  ;;  %v862_v0 = vld [vmem:[#allocation2 + $0x1c0] sm:$0xf]  ;;  %v948_v2 = vld [vmem:[#allocation2 + $0x1c4] sm:$0xf] }
   0x6   :  { %v952_v1 = vld [vmem:[#allocation2 + $0x1dc] sm:$0xf0]  ;;  %v864_v4 = vld [vmem:[#allocation2 + $0x1e0] sm:$0xf0]  ;;  %v870_v5 = vld [vmem:[#allocation2 + $0x1c8] sm:$0xf] }
   0x7   :  { %v863_v3 = vor.u32 %v952_v1, %v862_v0  ;;  %v953_v6 = vld [vmem:[#allocation2 + $0x1e4] sm:$0xf0]  ;;  %v867_v7 = vor.u32 %v948_v2, %v864_v4  ;;  %v949_v9 = vld [vmem:[#allocation2 + $0x1cc] sm:$0xf]  ;;  %v830_v11 = vld [vmem:[#allocation2 + $0x180] sm:$0xf] }
   0x8   :  { %v871_v8 = vor.u32 %v953_v6, %v870_v5  ;;  %v872_v10 = vld [vmem:[#allocation2 + $0x1e8] sm:$0xf0]  ;;  %v944_v13 = vld [vmem:[#allocation2 + $0x19c] sm:$0xf0]  ;;  %v940_v14 = vld [vmem:[#allocation2 + $0x184] sm:$0xf] }
   0x9   :  { %447 = vmatpush.bf16.msra.mxu0 %v863_v3  ;;  %v875_v12 = vor.u32 %v949_v9, %v872_v10  ;;  %v832_v15 = vld [vmem:[#allocation2 + $0x1a0] sm:$0xf0]  ;;  %466 = vmatpush.bf16.msra.mxu1 %v867_v7  ;;  %v831_v16 = vor.u32 %v944_v13, %v830_v11  ;;  %v838_v18 = vld [vmem:[#allocation2 + $0x188] sm:$0xf]  ;;  %v941_v20 = vld [vmem:[#allocation2 + $0x18c] sm:$0xf] }
   0xa   :  { %485 = vmatpush.bf16.msra.mxu2 %v871_v8  ;;  %v835_v17 = vor.u32 %v940_v14, %v832_v15  ;;  %v945_v19 = vld [vmem:[#allocation2 + $0x1a4] sm:$0xf0]  ;;  %v840_v22 = vld [vmem:[#allocation2 + $0x1a8] sm:$0xf0]  ;;  %v798_v23 = vld [vmem:[#allocation2 + $0x140] sm:$0xf] }
   0xb   :  { %504 = vmatpush.bf16.msra.mxu3 %v875_v12  ;;  %v839_v21 = vor.u32 %v945_v19, %v838_v18  ;;  %v936_v24 = vld [vmem:[#allocation2 + $0x15c] sm:$0xf0]  ;;  %v843_v25 = vor.u32 %v941_v20, %v840_v22  ;;  %v932_v26 = vld [vmem:[#allocation2 + $0x144] sm:$0xf]  ;;  %v806_v28 = vld [vmem:[#allocation2 + $0x148] sm:$0xf] }
   0xc   :  { %v800_v27 = vld [vmem:[#allocation2 + $0x160] sm:$0xf0]  ;;  %v799_v29 = vor.u32 %v936_v24, %v798_v23  ;;  %v937_v30 = vld [vmem:[#allocation2 + $0x164] sm:$0xf0]  ;;  %v933_v31 = vld [vmem:[#allocation2 + $0x14c] sm:$0xf] }
   0xd   :  { %448 = vmatpush.bf16.msra.mxu0 %v831_v16  ;;  %v808_v32 = vld [vmem:[#allocation2 + $0x168] sm:$0xf0]  ;;  %467 = vmatpush.bf16.msra.mxu1 %v835_v17  ;;  %v803_v33 = vor.u32 %v932_v26, %v800_v27  ;;  %v807_v34 = vor.u32 %v937_v30, %v806_v28  ;;  %v766_v35 = vld [vmem:[#allocation2 + $0x100] sm:$0xf]  ;;  %v924_v37 = vld [vmem:[#allocation2 + $0x104] sm:$0xf] }
   0xe   :  { %486 = vmatpush.bf16.msra.mxu2 %v839_v21  ;;  %v928_v36 = vld [vmem:[#allocation2 + $0x11c] sm:$0xf0]  ;;  %v811_v38 = vor.u32 %v933_v31, %v808_v32  ;;  %v768_v39 = vld [vmem:[#allocation2 + $0x120] sm:$0xf0]  ;;  %v774_v40 = vld [vmem:[#allocation2 + $0x108] sm:$0xf] }
   0xf   :  { %505 = vmatpush.bf16.msra.mxu3 %v843_v25  ;;  %v929_v41 = vld [vmem:[#allocation2 + $0x124] sm:$0xf0]  ;;  %v925_v42 = vld [vmem:[#allocation2 + $0x10c] sm:$0xf]  ;;  %v767_v44 = vor.u32 %v928_v36, %v766_v35  ;;  %v771_v45 = vor.u32 %v924_v37, %v768_v39  ;;  %v734_v47 = vld [vmem:[#allocation2 + $0xc0] sm:$0xf] }
  0x10   :  { %v776_v43 = vld [vmem:[#allocation2 + $0x128] sm:$0xf0]  ;;  %v775_v46 = vor.u32 %v929_v41, %v774_v40  ;;  %v920_v48 = vld [vmem:[#allocation2 + $0xdc] sm:$0xf0]  ;;  %v916_v49 = vld [vmem:[#allocation2 + $0xc4] sm:$0xf] }
  0x11   :  { %449 = vmatpush.bf16.msra.mxu0 %v799_v29  ;;  %468 = vmatpush.bf16.msra.mxu1 %v803_v33  ;;  %v779_v50 = vor.u32 %v925_v42, %v776_v43  ;;  %v736_v51 = vld [vmem:[#allocation2 + $0xe0] sm:$0xf0]  ;;  %v742_v52 = vld [vmem:[#allocation2 + $0xc8] sm:$0xf]  ;;  %v917_v54 = vld [vmem:[#allocation2 + $0xcc] sm:$0xf]  ;;  %v735_v56 = vor.u32 %v920_v48, %v734_v47 }
  0x12   :  { %487 = vmatpush.bf16.msra.mxu2 %v807_v34  ;;  %v921_v53 = vld [vmem:[#allocation2 + $0xe4] sm:$0xf0]  ;;  %v744_v55 = vld [vmem:[#allocation2 + $0xe8] sm:$0xf0]  ;;  %v739_v57 = vor.u32 %v916_v49, %v736_v51  ;;  %v702_v59 = vld [vmem:[#allocation2 + $0x80] sm:$0xf] }
  0x13   :  { %506 = vmatpush.bf16.msra.mxu3 %v811_v38  ;;  %v743_v58 = vor.u32 %v921_v53, %v742_v52  ;;  %v912_v60 = vld [vmem:[#allocation2 + $0x9c] sm:$0xf0]  ;;  %v908_v61 = vld [vmem:[#allocation2 + $0x84] sm:$0xf]  ;;  %v747_v62 = vor.u32 %v917_v54, %v744_v55  ;;  %v710_v0 = vld [vmem:[#allocation2 + $0x88] sm:$0xf] }
  0x14   :  { %v704_v63 = vld [vmem:[#allocation2 + $0xa0] sm:$0xf0]  ;;  %v913_v1 = vld [vmem:[#allocation2 + $0xa4] sm:$0xf0]  ;;  %v909_v2 = vld [vmem:[#allocation2 + $0x8c] sm:$0xf]  ;;  %v703_v5 = vor.u32 %v912_v60, %v702_v59 }
  0x15   :  { %450 = vmatpush.bf16.msra.mxu0 %v767_v44  ;;  %469 = vmatpush.bf16.msra.mxu1 %v771_v45  ;;  %v712_v3 = vld [vmem:[#allocation2 + $0xa8] sm:$0xf0]  ;;  %v670_v4 = vld [vmem:[#allocation2 + $0x40] sm:$0xf]  ;;  %v900_v7 = vld [vmem:[#allocation2 + $0x44] sm:$0xf]  ;;  %v707_v9 = vor.u32 %v908_v61, %v704_v63  ;;  %v711_v10 = vor.u32 %v913_v1, %v710_v0 }
  0x16   :  { %488 = vmatpush.bf16.msra.mxu2 %v775_v46  ;;  %v904_v6 = vld [vmem:[#allocation2 + $0x5c] sm:$0xf0]  ;;  %v672_v8 = vld [vmem:[#allocation2 + $0x60] sm:$0xf0]  ;;  %v678_v11 = vld [vmem:[#allocation2 + $0x48] sm:$0xf]  ;;  %v715_v14 = vor.u32 %v909_v2, %v712_v3 }
  0x17   :  { %507 = vmatpush.bf16.msra.mxu3 %v779_v50  ;;  %v905_v12 = vld [vmem:[#allocation2 + $0x64] sm:$0xf0]  ;;  %v901_v13 = vld [vmem:[#allocation2 + $0x4c] sm:$0xf]  ;;  %v957_v16 = vld [vmem:[%s1119_s0] sm:$0xff]   ;;  %v671_v21 = vor.u32 %v904_v6, %v670_v4  ;;  %v675_v22 = vor.u32 %v900_v7, %v672_v8 }
  0x18   :  { %v680_v15 = vld [vmem:[#allocation2 + $0x68] sm:$0xf0]  ;;  %v958_v17 = vunpack.c.l.bf16 %v957_v16  ;;  %v959_v18 = vunpack.c.h.bf16 %v957_v16  ;;  %v1033_v19 = vld [vmem:[%s1120_s1] ss:$0 sm:$0xff]  ;;  %v679_v24 = vor.u32 %v905_v12, %v678_v11  ;;  %v892_v26 = vld [vmem:[#allocation2 + $0x4] sm:$0xf] }
  0x19   :  { %451 = vmatpush.bf16.msra.mxu0 %v735_v56  ;;  %470 = vmatpush.bf16.msra.mxu1 %v739_v57  ;;  %v1038_v20 = vld [vmem:[%s1121_s2] ss:$0 sm:$0xff]  ;;  %v640_v27 = vld [vmem:[#allocation2 + $0x20] sm:$0xf0]  ;;  %v683_v30 = vor.u32 %v901_v13, %v680_v15  ;;  %v646_v31 = vld [vmem:[#allocation2 + $0x8] sm:$0xf] }
  0x1a   :  { %489 = vmatpush.bf16.msra.mxu2 %v743_v58  ;;  %v638_v23 = vld [vmem:[#allocation2] sm:$0xf]  ;;  %v45_v28 = vmul.f32 %v1033_v19, %v958_v17  ;;  %v46_v29 = vmul.f32 %v1033_v19, %v959_v18  ;;  %v897_v32 = vld [vmem:[#allocation2 + $0x24] sm:$0xf0]  ;;  %v893_v33 = vld [vmem:[#allocation2 + $0xc] sm:$0xf]  ;;  %v643_v42 = vor.u32 %v892_v26, %v640_v27 }
  0x1b   :  { %508 = vmatpush.bf16.msra.mxu3 %v747_v62  ;;  %v896_v25 = vld [vmem:[#allocation2 + $0x1c] sm:$0xf0]  ;;  %v648_v34 = vld [vmem:[#allocation2 + $0x28] sm:$0xf0]  ;;  %v886_v37 = vld [vmem:[#allocation2 + $0x1d8] sm:$0xf]  ;;  %v647_v43 = vor.u32 %v897_v32, %v646_v31 }
  0x1c   :  { %v53_v35 = vadd.f32 %v1038_v20, %v45_v28  ;;  %v54_v36 = vadd.f32 %v1038_v20, %v46_v29  ;;  %v955_v38 = vld [vmem:[#allocation2 + $0x1f4] sm:$0xf0]  ;;  %v639_v39 = vor.u32 %v896_v25, %v638_v23  ;;  %v951_v40 = vld [vmem:[#allocation2 + $0x1dc] sm:$0xf]  ;;  %v651_v46 = vor.u32 %v893_v33, %v648_v34  ;;  %v878_v48 = vld [vmem:[#allocation2 + $0x1d0] sm:$0xf] }
  0x1d   :  { %452 = vmatpush.bf16.msra.mxu0 %v703_v5  ;;  %471 = vmatpush.bf16.msra.mxu1 %v707_v9  ;;  %v888_v41 = vld [vmem:[#allocation2 + $0x1f8] sm:$0xf0]  ;;  %v887_v47 = vor.u32 %v955_v38, %v886_v37  ;;  %v954_v49 = vld [vmem:[#allocation2 + $0x1ec] sm:$0xf0]  ;;  %v950_v50 = vld [vmem:[#allocation2 + $0x1d4] sm:$0xf] }
  0x1e   :  { %490 = vmatpush.bf16.msra.mxu2 %v711_v10  ;;  %v57_v44 = vmax.f32 %v53_v35, 0.0  ;;  %v58_v45 = vmax.f32 %v54_v36, 0.0  ;;  %v891_v52 = vor.u32 %v951_v40, %v888_v41  ;;  %v880_v53 = vld [vmem:[#allocation2 + $0x1f0] sm:$0xf0]  ;;  %v854_v54 = vld [vmem:[#allocation2 + $0x198] sm:$0xf]  ;;  %v879_v58 = vor.u32 %v954_v49, %v878_v48 }
  0x1f   :  { %509 = vmatpush.bf16.msra.mxu3 %v715_v14  ;;  %v947_v55 = vld [vmem:[#allocation2 + $0x1b4] sm:$0xf0]  ;;  %v943_v56 = vld [vmem:[#allocation2 + $0x19c] sm:$0xf]  ;;  %v846_v59 = vld [vmem:[#allocation2 + $0x190] sm:$0xf]  ;;  %v883_v60 = vor.u32 %v950_v50, %v880_v53 }
  0x20   :  { %v1044_v51 = vpack.c.bf16 %v58_v45, %v57_v44  ;;  %v856_v57 = vld [vmem:[#allocation2 + $0x1b8] sm:$0xf0]  ;;  %v855_v61 = vor.u32 %v947_v55, %v854_v54  ;;  %v946_v62 = vld [vmem:[#allocation2 + $0x1ac] sm:$0xf0]  ;;  %v942_v63 = vld [vmem:[#allocation2 + $0x194] sm:$0xf] }
  0x21   :  { %453 = vmatpush.bf16.msra.mxu0 %v671_v21  ;;  %472 = vmatpush.bf16.msra.mxu1 %v675_v22  ;;  %v848_v0 = vld [vmem:[#allocation2 + $0x1b0] sm:$0xf0]  ;;  %v859_v1 = vor.u32 %v943_v56, %v856_v57  ;;  %v822_v2 = vld [vmem:[#allocation2 + $0x158] sm:$0xf]  ;;  %v964_v4 = vld [vmem:[%s1119_s0 + $0x8] sm:$0xff]   ;;  %v847_v9 = vor.u32 %v946_v62, %v846_v59 }
  0x22   :  { %491 = vmatpush.bf16.msra.mxu2 %v679_v24  ;;  %v939_v3 = vld [vmem:[#allocation2 + $0x174] sm:$0xf0]  ;;  %v935_v5 = vld [vmem:[#allocation2 + $0x15c] sm:$0xf]  ;;  %v962_v7 = vunpack.c.l.bf16 %v964_v4  ;;  %v963_v8 = vunpack.c.h.bf16 %v964_v4  ;;  %v851_v10 = vor.u32 %v942_v63, %v848_v0  ;;  %v814_v12 = vld [vmem:[#allocation2 + $0x150] sm:$0xf] }
  0x23   :  { %510 = vmatpush.bf16.msra.mxu3 %v683_v30  ;;  %v824_v6 = vld [vmem:[#allocation2 + $0x178] sm:$0xf0]  ;;  %v823_v11 = vor.u32 %v939_v3, %v822_v2  ;;  %v938_v13 = vld [vmem:[#allocation2 + $0x16c] sm:$0xf0]  ;;  %v934_v14 = vld [vmem:[#allocation2 + $0x154] sm:$0xf] }
  0x24   :  { %v47_v15 = vmul.f32 %v1033_v19, %v962_v7  ;;  %v48_v16 = vmul.f32 %v1033_v19, %v963_v8  ;;  %v827_v17 = vor.u32 %v935_v5, %v824_v6  ;;  %v816_v18 = vld [vmem:[#allocation2 + $0x170] sm:$0xf0]  ;;  %v790_v21 = vld [vmem:[#allocation2 + $0x118] sm:$0xf]  ;;  %v927_v23 = vld [vmem:[#allocation2 + $0x11c] sm:$0xf]  ;;  %v815_v27 = vor.u32 %v938_v13, %v814_v12 }
  0x25   :  { %454 = vmatpush.bf16.msra.mxu0 %v639_v39  ;;  %473 = vmatpush.bf16.msra.mxu1 %v643_v42  ;;  %v931_v22 = vld [vmem:[#allocation2 + $0x134] sm:$0xf0]  ;;  %v792_v24 = vld [vmem:[#allocation2 + $0x138] sm:$0xf0]  ;;  %v782_v28 = vld [vmem:[#allocation2 + $0x110] sm:$0xf]  ;;  %v819_v29 = vor.u32 %v934_v14, %v816_v18 }
  0x26   :  { %492 = vmatpush.bf16.msra.mxu2 %v647_v43  ;;  %v55_v25 = vadd.f32 %v1038_v20, %v47_v15  ;;  %v56_v26 = vadd.f32 %v1038_v20, %v48_v16  ;;  %v791_v30 = vor.u32 %v931_v22, %v790_v21  ;;  %v930_v31 = vld [vmem:[#allocation2 + $0x12c] sm:$0xf0]  ;;  %v926_v19 = vld [vmem:[#allocation2 + $0x114] sm:$0xf]  ;;  %v795_v33 = vor.u32 %v927_v23, %v792_v24  ;;  %v758_v36 = vld [vmem:[#allocation2 + $0xd8] sm:$0xf] }
  0x27   :  { %511 = vmatpush.bf16.msra.mxu3 %v651_v46  ;;  %v784_v32 = vld [vmem:[#allocation2 + $0x130] sm:$0xf0]  ;;  %v923_v37 = vld [vmem:[#allocation2 + $0xf4] sm:$0xf0]  ;;  %v919_v38 = vld [vmem:[#allocation2 + $0xdc] sm:$0xf]  ;;  %v783_v20 = vor.u32 %v930_v31, %v782_v28 }
  0x28   :  { %455 = vmatmul.bf16.vlgmr.msra.gmra.mxu0 %v1044_v51  ;;  %474 = vmatmul.bf16.vlgmr.msra.gmra.mxu1 %v1044_v51  ;;  %v59_v34 = vmax.f32 %v55_v25, 0.0  ;;  %v60_v35 = vmax.f32 %v56_v26, 0.0  ;;  %v760_v39 = vld [vmem:[#allocation2 + $0xf8] sm:$0xf0]  ;;  %v787_v40 = vor.u32 %v926_v19, %v784_v32  ;;  %v759_v41 = vor.u32 %v923_v37, %v758_v36  ;;  %v750_v42 = vld [vmem:[#allocation2 + $0xd0] sm:$0xf] }
  0x29   :  { %493 = vmatmul.bf16.vlgmr.msra.gmra.mxu2 %v1044_v51  ;;  %523 = vmatpush.bf16.msrb.mxu0 %v879_v58  ;;  %v922_v43 = vld [vmem:[#allocation2 + $0xec] sm:$0xf0]  ;;  %v918_v44 = vld [vmem:[#allocation2 + $0xd4] sm:$0xf]  ;;  %v763_v46 = vor.u32 %v919_v38, %v760_v39  ;;  %v726_v48 = vld [vmem:[#allocation2 + $0x98] sm:$0xf] }
  0x2a   :  { %561 = vmatpush.bf16.msrb.mxu2 %v887_v47  ;;  %512 = vmatmul.bf16.vlgmr.msra.gmra.mxu3 %v1044_v51  ;;  %v1057_v45 = vpack.c.bf16 %v60_v35, %v59_v34  ;;  %v752_v47 = vld [vmem:[#allocation2 + $0xf0] sm:$0xf0]  ;;  %v915_v49 = vld [vmem:[#allocation2 + $0xb4] sm:$0xf0]  ;;  %v911_v50 = vld [vmem:[#allocation2 + $0x9c] sm:$0xf]  ;;  %v751_v53 = vor.u32 %v922_v43, %v750_v42 }
  0x2b   :  { %580 = vmatpush.bf16.msrb.mxu3 %v891_v52  ;;  %542 = vmatpush.bf16.msrb.mxu1 %v883_v60  ;;  %v728_v52 = vld [vmem:[#allocation2 + $0xb8] sm:$0xf0]  ;;  %v755_v54 = vor.u32 %v918_v44, %v752_v47  ;;  %v727_v55 = vor.u32 %v915_v49, %v726_v48  ;;  %v718_v56 = vld [vmem:[#allocation2 + $0x90] sm:$0xf]  ;;  %v910_v58 = vld [vmem:[#allocation2 + $0x94] sm:$0xf] }
  0x2c   :  { %v914_v57 = vld [vmem:[#allocation2 + $0xac] sm:$0xf0]  ;;  %v731_v59 = vor.u32 %v911_v50, %v728_v52  ;;  %v720_v60 = vld [vmem:[#allocation2 + $0xb0] sm:$0xf0]  ;;  %v907_v62 = vld [vmem:[#allocation2 + $0x74] sm:$0xf0] }
  0x2d   :  { %524 = vmatpush.bf16.msrb.mxu0 %v847_v9  ;;  %v903_v63 = vld [vmem:[#allocation2 + $0x5c] sm:$0xf]  ;;  %v723_v2 = vor.u32 %v910_v58, %v720_v60  ;;  %v686_v4 = vld [vmem:[#allocation2 + $0x50] sm:$0xf]  ;;  %v902_v6 = vld [vmem:[#allocation2 + $0x54] sm:$0xf] }
  0x2e   :  { %562 = vmatpush.bf16.msrb.mxu2 %v855_v61  ;;  %v694_v61 = vld [vmem:[#allocation2 + $0x58] sm:$0xf]  ;;  %v696_v0 = vld [vmem:[#allocation2 + $0x78] sm:$0xf0]  ;;  %v906_v5 = vld [vmem:[#allocation2 + $0x6c] sm:$0xf0] }
  0x2f   :  { %581 = vmatpush.bf16.msrb.mxu3 %v859_v1  ;;  %543 = vmatpush.bf16.msrb.mxu1 %v851_v10  ;;  %v719_v1 = vor.u32 %v914_v57, %v718_v56  ;;  %v695_v3 = vor.u32 %v907_v62, %v694_v61  ;;  %v699_v7 = vor.u32 %v903_v63, %v696_v0  ;;  %v688_v8 = vld [vmem:[#allocation2 + $0x70] sm:$0xf0]  ;;  %v662_v9 = vld [vmem:[#allocation2 + $0x18] sm:$0xf]  ;;  %v664_v12 = vld [vmem:[#allocation2 + $0x38] sm:$0xf0] }
  0x30   :  { %v899_v10 = vld [vmem:[#allocation2 + $0x34] sm:$0xf0]  ;;  %v687_v13 = vor.u32 %v906_v5, %v686_v4  ;;  %v691_v14 = vor.u32 %v902_v6, %v688_v8  ;;  %v654_v16 = vld [vmem:[#allocation2 + $0x10] sm:$0xf]  ;;  %v894_v21 = vld [vmem:[#allocation2 + $0x14] sm:$0xf] }
  0x31   :  { %525 = vmatpush.bf16.msrb.mxu0 %v815_v27  ;;  %v663_v15 = vor.u32 %v899_v10, %v662_v9  ;;  %v656_v22 = vld [vmem:[#allocation2 + $0x30] sm:$0xf0] }
  0x32   :  { %563 = vmatpush.bf16.msrb.mxu2 %v823_v11  ;;  %v895_v11 = vld [vmem:[#allocation2 + $0x1c] sm:$0xf]  ;;  %v659_v24 = vor.u32 %v894_v21, %v656_v22 }
  0x33   :  { %582 = vmatpush.bf16.msrb.mxu3 %v827_v17  ;;  %544 = vmatpush.bf16.msrb.mxu1 %v819_v29  ;;  %v898_v17 = vld [vmem:[#allocation2 + $0x2c] sm:$0xf0]  ;;  %v667_v18 = vor.u32 %v895_v11, %v664_v12 }
  0x34   :  { %v655_v23 = vor.u32 %v898_v17, %v654_v16 }
  0x35   :  { %526 = vmatpush.bf16.msrb.mxu0 %v783_v20 }
  0x36   :  { %564 = vmatpush.bf16.msrb.mxu2 %v791_v30 }
  0x37   :  { %583 = vmatpush.bf16.msrb.mxu3 %v795_v33  ;;  %545 = vmatpush.bf16.msrb.mxu1 %v787_v40 }
  0x38   :  { %460 = vmatmul.bf16.gmra.mxu0 %v1057_v45  ;;  %479 = vmatmul.bf16.gmra.mxu1 %v1057_v45 }
  0x39   :  { %498 = vmatmul.bf16.gmra.mxu2 %v1057_v45  ;;  %527 = vmatpush.bf16.msrb.mxu0 %v751_v53 }
  0x3a   :  { %565 = vmatpush.bf16.msrb.mxu2 %v759_v41  ;;  %517 = vmatmul.bf16.gmra.mxu3 %v1057_v45 }
  0x3b   :  { %584 = vmatpush.bf16.msrb.mxu3 %v763_v46  ;;  %546 = vmatpush.bf16.msrb.mxu1 %v755_v54 }
  0x3d   :  { %528 = vmatpush.bf16.msrb.mxu0 %v719_v1 }
  0x3e   :  { %566 = vmatpush.bf16.msrb.mxu2 %v727_v55 }
  0x3f   :  { %585 = vmatpush.bf16.msrb.mxu3 %v731_v59  ;;  %547 = vmatpush.bf16.msrb.mxu1 %v723_v2 }
  0x41   :  { %529 = vmatpush.bf16.msrb.mxu0 %v687_v13 }
  0x42   :  { %567 = vmatpush.bf16.msrb.mxu2 %v695_v3 }
  0x43   :  { %586 = vmatpush.bf16.msrb.mxu3 %v699_v7  ;;  %548 = vmatpush.bf16.msrb.mxu1 %v691_v14 }
  0x45   :  { %530 = vmatpush.bf16.msrb.mxu0 %v655_v23 }
  0x46   :  { %568 = vmatpush.bf16.msrb.mxu2 %v663_v15 }
  0x47   :  { %587 = vmatpush.bf16.msrb.mxu3 %v667_v18  ;;  %549 = vmatpush.bf16.msrb.mxu1 %v659_v24 }
  0x48   :  { %531 = vmatmul.bf16.vlgmr.msrb.gmra.mxu0 %v1044_v51 }
  0x49   :  { %569 = vmatmul.bf16.vlgmr.msrb.gmra.mxu2 %v1044_v51 }
  0x4a   :  { %550 = vmatmul.bf16.vlgmr.msrb.gmra.mxu1 %v1044_v51  ;;  %588 = vmatmul.bf16.vlgmr.msrb.gmra.mxu3 %v1044_v51 }
  0x58   :  { %536 = vmatmul.bf16.gmra.mxu0 %v1057_v45 }
  0x59   :  { %574 = vmatmul.bf16.gmra.mxu2 %v1057_v45 }
  0x5a   :  { %555 = vmatmul.bf16.gmra.mxu1 %v1057_v45  ;;  %593 = vmatmul.bf16.gmra.mxu3 %v1057_v45 }
  0xa5   :  { %v456_v25 = vpop.f32.mrf.mxu0  ;;  %v475_v26 = vpop.f32.mrf.mxu1 }
  0xa6   :  { %v599_v27 = vpack.c.bf16 %v475_v26, %v456_v25 }
  0xa8   :  { %615 = vst [vmem:[%s1123_s4] sm:$0xff] %v599_v27 }
  0xac   :  { %v494_v28 = vpop.f32.mrf.mxu2 }
  0xad   :  { %v513_v29 = vpop.f32.mrf.mxu3  ;;  %v458_v30 = vpop.f32.mrf.mxu0 }
  0xae   :  { %v600_v31 = vpack.c.bf16 %v513_v29, %v494_v28  ;;  %v477_v51 = vpop.f32.mrf.mxu1 }
  0xaf   :  { %v603_v19 = vpack.c.bf16 %v477_v51, %v458_v30 }
  0xb0   :  { %616 = vst [vmem:[%s1123_s4 + $0x8] sm:$0xff] %v600_v31 }
  0xb1   :  { %619 = vst [vmem:[%s1123_s4 + $0x20] sm:$0xff] %v603_v19 }
  0xb4   :  { %v496_v32 = vpop.f32.mrf.mxu2 }
  0xb5   :  { %v515_v33 = vpop.f32.mrf.mxu3  ;;  %v461_v34 = vpop.f32.mrf.mxu0 }
  0xb6   :  { %v604_v35 = vpack.c.bf16 %v515_v33, %v496_v32  ;;  %v480_v36 = vpop.f32.mrf.mxu1 }
  0xb7   :  { %v607_v37 = vpack.c.bf16 %v480_v36, %v461_v34 }
  0xb8   :  { %620 = vst [vmem:[%s1123_s4 + $0x28] sm:$0xff] %v604_v35 }
  0xb9   :  { %623 = vst [vmem:[%s1123_s4 + $0x40] sm:$0xff] %v607_v37 }
  0xbc   :  { %v499_v38 = vpop.f32.mrf.mxu2 }
  0xbd   :  { %v518_v39 = vpop.f32.mrf.mxu3  ;;  %v463_v20 = vpop.f32.mrf.mxu0 }
  0xbe   :  { %v608_v40 = vpack.c.bf16 %v518_v39, %v499_v38  ;;  %v482_v41 = vpop.f32.mrf.mxu1 }
  0xbf   :  { %v611_v42 = vpack.c.bf16 %v482_v41, %v463_v20 }
  0xc0   :  { %624 = vst [vmem:[%s1123_s4 + $0x48] sm:$0xff] %v608_v40 }
  0xc1   :  { %627 = vst [vmem:[%s1123_s4 + $0x60] sm:$0xff] %v611_v42 }
  0xc4   :  { %v501_v43 = vpop.f32.mrf.mxu2 }
  0xc5   :  { %v520_v44 = vpop.f32.mrf.mxu3  ;;  %v532_v46 = vpop.f32.mrf.mxu0 }
  0xc6   :  { %v612_v45 = vpack.c.bf16 %v520_v44, %v501_v43 }
  0xc7   :  { %v551_v47 = vpop.f32.mrf.mxu1 }
  0xc8   :  { %628 = vst [vmem:[%s1123_s4 + $0x68] sm:$0xff] %v612_v45  ;;  %v601_v48 = vpack.c.bf16 %v551_v47, %v532_v46 }
  0xca   :  { %617 = vst [vmem:[%s1123_s4 + $0x10] sm:$0xff] %v601_v48 }
  0xcc   :  { %v570_v49 = vpop.f32.mrf.mxu2 }
  0xcd   :  { %v589_v50 = vpop.f32.mrf.mxu3  ;;  %v534_v53 = vpop.f32.mrf.mxu0 }
  0xce   :  { %v602_v52 = vpack.c.bf16 %v589_v50, %v570_v49 }
  0xcf   :  { %v553_v54 = vpop.f32.mrf.mxu1 }
  0xd0   :  { %618 = vst [vmem:[%s1123_s4 + $0x18] sm:$0xff] %v602_v52  ;;  %v605_v55 = vpack.c.bf16 %v553_v54, %v534_v53 }
  0xd2   :  { %621 = vst [vmem:[%s1123_s4 + $0x30] sm:$0xff] %v605_v55 }
  0xd4   :  { %v572_v56 = vpop.f32.mrf.mxu2 }
  0xd5   :  { %v591_v57 = vpop.f32.mrf.mxu3  ;;  %v537_v59 = vpop.f32.mrf.mxu0 }
  0xd6   :  { %v606_v58 = vpack.c.bf16 %v591_v57, %v572_v56 }
  0xd7   :  { %v556_v60 = vpop.f32.mrf.mxu1 }
  0xd8   :  { %622 = vst [vmem:[%s1123_s4 + $0x38] sm:$0xff] %v606_v58  ;;  %v609_v61 = vpack.c.bf16 %v556_v60, %v537_v59 }
  0xda   :  { %625 = vst [vmem:[%s1123_s4 + $0x50] sm:$0xff] %v609_v61 }
  0xdc   :  { %v575_v62 = vpop.f32.mrf.mxu2 }
  0xdd   :  { %v594_v63 = vpop.f32.mrf.mxu3  ;;  %v539_v1 = vpop.f32.mrf.mxu0 }
  0xde   :  { %v610_v0 = vpack.c.bf16 %v594_v63, %v575_v62 }
  0xdf   :  { %v558_v2 = vpop.f32.mrf.mxu1 }
  0xe0   :  { %626 = vst [vmem:[%s1123_s4 + $0x58] sm:$0xff] %v610_v0  ;;  %v613_v3 = vpack.c.bf16 %v558_v2, %v539_v1 }
  0xe2   :  { %629 = vst [vmem:[%s1123_s4 + $0x70] sm:$0xff] %v613_v3 }
  0xe4   :  { %v577_v4 = vpop.f32.mrf.mxu2 }
  0xe5   :  { %v596_v5 = vpop.f32.mrf.mxu3 }
  0xe6   :  { %v614_v6 = vpack.c.bf16 %v596_v5, %v577_v4 }
  0xe8   :  { %630 = vst [vmem:[%s1123_s4 + $0x78] sm:$0xff] %v614_v6 }
  0xe9   :  { %635 = vsyncpa [#allocation3], 1 }

// kernel: generator_forward.12
= control target key start
LH: loop header
LB: loop body
LE: loop exit
PB: predicated region body
PF: predicated region fallthrough
CT: control target
= control target key end

     0   :  { %v128_v0 = vmov 0.0   ;;  %s174_s1 = inlined_call_operand.vmem [shape: f32[8,128], index: 1, kind: output, shape index: {0}]   ;;  %s175_s2 = inlined_call_operand.vmem [shape: f32[8,128], index: 2, kind: output, shape index: {1}]   ;;  %s176_s0 = inlined_call_operand.vmem [shape: bf16[64,128], index: 0, kind: input, shape index: {}]  }
   0x1   :  { %36 = vst [vmem:[%s174_s1] sm:$0xff] %v128_v0  ;;  %v109_v1 = vld [vmem:[%s176_s0] sm:$0xff]   ;;  %v124_v2 = vld [vmem:[%s176_s0 + $0x8] sm:$0xff]   ;;  %v125_v3 = vld [vmem:[%s176_s0 + $0x10] sm:$0xff]  }
   0x2   :  { %37 = vst [vmem:[%s175_s2] sm:$0xff] %v128_v0  ;;  %v110_v4 = vunpack.c.l.bf16 %v109_v1  ;;  %v111_v5 = vunpack.c.h.bf16 %v109_v1  ;;  %v114_v6 = vunpack.c.l.bf16 %v124_v2  ;;  %v115_v7 = vunpack.c.h.bf16 %v124_v2  ;;  %v126_v13 = vld [vmem:[%s176_s0 + $0x18] sm:$0xff]  }
   0x3   :  { %v118_v8 = vunpack.c.l.bf16 %v125_v3  ;;  %v119_v14 = vunpack.c.h.bf16 %v125_v3  ;;  %v122_v18 = vunpack.c.l.bf16 %v126_v13  ;;  %v123_v22 = vunpack.c.h.bf16 %v126_v13 }
   0x4   :  { %v55_v9 = vadd.f32 %v111_v5, %v110_v4  ;;  %v71_v10 = vmul.f32 %v110_v4, %v110_v4  ;;  %v72_v11 = vmul.f32 %v111_v5, %v111_v5  ;;  %v73_v12 = vmul.f32 %v114_v6, %v114_v6 }
   0x5   :  { %v74_v16 = vmul.f32 %v115_v7, %v115_v7  ;;  %v75_v20 = vmul.f32 %v118_v8, %v118_v8  ;;  %v76_v24 = vmul.f32 %v119_v14, %v119_v14  ;;  %v77_v27 = vmul.f32 %v122_v18, %v122_v18 }
   0x6   :  { %v56_v15 = vadd.f32 %v114_v6, %v55_v9  ;;  %v79_v17 = vadd.f32 %v72_v11, %v71_v10  ;;  %v78_v30 = vmul.f32 %v123_v22, %v123_v22 }
   0x8   :  { %v57_v19 = vadd.f32 %v115_v7, %v56_v15  ;;  %v80_v21 = vadd.f32 %v79_v17, %v73_v12  ;;  %v54_v44 = vld [vmem:[%s174_s1] sm:$0x1] }
   0x9   :  { %v70_v47 = vld [vmem:[%s175_s2] sm:$0x1] }
   0xa   :  { %v58_v23 = vadd.f32 %v118_v8, %v57_v19  ;;  %v81_v25 = vadd.f32 %v80_v21, %v74_v16 }
   0xc   :  { %v59_v26 = vadd.f32 %v119_v14, %v58_v23  ;;  %v82_v28 = vadd.f32 %v81_v25, %v75_v20 }
   0xe   :  { %v60_v29 = vadd.f32 %v122_v18, %v59_v26  ;;  %v83_v31 = vadd.f32 %v82_v28, %v76_v24 }
  0x10   :  { %v61_v32 = vadd.f32 %v123_v22, %v60_v29  ;;  %v84_v33 = vadd.f32 %v83_v31, %v77_v27 }
  0x12   :  { %v62_v34 = vrot.slane %v61_v32, 4  ;;  %v85_v35 = vadd.f32 %v84_v33, %v78_v30 }
  0x14   :  { %v63_v36 = vadd.f32 %v62_v34, %v61_v32  ;;  %v86_v37 = vrot.slane %v85_v35, 4 }
  0x16   :  { %v64_v38 = vrot.slane %v63_v36, 2  ;;  %v87_v39 = vadd.f32 %v86_v37, %v85_v35 }
  0x18   :  { %v65_v40 = vadd.f32 %v64_v38, %v63_v36  ;;  %v88_v41 = vrot.slane %v87_v39, 2 }
  0x1a   :  { %v66_v42 = vrot.slane %v65_v40, 1  ;;  %v89_v43 = vadd.f32 %v88_v41, %v87_v39 }
  0x1c   :  { %v67_v45 = vadd.f32 %v66_v42, %v65_v40  ;;  %v90_v46 = vrot.slane %v89_v43, 1 }
  0x1e   :  { %v68_v48 = vadd.f32 %v67_v45, %v54_v44  ;;  %v91_v49 = vadd.f32 %v90_v46, %v89_v43 }
  0x20   :  { %69 = vst [vmem:[%s174_s1] sm:$0x1] %v68_v48  ;;  %v92_v50 = vadd.f32 %v91_v49, %v70_v47 }
  0x22   :  { %93 = vst [vmem:[%s175_s2] sm:$0x1] %v92_v50 }

// kernel: generator_forward.13
= control target key start
LH: loop header
LB: loop body
LE: loop exit
PB: predicated region body
PF: predicated region fallthrough
CT: control target
= control target key end

     0   :  { %vm210_vm0 = vcmask 523264   ;;  %s967_s3 = inlined_call_operand.vmem [shape: bf16[64,512], index: 3, kind: input, shape index: {}]   ;;  %s968_s0 = inlined_call_operand.vmem [shape: bf16[128,64], index: 0, kind: input, shape index: {}]   ;;  %s969_s1 = inlined_call_operand.vmem [shape: f32[1,64], index: 1, kind: input, shape index: {}]   ;;  %s970_s2 = inlined_call_operand.vmem [shape: f32[1,64], index: 2, kind: input, shape index: {}]   ;;  %s971_s4 = inlined_call_operand.vmem [shape: bf16[128,512], index: 4, kind: output, shape index: {}]  }
   0x1   :  { %v549_v0 = vld [vmem:[%s967_s3 + $0x60] sm:$0xf]  ;;  %v609_v1 = vld [vmem:[%s967_s3 + $0x6c] sm:$0xf0]  ;;  %v607_v2 = vld [vmem:[%s967_s3 + $0x64] sm:$0xf] }
   0x2   :  { %v550_v3 = vor.u32 %v609_v1, %v549_v0  ;;  %v551_v4 = vld [vmem:[%s967_s3 + $0x70] sm:$0xf0]  ;;  %v557_v5 = vld [vmem:[%s967_s3 + $0x68] sm:$0xf]  ;;  %v610_v6 = vld [vmem:[%s967_s3 + $0x74] sm:$0xf0] }
   0x3   :  { %v554_v7 = vor.u32 %v607_v2, %v551_v4  ;;  %v558_v8 = vor.u32 %v610_v6, %v557_v5  ;;  %v608_v9 = vld [vmem:[%s967_s3 + $0x6c] sm:$0xf]  ;;  %v559_v10 = vld [vmem:[%s967_s3 + $0x78] sm:$0xf0]  ;;  %v533_v11 = vld [vmem:[%s967_s3 + $0x40] sm:$0xf] }
   0x4   :  { %239 = vmatpush.bf16.msra.mxu0 %v550_v3  ;;  %v562_v12 = vor.u32 %v608_v9, %v559_v10  ;;  %v605_v13 = vld [vmem:[%s967_s3 + $0x4c] sm:$0xf0]  ;;  %v603_v14 = vld [vmem:[%s967_s3 + $0x44] sm:$0xf]  ;;  %v535_v15 = vld [vmem:[%s967_s3 + $0x50] sm:$0xf0] }
   0x5   :  { %288 = vmatpush.bf16.msra.mxu1 %v554_v7  ;;  %337 = vmatpush.bf16.msra.mxu2 %v558_v8  ;;  %v534_v16 = vor.u32 %v605_v13, %v533_v11  ;;  %v538_v17 = vor.u32 %v603_v14, %v535_v15  ;;  %v541_v18 = vld [vmem:[%s967_s3 + $0x48] sm:$0xf]  ;;  %v606_v19 = vld [vmem:[%s967_s3 + $0x54] sm:$0xf0]  ;;  %v604_v20 = vld [vmem:[%s967_s3 + $0x4c] sm:$0xf] }
   0x6   :  { %386 = vmatpush.bf16.msra.mxu3 %v562_v12  ;;  %v542_v21 = vor.u32 %v606_v19, %v541_v18  ;;  %v543_v22 = vld [vmem:[%s967_s3 + $0x58] sm:$0xf0]  ;;  %v517_v23 = vld [vmem:[%s967_s3 + $0x20] sm:$0xf]  ;;  %v601_v24 = vld [vmem:[%s967_s3 + $0x2c] sm:$0xf0] }
   0x7   :  { %v546_v25 = vor.u32 %v604_v20, %v543_v22  ;;  %v599_v26 = vld [vmem:[%s967_s3 + $0x24] sm:$0xf]  ;;  %v519_v27 = vld [vmem:[%s967_s3 + $0x30] sm:$0xf0]  ;;  %v525_v28 = vld [vmem:[%s967_s3 + $0x28] sm:$0xf]  ;;  %v518_v29 = vor.u32 %v601_v24, %v517_v23 }
   0x8   :  { %240 = vmatpush.bf16.msra.mxu0 %v534_v16  ;;  %v602_v30 = vld [vmem:[%s967_s3 + $0x34] sm:$0xf0]  ;;  %v600_v31 = vld [vmem:[%s967_s3 + $0x2c] sm:$0xf]  ;;  %v527_v32 = vld [vmem:[%s967_s3 + $0x38] sm:$0xf0]  ;;  %v522_v33 = vor.u32 %v599_v26, %v519_v27 }
   0x9   :  { %289 = vmatpush.bf16.msra.mxu1 %v538_v17  ;;  %338 = vmatpush.bf16.msra.mxu2 %v542_v21  ;;  %v526_v34 = vor.u32 %v602_v30, %v525_v28  ;;  %v501_v35 = vld [vmem:[%s967_s3] sm:$0xf]  ;;  %v597_v36 = vld [vmem:[%s967_s3 + $0xc] sm:$0xf0]  ;;  %v595_v37 = vld [vmem:[%s967_s3 + $0x4] sm:$0xf]  ;;  %v530_v38 = vor.u32 %v600_v31, %v527_v32 }
   0xa   :  { %387 = vmatpush.bf16.msra.mxu3 %v546_v25  ;;  %v503_v39 = vld [vmem:[%s967_s3 + $0x10] sm:$0xf0]  ;;  %v509_v40 = vld [vmem:[%s967_s3 + $0x8] sm:$0xf]  ;;  %v598_v41 = vld [vmem:[%s967_s3 + $0x14] sm:$0xf0]  ;;  %v502_v45 = vor.u32 %v597_v36, %v501_v35 }
   0xb   :  { %v596_v42 = vld [vmem:[%s967_s3 + $0xc] sm:$0xf]  ;;  %v511_v43 = vld [vmem:[%s967_s3 + $0x18] sm:$0xf0]  ;;  %v612_v44 = vld [vmem:[%s968_s0] sm:$0xff]   ;;  %v506_v49 = vor.u32 %v595_v37, %v503_v39  ;;  %v510_v50 = vor.u32 %v598_v41, %v509_v40 }
   0xc   :  { %241 = vmatpush.bf16.msra.mxu0 %v518_v29  ;;  %v613_v46 = vunpack.c.l.bf16 %v612_v44  ;;  %v614_v47 = vunpack.c.h.bf16 %v612_v44  ;;  %v779_v48 = vld [vmem:[%s969_s1] ss:$0 sm:$0xff]  ;;  %v514_v52 = vor.u32 %v596_v42, %v511_v43  ;;  %v643_v55 = vld [vmem:[%s968_s0 + $0x8] sm:$0xff]   ;;  %v644_v5 = vld [vmem:[%s968_s0 + $0x10] sm:$0xff]  }
   0xd   :  { %290 = vmatpush.bf16.msra.mxu1 %v522_v33  ;;  %339 = vmatpush.bf16.msra.mxu2 %v526_v34  ;;  %v784_v51 = vld [vmem:[%s970_s2] ss:$0 sm:$0xff]  ;;  %v617_v60 = vunpack.c.l.bf16 %v643_v55  ;;  %v618_v61 = vunpack.c.h.bf16 %v643_v55  ;;  %v621_v7 = vunpack.c.l.bf16 %v644_v5  ;;  %v622_v8 = vunpack.c.h.bf16 %v644_v5  ;;  %v645_v15 = vld [vmem:[%s968_s0 + $0x18] sm:$0xff]   ;;  %v647_v35 = vld [vmem:[%s968_s0 + $0x28] sm:$0xff]  }
   0xe   :  { %388 = vmatpush.bf16.msra.mxu3 %v530_v38  ;;  %v54_v53 = vmul.f32 %v779_v48, %v613_v46  ;;  %v55_v54 = vmul.f32 %v779_v48, %v614_v47  ;;  %v625_v17 = vunpack.c.l.bf16 %v645_v15  ;;  %v626_v18 = vunpack.c.h.bf16 %v645_v15  ;;  %v646_v25 = vld [vmem:[%s968_s0 + $0x20] sm:$0xff]  }
   0xf   :  { %v56_v63 = vmul.f32 %v779_v48, %v617_v60  ;;  %v57_v0 = vmul.f32 %v779_v48, %v618_v61  ;;  %v58_v9 = vmul.f32 %v779_v48, %v621_v7  ;;  %v59_v10 = vmul.f32 %v779_v48, %v622_v8 }
  0x10   :  { %242 = vmatpush.bf16.msra.mxu0 %v502_v45  ;;  %v74_v56 = vadd.f32 %v784_v51, %v54_v53  ;;  %v75_v57 = vadd.f32 %v784_v51, %v55_v54  ;;  %v60_v19 = vmul.f32 %v779_v48, %v625_v17  ;;  %v61_v20 = vmul.f32 %v779_v48, %v626_v18  ;;  %v648_v45 = vld [vmem:[%s968_s0 + $0x30] sm:$0xff]  }
  0x11   :  { %291 = vmatpush.bf16.msra.mxu1 %v506_v49  ;;  %340 = vmatpush.bf16.msra.mxu2 %v510_v50  ;;  %v76_v1 = vadd.f32 %v784_v51, %v56_v63  ;;  %v77_v2 = vadd.f32 %v784_v51, %v57_v0  ;;  %v78_v11 = vadd.f32 %v784_v51, %v58_v9  ;;  %v629_v27 = vunpack.c.l.bf16 %v646_v25 }
  0x12   :  { %389 = vmatpush.bf16.msra.mxu3 %v514_v52  ;;  %v90_v58 = vmax.f32 %v74_v56, 0.0  ;;  %v91_v59 = vmax.f32 %v75_v57, 0.0  ;;  %v79_v12 = vadd.f32 %v784_v51, %v59_v10  ;;  %v80_v21 = vadd.f32 %v784_v51, %v60_v19  ;;  %v649_v57 = vld [vmem:[%s968_s0 + $0x38] sm:$0xff]  }
  0x13   :  { %v92_v3 = vmax.f32 %v76_v1, 0.0  ;;  %v93_v4 = vmax.f32 %v77_v2, 0.0  ;;  %v94_v13 = vmax.f32 %v78_v11, 0.0  ;;  %v81_v22 = vadd.f32 %v784_v51, %v61_v20 }
  0x14   :  { %v106_v62 = vpack.c.bf16 %v91_v59, %v90_v58  ;;  %v95_v14 = vmax.f32 %v79_v12, 0.0  ;;  %v96_v23 = vmax.f32 %v80_v21, 0.0  ;;  %v630_v28 = vunpack.c.h.bf16 %v646_v25 }
  0x15   :  { %v107_v6 = vpack.c.bf16 %v93_v4, %v92_v3  ;;  %v97_v24 = vmax.f32 %v81_v22, 0.0  ;;  %v62_v29 = vmul.f32 %v779_v48, %v629_v27  ;;  %v633_v37 = vunpack.c.l.bf16 %v647_v35 }
  0x16   :  { %563 = vmatmul.msk.bf16.vlgmr.msra.gmra.mxu0 %vm210_vm0, %v106_v62  ;;  %571 = vmatmul.msk.bf16.vlgmr.msra.gmra.mxu1 %vm210_vm0, %v106_v62  ;;  %v108_v16 = vpack.c.bf16 %v95_v14, %v94_v13  ;;  %v63_v30 = vmul.f32 %v779_v48, %v630_v28  ;;  %v634_v38 = vunpack.c.h.bf16 %v647_v35  ;;  %v637_v47 = vunpack.c.l.bf16 %v648_v45 }
  0x17   :  { %579 = vmatmul.msk.bf16.vlgmr.msra.gmra.mxu2 %vm210_vm0, %v106_v62  ;;  %587 = vmatmul.msk.bf16.vlgmr.msra.gmra.mxu3 %vm210_vm0, %v106_v62  ;;  %v109_v26 = vpack.c.bf16 %v97_v24, %v96_v23  ;;  %v82_v31 = vadd.f32 %v784_v51, %v62_v29  ;;  %v64_v39 = vmul.f32 %v779_v48, %v633_v37  ;;  %v638_v49 = vunpack.c.h.bf16 %v648_v45 }
  0x18   :  { %v83_v32 = vadd.f32 %v784_v51, %v63_v30  ;;  %v65_v40 = vmul.f32 %v779_v48, %v634_v38  ;;  %v66_v50 = vmul.f32 %v779_v48, %v637_v47  ;;  %v641_v59 = vunpack.c.l.bf16 %v649_v57 }
  0x19   :  { %v98_v33 = vmax.f32 %v82_v31, 0.0  ;;  %v84_v41 = vadd.f32 %v784_v51, %v64_v39  ;;  %v67_v52 = vmul.f32 %v779_v48, %v638_v49  ;;  %v642_v60 = vunpack.c.h.bf16 %v649_v57 }
  0x1a   :  { %v99_v34 = vmax.f32 %v83_v32, 0.0  ;;  %v85_v42 = vadd.f32 %v784_v51, %v65_v40  ;;  %v86_v53 = vadd.f32 %v784_v51, %v66_v50  ;;  %v68_v61 = vmul.f32 %v779_v48, %v641_v59 }
  0x1b   :  { %v100_v43 = vmax.f32 %v84_v41, 0.0  ;;  %v87_v54 = vadd.f32 %v784_v51, %v67_v52  ;;  %v69_v62 = vmul.f32 %v779_v48, %v642_v60 }
  0x1c   :  { %v110_v36 = vpack.c.bf16 %v99_v34, %v98_v33  ;;  %v101_v44 = vmax.f32 %v85_v42, 0.0  ;;  %v102_v55 = vmax.f32 %v86_v53, 0.0  ;;  %v88_v63 = vadd.f32 %v784_v51, %v68_v61 }
  0x1d   :  { %v103_v56 = vmax.f32 %v87_v54, 0.0  ;;  %v89_v0 = vadd.f32 %v784_v51, %v69_v62 }
  0x1e   :  { %v111_v46 = vpack.c.bf16 %v101_v44, %v100_v43  ;;  %v104_v1 = vmax.f32 %v88_v63, 0.0 }
  0x1f   :  { %v112_v58 = vpack.c.bf16 %v103_v56, %v102_v55  ;;  %v105_v2 = vmax.f32 %v89_v0, 0.0 }
  0x21   :  { %v113_v3 = vpack.c.bf16 %v105_v2, %v104_v1 }
  0x26   :  { %564 = vmatmul.msk.bf16.gmra.mxu0 %vm210_vm0, %v107_v6  ;;  %572 = vmatmul.msk.bf16.gmra.mxu1 %vm210_vm0, %v107_v6 }
  0x27   :  { %580 = vmatmul.msk.bf16.gmra.mxu2 %vm210_vm0, %v107_v6  ;;  %588 = vmatmul.msk.bf16.gmra.mxu3 %vm210_vm0, %v107_v6 }
  0x36   :  { %565 = vmatmul.msk.bf16.gmra.mxu0 %vm210_vm0, %v108_v16  ;;  %573 = vmatmul.msk.bf16.gmra.mxu1 %vm210_vm0, %v108_v16 }
  0x37   :  { %581 = vmatmul.msk.bf16.gmra.mxu2 %vm210_vm0, %v108_v16  ;;  %589 = vmatmul.msk.bf16.gmra.mxu3 %vm210_vm0, %v108_v16 }
  0x46   :  { %566 = vmatmul.msk.bf16.gmra.mxu0 %vm210_vm0, %v109_v26  ;;  %574 = vmatmul.msk.bf16.gmra.mxu1 %vm210_vm0, %v109_v26 }
  0x47   :  { %582 = vmatmul.msk.bf16.gmra.mxu2 %vm210_vm0, %v109_v26  ;;  %590 = vmatmul.msk.bf16.gmra.mxu3 %vm210_vm0, %v109_v26 }
  0x56   :  { %567 = vmatmul.msk.bf16.gmra.mxu0 %vm210_vm0, %v110_v36  ;;  %575 = vmatmul.msk.bf16.gmra.mxu1 %vm210_vm0, %v110_v36 }
  0x57   :  { %583 = vmatmul.msk.bf16.gmra.mxu2 %vm210_vm0, %v110_v36  ;;  %591 = vmatmul.msk.bf16.gmra.mxu3 %vm210_vm0, %v110_v36 }
  0x66   :  { %568 = vmatmul.msk.bf16.gmra.mxu0 %vm210_vm0, %v111_v46  ;;  %576 = vmatmul.msk.bf16.gmra.mxu1 %vm210_vm0, %v111_v46 }
  0x67   :  { %584 = vmatmul.msk.bf16.gmra.mxu2 %vm210_vm0, %v111_v46  ;;  %592 = vmatmul.msk.bf16.gmra.mxu3 %vm210_vm0, %v111_v46 }
  0x76   :  { %569 = vmatmul.msk.bf16.gmra.mxu0 %vm210_vm0, %v112_v58  ;;  %577 = vmatmul.msk.bf16.gmra.mxu1 %vm210_vm0, %v112_v58 }
  0x77   :  { %585 = vmatmul.msk.bf16.gmra.mxu2 %vm210_vm0, %v112_v58  ;;  %593 = vmatmul.msk.bf16.gmra.mxu3 %vm210_vm0, %v112_v58 }
  0x86   :  { %570 = vmatmul.msk.bf16.gmra.mxu0 %vm210_vm0, %v113_v3  ;;  %578 = vmatmul.msk.bf16.gmra.mxu1 %vm210_vm0, %v113_v3 }
  0x87   :  { %586 = vmatmul.msk.bf16.gmra.mxu2 %vm210_vm0, %v113_v3  ;;  %594 = vmatmul.msk.bf16.gmra.mxu3 %vm210_vm0, %v113_v3 }
  0x93   :  { %v244_v48 = vpop.f32.mrf.mxu0  ;;  %v293_v4 = vpop.f32.mrf.mxu1 }
  0x94   :  { %v431_v5 = vpack.c.bf16 %v293_v4, %v244_v48 }
  0x96   :  { %463 = vst [vmem:[%s971_s4] sm:$0xff] %v431_v5 }
  0x9a   :  { %v342_v6 = vpop.f32.mrf.mxu2  ;;  %v391_v51 = vpop.f32.mrf.mxu3 }
  0x9b   :  { %v432_v7 = vpack.c.bf16 %v391_v51, %v342_v6  ;;  %v246_v8 = vpop.f32.mrf.mxu0  ;;  %v295_v9 = vpop.f32.mrf.mxu1 }
  0x9c   :  { %v433_v10 = vpack.c.bf16 %v295_v9, %v246_v8 }
  0x9d   :  { %464 = vst [vmem:[%s971_s4 + $0x8] sm:$0xff] %v432_v7 }
  0x9e   :  { %465 = vst [vmem:[%s971_s4 + $0x10] sm:$0xff] %v433_v10 }
  0xa2   :  { %v344_v11 = vpop.f32.mrf.mxu2  ;;  %v393_v12 = vpop.f32.mrf.mxu3 }
  0xa3   :  { %v434_v13 = vpack.c.bf16 %v393_v12, %v344_v11  ;;  %v249_v14 = vpop.f32.mrf.mxu0  ;;  %v298_v15 = vpop.f32.mrf.mxu1 }
  0xa4   :  { %v435_v16 = vpack.c.bf16 %v298_v15, %v249_v14 }
  0xa5   :  { %466 = vst [vmem:[%s971_s4 + $0x18] sm:$0xff] %v434_v13 }
  0xa6   :  { %467 = vst [vmem:[%s971_s4 + $0x20] sm:$0xff] %v435_v16 }
  0xaa   :  { %v347_v17 = vpop.f32.mrf.mxu2  ;;  %v396_v18 = vpop.f32.mrf.mxu3 }
  0xab   :  { %v436_v19 = vpack.c.bf16 %v396_v18, %v347_v17  ;;  %v251_v20 = vpop.f32.mrf.mxu0  ;;  %v300_v21 = vpop.f32.mrf.mxu1 }
  0xac   :  { %v437_v22 = vpack.c.bf16 %v300_v21, %v251_v20 }
  0xad   :  { %468 = vst [vmem:[%s971_s4 + $0x28] sm:$0xff] %v436_v19 }
  0xae   :  { %469 = vst [vmem:[%s971_s4 + $0x30] sm:$0xff] %v437_v22 }
  0xb2   :  { %v349_v23 = vpop.f32.mrf.mxu2  ;;  %v398_v24 = vpop.f32.mrf.mxu3 }
  0xb3   :  { %v438_v25 = vpack.c.bf16 %v398_v24, %v349_v23  ;;  %v254_v26 = vpop.f32.mrf.mxu0  ;;  %v303_v27 = vpop.f32.mrf.mxu1 }
  0xb4   :  { %v439_v28 = vpack.c.bf16 %v303_v27, %v254_v26 }
  0xb5   :  { %470 = vst [vmem:[%s971_s4 + $0x38] sm:$0xff] %v438_v25 }
  0xb6   :  { %471 = vst [vmem:[%s971_s4 + $0x40] sm:$0xff] %v439_v28 }
  0xba   :  { %v352_v29 = vpop.f32.mrf.mxu2  ;;  %v401_v30 = vpop.f32.mrf.mxu3 }
  0xbb   :  { %v440_v31 = vpack.c.bf16 %v401_v30, %v352_v29  ;;  %v256_v32 = vpop.f32.mrf.mxu0  ;;  %v305_v33 = vpop.f32.mrf.mxu1 }
  0xbc   :  { %v441_v34 = vpack.c.bf16 %v305_v33, %v256_v32 }
  0xbd   :  { %472 = vst [vmem:[%s971_s4 + $0x48] sm:$0xff] %v440_v31 }
  0xbe   :  { %473 = vst [vmem:[%s971_s4 + $0x50] sm:$0xff] %v441_v34 }
  0xc2   :  { %v354_v35 = vpop.f32.mrf.mxu2  ;;  %v403_v36 = vpop.f32.mrf.mxu3 }
  0xc3   :  { %v442_v37 = vpack.c.bf16 %v403_v36, %v354_v35  ;;  %v259_v38 = vpop.f32.mrf.mxu0  ;;  %v308_v39 = vpop.f32.mrf.mxu1 }
  0xc4   :  { %v443_v40 = vpack.c.bf16 %v308_v39, %v259_v38 }
  0xc5   :  { %474 = vst [vmem:[%s971_s4 + $0x58] sm:$0xff] %v442_v37 }
  0xc6   :  { %475 = vst [vmem:[%s971_s4 + $0x60] sm:$0xff] %v443_v40 }
  0xca   :  { %v357_v41 = vpop.f32.mrf.mxu2  ;;  %v406_v42 = vpop.f32.mrf.mxu3 }
  0xcb   :  { %v444_v43 = vpack.c.bf16 %v406_v42, %v357_v41  ;;  %v261_v44 = vpop.f32.mrf.mxu0  ;;  %v310_v45 = vpop.f32.mrf.mxu1 }
  0xcc   :  { %v445_v46 = vpack.c.bf16 %v310_v45, %v261_v44 }
  0xcd   :  { %476 = vst [vmem:[%s971_s4 + $0x68] sm:$0xff] %v444_v43 }
  0xce   :  { %477 = vst [vmem:[%s971_s4 + $0x70] sm:$0xff] %v445_v46 }
  0xd2   :  { %v359_v47 = vpop.f32.mrf.mxu2  ;;  %v408_v49 = vpop.f32.mrf.mxu3 }
  0xd3   :  { %v446_v50 = vpack.c.bf16 %v408_v49, %v359_v47  ;;  %v264_v52 = vpop.f32.mrf.mxu0  ;;  %v313_v53 = vpop.f32.mrf.mxu1 }
  0xd4   :  { %v447_v54 = vpack.c.bf16 %v313_v53, %v264_v52 }
  0xd5   :  { %478 = vst [vmem:[%s971_s4 + $0x78] sm:$0xff] %v446_v50 }
  0xd6   :  { %479 = vst [vmem:[%s971_s4 + $0x80] sm:$0xff] %v447_v54 }
  0xda   :  { %v362_v55 = vpop.f32.mrf.mxu2  ;;  %v411_v56 = vpop.f32.mrf.mxu3 }
  0xdb   :  { %v448_v57 = vpack.c.bf16 %v411_v56, %v362_v55  ;;  %v266_v58 = vpop.f32.mrf.mxu0  ;;  %v315_v59 = vpop.f32.mrf.mxu1 }
  0xdc   :  { %v449_v60 = vpack.c.bf16 %v315_v59, %v266_v58 }
  0xdd   :  { %480 = vst [vmem:[%s971_s4 + $0x88] sm:$0xff] %v448_v57 }
  0xde   :  { %481 = vst [vmem:[%s971_s4 + $0x90] sm:$0xff] %v449_v60 }
  0xe2   :  { %v364_v61 = vpop.f32.mrf.mxu2  ;;  %v413_v62 = vpop.f32.mrf.mxu3 }
  0xe3   :  { %v450_v63 = vpack.c.bf16 %v413_v62, %v364_v61  ;;  %v269_v0 = vpop.f32.mrf.mxu0  ;;  %v318_v1 = vpop.f32.mrf.mxu1 }
  0xe4   :  { %v451_v2 = vpack.c.bf16 %v318_v1, %v269_v0 }
  0xe5   :  { %482 = vst [vmem:[%s971_s4 + $0x98] sm:$0xff] %v450_v63 }
  0xe6   :  { %483 = vst [vmem:[%s971_s4 + $0xa0] sm:$0xff] %v451_v2 }
  0xea   :  { %v367_v3 = vpop.f32.mrf.mxu2  ;;  %v416_v48 = vpop.f32.mrf.mxu3 }
  0xeb   :  { %v452_v4 = vpack.c.bf16 %v416_v48, %v367_v3  ;;  %v271_v5 = vpop.f32.mrf.mxu0  ;;  %v320_v6 = vpop.f32.mrf.mxu1 }
  0xec   :  { %v453_v51 = vpack.c.bf16 %v320_v6, %v271_v5 }
  0xed   :  { %484 = vst [vmem:[%s971_s4 + $0xa8] sm:$0xff] %v452_v4 }
  0xee   :  { %485 = vst [vmem:[%s971_s4 + $0xb0] sm:$0xff] %v453_v51 }
  0xf2   :  { %v369_v7 = vpop.f32.mrf.mxu2  ;;  %v418_v8 = vpop.f32.mrf.mxu3 }
  0xf3   :  { %v454_v9 = vpack.c.bf16 %v418_v8, %v369_v7  ;;  %v274_v10 = vpop.f32.mrf.mxu0  ;;  %v323_v11 = vpop.f32.mrf.mxu1 }
  0xf4   :  { %v455_v12 = vpack.c.bf16 %v323_v11, %v274_v10 }
  0xf5   :  { %486 = vst [vmem:[%s971_s4 + $0xb8] sm:$0xff] %v454_v9 }
  0xf6   :  { %487 = vst [vmem:[%s971_s4 + $0xc0] sm:$0xff] %v455_v12 }
  0xfa   :  { %v372_v13 = vpop.f32.mrf.mxu2  ;;  %v421_v14 = vpop.f32.mrf.mxu3 }
  0xfb   :  { %v456_v15 = vpack.c.bf16 %v421_v14, %v372_v13  ;;  %v276_v16 = vpop.f32.mrf.mxu0  ;;  %v325_v17 = vpop.f32.mrf.mxu1 }
  0xfc   :  { %v457_v18 = vpack.c.bf16 %v325_v17, %v276_v16 }
  0xfd   :  { %488 = vst [vmem:[%s971_s4 + $0xc8] sm:$0xff] %v456_v15 }
  0xfe   :  { %489 = vst [vmem:[%s971_s4 + $0xd0] sm:$0xff] %v457_v18 }
 0x102   :  { %v374_v19 = vpop.f32.mrf.mxu2  ;;  %v423_v20 = vpop.f32.mrf.mxu3 }
 0x103   :  { %v458_v21 = vpack.c.bf16 %v423_v20, %v374_v19  ;;  %v279_v22 = vpop.f32.mrf.mxu0  ;;  %v328_v23 = vpop.f32.mrf.mxu1 }
 0x104   :  { %v459_v24 = vpack.c.bf16 %v328_v23, %v279_v22 }
 0x105   :  { %490 = vst [vmem:[%s971_s4 + $0xd8] sm:$0xff] %v458_v21 }
 0x106   :  { %491 = vst [vmem:[%s971_s4 + $0xe0] sm:$0xff] %v459_v24 }
 0x10a   :  { %v377_v25 = vpop.f32.mrf.mxu2  ;;  %v426_v26 = vpop.f32.mrf.mxu3 }
 0x10b   :  { %v460_v27 = vpack.c.bf16 %v426_v26, %v377_v25  ;;  %v281_v28 = vpop.f32.mrf.mxu0  ;;  %v330_v29 = vpop.f32.mrf.mxu1 }
 0x10c   :  { %v461_v30 = vpack.c.bf16 %v330_v29, %v281_v28 }
 0x10d   :  { %492 = vst [vmem:[%s971_s4 + $0xe8] sm:$0xff] %v460_v27 }
 0x10e   :  { %493 = vst [vmem:[%s971_s4 + $0xf0] sm:$0xff] %v461_v30 }
 0x112   :  { %v379_v31 = vpop.f32.mrf.mxu2  ;;  %v428_v32 = vpop.f32.mrf.mxu3 }
 0x113   :  { %v462_v33 = vpack.c.bf16 %v428_v32, %v379_v31 }
 0x115   :  { %494 = vst [vmem:[%s971_s4 + $0xf8] sm:$0xff] %v462_v33 }

// kernel: generator_forward.14
= control target key start
LH: loop header
LB: loop body
LE: loop exit
PB: predicated region body
PF: predicated region fallthrough
CT: control target
= control target key end

     0   :  { %v188_v0 = vmov 0.0   ;;  %s246_s1 = inlined_call_operand.vmem [shape: f32[8,128], index: 1, kind: output, shape index: {0}]   ;;  %s247_s2 = inlined_call_operand.vmem [shape: f32[8,128], index: 2, kind: output, shape index: {1}]   ;;  %s248_s0 = inlined_call_operand.vmem [shape: bf16[128,128], index: 0, kind: input, shape index: {}]  }
   0x1   :  { %36 = vst [vmem:[%s246_s1] sm:$0xff] %v188_v0  ;;  %v149_v1 = vld [vmem:[%s248_s0] sm:$0xff]   ;;  %v180_v2 = vld [vmem:[%s248_s0 + $0x8] sm:$0xff]   ;;  %v181_v6 = vld [vmem:[%s248_s0 + $0x10] sm:$0xff]  }
   0x2   :  { %37 = vst [vmem:[%s247_s2] sm:$0xff] %v188_v0  ;;  %v150_v3 = vunpack.c.l.bf16 %v149_v1  ;;  %v151_v4 = vunpack.c.h.bf16 %v149_v1  ;;  %v154_v5 = vunpack.c.l.bf16 %v180_v2  ;;  %v155_v7 = vunpack.c.h.bf16 %v180_v2  ;;  %v182_v14 = vld [vmem:[%s248_s0 + $0x18] sm:$0xff]   ;;  %v183_v23 = vld [vmem:[%s248_s0 + $0x20] sm:$0xff]   ;;  %v184_v32 = vld [vmem:[%s248_s0 + $0x28] sm:$0xff]  }
   0x3   :  { %v158_v11 = vunpack.c.l.bf16 %v181_v6  ;;  %v159_v15 = vunpack.c.h.bf16 %v181_v6  ;;  %v162_v19 = vunpack.c.l.bf16 %v182_v14  ;;  %v163_v24 = vunpack.c.h.bf16 %v182_v14  ;;  %v185_v41 = vld [vmem:[%s248_s0 + $0x30] sm:$0xff]   ;;  %v186_v50 = vld [vmem:[%s248_s0 + $0x38] sm:$0xff]  }
   0x4   :  { %v71_v8 = vadd.f32 %v151_v4, %v150_v3  ;;  %v95_v9 = vmul.f32 %v150_v3, %v150_v3  ;;  %v96_v10 = vmul.f32 %v151_v4, %v151_v4  ;;  %v97_v13 = vmul.f32 %v154_v5, %v154_v5 }
   0x5   :  { %v98_v17 = vmul.f32 %v155_v7, %v155_v7  ;;  %v99_v21 = vmul.f32 %v158_v11, %v158_v11  ;;  %v100_v26 = vmul.f32 %v159_v15, %v159_v15  ;;  %v166_v28 = vunpack.c.l.bf16 %v183_v23 }
   0x6   :  { %v72_v12 = vadd.f32 %v154_v5, %v71_v8  ;;  %v111_v18 = vadd.f32 %v96_v10, %v95_v9  ;;  %v101_v30 = vmul.f32 %v162_v19, %v162_v19  ;;  %v167_v33 = vunpack.c.h.bf16 %v183_v23 }
   0x7   :  { %v102_v35 = vmul.f32 %v163_v24, %v163_v24  ;;  %v170_v37 = vunpack.c.l.bf16 %v184_v32  ;;  %v103_v39 = vmul.f32 %v166_v28, %v166_v28  ;;  %v171_v42 = vunpack.c.h.bf16 %v184_v32 }
   0x8   :  { %v73_v16 = vadd.f32 %v155_v7, %v72_v12  ;;  %v112_v22 = vadd.f32 %v111_v18, %v97_v13  ;;  %v104_v44 = vmul.f32 %v167_v33, %v167_v33  ;;  %v174_v46 = vunpack.c.l.bf16 %v185_v41 }
   0x9   :  { %v105_v48 = vmul.f32 %v170_v37, %v170_v37  ;;  %v175_v51 = vunpack.c.h.bf16 %v185_v41  ;;  %v106_v53 = vmul.f32 %v171_v42, %v171_v42  ;;  %v178_v55 = vunpack.c.l.bf16 %v186_v50 }
   0xa   :  { %v74_v20 = vadd.f32 %v158_v11, %v73_v16  ;;  %v113_v27 = vadd.f32 %v112_v22, %v98_v17  ;;  %v107_v57 = vmul.f32 %v174_v46, %v174_v46  ;;  %v179_v59 = vunpack.c.h.bf16 %v186_v50 }
   0xb   :  { %v108_v61 = vmul.f32 %v175_v51, %v175_v51  ;;  %v109_v0 = vmul.f32 %v178_v55, %v178_v55 }
   0xc   :  { %v75_v25 = vadd.f32 %v159_v15, %v74_v20  ;;  %v114_v31 = vadd.f32 %v113_v27, %v99_v21  ;;  %v110_v3 = vmul.f32 %v179_v59, %v179_v59  ;;  %v70_v15 = vld [vmem:[%s246_s1] sm:$0x1] }
   0xd   :  { %v94_v20 = vld [vmem:[%s247_s2] sm:$0x1] }
   0xe   :  { %v76_v29 = vadd.f32 %v162_v19, %v75_v25  ;;  %v115_v36 = vadd.f32 %v114_v31, %v100_v26 }
  0x10   :  { %v77_v34 = vadd.f32 %v163_v24, %v76_v29  ;;  %v116_v40 = vadd.f32 %v115_v36, %v101_v30 }
  0x12   :  { %v78_v38 = vadd.f32 %v166_v28, %v77_v34  ;;  %v117_v45 = vadd.f32 %v116_v40, %v102_v35 }
  0x14   :  { %v79_v43 = vadd.f32 %v167_v33, %v78_v38  ;;  %v118_v49 = vadd.f32 %v117_v45, %v103_v39 }
  0x16   :  { %v80_v47 = vadd.f32 %v170_v37, %v79_v43  ;;  %v119_v54 = vadd.f32 %v118_v49, %v104_v44 }
  0x18   :  { %v81_v52 = vadd.f32 %v171_v42, %v80_v47  ;;  %v120_v58 = vadd.f32 %v119_v54, %v105_v48 }
  0x1a   :  { %v82_v56 = vadd.f32 %v174_v46, %v81_v52  ;;  %v121_v62 = vadd.f32 %v120_v58, %v106_v53 }
  0x1c   :  { %v83_v60 = vadd.f32 %v175_v51, %v82_v56  ;;  %v122_v1 = vadd.f32 %v121_v62, %v107_v57 }
  0x1e   :  { %v84_v63 = vadd.f32 %v178_v55, %v83_v60  ;;  %v123_v4 = vadd.f32 %v122_v1, %v108_v61 }
  0x20   :  { %v85_v2 = vadd.f32 %v179_v59, %v84_v63  ;;  %v124_v6 = vadd.f32 %v123_v4, %v109_v0 }
  0x22   :  { %v86_v5 = vrot.slane %v85_v2, 4  ;;  %v125_v8 = vadd.f32 %v124_v6, %v110_v3 }
  0x24   :  { %v87_v7 = vadd.f32 %v86_v5, %v85_v2  ;;  %v126_v10 = vrot.slane %v125_v8, 4 }
  0x26   :  { %v88_v9 = vrot.slane %v87_v7, 2  ;;  %v127_v12 = vadd.f32 %v126_v10, %v125_v8 }
  0x28   :  { %v89_v11 = vadd.f32 %v88_v9, %v87_v7  ;;  %v128_v14 = vrot.slane %v127_v12, 2 }
  0x2a   :  { %v90_v13 = vrot.slane %v89_v11, 1  ;;  %v129_v17 = vadd.f32 %v128_v14, %v127_v12 }
  0x2c   :  { %v91_v16 = vadd.f32 %v90_v13, %v89_v11  ;;  %v130_v19 = vrot.slane %v129_v17, 1 }
  0x2e   :  { %v92_v18 = vadd.f32 %v91_v16, %v70_v15  ;;  %v131_v21 = vadd.f32 %v130_v19, %v129_v17 }
  0x30   :  { %93 = vst [vmem:[%s246_s1] sm:$0x1] %v92_v18  ;;  %v132_v22 = vadd.f32 %v131_v21, %v94_v20 }
  0x32   :  { %133 = vst [vmem:[%s247_s2] sm:$0x1] %v132_v22 }

// kernel: generator_forward.15
= control target key start
LH: loop header
LB: loop body
LE: loop exit
PB: predicated region body
PF: predicated region fallthrough
CT: control target
= control target key end

     0   :  { %vm402_vm0 = vcmask 261120   ;;  %s1757_s3 = inlined_call_operand.vmem [shape: bf16[32,256], index: 3, kind: input, shape index: {}]   ;;  %s1758_s0 = inlined_call_operand.vmem [shape: bf16[512,32], index: 0, kind: input, shape index: {}]   ;;  %s1759_s1 = inlined_call_operand.vmem [shape: f32[1,32], index: 1, kind: input, shape index: {}]   ;;  %s1760_s2 = inlined_call_operand.vmem [shape: f32[1,32], index: 2, kind: input, shape index: {}]   ;;  %s1761_s4 = inlined_call_operand.vmem [shape: bf16[512,256], index: 4, kind: output, shape index: {}]  }
   0x1   :  { %v979_v0 = vld [vmem:[%s1757_s3 + $0x10] sm:$0xf]  ;;  %v1052_v1 = vld [vmem:[%s1757_s3 + $0x14] sm:$0xf0]  ;;  %v1051_v2 = vld [vmem:[%s1757_s3 + $0x14] sm:$0xf] }
   0x2   :  { %v980_v3 = vor.u32 %v1052_v1, %v979_v0  ;;  %v981_v4 = vld [vmem:[%s1757_s3 + $0x18] sm:$0xf0]  ;;  %v971_v5 = vld [vmem:[%s1757_s3] sm:$0xf]  ;;  %v1050_v6 = vld [vmem:[%s1757_s3 + $0x4] sm:$0xf0] }
   0x3   :  { %v984_v7 = vor.u32 %v1051_v2, %v981_v4  ;;  %v1049_v8 = vld [vmem:[%s1757_s3 + $0x4] sm:$0xf]  ;;  %v973_v9 = vld [vmem:[%s1757_s3 + $0x8] sm:$0xf0]  ;;  %v972_v11 = vor.u32 %v1050_v6, %v971_v5  ;;  %v1273_v14 = vld [vmem:[%s1759_s1] ss:$0 sm:$0xff] }
   0x4   :  { %v1054_v10 = vld [vmem:[%s1758_s0] sm:$0xff]   ;;  %505 = vmatpush.bf16.msra.mxu0 %v980_v3  ;;  %1212 = vmatpush.bf16.msra.mxu2 %v980_v3  ;;  %v976_v15 = vor.u32 %v1049_v8, %v973_v9  ;;  %v1181_v22 = vld [vmem:[%s1758_s0 + $0x8] sm:$0xff]   ;;  %v1182_v50 = vld [vmem:[%s1758_s0 + $0x10] sm:$0xff]  }
   0x5   :  { %v1055_v12 = vunpack.c.l.bf16 %v1054_v10  ;;  %v1056_v13 = vunpack.c.h.bf16 %v1054_v10  ;;  %674 = vmatpush.bf16.msra.mxu1 %v984_v7  ;;  %1214 = vmatpush.bf16.msra.mxu3 %v984_v7  ;;  %v1278_v16 = vld [vmem:[%s1760_s2] ss:$0 sm:$0xff]  ;;  %v1059_v27 = vunpack.c.l.bf16 %v1181_v22  ;;  %v1060_v31 = vunpack.c.h.bf16 %v1181_v22  ;;  %v1197_v32 = vld [vmem:[%s1758_s0 + $0x88] sm:$0xff]   ;;  %v1198_v56 = vld [vmem:[%s1758_s0 + $0x90] sm:$0xff]  }
   0x6   :  { %v1196_v17 = vld [vmem:[%s1758_s0 + $0x80] sm:$0xff]   ;;  %v1123_v37 = vunpack.c.l.bf16 %v1197_v32  ;;  %v1124_v38 = vunpack.c.h.bf16 %v1197_v32  ;;  %v1063_v54 = vunpack.c.l.bf16 %v1182_v50  ;;  %v1064_v55 = vunpack.c.h.bf16 %v1182_v50  ;;  %v1183_v6 = vld [vmem:[%s1758_s0 + $0x18] sm:$0xff]  }
   0x7   :  { %v150_v18 = vmul.f32 %v1273_v14, %v1055_v12  ;;  %v151_v19 = vmul.f32 %v1273_v14, %v1056_v13  ;;  %v1119_v20 = vunpack.c.l.bf16 %v1196_v17  ;;  %v1120_v21 = vunpack.c.h.bf16 %v1196_v17  ;;  %v1199_v12 = vld [vmem:[%s1758_s0 + $0x98] sm:$0xff]  }
   0x8   :  { %506 = vmatpush.bf16.msra.mxu0 %v972_v11  ;;  %1213 = vmatpush.bf16.msra.mxu2 %v972_v11  ;;  %v152_v39 = vmul.f32 %v1273_v14, %v1059_v27  ;;  %v153_v40 = vmul.f32 %v1273_v14, %v1060_v31  ;;  %v184_v42 = vmul.f32 %v1273_v14, %v1123_v37  ;;  %v1127_v58 = vunpack.c.l.bf16 %v1198_v56 }
   0x9   :  { %v218_v23 = vadd.f32 %v1278_v16, %v150_v18  ;;  %v219_v24 = vadd.f32 %v1278_v16, %v151_v19  ;;  %v182_v25 = vmul.f32 %v1273_v14, %v1119_v20  ;;  %675 = vmatpush.bf16.msra.mxu1 %v976_v15  ;;  %1215 = vmatpush.bf16.msra.mxu3 %v976_v15  ;;  %v1128_v59 = vunpack.c.h.bf16 %v1198_v56 }
   0xa   :  { %v183_v26 = vmul.f32 %v1273_v14, %v1120_v21  ;;  %v185_v43 = vmul.f32 %v1273_v14, %v1124_v38  ;;  %v220_v44 = vadd.f32 %v1278_v16, %v152_v39  ;;  %v221_v45 = vadd.f32 %v1278_v16, %v153_v40 }
   0xb   :  { %v282_v28 = vmax.f32 %v218_v23, 0.0  ;;  %v283_v29 = vmax.f32 %v219_v24, 0.0  ;;  %v250_v30 = vadd.f32 %v1278_v16, %v182_v25  ;;  %v252_v46 = vadd.f32 %v1278_v16, %v184_v42 }
   0xc   :  { %v251_v33 = vadd.f32 %v1278_v16, %v183_v26  ;;  %v253_v47 = vadd.f32 %v1278_v16, %v185_v43  ;;  %v284_v48 = vmax.f32 %v220_v44, 0.0  ;;  %v285_v49 = vmax.f32 %v221_v45, 0.0 }
   0xd   :  { %v346_v34 = vpack.c.bf16 %v283_v29, %v282_v28  ;;  %v314_v35 = vmax.f32 %v250_v30, 0.0  ;;  %v316_v51 = vmax.f32 %v252_v46, 0.0  ;;  %v154_v60 = vmul.f32 %v1273_v14, %v1063_v54  ;;  %v1184_v28 = vld [vmem:[%s1758_s0 + $0x20] sm:$0xff]   ;;  %v1201_v54 = vld [vmem:[%s1758_s0 + $0xa8] sm:$0xff]  }
   0xe   :  { %v315_v36 = vmax.f32 %v251_v33, 0.0  ;;  %v317_v52 = vmax.f32 %v253_v47, 0.0  ;;  %v347_v53 = vpack.c.bf16 %v285_v49, %v284_v48  ;;  %v155_v61 = vmul.f32 %v1273_v14, %v1064_v55  ;;  %v1185_v48 = vld [vmem:[%s1758_s0 + $0x28] sm:$0xff]  }
   0xf   :  { %985 = vmatmul.msk.bf16.vlgmr.msra.gmra.mxu0 %vm402_vm0, %v346_v34  ;;  %1017 = vmatmul.msk.bf16.vlgmr.msra.gmra.mxu1 %vm402_vm0, %v346_v34  ;;  %v186_v62 = vmul.f32 %v1273_v14, %v1127_v58  ;;  %v187_v63 = vmul.f32 %v1273_v14, %v1128_v59  ;;  %v222_v0 = vadd.f32 %v1278_v16, %v154_v60  ;;  %v1067_v10 = vunpack.c.l.bf16 %v1183_v6  ;;  %v1200_v34 = vld [vmem:[%s1758_s0 + $0xa0] sm:$0xff]  }
  0x10   :  { %v362_v41 = vpack.c.bf16 %v315_v36, %v314_v35  ;;  %v363_v57 = vpack.c.bf16 %v317_v52, %v316_v51  ;;  %v223_v1 = vadd.f32 %v1278_v16, %v155_v61  ;;  %v1068_v11 = vunpack.c.h.bf16 %v1183_v6 }
  0x11   :  { %v254_v2 = vadd.f32 %v1278_v16, %v186_v62  ;;  %v255_v3 = vadd.f32 %v1278_v16, %v187_v63  ;;  %v286_v4 = vmax.f32 %v222_v0, 0.0  ;;  %v1131_v15 = vunpack.c.l.bf16 %v1199_v12 }
  0x12   :  { %1001 = vmatmul.msk.bf16.vlgmr.msra.gmra.mxu2 %vm402_vm0, %v362_v41  ;;  %1033 = vmatmul.msk.bf16.vlgmr.msra.gmra.mxu3 %vm402_vm0, %v362_v41  ;;  %v287_v5 = vmax.f32 %v223_v1, 0.0  ;;  %v1132_v17 = vunpack.c.h.bf16 %v1199_v12  ;;  %v156_v18 = vmul.f32 %v1273_v14, %v1067_v10  ;;  %v157_v19 = vmul.f32 %v1273_v14, %v1068_v11  ;;  %v1202_v10 = vld [vmem:[%s1758_s0 + $0xb0] sm:$0xff]  }
  0x13   :  { %v318_v7 = vmax.f32 %v254_v2, 0.0  ;;  %v319_v8 = vmax.f32 %v255_v3, 0.0  ;;  %v188_v20 = vmul.f32 %v1273_v14, %v1131_v15  ;;  %v1071_v32 = vunpack.c.l.bf16 %v1184_v28 }
  0x14   :  { %v348_v9 = vpack.c.bf16 %v287_v5, %v286_v4  ;;  %v189_v21 = vmul.f32 %v1273_v14, %v1132_v17  ;;  %v224_v22 = vadd.f32 %v1278_v16, %v156_v18  ;;  %v225_v23 = vadd.f32 %v1278_v16, %v157_v19  ;;  %v1186_v4 = vld [vmem:[%s1758_s0 + $0x30] sm:$0xff]  }
  0x15   :  { %v364_v13 = vpack.c.bf16 %v319_v8, %v318_v7  ;;  %v256_v24 = vadd.f32 %v1278_v16, %v188_v20  ;;  %v1072_v33 = vunpack.c.h.bf16 %v1184_v28  ;;  %v1135_v36 = vunpack.c.l.bf16 %v1200_v34 }
  0x16   :  { %v257_v25 = vadd.f32 %v1278_v16, %v189_v21  ;;  %v288_v26 = vmax.f32 %v224_v22, 0.0  ;;  %v289_v27 = vmax.f32 %v225_v23, 0.0  ;;  %v1136_v37 = vunpack.c.h.bf16 %v1200_v34 }
  0x17   :  { %v320_v29 = vmax.f32 %v256_v24, 0.0  ;;  %v158_v38 = vmul.f32 %v1273_v14, %v1071_v32  ;;  %v159_v39 = vmul.f32 %v1273_v14, %v1072_v33  ;;  %v190_v40 = vmul.f32 %v1273_v14, %v1135_v36  ;;  %v1203_v32 = vld [vmem:[%s1758_s0 + $0xb8] sm:$0xff]  }
  0x18   :  { %v321_v30 = vmax.f32 %v257_v25, 0.0  ;;  %v349_v31 = vpack.c.bf16 %v289_v27, %v288_v26  ;;  %v191_v41 = vmul.f32 %v1273_v14, %v1136_v37  ;;  %v1075_v52 = vunpack.c.l.bf16 %v1185_v48  ;;  %v1187_v26 = vld [vmem:[%s1758_s0 + $0x38] sm:$0xff]  }
  0x19   :  { %v226_v42 = vadd.f32 %v1278_v16, %v158_v38  ;;  %v227_v43 = vadd.f32 %v1278_v16, %v159_v39  ;;  %v258_v44 = vadd.f32 %v1278_v16, %v190_v40  ;;  %v1139_v56 = vunpack.c.l.bf16 %v1201_v54 }
  0x1a   :  { %v365_v35 = vpack.c.bf16 %v321_v30, %v320_v29  ;;  %v259_v45 = vadd.f32 %v1278_v16, %v191_v41  ;;  %v160_v58 = vmul.f32 %v1273_v14, %v1075_v52  ;;  %v1079_v8 = vunpack.c.l.bf16 %v1186_v4  ;;  %v1204_v52 = vld [vmem:[%s1758_s0 + $0xc0] sm:$0xff]  }
  0x1b   :  { %v290_v46 = vmax.f32 %v226_v42, 0.0  ;;  %v291_v47 = vmax.f32 %v227_v43, 0.0  ;;  %v322_v49 = vmax.f32 %v258_v44, 0.0  ;;  %v192_v60 = vmul.f32 %v1273_v14, %v1139_v56 }
  0x1c   :  { %v323_v50 = vmax.f32 %v259_v45, 0.0  ;;  %v228_v62 = vadd.f32 %v1278_v16, %v160_v58  ;;  %v1143_v12 = vunpack.c.l.bf16 %v1202_v10  ;;  %v162_v15 = vmul.f32 %v1273_v14, %v1079_v8  ;;  %v1205_v8 = vld [vmem:[%s1758_s0 + $0xc8] sm:$0xff]  }
  0x1d   :  { %v350_v51 = vpack.c.bf16 %v291_v47, %v290_v46  ;;  %v260_v0 = vadd.f32 %v1278_v16, %v192_v60  ;;  %v1083_v30 = vunpack.c.l.bf16 %v1187_v26  ;;  %v1147_v34 = vunpack.c.l.bf16 %v1203_v32  ;;  %v1188_v46 = vld [vmem:[%s1758_s0 + $0x40] sm:$0xff]  }
  0x1e   :  { %v366_v55 = vpack.c.bf16 %v323_v50, %v322_v49  ;;  %v292_v2 = vmax.f32 %v228_v62, 0.0  ;;  %v194_v18 = vmul.f32 %v1273_v14, %v1143_v12  ;;  %v230_v20 = vadd.f32 %v1278_v16, %v162_v15 }
  0x1f   :  { %986 = vmatmul.msk.bf16.gmra.mxu0 %vm402_vm0, %v347_v53  ;;  %1018 = vmatmul.msk.bf16.gmra.mxu1 %vm402_vm0, %v347_v53  ;;  %v1076_v53 = vunpack.c.h.bf16 %v1185_v48  ;;  %v324_v5 = vmax.f32 %v260_v0, 0.0  ;;  %v164_v36 = vmul.f32 %v1273_v14, %v1083_v30  ;;  %v196_v38 = vmul.f32 %v1273_v14, %v1147_v34 }
  0x20   :  { %v262_v22 = vadd.f32 %v1278_v16, %v194_v18  ;;  %v294_v24 = vmax.f32 %v230_v20, 0.0  ;;  %v1087_v50 = vunpack.c.l.bf16 %v1188_v46  ;;  %v1156_v15 = vunpack.c.h.bf16 %v1205_v8 }
  0x21   :  { %v161_v59 = vmul.f32 %v1273_v14, %v1076_v53  ;;  %v232_v40 = vadd.f32 %v1278_v16, %v164_v36  ;;  %v264_v42 = vadd.f32 %v1278_v16, %v196_v38 }
  0x22   :  { %1002 = vmatmul.msk.bf16.gmra.mxu2 %vm402_vm0, %v363_v57  ;;  %1034 = vmatmul.msk.bf16.gmra.mxu3 %vm402_vm0, %v363_v57  ;;  %v1140_v57 = vunpack.c.h.bf16 %v1201_v54  ;;  %v326_v27 = vmax.f32 %v262_v22, 0.0  ;;  %v1151_v54 = vunpack.c.l.bf16 %v1204_v52  ;;  %v166_v56 = vmul.f32 %v1273_v14, %v1087_v50 }
  0x23   :  { %v229_v63 = vadd.f32 %v1278_v16, %v161_v59  ;;  %v296_v44 = vmax.f32 %v232_v40, 0.0  ;;  %v328_v47 = vmax.f32 %v264_v42, 0.0  ;;  %v201_v20 = vmul.f32 %v1273_v14, %v1156_v15 }
  0x24   :  { %v193_v61 = vmul.f32 %v1273_v14, %v1140_v57  ;;  %v198_v58 = vmul.f32 %v1273_v14, %v1151_v54  ;;  %v234_v60 = vadd.f32 %v1278_v16, %v166_v56 }
  0x25   :  { %v293_v3 = vmax.f32 %v229_v63, 0.0  ;;  %v269_v30 = vadd.f32 %v1278_v16, %v201_v20 }
  0x26   :  { %v261_v1 = vadd.f32 %v1278_v16, %v193_v61  ;;  %v266_v62 = vadd.f32 %v1278_v16, %v198_v58  ;;  %v298_v0 = vmax.f32 %v234_v60, 0.0 }
  0x27   :  { %v351_v7 = vpack.c.bf16 %v293_v3, %v292_v2  ;;  %v1189_v2 = vld [vmem:[%s1758_s0 + $0x48] sm:$0xff]  }
  0x28   :  { %v325_v6 = vmax.f32 %v261_v1, 0.0  ;;  %v330_v3 = vmax.f32 %v266_v62, 0.0 }
  0x2a   :  { %v367_v11 = vpack.c.bf16 %v325_v6, %v324_v5  ;;  %v1091_v6 = vunpack.c.l.bf16 %v1189_v2 }
  0x2f   :  { %987 = vmatmul.msk.bf16.gmra.mxu0 %vm402_vm0, %v348_v9  ;;  %1019 = vmatmul.msk.bf16.gmra.mxu1 %vm402_vm0, %v348_v9  ;;  %v1080_v9 = vunpack.c.h.bf16 %v1186_v4 }
  0x31   :  { %v163_v17 = vmul.f32 %v1273_v14, %v1080_v9 }
  0x32   :  { %1003 = vmatmul.msk.bf16.gmra.mxu2 %vm402_vm0, %v364_v13  ;;  %1035 = vmatmul.msk.bf16.gmra.mxu3 %vm402_vm0, %v364_v13  ;;  %v1144_v13 = vunpack.c.h.bf16 %v1202_v10 }
  0x33   :  { %v231_v21 = vadd.f32 %v1278_v16, %v163_v17  ;;  %v168_v17 = vmul.f32 %v1273_v14, %v1091_v6 }
  0x34   :  { %v195_v19 = vmul.f32 %v1273_v14, %v1144_v13  ;;  %v1155_v13 = vunpack.c.l.bf16 %v1205_v8 }
  0x35   :  { %v295_v25 = vmax.f32 %v231_v21, 0.0  ;;  %v236_v21 = vadd.f32 %v1278_v16, %v168_v17 }
  0x36   :  { %v263_v23 = vadd.f32 %v1278_v16, %v195_v19  ;;  %v200_v19 = vmul.f32 %v1273_v14, %v1155_v13 }
  0x37   :  { %v352_v29 = vpack.c.bf16 %v295_v25, %v294_v24 }
  0x38   :  { %v327_v28 = vmax.f32 %v263_v23, 0.0 }
  0x3a   :  { %v368_v33 = vpack.c.bf16 %v327_v28, %v326_v27 }
  0x3f   :  { %988 = vmatmul.msk.bf16.gmra.mxu0 %vm402_vm0, %v349_v31  ;;  %1020 = vmatmul.msk.bf16.gmra.mxu1 %vm402_vm0, %v349_v31  ;;  %v1084_v31 = vunpack.c.h.bf16 %v1187_v26 }
  0x41   :  { %v165_v37 = vmul.f32 %v1273_v14, %v1084_v31  ;;  %v300_v31 = vmax.f32 %v236_v21, 0.0 }
  0x42   :  { %1004 = vmatmul.msk.bf16.gmra.mxu2 %vm402_vm0, %v365_v35  ;;  %1036 = vmatmul.msk.bf16.gmra.mxu3 %vm402_vm0, %v365_v35  ;;  %v1148_v35 = vunpack.c.h.bf16 %v1203_v32 }
  0x43   :  { %v233_v41 = vadd.f32 %v1278_v16, %v165_v37 }
  0x44   :  { %v197_v39 = vmul.f32 %v1273_v14, %v1148_v35  ;;  %v333_v35 = vmax.f32 %v269_v30, 0.0 }
  0x45   :  { %v297_v45 = vmax.f32 %v233_v41, 0.0 }
  0x46   :  { %v265_v43 = vadd.f32 %v1278_v16, %v197_v39  ;;  %v1206_v39 = vld [vmem:[%s1758_s0 + $0xd0] sm:$0xff]  }
  0x47   :  { %v353_v49 = vpack.c.bf16 %v297_v45, %v296_v44 }
  0x48   :  { %v329_v48 = vmax.f32 %v265_v43, 0.0 }
  0x4a   :  { %v369_v53 = vpack.c.bf16 %v329_v48, %v328_v47  ;;  %v1159_v47 = vunpack.c.l.bf16 %v1206_v39  ;;  %v1160_v48 = vunpack.c.h.bf16 %v1206_v39 }
  0x4f   :  { %989 = vmatmul.msk.bf16.gmra.mxu0 %vm402_vm0, %v350_v51  ;;  %1021 = vmatmul.msk.bf16.gmra.mxu1 %vm402_vm0, %v350_v51  ;;  %v1088_v51 = vunpack.c.h.bf16 %v1188_v46 }
  0x51   :  { %v167_v57 = vmul.f32 %v1273_v14, %v1088_v51  ;;  %v202_v51 = vmul.f32 %v1273_v14, %v1159_v47 }
  0x52   :  { %1005 = vmatmul.msk.bf16.gmra.mxu2 %vm402_vm0, %v366_v55  ;;  %1037 = vmatmul.msk.bf16.gmra.mxu3 %vm402_vm0, %v366_v55  ;;  %v1152_v55 = vunpack.c.h.bf16 %v1204_v52  ;;  %v203_v52 = vmul.f32 %v1273_v14, %v1160_v48 }
  0x53   :  { %v235_v61 = vadd.f32 %v1278_v16, %v167_v57 }
  0x54   :  { %v199_v59 = vmul.f32 %v1273_v14, %v1152_v55  ;;  %v271_v62 = vadd.f32 %v1278_v16, %v203_v52 }
  0x55   :  { %v299_v1 = vmax.f32 %v235_v61, 0.0  ;;  %v270_v61 = vadd.f32 %v1278_v16, %v202_v51 }
  0x56   :  { %v267_v63 = vadd.f32 %v1278_v16, %v199_v59 }
  0x57   :  { %v354_v5 = vpack.c.bf16 %v299_v1, %v298_v0  ;;  %v1191_v1 = vld [vmem:[%s1758_s0 + $0x58] sm:$0xff]  }
  0x58   :  { %v331_v4 = vmax.f32 %v267_v63, 0.0  ;;  %v1100_v6 = vunpack.c.h.bf16 %v1191_v1 }
  0x5a   :  { %v370_v12 = vpack.c.bf16 %v331_v4, %v330_v3  ;;  %v335_v3 = vmax.f32 %v271_v62, 0.0  ;;  %v173_v20 = vmul.f32 %v1273_v14, %v1100_v6 }
  0x5f   :  { %990 = vmatmul.msk.bf16.gmra.mxu0 %vm402_vm0, %v351_v7  ;;  %1022 = vmatmul.msk.bf16.gmra.mxu1 %vm402_vm0, %v351_v7  ;;  %v1092_v7 = vunpack.c.h.bf16 %v1189_v2  ;;  %v334_v2 = vmax.f32 %v270_v61, 0.0 }
  0x61   :  { %v169_v18 = vmul.f32 %v1273_v14, %v1092_v7  ;;  %v1207_v7 = vld [vmem:[%s1758_s0 + $0xd8] sm:$0xff]   ;;  %v372_v15 = vpack.c.bf16 %v335_v3, %v334_v2  ;;  %v1193_v3 = vld [vmem:[%s1758_s0 + $0x68] sm:$0xff]  }
  0x62   :  { %1006 = vmatmul.msk.bf16.gmra.mxu2 %vm402_vm0, %v367_v11  ;;  %1038 = vmatmul.msk.bf16.gmra.mxu3 %vm402_vm0, %v367_v11  ;;  %v1163_v17 = vunpack.c.l.bf16 %v1207_v7 }
  0x63   :  { %v237_v22 = vadd.f32 %v1278_v16, %v169_v18  ;;  %v1164_v18 = vunpack.c.h.bf16 %v1207_v7  ;;  %v1107_v7 = vunpack.c.l.bf16 %v1193_v3 }
  0x64   :  { %v204_v21 = vmul.f32 %v1273_v14, %v1163_v17 }
  0x65   :  { %v301_v32 = vmax.f32 %v237_v22, 0.0  ;;  %v205_v22 = vmul.f32 %v1273_v14, %v1164_v18 }
  0x67   :  { %v355_v36 = vpack.c.bf16 %v301_v32, %v300_v31  ;;  %v272_v31 = vadd.f32 %v1278_v16, %v204_v21  ;;  %v273_v32 = vadd.f32 %v1278_v16, %v205_v22  ;;  %v176_v21 = vmul.f32 %v1273_v14, %v1107_v7 }
  0x6f   :  { %991 = vmatmul.msk.bf16.gmra.mxu0 %vm402_vm0, %v352_v29  ;;  %1023 = vmatmul.msk.bf16.gmra.mxu1 %vm402_vm0, %v352_v29  ;;  %v268_v29 = vadd.f32 %v1278_v16, %v200_v19 }
  0x71   :  { %v332_v34 = vmax.f32 %v268_v29, 0.0 }
  0x72   :  { %1007 = vmatmul.msk.bf16.gmra.mxu2 %vm402_vm0, %v368_v33  ;;  %1039 = vmatmul.msk.bf16.gmra.mxu3 %vm402_vm0, %v368_v33  ;;  %v1190_v33 = vld [vmem:[%s1758_s0 + $0x50] sm:$0xff]  }
  0x73   :  { %v1095_v37 = vunpack.c.l.bf16 %v1190_v33  ;;  %v1096_v38 = vunpack.c.h.bf16 %v1190_v33  ;;  %v371_v46 = vpack.c.bf16 %v333_v35, %v332_v34  ;;  %v1192_v35 = vld [vmem:[%s1758_s0 + $0x60] sm:$0xff]  }
  0x74   :  { %v1103_v39 = vunpack.c.l.bf16 %v1192_v35 }
  0x75   :  { %v171_v50 = vmul.f32 %v1273_v14, %v1096_v38 }
  0x76   :  { %v174_v51 = vmul.f32 %v1273_v14, %v1103_v39 }
  0x77   :  { %v239_v54 = vadd.f32 %v1278_v16, %v171_v50 }
  0x79   :  { %v303_v0 = vmax.f32 %v239_v54, 0.0 }
  0x7f   :  { %992 = vmatmul.msk.bf16.gmra.mxu0 %vm402_vm0, %v353_v49  ;;  %1024 = vmatmul.msk.bf16.gmra.mxu1 %vm402_vm0, %v353_v49  ;;  %v170_v49 = vmul.f32 %v1273_v14, %v1095_v37  ;;  %v337_v37 = vmax.f32 %v273_v32, 0.0 }
  0x82   :  { %1008 = vmatmul.msk.bf16.gmra.mxu2 %vm402_vm0, %v369_v53  ;;  %1040 = vmatmul.msk.bf16.gmra.mxu3 %vm402_vm0, %v369_v53  ;;  %v238_v53 = vadd.f32 %v1278_v16, %v170_v49 }
  0x84   :  { %v302_v63 = vmax.f32 %v238_v53, 0.0 }
  0x86   :  { %v356_v4 = vpack.c.bf16 %v303_v0, %v302_v63 }
  0x8c   :  { %v508_v9 = vpop.f32.mrf.mxu0  ;;  %v677_v10 = vpop.f32.mrf.mxu1 }
  0x8d   :  { %v837_v11 = vpack.c.bf16 %v677_v10, %v508_v9 }
  0x8f   :  { %901 = vst [vmem:[%s1761_s4] sm:$0xff] %v837_v11  ;;  %993 = vmatmul.msk.bf16.gmra.mxu0 %vm402_vm0, %v354_v5  ;;  %1025 = vmatmul.msk.bf16.gmra.mxu1 %vm402_vm0, %v354_v5  ;;  %v1099_v5 = vunpack.c.l.bf16 %v1191_v1 }
  0x91   :  { %v172_v19 = vmul.f32 %v1273_v14, %v1099_v5 }
  0x92   :  { %1009 = vmatmul.msk.bf16.gmra.mxu2 %vm402_vm0, %v370_v12  ;;  %1041 = vmatmul.msk.bf16.gmra.mxu3 %vm402_vm0, %v370_v12 }
  0x94   :  { %v510_v23 = vpop.f32.mrf.mxu0  ;;  %v679_v24 = vpop.f32.mrf.mxu1 }
  0x95   :  { %v588_v25 = vpop.f32.mrf.mxu2  ;;  %v757_v26 = vpop.f32.mrf.mxu3  ;;  %v838_v27 = vpack.c.bf16 %v679_v24, %v510_v23  ;;  %v240_v23 = vadd.f32 %v1278_v16, %v172_v19  ;;  %v241_v24 = vadd.f32 %v1278_v16, %v173_v20 }
  0x96   :  { %v869_v28 = vpack.c.bf16 %v757_v26, %v588_v25 }
  0x97   :  { %902 = vst [vmem:[%s1761_s4 + $0x8] sm:$0xff] %v838_v27  ;;  %v304_v33 = vmax.f32 %v240_v23, 0.0  ;;  %v305_v34 = vmax.f32 %v241_v24, 0.0 }
  0x98   :  { %933 = vst [vmem:[%s1761_s4 + $0x100] sm:$0xff] %v869_v28 }
  0x99   :  { %v357_v38 = vpack.c.bf16 %v305_v34, %v304_v33 }
  0x9c   :  { %v513_v40 = vpop.f32.mrf.mxu0  ;;  %v682_v41 = vpop.f32.mrf.mxu1 }
  0x9d   :  { %v590_v42 = vpop.f32.mrf.mxu2  ;;  %v759_v43 = vpop.f32.mrf.mxu3  ;;  %v839_v44 = vpack.c.bf16 %v682_v41, %v513_v40  ;;  %v1104_v40 = vunpack.c.h.bf16 %v1192_v35  ;;  %v1208_v41 = vld [vmem:[%s1758_s0 + $0xe0] sm:$0xff]  }
  0x9e   :  { %v870_v45 = vpack.c.bf16 %v759_v43, %v590_v42  ;;  %v1167_v49 = vunpack.c.l.bf16 %v1208_v41  ;;  %v1168_v50 = vunpack.c.h.bf16 %v1208_v41 }
  0x9f   :  { %903 = vst [vmem:[%s1761_s4 + $0x10] sm:$0xff] %v839_v44  ;;  %994 = vmatmul.msk.bf16.gmra.mxu0 %vm402_vm0, %v355_v36  ;;  %1026 = vmatmul.msk.bf16.gmra.mxu1 %vm402_vm0, %v355_v36  ;;  %v336_v36 = vmax.f32 %v272_v31, 0.0  ;;  %v175_v52 = vmul.f32 %v1273_v14, %v1104_v40 }
  0xa0   :  { %934 = vst [vmem:[%s1761_s4 + $0x108] sm:$0xff] %v870_v45  ;;  %v206_v53 = vmul.f32 %v1273_v14, %v1167_v49  ;;  %v207_v54 = vmul.f32 %v1273_v14, %v1168_v50 }
  0xa1   :  { %v373_v48 = vpack.c.bf16 %v337_v37, %v336_v36  ;;  %v1194_v37 = vld [vmem:[%s1758_s0 + $0x70] sm:$0xff]  }
  0xa2   :  { %1010 = vmatmul.msk.bf16.gmra.mxu2 %vm402_vm0, %v371_v46  ;;  %1042 = vmatmul.msk.bf16.gmra.mxu3 %vm402_vm0, %v371_v46  ;;  %v274_v63 = vadd.f32 %v1278_v16, %v206_v53  ;;  %v275_v0 = vadd.f32 %v1278_v16, %v207_v54  ;;  %v1111_v41 = vunpack.c.l.bf16 %v1194_v37 }
  0xa4   :  { %v515_v55 = vpop.f32.mrf.mxu0  ;;  %v684_v56 = vpop.f32.mrf.mxu1  ;;  %v339_v5 = vmax.f32 %v275_v0, 0.0  ;;  %v178_v53 = vmul.f32 %v1273_v14, %v1111_v41 }
  0xa5   :  { %v593_v57 = vpop.f32.mrf.mxu2  ;;  %v762_v58 = vpop.f32.mrf.mxu3  ;;  %v840_v59 = vpack.c.bf16 %v684_v56, %v515_v55  ;;  %v242_v55 = vadd.f32 %v1278_v16, %v174_v51  ;;  %v243_v56 = vadd.f32 %v1278_v16, %v175_v52 }
  0xa6   :  { %v871_v60 = vpack.c.bf16 %v762_v58, %v593_v57 }
  0xa7   :  { %904 = vst [vmem:[%s1761_s4 + $0x18] sm:$0xff] %v840_v59  ;;  %v306_v1 = vmax.f32 %v242_v55, 0.0  ;;  %v307_v2 = vmax.f32 %v243_v56, 0.0 }
  0xa8   :  { %935 = vst [vmem:[%s1761_s4 + $0x110] sm:$0xff] %v871_v60 }
  0xa9   :  { %v358_v6 = vpack.c.bf16 %v307_v2, %v306_v1 }
  0xac   :  { %v518_v8 = vpop.f32.mrf.mxu0  ;;  %v687_v9 = vpop.f32.mrf.mxu1 }
  0xad   :  { %v595_v10 = vpop.f32.mrf.mxu2  ;;  %v764_v11 = vpop.f32.mrf.mxu3  ;;  %v841_v12 = vpack.c.bf16 %v687_v9, %v518_v8  ;;  %v1108_v8 = vunpack.c.h.bf16 %v1193_v3  ;;  %v1209_v9 = vld [vmem:[%s1758_s0 + $0xe8] sm:$0xff]  }
  0xae   :  { %v872_v13 = vpack.c.bf16 %v764_v11, %v595_v10  ;;  %v1171_v19 = vunpack.c.l.bf16 %v1209_v9  ;;  %v1172_v20 = vunpack.c.h.bf16 %v1209_v9 }
  0xaf   :  { %905 = vst [vmem:[%s1761_s4 + $0x20] sm:$0xff] %v841_v12  ;;  %995 = vmatmul.msk.bf16.gmra.mxu0 %vm402_vm0, %v356_v4  ;;  %1027 = vmatmul.msk.bf16.gmra.mxu1 %vm402_vm0, %v356_v4  ;;  %v338_v4 = vmax.f32 %v274_v63, 0.0  ;;  %v177_v22 = vmul.f32 %v1273_v14, %v1108_v8 }
  0xb0   :  { %936 = vst [vmem:[%s1761_s4 + $0x118] sm:$0xff] %v872_v13  ;;  %v208_v23 = vmul.f32 %v1273_v14, %v1171_v19  ;;  %v209_v24 = vmul.f32 %v1273_v14, %v1172_v20 }
  0xb1   :  { %v374_v18 = vpack.c.bf16 %v339_v5, %v338_v4  ;;  %v1195_v5 = vld [vmem:[%s1758_s0 + $0x78] sm:$0xff]  }
  0xb2   :  { %1011 = vmatmul.msk.bf16.gmra.mxu2 %vm402_vm0, %v372_v15  ;;  %1043 = vmatmul.msk.bf16.gmra.mxu3 %vm402_vm0, %v372_v15  ;;  %v276_v33 = vadd.f32 %v1278_v16, %v208_v23  ;;  %v277_v34 = vadd.f32 %v1278_v16, %v209_v24  ;;  %v1115_v9 = vunpack.c.l.bf16 %v1195_v5 }
  0xb4   :  { %v520_v25 = vpop.f32.mrf.mxu0  ;;  %v689_v26 = vpop.f32.mrf.mxu1  ;;  %v341_v39 = vmax.f32 %v277_v34, 0.0  ;;  %v180_v23 = vmul.f32 %v1273_v14, %v1115_v9 }
  0xb5   :  { %v598_v27 = vpop.f32.mrf.mxu2  ;;  %v767_v28 = vpop.f32.mrf.mxu3  ;;  %v842_v29 = vpack.c.bf16 %v689_v26, %v520_v25  ;;  %v244_v25 = vadd.f32 %v1278_v16, %v176_v21  ;;  %v245_v26 = vadd.f32 %v1278_v16, %v177_v22 }
  0xb6   :  { %v873_v30 = vpack.c.bf16 %v767_v28, %v598_v27 }
  0xb7   :  { %906 = vst [vmem:[%s1761_s4 + $0x28] sm:$0xff] %v842_v29  ;;  %v308_v35 = vmax.f32 %v244_v25, 0.0  ;;  %v309_v36 = vmax.f32 %v245_v26, 0.0 }
  0xb8   :  { %937 = vst [vmem:[%s1761_s4 + $0x120] sm:$0xff] %v873_v30 }
  0xb9   :  { %v359_v40 = vpack.c.bf16 %v309_v36, %v308_v35 }
  0xbc   :  { %v523_v42 = vpop.f32.mrf.mxu0  ;;  %v692_v43 = vpop.f32.mrf.mxu1 }
  0xbd   :  { %v600_v44 = vpop.f32.mrf.mxu2  ;;  %v769_v45 = vpop.f32.mrf.mxu3  ;;  %v843_v46 = vpack.c.bf16 %v692_v43, %v523_v42  ;;  %v1112_v42 = vunpack.c.h.bf16 %v1194_v37  ;;  %v1210_v43 = vld [vmem:[%s1758_s0 + $0xf0] sm:$0xff]  }
  0xbe   :  { %v874_v47 = vpack.c.bf16 %v769_v45, %v600_v44  ;;  %v1175_v51 = vunpack.c.l.bf16 %v1210_v43  ;;  %v1176_v52 = vunpack.c.h.bf16 %v1210_v43 }
  0xbf   :  { %907 = vst [vmem:[%s1761_s4 + $0x30] sm:$0xff] %v843_v46  ;;  %996 = vmatmul.msk.bf16.gmra.mxu0 %vm402_vm0, %v357_v38  ;;  %1028 = vmatmul.msk.bf16.gmra.mxu1 %vm402_vm0, %v357_v38  ;;  %v340_v38 = vmax.f32 %v276_v33, 0.0  ;;  %v179_v54 = vmul.f32 %v1273_v14, %v1112_v42 }
  0xc0   :  { %938 = vst [vmem:[%s1761_s4 + $0x128] sm:$0xff] %v874_v47  ;;  %v210_v55 = vmul.f32 %v1273_v14, %v1175_v51  ;;  %v211_v56 = vmul.f32 %v1273_v14, %v1176_v52 }
  0xc1   :  { %v375_v50 = vpack.c.bf16 %v341_v39, %v340_v38 }
  0xc2   :  { %1012 = vmatmul.msk.bf16.gmra.mxu2 %vm402_vm0, %v373_v48  ;;  %1044 = vmatmul.msk.bf16.gmra.mxu3 %vm402_vm0, %v373_v48  ;;  %v278_v1 = vadd.f32 %v1278_v16, %v210_v55  ;;  %v279_v2 = vadd.f32 %v1278_v16, %v211_v56 }
  0xc4   :  { %v525_v57 = vpop.f32.mrf.mxu0  ;;  %v694_v58 = vpop.f32.mrf.mxu1  ;;  %v343_v7 = vmax.f32 %v279_v2, 0.0 }
  0xc5   :  { %v603_v59 = vpop.f32.mrf.mxu2  ;;  %v772_v60 = vpop.f32.mrf.mxu3  ;;  %v844_v61 = vpack.c.bf16 %v694_v58, %v525_v57  ;;  %v246_v57 = vadd.f32 %v1278_v16, %v178_v53  ;;  %v247_v58 = vadd.f32 %v1278_v16, %v179_v54 }
  0xc6   :  { %v875_v62 = vpack.c.bf16 %v772_v60, %v603_v59 }
  0xc7   :  { %908 = vst [vmem:[%s1761_s4 + $0x38] sm:$0xff] %v844_v61  ;;  %v310_v3 = vmax.f32 %v246_v57, 0.0  ;;  %v311_v4 = vmax.f32 %v247_v58, 0.0 }
  0xc8   :  { %939 = vst [vmem:[%s1761_s4 + $0x130] sm:$0xff] %v875_v62 }
  0xc9   :  { %v360_v8 = vpack.c.bf16 %v311_v4, %v310_v3 }
  0xcc   :  { %v528_v10 = vpop.f32.mrf.mxu0  ;;  %v697_v11 = vpop.f32.mrf.mxu1 }
  0xcd   :  { %v605_v12 = vpop.f32.mrf.mxu2  ;;  %v774_v13 = vpop.f32.mrf.mxu3  ;;  %v845_v15 = vpack.c.bf16 %v697_v11, %v528_v10  ;;  %v1116_v10 = vunpack.c.h.bf16 %v1195_v5  ;;  %v1211_v11 = vld [vmem:[%s1758_s0 + $0xf8] sm:$0xff]  }
  0xce   :  { %v876_v17 = vpack.c.bf16 %v774_v13, %v605_v12  ;;  %v1179_v21 = vunpack.c.l.bf16 %v1211_v11  ;;  %v1180_v22 = vunpack.c.h.bf16 %v1211_v11 }
  0xcf   :  { %909 = vst [vmem:[%s1761_s4 + $0x40] sm:$0xff] %v845_v15  ;;  %997 = vmatmul.msk.bf16.gmra.mxu0 %vm402_vm0, %v358_v6  ;;  %1029 = vmatmul.msk.bf16.gmra.mxu1 %vm402_vm0, %v358_v6  ;;  %v342_v6 = vmax.f32 %v278_v1, 0.0  ;;  %v181_v24 = vmul.f32 %v1273_v14, %v1116_v10 }
  0xd0   :  { %940 = vst [vmem:[%s1761_s4 + $0x138] sm:$0xff] %v876_v17  ;;  %v212_v25 = vmul.f32 %v1273_v14, %v1179_v21  ;;  %v213_v26 = vmul.f32 %v1273_v14, %v1180_v22 }
  0xd1   :  { %v376_v20 = vpack.c.bf16 %v343_v7, %v342_v6 }
  0xd2   :  { %1013 = vmatmul.msk.bf16.gmra.mxu2 %vm402_vm0, %v374_v18  ;;  %1045 = vmatmul.msk.bf16.gmra.mxu3 %vm402_vm0, %v374_v18  ;;  %v280_v35 = vadd.f32 %v1278_v16, %v212_v25  ;;  %v281_v36 = vadd.f32 %v1278_v16, %v213_v26 }
  0xd4   :  { %v530_v27 = vpop.f32.mrf.mxu0  ;;  %v699_v28 = vpop.f32.mrf.mxu1  ;;  %v344_v38 = vmax.f32 %v280_v35, 0.0  ;;  %v345_v39 = vmax.f32 %v281_v36, 0.0 }
  0xd5   :  { %v608_v29 = vpop.f32.mrf.mxu2  ;;  %v777_v30 = vpop.f32.mrf.mxu3  ;;  %v846_v31 = vpack.c.bf16 %v699_v28, %v530_v27  ;;  %v248_v27 = vadd.f32 %v1278_v16, %v180_v23  ;;  %v249_v28 = vadd.f32 %v1278_v16, %v181_v24 }
  0xd6   :  { %v877_v32 = vpack.c.bf16 %v777_v30, %v608_v29  ;;  %v377_v16 = vpack.c.bf16 %v345_v39, %v344_v38 }
  0xd7   :  { %910 = vst [vmem:[%s1761_s4 + $0x48] sm:$0xff] %v846_v31  ;;  %v312_v37 = vmax.f32 %v248_v27, 0.0  ;;  %v313_v14 = vmax.f32 %v249_v28, 0.0 }
  0xd8   :  { %941 = vst [vmem:[%s1761_s4 + $0x140] sm:$0xff] %v877_v32 }
  0xdc   :  { %v533_v44 = vpop.f32.mrf.mxu0  ;;  %v702_v45 = vpop.f32.mrf.mxu1 }
  0xdd   :  { %v610_v46 = vpop.f32.mrf.mxu2  ;;  %v779_v47 = vpop.f32.mrf.mxu3  ;;  %v847_v48 = vpack.c.bf16 %v702_v45, %v533_v44 }
  0xde   :  { %v878_v49 = vpack.c.bf16 %v779_v47, %v610_v46 }
  0xdf   :  { %911 = vst [vmem:[%s1761_s4 + $0x50] sm:$0xff] %v847_v48  ;;  %998 = vmatmul.msk.bf16.gmra.mxu0 %vm402_vm0, %v359_v40  ;;  %1030 = vmatmul.msk.bf16.gmra.mxu1 %vm402_vm0, %v359_v40  ;;  %v361_v40 = vpack.c.bf16 %v313_v14, %v312_v37 }
  0xe0   :  { %942 = vst [vmem:[%s1761_s4 + $0x148] sm:$0xff] %v878_v49 }
  0xe2   :  { %1014 = vmatmul.msk.bf16.gmra.mxu2 %vm402_vm0, %v375_v50  ;;  %1046 = vmatmul.msk.bf16.gmra.mxu3 %vm402_vm0, %v375_v50 }
  0xe4   :  { %v535_v59 = vpop.f32.mrf.mxu0  ;;  %v704_v60 = vpop.f32.mrf.mxu1 }
  0xe5   :  { %v613_v61 = vpop.f32.mrf.mxu2  ;;  %v782_v62 = vpop.f32.mrf.mxu3  ;;  %v848_v63 = vpack.c.bf16 %v704_v60, %v535_v59 }
  0xe6   :  { %v879_v0 = vpack.c.bf16 %v782_v62, %v613_v61 }
  0xe7   :  { %912 = vst [vmem:[%s1761_s4 + $0x58] sm:$0xff] %v848_v63 }
  0xe8   :  { %943 = vst [vmem:[%s1761_s4 + $0x150] sm:$0xff] %v879_v0 }
  0xec   :  { %v538_v12 = vpop.f32.mrf.mxu0  ;;  %v707_v13 = vpop.f32.mrf.mxu1 }
  0xed   :  { %v615_v15 = vpop.f32.mrf.mxu2  ;;  %v784_v17 = vpop.f32.mrf.mxu3  ;;  %v849_v18 = vpack.c.bf16 %v707_v13, %v538_v12 }
  0xee   :  { %v880_v19 = vpack.c.bf16 %v784_v17, %v615_v15 }
  0xef   :  { %913 = vst [vmem:[%s1761_s4 + $0x60] sm:$0xff] %v849_v18  ;;  %999 = vmatmul.msk.bf16.gmra.mxu0 %vm402_vm0, %v360_v8  ;;  %1031 = vmatmul.msk.bf16.gmra.mxu1 %vm402_vm0, %v360_v8 }
  0xf0   :  { %944 = vst [vmem:[%s1761_s4 + $0x158] sm:$0xff] %v880_v19 }
  0xf2   :  { %1015 = vmatmul.msk.bf16.gmra.mxu2 %vm402_vm0, %v376_v20  ;;  %1047 = vmatmul.msk.bf16.gmra.mxu3 %vm402_vm0, %v376_v20 }
  0xf4   :  { %v540_v29 = vpop.f32.mrf.mxu0  ;;  %v709_v30 = vpop.f32.mrf.mxu1 }
  0xf5   :  { %v618_v31 = vpop.f32.mrf.mxu2  ;;  %v787_v32 = vpop.f32.mrf.mxu3  ;;  %v850_v33 = vpack.c.bf16 %v709_v30, %v540_v29 }
  0xf6   :  { %v881_v34 = vpack.c.bf16 %v787_v32, %v618_v31 }
  0xf7   :  { %914 = vst [vmem:[%s1761_s4 + $0x68] sm:$0xff] %v850_v33 }
  0xf8   :  { %945 = vst [vmem:[%s1761_s4 + $0x160] sm:$0xff] %v881_v34 }
  0xfc   :  { %v543_v41 = vpop.f32.mrf.mxu0  ;;  %v712_v42 = vpop.f32.mrf.mxu1 }
  0xfd   :  { %v620_v43 = vpop.f32.mrf.mxu2  ;;  %v789_v44 = vpop.f32.mrf.mxu3  ;;  %v851_v45 = vpack.c.bf16 %v712_v42, %v543_v41 }
  0xfe   :  { %v882_v46 = vpack.c.bf16 %v789_v44, %v620_v43 }
  0xff   :  { %915 = vst [vmem:[%s1761_s4 + $0x70] sm:$0xff] %v851_v45  ;;  %1000 = vmatmul.msk.bf16.gmra.mxu0 %vm402_vm0, %v361_v40  ;;  %1032 = vmatmul.msk.bf16.gmra.mxu1 %vm402_vm0, %v361_v40 }
 0x100   :  { %946 = vst [vmem:[%s1761_s4 + $0x168] sm:$0xff] %v882_v46 }
 0x102   :  { %1016 = vmatmul.msk.bf16.gmra.mxu2 %vm402_vm0, %v377_v16  ;;  %1048 = vmatmul.msk.bf16.gmra.mxu3 %vm402_vm0, %v377_v16 }
 0x104   :  { %v545_v47 = vpop.f32.mrf.mxu0  ;;  %v714_v48 = vpop.f32.mrf.mxu1 }
 0x105   :  { %v623_v49 = vpop.f32.mrf.mxu2  ;;  %v792_v50 = vpop.f32.mrf.mxu3  ;;  %v852_v51 = vpack.c.bf16 %v714_v48, %v545_v47 }
 0x106   :  { %v883_v52 = vpack.c.bf16 %v792_v50, %v623_v49 }
 0x107   :  { %916 = vst [vmem:[%s1761_s4 + $0x78] sm:$0xff] %v852_v51 }
 0x108   :  { %947 = vst [vmem:[%s1761_s4 + $0x170] sm:$0xff] %v883_v52 }
 0x10c   :  { %v548_v53 = vpop.f32.mrf.mxu0  ;;  %v717_v54 = vpop.f32.mrf.mxu1 }
 0x10d   :  { %v625_v55 = vpop.f32.mrf.mxu2  ;;  %v794_v56 = vpop.f32.mrf.mxu3  ;;  %v853_v57 = vpack.c.bf16 %v717_v54, %v548_v53 }
 0x10e   :  { %v884_v58 = vpack.c.bf16 %v794_v56, %v625_v55 }
 0x10f   :  { %917 = vst [vmem:[%s1761_s4 + $0x80] sm:$0xff] %v853_v57 }
 0x110   :  { %948 = vst [vmem:[%s1761_s4 + $0x178] sm:$0xff] %v884_v58 }
 0x114   :  { %v550_v59 = vpop.f32.mrf.mxu0  ;;  %v719_v60 = vpop.f32.mrf.mxu1 }
 0x115   :  { %v628_v61 = vpop.f32.mrf.mxu2  ;;  %v797_v62 = vpop.f32.mrf.mxu3  ;;  %v854_v63 = vpack.c.bf16 %v719_v60, %v550_v59 }
 0x116   :  { %v885_v0 = vpack.c.bf16 %v797_v62, %v628_v61 }
 0x117   :  { %918 = vst [vmem:[%s1761_s4 + $0x88] sm:$0xff] %v854_v63 }
 0x118   :  { %949 = vst [vmem:[%s1761_s4 + $0x180] sm:$0xff] %v885_v0 }
 0x11c   :  { %v553_v1 = vpop.f32.mrf.mxu0  ;;  %v722_v2 = vpop.f32.mrf.mxu1 }
 0x11d   :  { %v630_v3 = vpop.f32.mrf.mxu2  ;;  %v799_v4 = vpop.f32.mrf.mxu3  ;;  %v855_v5 = vpack.c.bf16 %v722_v2, %v553_v1 }
 0x11e   :  { %v886_v6 = vpack.c.bf16 %v799_v4, %v630_v3 }
 0x11f   :  { %919 = vst [vmem:[%s1761_s4 + $0x90] sm:$0xff] %v855_v5 }
 0x120   :  { %950 = vst [vmem:[%s1761_s4 + $0x188] sm:$0xff] %v886_v6 }
 0x124   :  { %v555_v7 = vpop.f32.mrf.mxu0  ;;  %v724_v8 = vpop.f32.mrf.mxu1 }
 0x125   :  { %v633_v9 = vpop.f32.mrf.mxu2  ;;  %v802_v10 = vpop.f32.mrf.mxu3  ;;  %v856_v11 = vpack.c.bf16 %v724_v8, %v555_v7 }
 0x126   :  { %v887_v12 = vpack.c.bf16 %v802_v10, %v633_v9 }
 0x127   :  { %920 = vst [vmem:[%s1761_s4 + $0x98] sm:$0xff] %v856_v11 }
 0x128   :  { %951 = vst [vmem:[%s1761_s4 + $0x190] sm:$0xff] %v887_v12 }
 0x12c   :  { %v558_v13 = vpop.f32.mrf.mxu0  ;;  %v727_v15 = vpop.f32.mrf.mxu1 }
 0x12d   :  { %v635_v17 = vpop.f32.mrf.mxu2  ;;  %v804_v18 = vpop.f32.mrf.mxu3  ;;  %v857_v19 = vpack.c.bf16 %v727_v15, %v558_v13 }
 0x12e   :  { %v888_v20 = vpack.c.bf16 %v804_v18, %v635_v17 }
 0x12f   :  { %921 = vst [vmem:[%s1761_s4 + $0xa0] sm:$0xff] %v857_v19 }
 0x130   :  { %952 = vst [vmem:[%s1761_s4 + $0x198] sm:$0xff] %v888_v20 }
 0x134   :  { %v560_v21 = vpop.f32.mrf.mxu0  ;;  %v729_v22 = vpop.f32.mrf.mxu1 }
 0x135   :  { %v638_v23 = vpop.f32.mrf.mxu2  ;;  %v807_v24 = vpop.f32.mrf.mxu3  ;;  %v858_v25 = vpack.c.bf16 %v729_v22, %v560_v21 }
 0x136   :  { %v889_v26 = vpack.c.bf16 %v807_v24, %v638_v23 }
 0x137   :  { %922 = vst [vmem:[%s1761_s4 + $0xa8] sm:$0xff] %v858_v25 }
 0x138   :  { %953 = vst [vmem:[%s1761_s4 + $0x1a0] sm:$0xff] %v889_v26 }
 0x13c   :  { %v563_v27 = vpop.f32.mrf.mxu0  ;;  %v732_v28 = vpop.f32.mrf.mxu1 }
 0x13d   :  { %v640_v29 = vpop.f32.mrf.mxu2  ;;  %v809_v30 = vpop.f32.mrf.mxu3  ;;  %v859_v31 = vpack.c.bf16 %v732_v28, %v563_v27 }
 0x13e   :  { %v890_v32 = vpack.c.bf16 %v809_v30, %v640_v29 }
 0x13f   :  { %923 = vst [vmem:[%s1761_s4 + $0xb0] sm:$0xff] %v859_v31 }
 0x140   :  { %954 = vst [vmem:[%s1761_s4 + $0x1a8] sm:$0xff] %v890_v32 }
 0x144   :  { %v565_v33 = vpop.f32.mrf.mxu0  ;;  %v734_v34 = vpop.f32.mrf.mxu1 }
 0x145   :  { %v643_v35 = vpop.f32.mrf.mxu2  ;;  %v812_v36 = vpop.f32.mrf.mxu3  ;;  %v860_v37 = vpack.c.bf16 %v734_v34, %v565_v33 }
 0x146   :  { %v891_v14 = vpack.c.bf16 %v812_v36, %v643_v35 }
 0x147   :  { %924 = vst [vmem:[%s1761_s4 + $0xb8] sm:$0xff] %v860_v37 }
 0x148   :  { %955 = vst [vmem:[%s1761_s4 + $0x1b0] sm:$0xff] %v891_v14 }
 0x14c   :  { %v568_v38 = vpop.f32.mrf.mxu0  ;;  %v737_v39 = vpop.f32.mrf.mxu1 }
 0x14d   :  { %v645_v40 = vpop.f32.mrf.mxu2  ;;  %v814_v41 = vpop.f32.mrf.mxu3  ;;  %v861_v42 = vpack.c.bf16 %v737_v39, %v568_v38 }
 0x14e   :  { %v892_v43 = vpack.c.bf16 %v814_v41, %v645_v40 }
 0x14f   :  { %925 = vst [vmem:[%s1761_s4 + $0xc0] sm:$0xff] %v861_v42 }
 0x150   :  { %956 = vst [vmem:[%s1761_s4 + $0x1b8] sm:$0xff] %v892_v43 }
 0x154   :  { %v570_v44 = vpop.f32.mrf.mxu0  ;;  %v739_v45 = vpop.f32.mrf.mxu1 }
 0x155   :  { %v648_v46 = vpop.f32.mrf.mxu2  ;;  %v817_v16 = vpop.f32.mrf.mxu3  ;;  %v862_v47 = vpack.c.bf16 %v739_v45, %v570_v44 }
 0x156   :  { %v893_v48 = vpack.c.bf16 %v817_v16, %v648_v46 }
 0x157   :  { %926 = vst [vmem:[%s1761_s4 + $0xc8] sm:$0xff] %v862_v47 }
 0x158   :  { %957 = vst [vmem:[%s1761_s4 + $0x1c0] sm:$0xff] %v893_v48 }
 0x15c   :  { %v573_v49 = vpop.f32.mrf.mxu0  ;;  %v742_v50 = vpop.f32.mrf.mxu1 }
 0x15d   :  { %v650_v51 = vpop.f32.mrf.mxu2  ;;  %v819_v52 = vpop.f32.mrf.mxu3  ;;  %v863_v53 = vpack.c.bf16 %v742_v50, %v573_v49 }
 0x15e   :  { %v894_v54 = vpack.c.bf16 %v819_v52, %v650_v51 }
 0x15f   :  { %927 = vst [vmem:[%s1761_s4 + $0xd0] sm:$0xff] %v863_v53 }
 0x160   :  { %958 = vst [vmem:[%s1761_s4 + $0x1c8] sm:$0xff] %v894_v54 }
 0x164   :  { %v575_v55 = vpop.f32.mrf.mxu0  ;;  %v744_v56 = vpop.f32.mrf.mxu1 }
 0x165   :  { %v653_v57 = vpop.f32.mrf.mxu2  ;;  %v822_v58 = vpop.f32.mrf.mxu3  ;;  %v864_v59 = vpack.c.bf16 %v744_v56, %v575_v55 }
 0x166   :  { %v895_v60 = vpack.c.bf16 %v822_v58, %v653_v57 }
 0x167   :  { %928 = vst [vmem:[%s1761_s4 + $0xd8] sm:$0xff] %v864_v59 }
 0x168   :  { %959 = vst [vmem:[%s1761_s4 + $0x1d0] sm:$0xff] %v895_v60 }
 0x16c   :  { %v578_v61 = vpop.f32.mrf.mxu0  ;;  %v747_v62 = vpop.f32.mrf.mxu1 }
 0x16d   :  { %v655_v63 = vpop.f32.mrf.mxu2  ;;  %v824_v0 = vpop.f32.mrf.mxu3  ;;  %v865_v1 = vpack.c.bf16 %v747_v62, %v578_v61 }
 0x16e   :  { %v896_v2 = vpack.c.bf16 %v824_v0, %v655_v63 }
 0x16f   :  { %929 = vst [vmem:[%s1761_s4 + $0xe0] sm:$0xff] %v865_v1 }
 0x170   :  { %960 = vst [vmem:[%s1761_s4 + $0x1d8] sm:$0xff] %v896_v2 }
 0x174   :  { %v580_v3 = vpop.f32.mrf.mxu0  ;;  %v749_v4 = vpop.f32.mrf.mxu1 }
 0x175   :  { %v658_v5 = vpop.f32.mrf.mxu2  ;;  %v827_v6 = vpop.f32.mrf.mxu3  ;;  %v866_v7 = vpack.c.bf16 %v749_v4, %v580_v3 }
 0x176   :  { %v897_v8 = vpack.c.bf16 %v827_v6, %v658_v5 }
 0x177   :  { %930 = vst [vmem:[%s1761_s4 + $0xe8] sm:$0xff] %v866_v7 }
 0x178   :  { %961 = vst [vmem:[%s1761_s4 + $0x1e0] sm:$0xff] %v897_v8 }
 0x17c   :  { %v583_v9 = vpop.f32.mrf.mxu0  ;;  %v752_v10 = vpop.f32.mrf.mxu1 }
 0x17d   :  { %v660_v11 = vpop.f32.mrf.mxu2  ;;  %v829_v12 = vpop.f32.mrf.mxu3  ;;  %v867_v13 = vpack.c.bf16 %v752_v10, %v583_v9 }
 0x17e   :  { %v898_v15 = vpack.c.bf16 %v829_v12, %v660_v11 }
 0x17f   :  { %931 = vst [vmem:[%s1761_s4 + $0xf0] sm:$0xff] %v867_v13 }
 0x180   :  { %962 = vst [vmem:[%s1761_s4 + $0x1e8] sm:$0xff] %v898_v15 }
 0x184   :  { %v585_v17 = vpop.f32.mrf.mxu0  ;;  %v754_v18 = vpop.f32.mrf.mxu1 }
 0x185   :  { %v663_v19 = vpop.f32.mrf.mxu2  ;;  %v832_v20 = vpop.f32.mrf.mxu3  ;;  %v868_v21 = vpack.c.bf16 %v754_v18, %v585_v17 }
 0x186   :  { %v899_v22 = vpack.c.bf16 %v832_v20, %v663_v19 }
 0x187   :  { %932 = vst [vmem:[%s1761_s4 + $0xf8] sm:$0xff] %v868_v21 }
 0x188   :  { %963 = vst [vmem:[%s1761_s4 + $0x1f0] sm:$0xff] %v899_v22 }
 0x18d   :  { %v665_v23 = vpop.f32.mrf.mxu2  ;;  %v834_v24 = vpop.f32.mrf.mxu3 }
 0x18e   :  { %v900_v25 = vpack.c.bf16 %v834_v24, %v665_v23 }
 0x190   :  { %964 = vst [vmem:[%s1761_s4 + $0x1f8] sm:$0xff] %v900_v25 }

// kernel: generator_forward.16
= control target key start
LH: loop header
LB: loop body
LE: loop exit
PB: predicated region body
PF: predicated region fallthrough
CT: control target
= control target key end

     0   :  { %v308_v0 = vmov 0.0   ;;  %s390_s1 = inlined_call_operand.vmem [shape: f32[8,128], index: 1, kind: output, shape index: {0}]   ;;  %s391_s2 = inlined_call_operand.vmem [shape: f32[8,128], index: 2, kind: output, shape index: {1}]   ;;  %s392_s0 = inlined_call_operand.vmem [shape: bf16[256,128], index: 0, kind: input, shape index: {}]  }
   0x1   :  { %36 = vst [vmem:[%s390_s1] sm:$0xff] %v308_v0  ;;  %v229_v1 = vld [vmem:[%s392_s0] sm:$0xff]   ;;  %v292_v2 = vld [vmem:[%s392_s0 + $0x8] sm:$0xff]   ;;  %v293_v6 = vld [vmem:[%s392_s0 + $0x10] sm:$0xff]  }
   0x2   :  { %37 = vst [vmem:[%s391_s2] sm:$0xff] %v308_v0  ;;  %v230_v3 = vunpack.c.l.bf16 %v229_v1  ;;  %v231_v4 = vunpack.c.h.bf16 %v229_v1  ;;  %v234_v5 = vunpack.c.l.bf16 %v292_v2  ;;  %v235_v8 = vunpack.c.h.bf16 %v292_v2  ;;  %v294_v14 = vld [vmem:[%s392_s0 + $0x18] sm:$0xff]   ;;  %v295_v23 = vld [vmem:[%s392_s0 + $0x20] sm:$0xff]   ;;  %v296_v32 = vld [vmem:[%s392_s0 + $0x28] sm:$0xff]  }
   0x3   :  { %v238_v12 = vunpack.c.l.bf16 %v293_v6  ;;  %v239_v16 = vunpack.c.h.bf16 %v293_v6  ;;  %v242_v20 = vunpack.c.l.bf16 %v294_v14  ;;  %v243_v25 = vunpack.c.h.bf16 %v294_v14  ;;  %v297_v41 = vld [vmem:[%s392_s0 + $0x30] sm:$0xff]   ;;  %v298_v50 = vld [vmem:[%s392_s0 + $0x38] sm:$0xff]   ;;  %v299_v59 = vld [vmem:[%s392_s0 + $0x40] sm:$0xff]  }
   0x4   :  { %v103_v7 = vadd.f32 %v231_v4, %v230_v3  ;;  %v143_v9 = vmul.f32 %v230_v3, %v230_v3  ;;  %v144_v10 = vmul.f32 %v231_v4, %v231_v4  ;;  %v145_v13 = vmul.f32 %v234_v5, %v234_v5  ;;  %v300_v4 = vld [vmem:[%s392_s0 + $0x48] sm:$0xff]  }
   0x5   :  { %v146_v17 = vmul.f32 %v235_v8, %v235_v8  ;;  %v147_v21 = vmul.f32 %v238_v12, %v238_v12  ;;  %v148_v26 = vmul.f32 %v239_v16, %v239_v16  ;;  %v246_v29 = vunpack.c.l.bf16 %v295_v23 }
   0x6   :  { %v104_v11 = vadd.f32 %v234_v5, %v103_v7  ;;  %v175_v18 = vadd.f32 %v144_v10, %v143_v9  ;;  %v149_v30 = vmul.f32 %v242_v20, %v242_v20  ;;  %v247_v34 = vunpack.c.h.bf16 %v295_v23 }
   0x7   :  { %v150_v35 = vmul.f32 %v243_v25, %v243_v25  ;;  %v250_v38 = vunpack.c.l.bf16 %v296_v32  ;;  %v151_v39 = vmul.f32 %v246_v29, %v246_v29  ;;  %v251_v43 = vunpack.c.h.bf16 %v296_v32 }
   0x8   :  { %v105_v15 = vadd.f32 %v235_v8, %v104_v11  ;;  %v176_v22 = vadd.f32 %v175_v18, %v145_v13  ;;  %v152_v44 = vmul.f32 %v247_v34, %v247_v34  ;;  %v254_v47 = vunpack.c.l.bf16 %v297_v41  ;;  %v301_v13 = vld [vmem:[%s392_s0 + $0x50] sm:$0xff]  }
   0x9   :  { %v153_v48 = vmul.f32 %v250_v38, %v250_v38  ;;  %v255_v52 = vunpack.c.h.bf16 %v297_v41  ;;  %v154_v53 = vmul.f32 %v251_v43, %v251_v43  ;;  %v258_v56 = vunpack.c.l.bf16 %v298_v50 }
   0xa   :  { %v106_v19 = vadd.f32 %v238_v12, %v105_v15  ;;  %v177_v27 = vadd.f32 %v176_v22, %v146_v17  ;;  %v155_v57 = vmul.f32 %v254_v47, %v254_v47  ;;  %v259_v61 = vunpack.c.h.bf16 %v298_v50  ;;  %v302_v22 = vld [vmem:[%s392_s0 + $0x58] sm:$0xff]  }
   0xb   :  { %v156_v62 = vmul.f32 %v255_v52, %v255_v52  ;;  %v262_v1 = vunpack.c.l.bf16 %v299_v59  ;;  %v157_v2 = vmul.f32 %v258_v56, %v258_v56  ;;  %v263_v6 = vunpack.c.h.bf16 %v299_v59 }
   0xc   :  { %v107_v24 = vadd.f32 %v239_v16, %v106_v19  ;;  %v178_v31 = vadd.f32 %v177_v27, %v147_v21  ;;  %v158_v7 = vmul.f32 %v259_v61, %v259_v61  ;;  %v266_v10 = vunpack.c.l.bf16 %v300_v4 }
   0xd   :  { %v159_v11 = vmul.f32 %v262_v1, %v262_v1  ;;  %v267_v15 = vunpack.c.h.bf16 %v300_v4  ;;  %v160_v16 = vmul.f32 %v263_v6, %v263_v6  ;;  %v270_v19 = vunpack.c.l.bf16 %v301_v13 }
   0xe   :  { %v108_v28 = vadd.f32 %v242_v20, %v107_v24  ;;  %v179_v36 = vadd.f32 %v178_v31, %v148_v26  ;;  %v161_v20 = vmul.f32 %v266_v10, %v266_v10  ;;  %v271_v24 = vunpack.c.h.bf16 %v301_v13  ;;  %v303_v31 = vld [vmem:[%s392_s0 + $0x60] sm:$0xff]  }
  0x10   :  { %v109_v33 = vadd.f32 %v243_v25, %v108_v28  ;;  %v180_v40 = vadd.f32 %v179_v36, %v149_v30  ;;  %v162_v25 = vmul.f32 %v267_v15, %v267_v15  ;;  %v274_v28 = vunpack.c.l.bf16 %v302_v22 }
  0x12   :  { %v110_v37 = vadd.f32 %v246_v29, %v109_v33  ;;  %v181_v45 = vadd.f32 %v180_v40, %v150_v35  ;;  %v163_v29 = vmul.f32 %v270_v19, %v270_v19  ;;  %v275_v33 = vunpack.c.h.bf16 %v302_v22  ;;  %v304_v40 = vld [vmem:[%s392_s0 + $0x68] sm:$0xff]   ;;  %v102_v22 = vld [vmem:[%s390_s1] sm:$0x1] }
  0x14   :  { %v111_v42 = vadd.f32 %v247_v34, %v110_v37  ;;  %v182_v49 = vadd.f32 %v181_v45, %v151_v39  ;;  %v164_v34 = vmul.f32 %v271_v24, %v271_v24  ;;  %v278_v37 = vunpack.c.l.bf16 %v303_v31 }
  0x16   :  { %v112_v46 = vadd.f32 %v250_v38, %v111_v42  ;;  %v183_v54 = vadd.f32 %v182_v49, %v152_v44  ;;  %v165_v38 = vmul.f32 %v274_v28, %v274_v28  ;;  %v279_v42 = vunpack.c.h.bf16 %v303_v31  ;;  %v305_v49 = vld [vmem:[%s392_s0 + $0x70] sm:$0xff]  }
  0x18   :  { %v113_v51 = vadd.f32 %v251_v43, %v112_v46  ;;  %v184_v58 = vadd.f32 %v183_v54, %v153_v48  ;;  %v166_v43 = vmul.f32 %v275_v33, %v275_v33  ;;  %v282_v46 = vunpack.c.l.bf16 %v304_v40 }
  0x1a   :  { %v114_v55 = vadd.f32 %v254_v47, %v113_v51  ;;  %v185_v63 = vadd.f32 %v184_v58, %v154_v53  ;;  %v167_v47 = vmul.f32 %v278_v37, %v278_v37  ;;  %v283_v51 = vunpack.c.h.bf16 %v304_v40  ;;  %v306_v58 = vld [vmem:[%s392_s0 + $0x78] sm:$0xff]  }
  0x1b   :  { %v291_v4 = vunpack.c.h.bf16 %v306_v58 }
  0x1c   :  { %v115_v60 = vadd.f32 %v255_v52, %v114_v55  ;;  %v186_v3 = vadd.f32 %v185_v63, %v155_v57  ;;  %v168_v52 = vmul.f32 %v279_v42, %v279_v42  ;;  %v286_v55 = vunpack.c.l.bf16 %v305_v49 }
  0x1e   :  { %v116_v0 = vadd.f32 %v258_v56, %v115_v60  ;;  %v187_v8 = vadd.f32 %v186_v3, %v156_v62  ;;  %v169_v56 = vmul.f32 %v282_v46, %v282_v46  ;;  %v287_v60 = vunpack.c.h.bf16 %v305_v49 }
  0x20   :  { %v117_v5 = vadd.f32 %v259_v61, %v116_v0  ;;  %v188_v12 = vadd.f32 %v187_v8, %v157_v2  ;;  %v170_v61 = vmul.f32 %v283_v51, %v283_v51  ;;  %v290_v0 = vunpack.c.l.bf16 %v306_v58 }
  0x22   :  { %v118_v9 = vadd.f32 %v262_v1, %v117_v5  ;;  %v189_v17 = vadd.f32 %v188_v12, %v158_v7  ;;  %v171_v1 = vmul.f32 %v286_v55, %v286_v55  ;;  %v172_v5 = vmul.f32 %v287_v60, %v287_v60 }
  0x23   :  { %v173_v8 = vmul.f32 %v290_v0, %v290_v0 }
  0x24   :  { %v119_v14 = vadd.f32 %v263_v6, %v118_v9  ;;  %v190_v21 = vadd.f32 %v189_v17, %v159_v11  ;;  %v174_v11 = vmul.f32 %v291_v4, %v291_v4 }
  0x26   :  { %v120_v18 = vadd.f32 %v266_v10, %v119_v14  ;;  %v191_v26 = vadd.f32 %v190_v21, %v160_v16 }
  0x28   :  { %v121_v23 = vadd.f32 %v267_v15, %v120_v18  ;;  %v192_v30 = vadd.f32 %v191_v26, %v161_v20 }
  0x2a   :  { %v122_v27 = vadd.f32 %v270_v19, %v121_v23  ;;  %v193_v35 = vadd.f32 %v192_v30, %v162_v25 }
  0x2c   :  { %v123_v32 = vadd.f32 %v271_v24, %v122_v27  ;;  %v194_v39 = vadd.f32 %v193_v35, %v163_v29 }
  0x2e   :  { %v124_v36 = vadd.f32 %v274_v28, %v123_v32  ;;  %v195_v44 = vadd.f32 %v194_v39, %v164_v34  ;;  %v142_v28 = vld [vmem:[%s391_s2] sm:$0x1] }
  0x30   :  { %v125_v41 = vadd.f32 %v275_v33, %v124_v36  ;;  %v196_v48 = vadd.f32 %v195_v44, %v165_v38 }
  0x32   :  { %v126_v45 = vadd.f32 %v278_v37, %v125_v41  ;;  %v197_v53 = vadd.f32 %v196_v48, %v166_v43 }
  0x34   :  { %v127_v50 = vadd.f32 %v279_v42, %v126_v45  ;;  %v198_v57 = vadd.f32 %v197_v53, %v167_v47 }
  0x36   :  { %v128_v54 = vadd.f32 %v282_v46, %v127_v50  ;;  %v199_v62 = vadd.f32 %v198_v57, %v168_v52 }
  0x38   :  { %v129_v59 = vadd.f32 %v283_v51, %v128_v54  ;;  %v200_v2 = vadd.f32 %v199_v62, %v169_v56 }
  0x3a   :  { %v130_v63 = vadd.f32 %v286_v55, %v129_v59  ;;  %v201_v6 = vadd.f32 %v200_v2, %v170_v61 }
  0x3c   :  { %v131_v3 = vadd.f32 %v287_v60, %v130_v63  ;;  %v202_v9 = vadd.f32 %v201_v6, %v171_v1 }
  0x3e   :  { %v132_v7 = vadd.f32 %v290_v0, %v131_v3  ;;  %v203_v12 = vadd.f32 %v202_v9, %v172_v5 }
  0x40   :  { %v133_v10 = vadd.f32 %v291_v4, %v132_v7  ;;  %v204_v14 = vadd.f32 %v203_v12, %v173_v8 }
  0x42   :  { %v134_v13 = vrot.slane %v133_v10, 4  ;;  %v205_v16 = vadd.f32 %v204_v14, %v174_v11 }
  0x44   :  { %v135_v15 = vadd.f32 %v134_v13, %v133_v10  ;;  %v206_v18 = vrot.slane %v205_v16, 4 }
  0x46   :  { %v136_v17 = vrot.slane %v135_v15, 2  ;;  %v207_v20 = vadd.f32 %v206_v18, %v205_v16 }
  0x48   :  { %v137_v19 = vadd.f32 %v136_v17, %v135_v15  ;;  %v208_v23 = vrot.slane %v207_v20, 2 }
  0x4a   :  { %v138_v21 = vrot.slane %v137_v19, 1  ;;  %v209_v25 = vadd.f32 %v208_v23, %v207_v20 }
  0x4c   :  { %v139_v24 = vadd.f32 %v138_v21, %v137_v19  ;;  %v210_v27 = vrot.slane %v209_v25, 1 }
  0x4e   :  { %v140_v26 = vadd.f32 %v139_v24, %v102_v22  ;;  %v211_v29 = vadd.f32 %v210_v27, %v209_v25 }
  0x50   :  { %141 = vst [vmem:[%s390_s1] sm:$0x1] %v140_v26  ;;  %v212_v30 = vadd.f32 %v211_v29, %v142_v28 }
  0x52   :  { %213 = vst [vmem:[%s391_s2] sm:$0x1] %v212_v30 }

// kernel: generator_forward.17
= control target key start
LH: loop header
LB: loop body
LE: loop exit
PB: predicated region body
PF: predicated region fallthrough
CT: control target
= control target key end

     0   :  { %vm1442_vm0 = vcmask 130048   ;;  %vm2732_vm1 = vcmask 388096   ;;  %s5892_s3 = inlined_call_operand.vmem [shape: bf16[16,48], index: 3, kind: input, shape index: {}]   ;;  %s5893_s0 = inlined_call_operand.vmem [shape: bf16[2048,16], index: 0, kind: input, shape index: {}]   ;;  %s5894_s1 = inlined_call_operand.vmem [shape: f32[1,16], index: 1, kind: input, shape index: {}]   ;;  %s5895_s2 = inlined_call_operand.vmem [shape: f32[1,16], index: 2, kind: input, shape index: {}]   ;;  %s5896_s4 = inlined_call_operand.vmem [shape: bf16[2048,48], index: 4, kind: output, shape index: {}]  }
   0x1   :  { %v3125_v0 = vld [vmem:[%s5892_s3] sm:$0xff]  ;;  %v3638_v25 = vld [vmem:[%s5893_s0 + $0x8] sm:$0xff]  }
   0x2   :  { %v3127_v1 = vld [vmem:[%s5893_s0] sm:$0xff]   ;;  %1834 = vmatpush.bf16.msra.mxu0 %v3125_v0  ;;  %3765 = vmatpush.bf16.msra.mxu1 %v3125_v0  ;;  %v3670_v34 = vld [vmem:[%s5893_s0 + $0x108] sm:$0xff]   ;;  %v3132_v38 = vunpack.c.l.bf16 %v3638_v25  ;;  %v3133_v45 = vunpack.c.h.bf16 %v3638_v25 }
   0x3   :  { %v3128_v2 = vunpack.c.l.bf16 %v3127_v1  ;;  %v3129_v3 = vunpack.c.h.bf16 %v3127_v1  ;;  %v3810_v4 = vld [vmem:[%s5894_s1] ss:$0 sm:$0xff]  ;;  %3766 = vmatpush.bf16.msra.mxu2 %v3125_v0  ;;  %3767 = vmatpush.bf16.msra.mxu3 %v3125_v0  ;;  %v3702_v39 = vld [vmem:[%s5893_s0 + $0x208] sm:$0xff]   ;;  %v3260_v47 = vunpack.c.l.bf16 %v3670_v34  ;;  %v3261_v51 = vunpack.c.h.bf16 %v3670_v34 }
   0x4   :  { %v3815_v5 = vld [vmem:[%s5895_s2] ss:$0 sm:$0xff]  ;;  %v536_v46 = vmul.f32 %v3810_v4, %v3132_v38  ;;  %v3734_v48 = vld [vmem:[%s5893_s0 + $0x308] sm:$0xff]   ;;  %v3388_v52 = vunpack.c.l.bf16 %v3702_v39  ;;  %v537_v53 = vmul.f32 %v3810_v4, %v3133_v45  ;;  %v3389_v55 = vunpack.c.h.bf16 %v3702_v39 }
   0x5   :  { %v3669_v6 = vld [vmem:[%s5893_s0 + $0x100] sm:$0xff]   ;;  %v534_v9 = vmul.f32 %v3810_v4, %v3128_v2  ;;  %v535_v10 = vmul.f32 %v3810_v4, %v3129_v3  ;;  %v600_v54 = vmul.f32 %v3810_v4, %v3260_v47  ;;  %v601_v56 = vmul.f32 %v3810_v4, %v3261_v51 }
   0x6   :  { %v3701_v7 = vld [vmem:[%s5893_s0 + $0x200] sm:$0xff]   ;;  %v3256_v11 = vunpack.c.l.bf16 %v3669_v6  ;;  %v3257_v12 = vunpack.c.h.bf16 %v3669_v6  ;;  %v664_v57 = vmul.f32 %v3810_v4, %v3388_v52  ;;  %v3516_v58 = vunpack.c.l.bf16 %v3734_v48 }
   0x7   :  { %v3733_v8 = vld [vmem:[%s5893_s0 + $0x300] sm:$0xff]   ;;  %v3384_v13 = vunpack.c.l.bf16 %v3701_v7  ;;  %v3385_v14 = vunpack.c.h.bf16 %v3701_v7  ;;  %v794_v17 = vadd.f32 %v3815_v5, %v534_v9  ;;  %v795_v18 = vadd.f32 %v3815_v5, %v535_v10 }
   0x8   :  { %v3512_v15 = vunpack.c.l.bf16 %v3733_v8  ;;  %v3513_v16 = vunpack.c.h.bf16 %v3733_v8  ;;  %v598_v19 = vmul.f32 %v3810_v4, %v3256_v11  ;;  %v599_v20 = vmul.f32 %v3810_v4, %v3257_v12  ;;  %v3639_v11 = vld [vmem:[%s5893_s0 + $0x10] sm:$0xff]  }
   0x9   :  { %v662_v21 = vmul.f32 %v3810_v4, %v3384_v13  ;;  %v663_v22 = vmul.f32 %v3810_v4, %v3385_v14  ;;  %v1050_v26 = vmax.f32 %v794_v17, 0.0  ;;  %v1051_v27 = vmax.f32 %v795_v18, 0.0 }
   0xa   :  { %v726_v23 = vmul.f32 %v3810_v4, %v3512_v15  ;;  %v727_v24 = vmul.f32 %v3810_v4, %v3513_v16  ;;  %v858_v28 = vadd.f32 %v3815_v5, %v598_v19  ;;  %v859_v29 = vadd.f32 %v3815_v5, %v599_v20  ;;  %v3671_v16 = vld [vmem:[%s5893_s0 + $0x110] sm:$0xff]  }
   0xb   :  { %v922_v30 = vadd.f32 %v3815_v5, %v662_v21  ;;  %v923_v31 = vadd.f32 %v3815_v5, %v663_v22  ;;  %v1306_v35 = vpack.c.bf16 %v1051_v27, %v1050_v26  ;;  %v3517_v59 = vunpack.c.h.bf16 %v3734_v48  ;;  %v3703_v19 = vld [vmem:[%s5893_s0 + $0x210] sm:$0xff]  }
   0xc   :  { %v986_v32 = vadd.f32 %v3815_v5, %v726_v23  ;;  %v987_v33 = vadd.f32 %v3815_v5, %v727_v24  ;;  %v1114_v36 = vmax.f32 %v858_v28, 0.0  ;;  %v1115_v37 = vmax.f32 %v859_v29, 0.0  ;;  %v3735_v23 = vld [vmem:[%s5893_s0 + $0x310] sm:$0xff]  }
   0xd   :  { %v1178_v40 = vmax.f32 %v922_v30, 0.0  ;;  %v1179_v41 = vmax.f32 %v923_v31, 0.0  ;;  %2997 = vmatmul.msk.bf16.vlgmr.msra.gmra.mxu0 %vm1442_vm0, %v1306_v35  ;;  %v796_v60 = vadd.f32 %v3815_v5, %v536_v46  ;;  %v797_v61 = vadd.f32 %v3815_v5, %v537_v53  ;;  %v3640_v53 = vld [vmem:[%s5893_s0 + $0x18] sm:$0xff]  }
   0xe   :  { %v1242_v42 = vmax.f32 %v986_v32, 0.0  ;;  %v1243_v43 = vmax.f32 %v987_v33, 0.0  ;;  %v1338_v44 = vpack.c.bf16 %v1115_v37, %v1114_v36  ;;  %v665_v62 = vmul.f32 %v3810_v4, %v3389_v55 }
   0xf   :  { %v1370_v49 = vpack.c.bf16 %v1179_v41, %v1178_v40  ;;  %v728_v63 = vmul.f32 %v3810_v4, %v3516_v58  ;;  %v729_v0 = vmul.f32 %v3810_v4, %v3517_v59  ;;  %v860_v1 = vadd.f32 %v3815_v5, %v600_v54  ;;  %v3672_v58 = vld [vmem:[%s5893_s0 + $0x118] sm:$0xff]  }
  0x10   :  { %v1402_v50 = vpack.c.bf16 %v1243_v43, %v1242_v42  ;;  %3029 = vmatmul.msk.bf16.vlgmr.msra.gmra.mxu1 %vm1442_vm0, %v1338_v44  ;;  %v861_v2 = vadd.f32 %v3815_v5, %v601_v56  ;;  %v924_v3 = vadd.f32 %v3815_v5, %v664_v57  ;;  %v925_v6 = vadd.f32 %v3815_v5, %v665_v62  ;;  %v3704_v59 = vld [vmem:[%s5893_s0 + $0x218] sm:$0xff]  }
  0x11   :  { %3061 = vmatmul.msk.bf16.vlgmr.msra.gmra.mxu2 %vm1442_vm0, %v1370_v49  ;;  %v988_v7 = vadd.f32 %v3815_v5, %v728_v63  ;;  %v989_v8 = vadd.f32 %v3815_v5, %v729_v0  ;;  %v1052_v9 = vmax.f32 %v796_v60, 0.0  ;;  %v1053_v10 = vmax.f32 %v797_v61, 0.0  ;;  %v3736_v63 = vld [vmem:[%s5893_s0 + $0x318] sm:$0xff]  }
  0x12   :  { %3093 = vmatmul.msk.bf16.vlgmr.msra.gmra.mxu3 %vm1442_vm0, %v1402_v50  ;;  %v1116_v12 = vmax.f32 %v860_v1, 0.0  ;;  %v1117_v13 = vmax.f32 %v861_v2, 0.0  ;;  %v1180_v14 = vmax.f32 %v924_v3, 0.0  ;;  %v1181_v15 = vmax.f32 %v925_v6, 0.0 }
  0x13   :  { %v1244_v17 = vmax.f32 %v988_v7, 0.0  ;;  %v1245_v18 = vmax.f32 %v989_v8, 0.0  ;;  %v1307_v20 = vpack.c.bf16 %v1053_v10, %v1052_v9  ;;  %v3136_v21 = vunpack.c.l.bf16 %v3639_v11 }
  0x14   :  { %v3137_v22 = vunpack.c.h.bf16 %v3639_v11  ;;  %v3264_v24 = vunpack.c.l.bf16 %v3671_v16  ;;  %v3265_v25 = vunpack.c.h.bf16 %v3671_v16  ;;  %v1339_v26 = vpack.c.bf16 %v1117_v13, %v1116_v12 }
  0x15   :  { %v1371_v27 = vpack.c.bf16 %v1181_v15, %v1180_v14  ;;  %v3392_v28 = vunpack.c.l.bf16 %v3703_v19  ;;  %v1403_v29 = vpack.c.bf16 %v1245_v18, %v1244_v17  ;;  %v3393_v30 = vunpack.c.h.bf16 %v3703_v19 }
  0x16   :  { %v3520_v31 = vunpack.c.l.bf16 %v3735_v23  ;;  %v3521_v32 = vunpack.c.h.bf16 %v3735_v23  ;;  %v538_v33 = vmul.f32 %v3810_v4, %v3136_v21  ;;  %v539_v34 = vmul.f32 %v3810_v4, %v3137_v22 }
  0x17   :  { %v602_v35 = vmul.f32 %v3810_v4, %v3264_v24  ;;  %v603_v36 = vmul.f32 %v3810_v4, %v3265_v25  ;;  %v666_v37 = vmul.f32 %v3810_v4, %v3392_v28  ;;  %v667_v38 = vmul.f32 %v3810_v4, %v3393_v30 }
  0x18   :  { %v730_v39 = vmul.f32 %v3810_v4, %v3520_v31  ;;  %v731_v40 = vmul.f32 %v3810_v4, %v3521_v32  ;;  %v798_v41 = vadd.f32 %v3815_v5, %v538_v33  ;;  %v799_v42 = vadd.f32 %v3815_v5, %v539_v34  ;;  %v3673_v34 = vld [vmem:[%s5893_s0 + $0x120] sm:$0xff]  }
  0x19   :  { %v862_v43 = vadd.f32 %v3815_v5, %v602_v35  ;;  %v863_v44 = vadd.f32 %v3815_v5, %v603_v36  ;;  %v926_v45 = vadd.f32 %v3815_v5, %v666_v37  ;;  %v927_v46 = vadd.f32 %v3815_v5, %v667_v38  ;;  %v3705_v37 = vld [vmem:[%s5893_s0 + $0x220] sm:$0xff]  }
  0x1a   :  { %v990_v47 = vadd.f32 %v3815_v5, %v730_v39  ;;  %v991_v48 = vadd.f32 %v3815_v5, %v731_v40  ;;  %v1054_v49 = vmax.f32 %v798_v41, 0.0  ;;  %v1055_v50 = vmax.f32 %v799_v42, 0.0  ;;  %v3737_v41 = vld [vmem:[%s5893_s0 + $0x320] sm:$0xff]  }
  0x1b   :  { %v1118_v51 = vmax.f32 %v862_v43, 0.0  ;;  %v1119_v52 = vmax.f32 %v863_v44, 0.0  ;;  %v1182_v54 = vmax.f32 %v926_v45, 0.0  ;;  %v1183_v55 = vmax.f32 %v927_v46, 0.0 }
  0x1c   :  { %v1246_v56 = vmax.f32 %v990_v47, 0.0  ;;  %v1247_v57 = vmax.f32 %v991_v48, 0.0  ;;  %v1308_v60 = vpack.c.bf16 %v1055_v50, %v1054_v49  ;;  %v3140_v61 = vunpack.c.l.bf16 %v3640_v53 }
  0x1d   :  { %2998 = vmatmul.msk.bf16.gmra.mxu0 %vm1442_vm0, %v1307_v20  ;;  %v3141_v62 = vunpack.c.h.bf16 %v3640_v53  ;;  %v1340_v0 = vpack.c.bf16 %v1119_v52, %v1118_v51  ;;  %v3268_v1 = vunpack.c.l.bf16 %v3672_v58  ;;  %v3269_v2 = vunpack.c.h.bf16 %v3672_v58 }
  0x1e   :  { %v3396_v3 = vunpack.c.l.bf16 %v3704_v59  ;;  %v3397_v6 = vunpack.c.h.bf16 %v3704_v59  ;;  %v1372_v7 = vpack.c.bf16 %v1183_v55, %v1182_v54  ;;  %v1404_v8 = vpack.c.bf16 %v1247_v57, %v1246_v56 }
  0x1f   :  { %v3524_v9 = vunpack.c.l.bf16 %v3736_v63  ;;  %v3525_v10 = vunpack.c.h.bf16 %v3736_v63  ;;  %v540_v11 = vmul.f32 %v3810_v4, %v3140_v61  ;;  %v541_v12 = vmul.f32 %v3810_v4, %v3141_v62 }
  0x20   :  { %3030 = vmatmul.msk.bf16.gmra.mxu1 %vm1442_vm0, %v1339_v26  ;;  %v604_v13 = vmul.f32 %v3810_v4, %v3268_v1  ;;  %v605_v14 = vmul.f32 %v3810_v4, %v3269_v2  ;;  %v668_v15 = vmul.f32 %v3810_v4, %v3396_v3  ;;  %v669_v16 = vmul.f32 %v3810_v4, %v3397_v6 }
  0x21   :  { %3062 = vmatmul.msk.bf16.gmra.mxu2 %vm1442_vm0, %v1371_v27  ;;  %v732_v17 = vmul.f32 %v3810_v4, %v3524_v9  ;;  %v733_v18 = vmul.f32 %v3810_v4, %v3525_v10  ;;  %v800_v19 = vadd.f32 %v3815_v5, %v540_v11  ;;  %v801_v20 = vadd.f32 %v3815_v5, %v541_v12  ;;  %v3674_v10 = vld [vmem:[%s5893_s0 + $0x128] sm:$0xff]  }
  0x22   :  { %3094 = vmatmul.msk.bf16.gmra.mxu3 %vm1442_vm0, %v1403_v29  ;;  %v864_v21 = vadd.f32 %v3815_v5, %v604_v13  ;;  %v865_v22 = vadd.f32 %v3815_v5, %v605_v14  ;;  %v928_v23 = vadd.f32 %v3815_v5, %v668_v15  ;;  %v929_v24 = vadd.f32 %v3815_v5, %v669_v16  ;;  %v3641_v29 = vld [vmem:[%s5893_s0 + $0x20] sm:$0xff]   ;;  %v3706_v15 = vld [vmem:[%s5893_s0 + $0x228] sm:$0xff]  }
  0x23   :  { %v992_v25 = vadd.f32 %v3815_v5, %v732_v17  ;;  %v993_v26 = vadd.f32 %v3815_v5, %v733_v18  ;;  %v1056_v27 = vmax.f32 %v800_v19, 0.0  ;;  %v1057_v28 = vmax.f32 %v801_v20, 0.0  ;;  %v3738_v19 = vld [vmem:[%s5893_s0 + $0x328] sm:$0xff]  }
  0x24   :  { %v1120_v30 = vmax.f32 %v864_v21, 0.0  ;;  %v1121_v31 = vmax.f32 %v865_v22, 0.0  ;;  %v1184_v32 = vmax.f32 %v928_v23, 0.0  ;;  %v1185_v33 = vmax.f32 %v929_v24, 0.0 }
  0x25   :  { %v1248_v35 = vmax.f32 %v992_v25, 0.0  ;;  %v1249_v36 = vmax.f32 %v993_v26, 0.0  ;;  %v1309_v38 = vpack.c.bf16 %v1057_v28, %v1056_v27  ;;  %v3144_v39 = vunpack.c.l.bf16 %v3641_v29 }
  0x26   :  { %v3145_v40 = vunpack.c.h.bf16 %v3641_v29  ;;  %v3272_v42 = vunpack.c.l.bf16 %v3673_v34  ;;  %v1341_v43 = vpack.c.bf16 %v1121_v31, %v1120_v30  ;;  %v1373_v44 = vpack.c.bf16 %v1185_v33, %v1184_v32 }
  0x27   :  { %v3273_v45 = vunpack.c.h.bf16 %v3673_v34  ;;  %v3400_v46 = vunpack.c.l.bf16 %v3705_v37  ;;  %v1405_v47 = vpack.c.bf16 %v1249_v36, %v1248_v35  ;;  %v3401_v48 = vunpack.c.h.bf16 %v3705_v37 }
  0x28   :  { %v3528_v49 = vunpack.c.l.bf16 %v3737_v41  ;;  %v3529_v50 = vunpack.c.h.bf16 %v3737_v41  ;;  %v542_v51 = vmul.f32 %v3810_v4, %v3144_v39  ;;  %v543_v52 = vmul.f32 %v3810_v4, %v3145_v40 }
  0x29   :  { %v606_v53 = vmul.f32 %v3810_v4, %v3272_v42  ;;  %v607_v54 = vmul.f32 %v3810_v4, %v3273_v45  ;;  %v670_v55 = vmul.f32 %v3810_v4, %v3400_v46  ;;  %v671_v56 = vmul.f32 %v3810_v4, %v3401_v48 }
  0x2a   :  { %v734_v57 = vmul.f32 %v3810_v4, %v3528_v49  ;;  %v735_v58 = vmul.f32 %v3810_v4, %v3529_v50  ;;  %v802_v59 = vadd.f32 %v3815_v5, %v542_v51  ;;  %v3276_v20 = vunpack.c.l.bf16 %v3674_v10  ;;  %v3643_v49 = vld [vmem:[%s5893_s0 + $0x30] sm:$0xff]  }
  0x2b   :  { %v866_v61 = vadd.f32 %v3815_v5, %v606_v53  ;;  %v867_v62 = vadd.f32 %v3815_v5, %v607_v54  ;;  %v930_v63 = vadd.f32 %v3815_v5, %v670_v55  ;;  %v3277_v21 = vunpack.c.h.bf16 %v3674_v10  ;;  %v3675_v54 = vld [vmem:[%s5893_s0 + $0x130] sm:$0xff]  }
  0x2c   :  { %v994_v1 = vadd.f32 %v3815_v5, %v734_v57  ;;  %v995_v2 = vadd.f32 %v3815_v5, %v735_v58  ;;  %v1058_v3 = vmax.f32 %v802_v59, 0.0  ;;  %v3404_v23 = vunpack.c.l.bf16 %v3706_v15  ;;  %v3707_v55 = vld [vmem:[%s5893_s0 + $0x230] sm:$0xff]  }
  0x2d   :  { %2999 = vmatmul.msk.bf16.gmra.mxu0 %vm1442_vm0, %v1308_v60  ;;  %v803_v60 = vadd.f32 %v3815_v5, %v543_v52  ;;  %v1123_v9 = vmax.f32 %v867_v62, 0.0  ;;  %v1186_v11 = vmax.f32 %v930_v63, 0.0  ;;  %v3405_v24 = vunpack.c.h.bf16 %v3706_v15  ;;  %v3739_v59 = vld [vmem:[%s5893_s0 + $0x330] sm:$0xff]  }
  0x2e   :  { %v1250_v13 = vmax.f32 %v994_v1, 0.0  ;;  %v1251_v14 = vmax.f32 %v995_v2, 0.0  ;;  %v3532_v27 = vunpack.c.l.bf16 %v3738_v19  ;;  %v3533_v28 = vunpack.c.h.bf16 %v3738_v19 }
  0x2f   :  { %v1059_v6 = vmax.f32 %v803_v60, 0.0  ;;  %v608_v31 = vmul.f32 %v3810_v4, %v3276_v20  ;;  %v609_v32 = vmul.f32 %v3810_v4, %v3277_v21  ;;  %v672_v33 = vmul.f32 %v3810_v4, %v3404_v23 }
  0x30   :  { %3031 = vmatmul.msk.bf16.gmra.mxu1 %vm1442_vm0, %v1340_v0  ;;  %v931_v0 = vadd.f32 %v3815_v5, %v671_v56  ;;  %v1406_v26 = vpack.c.bf16 %v1251_v14, %v1250_v13  ;;  %v673_v34 = vmul.f32 %v3810_v4, %v3405_v24  ;;  %v736_v35 = vmul.f32 %v3810_v4, %v3532_v27 }
  0x31   :  { %3063 = vmatmul.msk.bf16.gmra.mxu2 %vm1442_vm0, %v1372_v7  ;;  %v3642_v7 = vld [vmem:[%s5893_s0 + $0x28] sm:$0xff]   ;;  %v1310_v16 = vpack.c.bf16 %v1059_v6, %v1058_v3  ;;  %v737_v36 = vmul.f32 %v3810_v4, %v3533_v28  ;;  %v868_v39 = vadd.f32 %v3815_v5, %v608_v31  ;;  %v869_v40 = vadd.f32 %v3815_v5, %v609_v32  ;;  %v3676_v28 = vld [vmem:[%s5893_s0 + $0x138] sm:$0xff]  }
  0x32   :  { %3095 = vmatmul.msk.bf16.gmra.mxu3 %vm1442_vm0, %v1404_v8  ;;  %v1122_v8 = vmax.f32 %v866_v61, 0.0  ;;  %v1187_v12 = vmax.f32 %v931_v0, 0.0  ;;  %v3148_v17 = vunpack.c.l.bf16 %v3642_v7  ;;  %v3149_v18 = vunpack.c.h.bf16 %v3642_v7 }
  0x33   :  { %v932_v41 = vadd.f32 %v3815_v5, %v672_v33  ;;  %v933_v42 = vadd.f32 %v3815_v5, %v673_v34  ;;  %v1125_v48 = vmax.f32 %v869_v40, 0.0  ;;  %v3152_v57 = vunpack.c.l.bf16 %v3643_v49  ;;  %v3708_v33 = vld [vmem:[%s5893_s0 + $0x238] sm:$0xff]  }
  0x34   :  { %v1342_v22 = vpack.c.bf16 %v1123_v9, %v1122_v8  ;;  %v1374_v25 = vpack.c.bf16 %v1187_v12, %v1186_v11  ;;  %v544_v29 = vmul.f32 %v3810_v4, %v3148_v17  ;;  %v545_v30 = vmul.f32 %v3810_v4, %v3149_v18 }
  0x35   :  { %v1188_v50 = vmax.f32 %v932_v41, 0.0  ;;  %v1189_v51 = vmax.f32 %v933_v42, 0.0  ;;  %v3153_v58 = vunpack.c.h.bf16 %v3643_v49  ;;  %v3280_v62 = vunpack.c.l.bf16 %v3675_v54 }
  0x36   :  { %v804_v37 = vadd.f32 %v3815_v5, %v544_v29  ;;  %v3281_v63 = vunpack.c.h.bf16 %v3675_v54  ;;  %v3408_v0 = vunpack.c.l.bf16 %v3707_v55  ;;  %v3409_v2 = vunpack.c.h.bf16 %v3707_v55 }
  0x37   :  { %v1375_v61 = vpack.c.bf16 %v1189_v51, %v1188_v50  ;;  %v3536_v3 = vunpack.c.l.bf16 %v3739_v59  ;;  %v3537_v6 = vunpack.c.h.bf16 %v3739_v59  ;;  %v546_v7 = vmul.f32 %v3810_v4, %v3152_v57 }
  0x38   :  { %v1060_v45 = vmax.f32 %v804_v37, 0.0  ;;  %v547_v8 = vmul.f32 %v3810_v4, %v3153_v58  ;;  %v610_v9 = vmul.f32 %v3810_v4, %v3280_v62  ;;  %v611_v10 = vmul.f32 %v3810_v4, %v3281_v63  ;;  %v3740_v37 = vld [vmem:[%s5893_s0 + $0x338] sm:$0xff]  }
  0x39   :  { %v674_v11 = vmul.f32 %v3810_v4, %v3408_v0  ;;  %v675_v12 = vmul.f32 %v3810_v4, %v3409_v2  ;;  %v738_v13 = vmul.f32 %v3810_v4, %v3536_v3  ;;  %v739_v14 = vmul.f32 %v3810_v4, %v3537_v6  ;;  %v3645_v3 = vld [vmem:[%s5893_s0 + $0x40] sm:$0xff]  }
  0x3a   :  { %v806_v15 = vadd.f32 %v3815_v5, %v546_v7  ;;  %v870_v17 = vadd.f32 %v3815_v5, %v610_v9  ;;  %v871_v18 = vadd.f32 %v3815_v5, %v611_v10  ;;  %v3412_v41 = vunpack.c.l.bf16 %v3708_v33  ;;  %v3677_v10 = vld [vmem:[%s5893_s0 + $0x140] sm:$0xff]  }
  0x3b   :  { %v934_v19 = vadd.f32 %v3815_v5, %v674_v11  ;;  %v935_v20 = vadd.f32 %v3815_v5, %v675_v12  ;;  %v998_v21 = vadd.f32 %v3815_v5, %v738_v13  ;;  %v3413_v42 = vunpack.c.h.bf16 %v3708_v33  ;;  %v3709_v11 = vld [vmem:[%s5893_s0 + $0x240] sm:$0xff]  }
  0x3c   :  { %v1062_v23 = vmax.f32 %v806_v15, 0.0  ;;  %v1127_v27 = vmax.f32 %v871_v18, 0.0  ;;  %v676_v51 = vmul.f32 %v3810_v4, %v3412_v41  ;;  %v3160_v13 = vunpack.c.l.bf16 %v3645_v3  ;;  %v3741_v15 = vld [vmem:[%s5893_s0 + $0x340] sm:$0xff]  }
  0x3d   :  { %3000 = vmatmul.msk.bf16.gmra.mxu0 %vm1442_vm0, %v1309_v38  ;;  %v805_v38 = vadd.f32 %v3815_v5, %v545_v30  ;;  %v1190_v29 = vmax.f32 %v934_v19, 0.0  ;;  %v1191_v30 = vmax.f32 %v935_v20, 0.0  ;;  %v1254_v31 = vmax.f32 %v998_v21, 0.0 }
  0x3e   :  { %v936_v59 = vadd.f32 %v3815_v5, %v676_v51  ;;  %v3288_v18 = vunpack.c.l.bf16 %v3677_v10  ;;  %v3289_v19 = vunpack.c.h.bf16 %v3677_v10  ;;  %v3416_v20 = vunpack.c.l.bf16 %v3709_v11 }
  0x3f   :  { %v1061_v46 = vmax.f32 %v805_v38, 0.0  ;;  %v3284_v38 = vunpack.c.l.bf16 %v3676_v28 }
  0x40   :  { %3032 = vmatmul.msk.bf16.gmra.mxu1 %vm1442_vm0, %v1341_v43  ;;  %v996_v43 = vadd.f32 %v3815_v5, %v736_v35  ;;  %v1192_v6 = vmax.f32 %v936_v59, 0.0 }
  0x41   :  { %3064 = vmatmul.msk.bf16.gmra.mxu2 %vm1442_vm0, %v1373_v44  ;;  %v997_v44 = vadd.f32 %v3815_v5, %v737_v36  ;;  %v1311_v56 = vpack.c.bf16 %v1061_v46, %v1060_v45  ;;  %v3540_v45 = vunpack.c.l.bf16 %v3740_v37  ;;  %v3541_v46 = vunpack.c.h.bf16 %v3740_v37 }
  0x42   :  { %3096 = vmatmul.msk.bf16.gmra.mxu3 %vm1442_vm0, %v1405_v47  ;;  %v1124_v47 = vmax.f32 %v868_v39, 0.0  ;;  %v1252_v52 = vmax.f32 %v996_v43, 0.0  ;;  %v3285_v39 = vunpack.c.h.bf16 %v3676_v28  ;;  %v1376_v43 = vpack.c.bf16 %v1191_v30, %v1190_v29 }
  0x43   :  { %v1253_v53 = vmax.f32 %v997_v44, 0.0  ;;  %v612_v49 = vmul.f32 %v3810_v4, %v3284_v38  ;;  %v741_v54 = vmul.f32 %v3810_v4, %v3541_v46  ;;  %v615_v28 = vmul.f32 %v3810_v4, %v3289_v19 }
  0x44   :  { %v1343_v60 = vpack.c.bf16 %v1125_v48, %v1124_v47  ;;  %v613_v50 = vmul.f32 %v3810_v4, %v3285_v39  ;;  %v678_v29 = vmul.f32 %v3810_v4, %v3416_v20 }
  0x45   :  { %v1407_v1 = vpack.c.bf16 %v1253_v53, %v1252_v52  ;;  %v677_v52 = vmul.f32 %v3810_v4, %v3413_v42  ;;  %v740_v53 = vmul.f32 %v3810_v4, %v3540_v45  ;;  %v872_v57 = vadd.f32 %v3815_v5, %v612_v49 }
  0x46   :  { %v873_v58 = vadd.f32 %v3815_v5, %v613_v50  ;;  %v1001_v62 = vadd.f32 %v3815_v5, %v741_v54  ;;  %v938_v37 = vadd.f32 %v3815_v5, %v678_v29 }
  0x48   :  { %v1129_v2 = vmax.f32 %v873_v58, 0.0  ;;  %v1257_v9 = vmax.f32 %v1001_v62, 0.0 }
  0x4d   :  { %3001 = vmatmul.msk.bf16.gmra.mxu0 %vm1442_vm0, %v1310_v16  ;;  %v807_v16 = vadd.f32 %v3815_v5, %v547_v8 }
  0x4f   :  { %v1063_v24 = vmax.f32 %v807_v16, 0.0 }
  0x50   :  { %3033 = vmatmul.msk.bf16.gmra.mxu1 %vm1442_vm0, %v1342_v22  ;;  %v999_v22 = vadd.f32 %v3815_v5, %v739_v14  ;;  %v3161_v14 = vunpack.c.h.bf16 %v3645_v3 }
  0x51   :  { %3065 = vmatmul.msk.bf16.gmra.mxu2 %vm1442_vm0, %v1374_v25  ;;  %v3644_v25 = vld [vmem:[%s5893_s0 + $0x38] sm:$0xff]   ;;  %v1312_v34 = vpack.c.bf16 %v1063_v24, %v1062_v23  ;;  %v3544_v23 = vunpack.c.l.bf16 %v3741_v15  ;;  %v3545_v24 = vunpack.c.h.bf16 %v3741_v15 }
  0x52   :  { %3097 = vmatmul.msk.bf16.gmra.mxu3 %vm1442_vm0, %v1406_v26  ;;  %v1126_v26 = vmax.f32 %v870_v17, 0.0  ;;  %v1255_v32 = vmax.f32 %v999_v22, 0.0  ;;  %v3156_v35 = vunpack.c.l.bf16 %v3644_v25  ;;  %v3157_v36 = vunpack.c.h.bf16 %v3644_v25 }
  0x53   :  { %v3417_v22 = vunpack.c.h.bf16 %v3709_v11  ;;  %v550_v25 = vmul.f32 %v3810_v4, %v3160_v13 }
  0x54   :  { %v1344_v40 = vpack.c.bf16 %v1127_v27, %v1126_v26  ;;  %v1408_v44 = vpack.c.bf16 %v1255_v32, %v1254_v31  ;;  %v548_v47 = vmul.f32 %v3810_v4, %v3156_v35  ;;  %v549_v48 = vmul.f32 %v3810_v4, %v3157_v36 }
  0x55   :  { %v551_v26 = vmul.f32 %v3810_v4, %v3161_v14  ;;  %v614_v27 = vmul.f32 %v3810_v4, %v3288_v18  ;;  %v679_v30 = vmul.f32 %v3810_v4, %v3417_v22  ;;  %v742_v31 = vmul.f32 %v3810_v4, %v3544_v23 }
  0x56   :  { %v808_v55 = vadd.f32 %v3815_v5, %v548_v47  ;;  %v743_v32 = vmul.f32 %v3810_v4, %v3545_v24  ;;  %v810_v33 = vadd.f32 %v3815_v5, %v550_v25  ;;  %v875_v36 = vadd.f32 %v3815_v5, %v615_v28 }
  0x57   :  { %v874_v35 = vadd.f32 %v3815_v5, %v614_v27  ;;  %v939_v38 = vadd.f32 %v3815_v5, %v679_v30  ;;  %v1002_v39 = vadd.f32 %v3815_v5, %v742_v31  ;;  %v1194_v47 = vmax.f32 %v938_v37, 0.0  ;;  %v3647_v37 = vld [vmem:[%s5893_s0 + $0x50] sm:$0xff]  }
  0x58   :  { %v1064_v63 = vmax.f32 %v808_v55, 0.0  ;;  %v1066_v41 = vmax.f32 %v810_v33, 0.0  ;;  %v1131_v46 = vmax.f32 %v875_v36, 0.0 }
  0x59   :  { %v1130_v45 = vmax.f32 %v874_v35, 0.0  ;;  %v1195_v49 = vmax.f32 %v939_v38, 0.0  ;;  %v1258_v50 = vmax.f32 %v1002_v39, 0.0 }
  0x5b   :  { %v1346_v62 = vpack.c.bf16 %v1131_v46, %v1130_v45  ;;  %v3743_v45 = vld [vmem:[%s5893_s0 + $0x350] sm:$0xff]  }
  0x5d   :  { %3002 = vmatmul.msk.bf16.gmra.mxu0 %vm1442_vm0, %v1311_v56  ;;  %v809_v56 = vadd.f32 %v3815_v5, %v549_v48  ;;  %v3710_v48 = vld [vmem:[%s5893_s0 + $0x248] sm:$0xff]  }
  0x5e   :  { %v3420_v59 = vunpack.c.l.bf16 %v3710_v48 }
  0x5f   :  { %v1065_v0 = vmax.f32 %v809_v56, 0.0 }
  0x60   :  { %3034 = vmatmul.msk.bf16.gmra.mxu1 %vm1442_vm0, %v1343_v60  ;;  %v937_v60 = vadd.f32 %v3815_v5, %v677_v52  ;;  %v680_v11 = vmul.f32 %v3810_v4, %v3420_v59 }
  0x61   :  { %3066 = vmatmul.msk.bf16.gmra.mxu2 %vm1442_vm0, %v1375_v61  ;;  %v1000_v61 = vadd.f32 %v3815_v5, %v740_v53  ;;  %v1313_v12 = vpack.c.bf16 %v1065_v0, %v1064_v63  ;;  %v3742_v53 = vld [vmem:[%s5893_s0 + $0x348] sm:$0xff]  }
  0x62   :  { %3098 = vmatmul.msk.bf16.gmra.mxu3 %vm1442_vm0, %v1407_v1  ;;  %v1128_v1 = vmax.f32 %v872_v57, 0.0  ;;  %v1193_v7 = vmax.f32 %v937_v60, 0.0  ;;  %v3421_v60 = vunpack.c.h.bf16 %v3710_v48  ;;  %v3548_v63 = vunpack.c.l.bf16 %v3742_v53 }
  0x63   :  { %v1256_v8 = vmax.f32 %v1000_v61, 0.0  ;;  %v3549_v0 = vunpack.c.h.bf16 %v3742_v53  ;;  %v940_v20 = vadd.f32 %v3815_v5, %v680_v11 }
  0x64   :  { %v1345_v16 = vpack.c.bf16 %v1129_v2, %v1128_v1  ;;  %v1377_v17 = vpack.c.bf16 %v1193_v7, %v1192_v6  ;;  %v1378_v2 = vpack.c.bf16 %v1195_v49, %v1194_v47  ;;  %v744_v13 = vmul.f32 %v3810_v4, %v3548_v63 }
  0x65   :  { %v1409_v21 = vpack.c.bf16 %v1257_v9, %v1256_v8  ;;  %v745_v14 = vmul.f32 %v3810_v4, %v3549_v0  ;;  %v1196_v35 = vmax.f32 %v940_v20, 0.0 }
  0x66   :  { %v1004_v25 = vadd.f32 %v3815_v5, %v744_v13 }
  0x68   :  { %v1260_v38 = vmax.f32 %v1004_v25, 0.0 }
  0x6d   :  { %3003 = vmatmul.msk.bf16.gmra.mxu0 %vm1442_vm0, %v1312_v34  ;;  %v811_v34 = vadd.f32 %v3815_v5, %v551_v26  ;;  %v1005_v26 = vadd.f32 %v3815_v5, %v745_v14 }
  0x6f   :  { %v1067_v42 = vmax.f32 %v811_v34, 0.0  ;;  %v1261_v39 = vmax.f32 %v1005_v26, 0.0  ;;  %v3648_v26 = vld [vmem:[%s5893_s0 + $0x58] sm:$0xff]  }
  0x70   :  { %3035 = vmatmul.msk.bf16.gmra.mxu1 %vm1442_vm0, %v1344_v40  ;;  %v1003_v40 = vadd.f32 %v3815_v5, %v743_v32 }
  0x71   :  { %3067 = vmatmul.msk.bf16.gmra.mxu2 %vm1442_vm0, %v1376_v43  ;;  %v3646_v43 = vld [vmem:[%s5893_s0 + $0x48] sm:$0xff]   ;;  %v1314_v54 = vpack.c.bf16 %v1067_v42, %v1066_v41  ;;  %v3711_v41 = vld [vmem:[%s5893_s0 + $0x250] sm:$0xff]  }
  0x72   :  { %3099 = vmatmul.msk.bf16.gmra.mxu3 %vm1442_vm0, %v1408_v44  ;;  %v3678_v44 = vld [vmem:[%s5893_s0 + $0x148] sm:$0xff]   ;;  %v1259_v51 = vmax.f32 %v1003_v40, 0.0  ;;  %v3164_v52 = vunpack.c.l.bf16 %v3646_v43  ;;  %v3165_v55 = vunpack.c.h.bf16 %v3646_v43  ;;  %v3679_v40 = vld [vmem:[%s5893_s0 + $0x150] sm:$0xff]   ;;  %v3168_v43 = vunpack.c.l.bf16 %v3647_v37 }
  0x73   :  { %v3292_v56 = vunpack.c.l.bf16 %v3678_v44  ;;  %v3293_v58 = vunpack.c.h.bf16 %v3678_v44  ;;  %v3169_v44 = vunpack.c.h.bf16 %v3647_v37  ;;  %v3296_v49 = vunpack.c.l.bf16 %v3679_v40 }
  0x74   :  { %v1410_v3 = vpack.c.bf16 %v1259_v51, %v1258_v50  ;;  %v552_v6 = vmul.f32 %v3810_v4, %v3164_v52  ;;  %v553_v8 = vmul.f32 %v3810_v4, %v3165_v55  ;;  %v3297_v50 = vunpack.c.h.bf16 %v3679_v40 }
  0x75   :  { %v616_v9 = vmul.f32 %v3810_v4, %v3292_v56  ;;  %v617_v10 = vmul.f32 %v3810_v4, %v3293_v58  ;;  %v3424_v55 = vunpack.c.l.bf16 %v3711_v41  ;;  %v3425_v56 = vunpack.c.h.bf16 %v3711_v41 }
  0x76   :  { %v812_v15 = vadd.f32 %v3815_v5, %v552_v6  ;;  %v554_v63 = vmul.f32 %v3810_v4, %v3168_v43  ;;  %v555_v0 = vmul.f32 %v3810_v4, %v3169_v44  ;;  %v3173_v37 = vunpack.c.h.bf16 %v3648_v26 }
  0x77   :  { %v877_v19 = vadd.f32 %v3815_v5, %v617_v10  ;;  %v683_v6 = vmul.f32 %v3810_v4, %v3425_v56 }
  0x78   :  { %v1068_v31 = vmax.f32 %v812_v15, 0.0  ;;  %v815_v10 = vadd.f32 %v3815_v5, %v555_v0  ;;  %v4266_v0 = vld [vmem:[%s5895_s2] ss:$0 sm:$0xff] }
  0x79   :  { %v1133_v34 = vmax.f32 %v877_v19, 0.0 }
  0x7a   :  { %v1071_v25 = vmax.f32 %v815_v10, 0.0 }
  0x7d   :  { %3004 = vmatmul.msk.bf16.gmra.mxu0 %vm1442_vm0, %v1313_v12  ;;  %v681_v12 = vmul.f32 %v3810_v4, %v3421_v60  ;;  %v3552_v60 = vunpack.c.l.bf16 %v3743_v45 }
  0x80   :  { %3036 = vmatmul.msk.bf16.gmra.mxu1 %vm1442_vm0, %v1345_v16  ;;  %v813_v16 = vadd.f32 %v3815_v5, %v553_v8 }
  0x81   :  { %3068 = vmatmul.msk.bf16.gmra.mxu2 %vm1442_vm0, %v1377_v17  ;;  %v876_v17 = vadd.f32 %v3815_v5, %v616_v9  ;;  %v814_v9 = vadd.f32 %v3815_v5, %v554_v63 }
  0x82   :  { %3100 = vmatmul.msk.bf16.gmra.mxu3 %vm1442_vm0, %v1409_v21  ;;  %v941_v21 = vadd.f32 %v3815_v5, %v681_v12  ;;  %v1069_v32 = vmax.f32 %v813_v16, 0.0 }
  0x83   :  { %v1132_v33 = vmax.f32 %v876_v17, 0.0 }
  0x84   :  { %v1197_v36 = vmax.f32 %v941_v21, 0.0  ;;  %v1315_v42 = vpack.c.bf16 %v1069_v32, %v1068_v31  ;;  %v3712_v31 = vld [vmem:[%s5893_s0 + $0x258] sm:$0xff]  }
  0x85   :  { %v1347_v47 = vpack.c.bf16 %v1133_v34, %v1132_v33  ;;  %v3172_v34 = vunpack.c.l.bf16 %v3648_v26  ;;  %v3429_v43 = vunpack.c.h.bf16 %v3712_v31 }
  0x86   :  { %v1379_v48 = vpack.c.bf16 %v1197_v36, %v1196_v35  ;;  %v3744_v35 = vld [vmem:[%s5893_s0 + $0x358] sm:$0xff]  }
  0x8a   :  { %v1836_v57 = vpop.f32.mrf.mxu0 }
  0x8b   :  { %v2476_v61 = vpack.c.bf16 %v1836_v57, %v1836_v57 }
  0x8d   :  { %v1996_v1 = vpop.f32.mrf.mxu1  ;;  %2733 = vst.msk [vmem:[%s5896_s4] sm:$0xf] %vm2732_vm1, %v2476_v61  ;;  %3005 = vmatmul.msk.bf16.gmra.mxu0 %vm1442_vm0, %v1314_v54  ;;  %v1411_v54 = vpack.c.bf16 %v1261_v39, %v1260_v38  ;;  %v3553_v61 = vunpack.c.h.bf16 %v3743_v45 }
  0x8e   :  { %v2540_v7 = vpack.c.bf16 %v1996_v1, %v1996_v1  ;;  %v618_v1 = vmul.f32 %v3810_v4, %v3296_v49  ;;  %v3557_v49 = vunpack.c.h.bf16 %v3744_v35 }
  0x8f   :  { %v747_v8 = vmul.f32 %v3810_v4, %v3553_v61 }
  0x90   :  { %2797 = vst.msk [vmem:[%s5896_s4 + $0x100] sm:$0xf] %vm2732_vm1, %v2540_v7  ;;  %3037 = vmatmul.msk.bf16.gmra.mxu1 %vm1442_vm0, %v1346_v62  ;;  %v746_v7 = vmul.f32 %v3810_v4, %v3552_v60  ;;  %v878_v12 = vadd.f32 %v3815_v5, %v618_v1 }
  0x91   :  { %3069 = vmatmul.msk.bf16.gmra.mxu2 %vm1442_vm0, %v1378_v2  ;;  %v619_v2 = vmul.f32 %v3810_v4, %v3297_v50 }
  0x92   :  { %3101 = vmatmul.msk.bf16.gmra.mxu3 %vm1442_vm0, %v1410_v3  ;;  %v1838_v18 = vpop.f32.mrf.mxu0  ;;  %v682_v3 = vmul.f32 %v3810_v4, %v3424_v55  ;;  %v1006_v4 = vadd.f32 %v3815_v5, %v746_v7 }
  0x93   :  { %v2477_v24 = vpack.c.bf16 %v1838_v18, %v1838_v18  ;;  %v879_v13 = vadd.f32 %v3815_v5, %v619_v2  ;;  %v943_v18 = vadd.f32 %v3815_v5, %v683_v6 }
  0x94   :  { %v2156_v22 = vpop.f32.mrf.mxu2  ;;  %v942_v17 = vadd.f32 %v3815_v5, %v682_v3  ;;  %v1262_v32 = vmax.f32 %v1006_v4, 0.0 }
  0x95   :  { %v2316_v23 = vpop.f32.mrf.mxu3  ;;  %v2604_v27 = vpack.c.bf16 %v2156_v22, %v2156_v22  ;;  %v1998_v29 = vpop.f32.mrf.mxu1  ;;  %2734 = vst.msk [vmem:[%s5896_s4 + $0x4] sm:$0xf] %vm2732_vm1, %v2477_v24  ;;  %v1007_v22 = vadd.f32 %v3815_v5, %v747_v8  ;;  %v1070_v24 = vmax.f32 %v814_v9, 0.0  ;;  %v3680_v5 = vld [vmem:[%s5893_s0 + $0x158] sm:$0xff]  }
  0x96   :  { %v2668_v28 = vpack.c.bf16 %v2316_v23, %v2316_v23  ;;  %v2541_v30 = vpack.c.bf16 %v1998_v29, %v1998_v29  ;;  %v1198_v29 = vmax.f32 %v942_v17, 0.0  ;;  %v3300_v38 = vunpack.c.l.bf16 %v3680_v5 }
  0x97   :  { %2861 = vst.msk [vmem:[%s5896_s4 + $0x200] sm:$0xf] %vm2732_vm1, %v2604_v27  ;;  %v1134_v27 = vmax.f32 %v878_v12, 0.0  ;;  %v1263_v33 = vmax.f32 %v1007_v22, 0.0  ;;  %v1316_v36 = vpack.c.bf16 %v1071_v25, %v1070_v24  ;;  %v3301_v41 = vunpack.c.h.bf16 %v3680_v5  ;;  %v3649_v24 = vld [vmem:[%s5893_s0 + $0x60] sm:$0xff]  }
  0x98   :  { %2925 = vst.msk [vmem:[%s5896_s4 + $0x300] sm:$0xf] %vm2732_vm1, %v2668_v28  ;;  %v1135_v28 = vmax.f32 %v879_v13, 0.0 }
  0x99   :  { %2798 = vst.msk [vmem:[%s5896_s4 + $0x104] sm:$0xf] %vm2732_vm1, %v2541_v30  ;;  %v1199_v30 = vmax.f32 %v943_v18, 0.0 }
  0x9a   :  { %v1841_v46 = vpop.f32.mrf.mxu0  ;;  %v1348_v40 = vpack.c.bf16 %v1135_v28, %v1134_v27  ;;  %v3681_v27 = vld [vmem:[%s5893_s0 + $0x160] sm:$0xff]  }
  0x9b   :  { %v2478_v53 = vpack.c.bf16 %v1841_v46, %v1841_v46  ;;  %v3713_v28 = vld [vmem:[%s5893_s0 + $0x260] sm:$0xff]  }
  0x9c   :  { %v2158_v51 = vpop.f32.mrf.mxu2 }
  0x9d   :  { %v2318_v52 = vpop.f32.mrf.mxu3  ;;  %v2605_v57 = vpack.c.bf16 %v2158_v51, %v2158_v51  ;;  %v2001_v59 = vpop.f32.mrf.mxu1  ;;  %2735 = vst.msk [vmem:[%s5896_s4 + $0x8] sm:$0xf] %vm2732_vm1, %v2478_v53  ;;  %3006 = vmatmul.msk.bf16.gmra.mxu0 %vm1442_vm0, %v1315_v42  ;;  %v3428_v42 = vunpack.c.l.bf16 %v3712_v31  ;;  %v1412_v53 = vpack.c.bf16 %v1263_v33, %v1262_v32  ;;  %v3745_v31 = vld [vmem:[%s5893_s0 + $0x360] sm:$0xff]  }
  0x9e   :  { %v2669_v58 = vpack.c.bf16 %v2318_v52, %v2318_v52  ;;  %v2542_v62 = vpack.c.bf16 %v2001_v59, %v2001_v59 }
  0x9f   :  { %2862 = vst.msk [vmem:[%s5896_s4 + $0x204] sm:$0xf] %vm2732_vm1, %v2605_v57 }
  0xa0   :  { %2926 = vst.msk [vmem:[%s5896_s4 + $0x304] sm:$0xf] %vm2732_vm1, %v2669_v58  ;;  %3038 = vmatmul.msk.bf16.gmra.mxu1 %vm1442_vm0, %v1347_v47  ;;  %v1380_v47 = vpack.c.bf16 %v1199_v30, %v1198_v29  ;;  %v3176_v29 = vunpack.c.l.bf16 %v3649_v24  ;;  %v3177_v30 = vunpack.c.h.bf16 %v3649_v24  ;;  %v3746_v24 = vld [vmem:[%s5893_s0 + $0x368] sm:$0xff]  }
  0xa1   :  { %2799 = vst.msk [vmem:[%s5896_s4 + $0x108] sm:$0xf] %vm2732_vm1, %v2542_v62  ;;  %3070 = vmatmul.msk.bf16.gmra.mxu2 %vm1442_vm0, %v1379_v48  ;;  %v3556_v48 = vunpack.c.l.bf16 %v3744_v35  ;;  %v3304_v35 = vunpack.c.l.bf16 %v3681_v27 }
  0xa2   :  { %3102 = vmatmul.msk.bf16.gmra.mxu3 %vm1442_vm0, %v1411_v54  ;;  %v1843_v11 = vpop.f32.mrf.mxu0  ;;  %v4233_v54 = vld [vmem:[%s5894_s1] ss:$0 sm:$0xff] }
  0xa3   :  { %v2479_v16 = vpack.c.bf16 %v1843_v11, %v1843_v11  ;;  %v556_v55 = vmul.f32 %v4233_v54, %v3172_v34  ;;  %v557_v57 = vmul.f32 %v4233_v54, %v3173_v37  ;;  %v620_v58 = vmul.f32 %v4233_v54, %v3300_v38 }
  0xa4   :  { %v2161_v14 = vpop.f32.mrf.mxu2  ;;  %v621_v59 = vmul.f32 %v4233_v54, %v3301_v41  ;;  %v684_v60 = vmul.f32 %v4233_v54, %v3428_v42  ;;  %v685_v61 = vmul.f32 %v4233_v54, %v3429_v43  ;;  %v748_v62 = vmul.f32 %v4233_v54, %v3556_v48 }
  0xa5   :  { %v2321_v15 = vpop.f32.mrf.mxu3  ;;  %v2606_v19 = vpack.c.bf16 %v2161_v14, %v2161_v14  ;;  %v2003_v21 = vpop.f32.mrf.mxu1  ;;  %2736 = vst.msk [vmem:[%s5896_s4 + $0xc] sm:$0xf] %vm2732_vm1, %v2479_v16  ;;  %v749_v63 = vmul.f32 %v4233_v54, %v3557_v49  ;;  %v816_v1 = vadd.f32 %v4266_v0, %v556_v55  ;;  %v817_v2 = vadd.f32 %v4266_v0, %v557_v57 }
  0xa6   :  { %v2670_v20 = vpack.c.bf16 %v2321_v15, %v2321_v15  ;;  %v2543_v23 = vpack.c.bf16 %v2003_v21, %v2003_v21  ;;  %v880_v3 = vadd.f32 %v4266_v0, %v620_v58  ;;  %v881_v7 = vadd.f32 %v4266_v0, %v621_v59 }
  0xa7   :  { %2863 = vst.msk [vmem:[%s5896_s4 + $0x208] sm:$0xf] %vm2732_vm1, %v2606_v19  ;;  %v944_v8 = vadd.f32 %v4266_v0, %v684_v60  ;;  %v945_v9 = vadd.f32 %v4266_v0, %v685_v61  ;;  %v1008_v13 = vadd.f32 %v4266_v0, %v748_v62  ;;  %v1009_v14 = vadd.f32 %v4266_v0, %v749_v63 }
  0xa8   :  { %2927 = vst.msk [vmem:[%s5896_s4 + $0x308] sm:$0xf] %vm2732_vm1, %v2670_v20  ;;  %v1072_v19 = vmax.f32 %v816_v1, 0.0  ;;  %v1073_v20 = vmax.f32 %v817_v2, 0.0  ;;  %v1136_v21 = vmax.f32 %v880_v3, 0.0  ;;  %v1137_v4 = vmax.f32 %v881_v7, 0.0 }
  0xa9   :  { %2800 = vst.msk [vmem:[%s5896_s4 + $0x10c] sm:$0xf] %vm2732_vm1, %v2543_v23  ;;  %v1200_v22 = vmax.f32 %v944_v8, 0.0  ;;  %v1201_v23 = vmax.f32 %v945_v9, 0.0  ;;  %v1264_v25 = vmax.f32 %v1008_v13, 0.0  ;;  %v1265_v26 = vmax.f32 %v1009_v14, 0.0 }
  0xaa   :  { %v1846_v39 = vpop.f32.mrf.mxu0  ;;  %v1317_v5 = vpack.c.bf16 %v1073_v20, %v1072_v19  ;;  %v1349_v33 = vpack.c.bf16 %v1137_v4, %v1136_v21  ;;  %v3432_v41 = vunpack.c.l.bf16 %v3713_v28  ;;  %v3433_v42 = vunpack.c.h.bf16 %v3713_v28  ;;  %v3714_v21 = vld [vmem:[%s5893_s0 + $0x268] sm:$0xff]  }
  0xab   :  { %v2480_v46 = vpack.c.bf16 %v1846_v39, %v1846_v39  ;;  %v1381_v34 = vpack.c.bf16 %v1201_v23, %v1200_v22  ;;  %v558_v49 = vmul.f32 %v4233_v54, %v3176_v29 }
  0xac   :  { %v2163_v44 = vpop.f32.mrf.mxu2  ;;  %v687_v55 = vmul.f32 %v4233_v54, %v3433_v42 }
  0xad   :  { %v2323_v45 = vpop.f32.mrf.mxu3  ;;  %v2607_v50 = vpack.c.bf16 %v2163_v44, %v2163_v44  ;;  %v2006_v52 = vpop.f32.mrf.mxu1  ;;  %2737 = vst.msk [vmem:[%s5896_s4 + $0x10] sm:$0xf] %vm2732_vm1, %v2480_v46  ;;  %3007 = vmatmul.msk.bf16.gmra.mxu0 %vm1442_vm0, %v1316_v36  ;;  %v3305_v36 = vunpack.c.h.bf16 %v3681_v27  ;;  %v3560_v46 = vunpack.c.l.bf16 %v3745_v31  ;;  %v818_v58 = vadd.f32 %v4266_v0, %v558_v49 }
  0xae   :  { %v2671_v51 = vpack.c.bf16 %v2323_v45, %v2323_v45  ;;  %v2544_v56 = vpack.c.bf16 %v2006_v52, %v2006_v52 }
  0xaf   :  { %2864 = vst.msk [vmem:[%s5896_s4 + $0x20c] sm:$0xf] %vm2732_vm1, %v2607_v50  ;;  %v559_v50 = vmul.f32 %v4233_v54, %v3177_v30  ;;  %v623_v52 = vmul.f32 %v4233_v54, %v3305_v36  ;;  %v1074_v13 = vmax.f32 %v818_v58, 0.0  ;;  %v3436_v30 = vunpack.c.l.bf16 %v3714_v21 }
  0xb0   :  { %2928 = vst.msk [vmem:[%s5896_s4 + $0x30c] sm:$0xf] %vm2732_vm1, %v2671_v51  ;;  %3039 = vmatmul.msk.bf16.gmra.mxu1 %vm1442_vm0, %v1348_v40  ;;  %v1413_v40 = vpack.c.bf16 %v1265_v26, %v1264_v25  ;;  %v622_v51 = vmul.f32 %v4233_v54, %v3304_v35  ;;  %v3564_v36 = vunpack.c.l.bf16 %v3746_v24 }
  0xb1   :  { %2801 = vst.msk [vmem:[%s5896_s4 + $0x110] sm:$0xf] %vm2732_vm1, %v2544_v56  ;;  %3071 = vmatmul.msk.bf16.gmra.mxu2 %vm1442_vm0, %v1380_v47  ;;  %v3561_v47 = vunpack.c.h.bf16 %v3745_v31  ;;  %v750_v56 = vmul.f32 %v4233_v54, %v3560_v46  ;;  %v819_v59 = vadd.f32 %v4266_v0, %v559_v50  ;;  %v883_v62 = vadd.f32 %v4266_v0, %v623_v52 }
  0xb2   :  { %3103 = vmatmul.msk.bf16.gmra.mxu3 %vm1442_vm0, %v1412_v53  ;;  %v1848_v6 = vpop.f32.mrf.mxu0  ;;  %v686_v53 = vmul.f32 %v4233_v54, %v3432_v41  ;;  %v882_v61 = vadd.f32 %v4266_v0, %v622_v51  ;;  %v3437_v31 = vunpack.c.h.bf16 %v3714_v21  ;;  %v752_v49 = vmul.f32 %v4233_v54, %v3564_v36  ;;  %v3747_v21 = vld [vmem:[%s5893_s0 + $0x370] sm:$0xff]  }
  0xb3   :  { %v2481_v12 = vpack.c.bf16 %v1848_v6, %v1848_v6  ;;  %v751_v57 = vmul.f32 %v4233_v54, %v3561_v47  ;;  %v947_v6 = vadd.f32 %v4266_v0, %v687_v55  ;;  %v1075_v14 = vmax.f32 %v819_v59, 0.0 }
  0xb4   :  { %v2166_v10 = vpop.f32.mrf.mxu2  ;;  %v946_v3 = vadd.f32 %v4266_v0, %v686_v53  ;;  %v688_v47 = vmul.f32 %v4233_v54, %v3436_v30 }
  0xb5   :  { %v2326_v11 = vpop.f32.mrf.mxu3  ;;  %v2608_v15 = vpack.c.bf16 %v2166_v10, %v2166_v10  ;;  %v2008_v17 = vpop.f32.mrf.mxu1  ;;  %2738 = vst.msk [vmem:[%s5896_s4 + $0x14] sm:$0xf] %vm2732_vm1, %v2481_v12  ;;  %v1010_v10 = vadd.f32 %v4266_v0, %v750_v56  ;;  %v1203_v20 = vmax.f32 %v947_v6, 0.0  ;;  %v1318_v25 = vpack.c.bf16 %v1075_v14, %v1074_v13  ;;  %v3651_v13 = vld [vmem:[%s5893_s0 + $0x70] sm:$0xff]  }
  0xb6   :  { %v2672_v16 = vpack.c.bf16 %v2326_v11, %v2326_v11  ;;  %v2545_v18 = vpack.c.bf16 %v2008_v17, %v2008_v17  ;;  %v1011_v11 = vadd.f32 %v4266_v0, %v751_v57  ;;  %v1139_v17 = vmax.f32 %v883_v62, 0.0 }
  0xb7   :  { %2865 = vst.msk [vmem:[%s5896_s4 + $0x210] sm:$0xf] %vm2732_vm1, %v2608_v15  ;;  %v3650_v15 = vld [vmem:[%s5893_s0 + $0x68] sm:$0xff]   ;;  %v1202_v19 = vmax.f32 %v946_v3, 0.0  ;;  %v1266_v4 = vmax.f32 %v1010_v10, 0.0  ;;  %v948_v57 = vadd.f32 %v4266_v0, %v688_v47  ;;  %v1012_v62 = vadd.f32 %v4266_v0, %v752_v49 }
  0xb8   :  { %2929 = vst.msk [vmem:[%s5896_s4 + $0x310] sm:$0xf] %vm2732_vm1, %v2672_v16  ;;  %v1138_v16 = vmax.f32 %v882_v61, 0.0  ;;  %v1267_v22 = vmax.f32 %v1011_v11, 0.0  ;;  %v3180_v23 = vunpack.c.l.bf16 %v3650_v15  ;;  %v3181_v26 = vunpack.c.h.bf16 %v3650_v15 }
  0xb9   :  { %2802 = vst.msk [vmem:[%s5896_s4 + $0x114] sm:$0xf] %vm2732_vm1, %v2545_v18  ;;  %v3682_v18 = vld [vmem:[%s5893_s0 + $0x168] sm:$0xff]   ;;  %v1382_v35 = vpack.c.bf16 %v1203_v20, %v1202_v19  ;;  %v1204_v11 = vmax.f32 %v948_v57, 0.0  ;;  %v1268_v14 = vmax.f32 %v1012_v62, 0.0  ;;  %v3184_v19 = vunpack.c.l.bf16 %v3651_v13 }
  0xba   :  { %v1851_v32 = vpop.f32.mrf.mxu0  ;;  %v3308_v27 = vunpack.c.l.bf16 %v3682_v18  ;;  %v3309_v29 = vunpack.c.h.bf16 %v3682_v18  ;;  %v1414_v41 = vpack.c.bf16 %v1267_v22, %v1266_v4  ;;  %v560_v42 = vmul.f32 %v4233_v54, %v3180_v23 }
  0xbb   :  { %v2482_v39 = vpack.c.bf16 %v1851_v32, %v1851_v32  ;;  %v3185_v20 = vunpack.c.h.bf16 %v3651_v13  ;;  %v3748_v13 = vld [vmem:[%s5893_s0 + $0x378] sm:$0xff]  }
  0xbc   :  { %v2168_v37 = vpop.f32.mrf.mxu2  ;;  %v625_v46 = vmul.f32 %v4233_v54, %v3309_v29  ;;  %v820_v51 = vadd.f32 %v4266_v0, %v560_v42 }
  0xbd   :  { %v2328_v38 = vpop.f32.mrf.mxu3  ;;  %v2609_v43 = vpack.c.bf16 %v2168_v37, %v2168_v37  ;;  %v2011_v45 = vpop.f32.mrf.mxu1  ;;  %2739 = vst.msk [vmem:[%s5896_s4 + $0x18] sm:$0xf] %vm2732_vm1, %v2482_v39  ;;  %3008 = vmatmul.msk.bf16.gmra.mxu0 %vm1442_vm0, %v1317_v5  ;;  %v1350_v5 = vpack.c.bf16 %v1139_v17, %v1138_v16  ;;  %v3565_v37 = vunpack.c.h.bf16 %v3746_v24  ;;  %v3683_v16 = vld [vmem:[%s5893_s0 + $0x170] sm:$0xff]  }
  0xbe   :  { %v2673_v44 = vpack.c.bf16 %v2328_v38, %v2328_v38  ;;  %v2546_v48 = vpack.c.bf16 %v2011_v45, %v2011_v45  ;;  %v624_v45 = vmul.f32 %v4233_v54, %v3308_v27  ;;  %v885_v56 = vadd.f32 %v4266_v0, %v625_v46  ;;  %v3715_v17 = vld [vmem:[%s5893_s0 + $0x270] sm:$0xff]  }
  0xbf   :  { %2866 = vst.msk [vmem:[%s5896_s4 + $0x214] sm:$0xf] %vm2732_vm1, %v2609_v43  ;;  %v753_v50 = vmul.f32 %v4233_v54, %v3565_v37  ;;  %v3312_v24 = vunpack.c.l.bf16 %v3683_v16  ;;  %v3440_v29 = vunpack.c.l.bf16 %v3715_v17  ;;  %v3441_v30 = vunpack.c.h.bf16 %v3715_v17 }
  0xc0   :  { %2930 = vst.msk [vmem:[%s5896_s4 + $0x314] sm:$0xf] %vm2732_vm1, %v2673_v44  ;;  %3040 = vmatmul.msk.bf16.gmra.mxu1 %vm1442_vm0, %v1349_v33  ;;  %v561_v44 = vmul.f32 %v4233_v54, %v3181_v26  ;;  %v884_v53 = vadd.f32 %v4266_v0, %v624_v45  ;;  %v1141_v10 = vmax.f32 %v885_v56, 0.0  ;;  %v562_v37 = vmul.f32 %v4233_v54, %v3184_v19 }
  0xc1   :  { %2803 = vst.msk [vmem:[%s5896_s4 + $0x118] sm:$0xf] %vm2732_vm1, %v2546_v48  ;;  %3072 = vmatmul.msk.bf16.gmra.mxu2 %vm1442_vm0, %v1381_v34  ;;  %v689_v48 = vmul.f32 %v4233_v54, %v3437_v31  ;;  %v691_v42 = vmul.f32 %v4233_v54, %v3441_v30 }
  0xc2   :  { %3104 = vmatmul.msk.bf16.gmra.mxu3 %vm1442_vm0, %v1413_v40  ;;  %v1853_v60 = vpop.f32.mrf.mxu0  ;;  %v821_v52 = vadd.f32 %v4266_v0, %v561_v44  ;;  %v822_v45 = vadd.f32 %v4266_v0, %v562_v37 }
  0xc3   :  { %v2483_v2 = vpack.c.bf16 %v1853_v60, %v1853_v60  ;;  %v949_v58 = vadd.f32 %v4266_v0, %v689_v48 }
  0xc4   :  { %v2171_v63 = vpop.f32.mrf.mxu2  ;;  %v1078_v62 = vmax.f32 %v822_v45, 0.0 }
  0xc5   :  { %v2331_v1 = vpop.f32.mrf.mxu3  ;;  %v2610_v7 = vpack.c.bf16 %v2171_v63, %v2171_v63  ;;  %v2013_v9 = vpop.f32.mrf.mxu1  ;;  %2740 = vst.msk [vmem:[%s5896_s4 + $0x1c] sm:$0xf] %vm2732_vm1, %v2483_v2  ;;  %v1013_v63 = vadd.f32 %v4266_v0, %v753_v50 }
  0xc6   :  { %v2674_v8 = vpack.c.bf16 %v2331_v1, %v2331_v1  ;;  %v2547_v12 = vpack.c.bf16 %v2013_v9, %v2013_v9  ;;  %v1140_v9 = vmax.f32 %v884_v53, 0.0 }
  0xc7   :  { %2867 = vst.msk [vmem:[%s5896_s4 + $0x218] sm:$0xf] %vm2732_vm1, %v2610_v7  ;;  %v1076_v7 = vmax.f32 %v820_v51, 0.0  ;;  %v1269_v15 = vmax.f32 %v1013_v63, 0.0 }
  0xc8   :  { %2931 = vst.msk [vmem:[%s5896_s4 + $0x318] sm:$0xf] %vm2732_vm1, %v2674_v8  ;;  %v1077_v8 = vmax.f32 %v821_v52, 0.0  ;;  %v1351_v22 = vpack.c.bf16 %v1141_v10, %v1140_v9  ;;  %v3716_v9 = vld [vmem:[%s5893_s0 + $0x278] sm:$0xff]  }
  0xc9   :  { %2804 = vst.msk [vmem:[%s5896_s4 + $0x11c] sm:$0xf] %vm2732_vm1, %v2547_v12  ;;  %v1205_v12 = vmax.f32 %v949_v58, 0.0 }
  0xca   :  { %v1856_v28 = vpop.f32.mrf.mxu0  ;;  %v1319_v18 = vpack.c.bf16 %v1077_v8, %v1076_v7 }
  0xcb   :  { %v2484_v34 = vpack.c.bf16 %v1856_v28, %v1856_v28  ;;  %v1383_v23 = vpack.c.bf16 %v1205_v12, %v1204_v11 }
  0xcc   :  { %v2173_v32 = vpop.f32.mrf.mxu2 }
  0xcd   :  { %v2333_v33 = vpop.f32.mrf.mxu3  ;;  %v2611_v38 = vpack.c.bf16 %v2173_v32, %v2173_v32  ;;  %v2016_v40 = vpop.f32.mrf.mxu1  ;;  %2741 = vst.msk [vmem:[%s5896_s4 + $0x20] sm:$0xf] %vm2732_vm1, %v2484_v34  ;;  %3009 = vmatmul.msk.bf16.gmra.mxu0 %vm1442_vm0, %v1318_v25  ;;  %v3313_v25 = vunpack.c.h.bf16 %v3683_v16  ;;  %v3568_v34 = vunpack.c.l.bf16 %v3747_v21 }
  0xce   :  { %v2675_v39 = vpack.c.bf16 %v2333_v33, %v2333_v33  ;;  %v2548_v43 = vpack.c.bf16 %v2016_v40, %v2016_v40 }
  0xcf   :  { %2868 = vst.msk [vmem:[%s5896_s4 + $0x21c] sm:$0xf] %vm2732_vm1, %v2611_v38  ;;  %v563_v38 = vmul.f32 %v4233_v54, %v3185_v20  ;;  %v627_v40 = vmul.f32 %v4233_v54, %v3313_v25  ;;  %v3444_v20 = vunpack.c.l.bf16 %v3716_v9  ;;  %v3572_v25 = vunpack.c.l.bf16 %v3748_v13 }
  0xd0   :  { %2932 = vst.msk [vmem:[%s5896_s4 + $0x31c] sm:$0xf] %vm2732_vm1, %v2675_v39  ;;  %3041 = vmatmul.msk.bf16.gmra.mxu1 %vm1442_vm0, %v1350_v5  ;;  %v1415_v5 = vpack.c.bf16 %v1269_v15, %v1268_v14  ;;  %v626_v39 = vmul.f32 %v4233_v54, %v3312_v24 }
  0xd1   :  { %2805 = vst.msk [vmem:[%s5896_s4 + $0x120] sm:$0xf] %vm2732_vm1, %v2548_v43  ;;  %3073 = vmatmul.msk.bf16.gmra.mxu2 %vm1442_vm0, %v1382_v35  ;;  %v3569_v35 = vunpack.c.h.bf16 %v3747_v21  ;;  %v754_v43 = vmul.f32 %v4233_v54, %v3568_v34  ;;  %v823_v46 = vadd.f32 %v4266_v0, %v563_v38  ;;  %v887_v49 = vadd.f32 %v4266_v0, %v627_v40 }
  0xd2   :  { %3105 = vmatmul.msk.bf16.gmra.mxu3 %vm1442_vm0, %v1414_v41  ;;  %v1858_v55 = vpop.f32.mrf.mxu0  ;;  %v690_v41 = vmul.f32 %v4233_v54, %v3440_v29  ;;  %v886_v48 = vadd.f32 %v4266_v0, %v626_v39  ;;  %v3445_v21 = vunpack.c.h.bf16 %v3716_v9  ;;  %v756_v37 = vmul.f32 %v4233_v54, %v3572_v25  ;;  %v3749_v9 = vld [vmem:[%s5893_s0 + $0x380] sm:$0xff]  }
  0xd3   :  { %v2485_v61 = vpack.c.bf16 %v1858_v55, %v1858_v55  ;;  %v755_v44 = vmul.f32 %v4233_v54, %v3569_v35  ;;  %v951_v55 = vadd.f32 %v4266_v0, %v691_v42  ;;  %v1079_v63 = vmax.f32 %v823_v46, 0.0 }
  0xd4   :  { %v2176_v59 = vpop.f32.mrf.mxu2  ;;  %v950_v53 = vadd.f32 %v4266_v0, %v690_v41  ;;  %v692_v35 = vmul.f32 %v4233_v54, %v3444_v20 }
  0xd5   :  { %v2336_v60 = vpop.f32.mrf.mxu3  ;;  %v2612_v1 = vpack.c.bf16 %v2176_v59, %v2176_v59  ;;  %v2018_v3 = vpop.f32.mrf.mxu1  ;;  %2742 = vst.msk [vmem:[%s5896_s4 + $0x24] sm:$0xf] %vm2732_vm1, %v2485_v61  ;;  %v1014_v59 = vadd.f32 %v4266_v0, %v754_v43  ;;  %v1207_v8 = vmax.f32 %v951_v55, 0.0  ;;  %v1320_v14 = vpack.c.bf16 %v1079_v63, %v1078_v62  ;;  %v3653_v62 = vld [vmem:[%s5893_s0 + $0x80] sm:$0xff]  }
  0xd6   :  { %v2676_v2 = vpack.c.bf16 %v2336_v60, %v2336_v60  ;;  %v2549_v6 = vpack.c.bf16 %v2018_v3, %v2018_v3  ;;  %v1015_v60 = vadd.f32 %v4266_v0, %v755_v44  ;;  %v1143_v3 = vmax.f32 %v887_v49, 0.0 }
  0xd7   :  { %2869 = vst.msk [vmem:[%s5896_s4 + $0x220] sm:$0xf] %vm2732_vm1, %v2612_v1  ;;  %v3652_v1 = vld [vmem:[%s5893_s0 + $0x78] sm:$0xff]   ;;  %v1206_v7 = vmax.f32 %v950_v53, 0.0  ;;  %v1270_v10 = vmax.f32 %v1014_v59, 0.0  ;;  %v952_v44 = vadd.f32 %v4266_v0, %v692_v35  ;;  %v1016_v49 = vadd.f32 %v4266_v0, %v756_v37 }
  0xd8   :  { %2933 = vst.msk [vmem:[%s5896_s4 + $0x320] sm:$0xf] %vm2732_vm1, %v2676_v2  ;;  %v1142_v2 = vmax.f32 %v886_v48, 0.0  ;;  %v1271_v11 = vmax.f32 %v1015_v60, 0.0  ;;  %v3188_v12 = vunpack.c.l.bf16 %v3652_v1  ;;  %v3189_v15 = vunpack.c.h.bf16 %v3652_v1 }
  0xd9   :  { %2806 = vst.msk [vmem:[%s5896_s4 + $0x124] sm:$0xf] %vm2732_vm1, %v2549_v6  ;;  %v3684_v6 = vld [vmem:[%s5893_s0 + $0x178] sm:$0xff]   ;;  %v1384_v24 = vpack.c.bf16 %v1207_v8, %v1206_v7  ;;  %v1208_v60 = vmax.f32 %v952_v44, 0.0  ;;  %v1272_v63 = vmax.f32 %v1016_v49, 0.0  ;;  %v3192_v7 = vunpack.c.l.bf16 %v3653_v62 }
  0xda   :  { %v1861_v4 = vpop.f32.mrf.mxu0  ;;  %v3316_v16 = vunpack.c.l.bf16 %v3684_v6  ;;  %v3317_v19 = vunpack.c.h.bf16 %v3684_v6  ;;  %v1416_v29 = vpack.c.bf16 %v1271_v11, %v1270_v10  ;;  %v564_v30 = vmul.f32 %v4233_v54, %v3188_v12 }
  0xdb   :  { %v2486_v28 = vpack.c.bf16 %v1861_v4, %v1861_v4  ;;  %v3193_v8 = vunpack.c.h.bf16 %v3653_v62  ;;  %v3750_v62 = vld [vmem:[%s5893_s0 + $0x388] sm:$0xff]  }
  0xdc   :  { %v2178_v26 = vpop.f32.mrf.mxu2  ;;  %v629_v34 = vmul.f32 %v4233_v54, %v3317_v19  ;;  %v824_v39 = vadd.f32 %v4266_v0, %v564_v30 }
  0xdd   :  { %v2338_v27 = vpop.f32.mrf.mxu3  ;;  %v2613_v31 = vpack.c.bf16 %v2178_v26, %v2178_v26  ;;  %v2021_v33 = vpop.f32.mrf.mxu1  ;;  %2743 = vst.msk [vmem:[%s5896_s4 + $0x28] sm:$0xf] %vm2732_vm1, %v2486_v28  ;;  %3010 = vmatmul.msk.bf16.gmra.mxu0 %vm1442_vm0, %v1319_v18  ;;  %v1352_v18 = vpack.c.bf16 %v1143_v3, %v1142_v2  ;;  %v3573_v26 = vunpack.c.h.bf16 %v3748_v13  ;;  %v3685_v2 = vld [vmem:[%s5893_s0 + $0x180] sm:$0xff]  }
  0xde   :  { %v2677_v32 = vpack.c.bf16 %v2338_v27, %v2338_v27  ;;  %v2550_v36 = vpack.c.bf16 %v2021_v33, %v2021_v33  ;;  %v628_v33 = vmul.f32 %v4233_v54, %v3316_v16  ;;  %v889_v43 = vadd.f32 %v4266_v0, %v629_v34  ;;  %v3717_v3 = vld [vmem:[%s5893_s0 + $0x280] sm:$0xff]  }
  0xdf   :  { %2870 = vst.msk [vmem:[%s5896_s4 + $0x224] sm:$0xf] %vm2732_vm1, %v2613_v31  ;;  %v757_v38 = vmul.f32 %v4233_v54, %v3573_v26  ;;  %v3320_v13 = vunpack.c.l.bf16 %v3685_v2  ;;  %v3448_v19 = vunpack.c.l.bf16 %v3717_v3  ;;  %v3449_v20 = vunpack.c.h.bf16 %v3717_v3 }
  0xe0   :  { %2934 = vst.msk [vmem:[%s5896_s4 + $0x324] sm:$0xf] %vm2732_vm1, %v2677_v32  ;;  %3042 = vmatmul.msk.bf16.gmra.mxu1 %vm1442_vm0, %v1351_v22  ;;  %v565_v32 = vmul.f32 %v4233_v54, %v3189_v15  ;;  %v888_v41 = vadd.f32 %v4266_v0, %v628_v33  ;;  %v1145_v59 = vmax.f32 %v889_v43, 0.0  ;;  %v566_v26 = vmul.f32 %v4233_v54, %v3192_v7 }
  0xe1   :  { %2807 = vst.msk [vmem:[%s5896_s4 + $0x128] sm:$0xf] %vm2732_vm1, %v2550_v36  ;;  %3074 = vmatmul.msk.bf16.gmra.mxu2 %vm1442_vm0, %v1383_v23  ;;  %v693_v36 = vmul.f32 %v4233_v54, %v3445_v21  ;;  %v695_v30 = vmul.f32 %v4233_v54, %v3449_v20 }
  0xe2   :  { %3106 = vmatmul.msk.bf16.gmra.mxu3 %vm1442_vm0, %v1415_v5  ;;  %v1863_v47 = vpop.f32.mrf.mxu0  ;;  %v825_v40 = vadd.f32 %v4266_v0, %v565_v32  ;;  %v826_v33 = vadd.f32 %v4266_v0, %v566_v26 }
  0xe3   :  { %v2487_v52 = vpack.c.bf16 %v1863_v47, %v1863_v47  ;;  %v953_v45 = vadd.f32 %v4266_v0, %v693_v36 }
  0xe4   :  { %v2181_v50 = vpop.f32.mrf.mxu2  ;;  %v1082_v49 = vmax.f32 %v826_v33, 0.0 }
  0xe5   :  { %v2341_v51 = vpop.f32.mrf.mxu3  ;;  %v2614_v56 = vpack.c.bf16 %v2181_v50, %v2181_v50  ;;  %v2023_v58 = vpop.f32.mrf.mxu1  ;;  %2744 = vst.msk [vmem:[%s5896_s4 + $0x2c] sm:$0xf] %vm2732_vm1, %v2487_v52  ;;  %v1017_v50 = vadd.f32 %v4266_v0, %v757_v38 }
  0xe6   :  { %v2678_v57 = vpack.c.bf16 %v2341_v51, %v2341_v51  ;;  %v2551_v61 = vpack.c.bf16 %v2023_v58, %v2023_v58  ;;  %v1144_v58 = vmax.f32 %v888_v41, 0.0 }
  0xe7   :  { %2871 = vst.msk [vmem:[%s5896_s4 + $0x228] sm:$0xf] %vm2732_vm1, %v2614_v56  ;;  %v1080_v56 = vmax.f32 %v824_v39, 0.0  ;;  %v1273_v1 = vmax.f32 %v1017_v50, 0.0 }
  0xe8   :  { %2935 = vst.msk [vmem:[%s5896_s4 + $0x328] sm:$0xf] %vm2732_vm1, %v2678_v57  ;;  %v1081_v57 = vmax.f32 %v825_v40, 0.0  ;;  %v1353_v11 = vpack.c.bf16 %v1145_v59, %v1144_v58  ;;  %v3718_v58 = vld [vmem:[%s5893_s0 + $0x288] sm:$0xff]  }
  0xe9   :  { %2808 = vst.msk [vmem:[%s5896_s4 + $0x12c] sm:$0xf] %vm2732_vm1, %v2551_v61  ;;  %v1209_v61 = vmax.f32 %v953_v45, 0.0 }
  0xea   :  { %v1866_v17 = vpop.f32.mrf.mxu0  ;;  %v1321_v6 = vpack.c.bf16 %v1081_v57, %v1080_v56 }
  0xeb   :  { %v2488_v23 = vpack.c.bf16 %v1866_v17, %v1866_v17  ;;  %v1385_v12 = vpack.c.bf16 %v1209_v61, %v1208_v60 }
  0xec   :  { %v2183_v4 = vpop.f32.mrf.mxu2 }
  0xed   :  { %v2343_v22 = vpop.f32.mrf.mxu3  ;;  %v2615_v27 = vpack.c.bf16 %v2183_v4, %v2183_v4  ;;  %v2026_v5 = vpop.f32.mrf.mxu1  ;;  %2745 = vst.msk [vmem:[%s5896_s4 + $0x30] sm:$0xf] %vm2732_vm1, %v2488_v23  ;;  %3011 = vmatmul.msk.bf16.gmra.mxu0 %vm1442_vm0, %v1320_v14  ;;  %v3321_v14 = vunpack.c.h.bf16 %v3685_v2  ;;  %v3576_v23 = vunpack.c.l.bf16 %v3749_v9 }
  0xee   :  { %v2679_v28 = vpack.c.bf16 %v2343_v22, %v2343_v22  ;;  %v2552_v31 = vpack.c.bf16 %v2026_v5, %v2026_v5 }
  0xef   :  { %2872 = vst.msk [vmem:[%s5896_s4 + $0x22c] sm:$0xf] %vm2732_vm1, %v2615_v27  ;;  %v567_v27 = vmul.f32 %v4233_v54, %v3193_v8  ;;  %v631_v5 = vmul.f32 %v4233_v54, %v3321_v14  ;;  %v3452_v8 = vunpack.c.l.bf16 %v3718_v58  ;;  %v3580_v14 = vunpack.c.l.bf16 %v3750_v62 }
  0xf0   :  { %2936 = vst.msk [vmem:[%s5896_s4 + $0x32c] sm:$0xf] %vm2732_vm1, %v2679_v28  ;;  %3043 = vmatmul.msk.bf16.gmra.mxu1 %vm1442_vm0, %v1352_v18  ;;  %v1417_v18 = vpack.c.bf16 %v1273_v1, %v1272_v63  ;;  %v630_v28 = vmul.f32 %v4233_v54, %v3320_v13 }
  0xf1   :  { %2809 = vst.msk [vmem:[%s5896_s4 + $0x130] sm:$0xf] %vm2732_vm1, %v2552_v31  ;;  %3075 = vmatmul.msk.bf16.gmra.mxu2 %vm1442_vm0, %v1384_v24  ;;  %v3577_v24 = vunpack.c.h.bf16 %v3749_v9  ;;  %v758_v31 = vmul.f32 %v4233_v54, %v3576_v23  ;;  %v827_v34 = vadd.f32 %v4266_v0, %v567_v27  ;;  %v891_v37 = vadd.f32 %v4266_v0, %v631_v5 }
  0xf2   :  { %3107 = vmatmul.msk.bf16.gmra.mxu3 %vm1442_vm0, %v1416_v29  ;;  %v1868_v42 = vpop.f32.mrf.mxu0  ;;  %v694_v29 = vmul.f32 %v4233_v54, %v3448_v19  ;;  %v890_v36 = vadd.f32 %v4266_v0, %v630_v28  ;;  %v3453_v9 = vunpack.c.h.bf16 %v3718_v58  ;;  %v760_v26 = vmul.f32 %v4233_v54, %v3580_v14  ;;  %v3751_v58 = vld [vmem:[%s5893_s0 + $0x390] sm:$0xff]  }
  0xf3   :  { %v2489_v48 = vpack.c.bf16 %v1868_v42, %v1868_v42  ;;  %v759_v32 = vmul.f32 %v4233_v54, %v3577_v24  ;;  %v955_v42 = vadd.f32 %v4266_v0, %v695_v30  ;;  %v1083_v50 = vmax.f32 %v827_v34, 0.0 }
  0xf4   :  { %v2186_v46 = vpop.f32.mrf.mxu2  ;;  %v954_v41 = vadd.f32 %v4266_v0, %v694_v29  ;;  %v696_v24 = vmul.f32 %v4233_v54, %v3452_v8 }
  0xf5   :  { %v2346_v47 = vpop.f32.mrf.mxu3  ;;  %v2616_v51 = vpack.c.bf16 %v2186_v46, %v2186_v46  ;;  %v2028_v53 = vpop.f32.mrf.mxu1  ;;  %2746 = vst.msk [vmem:[%s5896_s4 + $0x34] sm:$0xf] %vm2732_vm1, %v2489_v48  ;;  %v1018_v46 = vadd.f32 %v4266_v0, %v758_v31  ;;  %v1211_v57 = vmax.f32 %v955_v42, 0.0  ;;  %v1322_v63 = vpack.c.bf16 %v1083_v50, %v1082_v49  ;;  %v3655_v49 = vld [vmem:[%s5893_s0 + $0x90] sm:$0xff]  }
  0xf6   :  { %v2680_v52 = vpack.c.bf16 %v2346_v47, %v2346_v47  ;;  %v2553_v55 = vpack.c.bf16 %v2028_v53, %v2028_v53  ;;  %v1019_v47 = vadd.f32 %v4266_v0, %v759_v32  ;;  %v1147_v53 = vmax.f32 %v891_v37, 0.0 }
  0xf7   :  { %2873 = vst.msk [vmem:[%s5896_s4 + $0x230] sm:$0xf] %vm2732_vm1, %v2616_v51  ;;  %v3654_v51 = vld [vmem:[%s5893_s0 + $0x88] sm:$0xff]   ;;  %v1210_v56 = vmax.f32 %v954_v41, 0.0  ;;  %v1274_v59 = vmax.f32 %v1018_v46, 0.0  ;;  %v956_v32 = vadd.f32 %v4266_v0, %v696_v24  ;;  %v1020_v37 = vadd.f32 %v4266_v0, %v760_v26 }
  0xf8   :  { %2937 = vst.msk [vmem:[%s5896_s4 + $0x330] sm:$0xf] %vm2732_vm1, %v2680_v52  ;;  %v1146_v52 = vmax.f32 %v890_v36, 0.0  ;;  %v1275_v60 = vmax.f32 %v1019_v47, 0.0  ;;  %v3196_v61 = vunpack.c.l.bf16 %v3654_v51  ;;  %v3197_v1 = vunpack.c.h.bf16 %v3654_v51 }
  0xf9   :  { %2810 = vst.msk [vmem:[%s5896_s4 + $0x134] sm:$0xf] %vm2732_vm1, %v2553_v55  ;;  %v3686_v55 = vld [vmem:[%s5893_s0 + $0x188] sm:$0xff]   ;;  %v1386_v13 = vpack.c.bf16 %v1211_v57, %v1210_v56  ;;  %v1212_v47 = vmax.f32 %v956_v32, 0.0  ;;  %v1276_v50 = vmax.f32 %v1020_v37, 0.0  ;;  %v3200_v56 = vunpack.c.l.bf16 %v3655_v49 }
  0xfa   :  { %v1871_v10 = vpop.f32.mrf.mxu0  ;;  %v3324_v2 = vunpack.c.l.bf16 %v3686_v55  ;;  %v3325_v7 = vunpack.c.h.bf16 %v3686_v55  ;;  %v1418_v19 = vpack.c.bf16 %v1275_v60, %v1274_v59  ;;  %v568_v20 = vmul.f32 %v4233_v54, %v3196_v61 }
  0xfb   :  { %v2490_v17 = vpack.c.bf16 %v1871_v10, %v1871_v10  ;;  %v3201_v57 = vunpack.c.h.bf16 %v3655_v49 }
  0xfc   :  { %v2188_v15 = vpop.f32.mrf.mxu2  ;;  %v633_v23 = vmul.f32 %v4233_v54, %v3325_v7  ;;  %v828_v28 = vadd.f32 %v4266_v0, %v568_v20 }
  0xfd   :  { %v2348_v16 = vpop.f32.mrf.mxu3  ;;  %v2617_v21 = vpack.c.bf16 %v2188_v15, %v2188_v15  ;;  %v2031_v22 = vpop.f32.mrf.mxu1  ;;  %2747 = vst.msk [vmem:[%s5896_s4 + $0x38] sm:$0xf] %vm2732_vm1, %v2490_v17  ;;  %3012 = vmatmul.msk.bf16.gmra.mxu0 %vm1442_vm0, %v1321_v6  ;;  %v1354_v6 = vpack.c.bf16 %v1147_v53, %v1146_v52  ;;  %v3581_v15 = vunpack.c.h.bf16 %v3750_v62  ;;  %v3687_v52 = vld [vmem:[%s5893_s0 + $0x190] sm:$0xff]  }
  0xfe   :  { %v2681_v4 = vpack.c.bf16 %v2348_v16, %v2348_v16  ;;  %v2554_v25 = vpack.c.bf16 %v2031_v22, %v2031_v22  ;;  %v632_v22 = vmul.f32 %v4233_v54, %v3324_v2  ;;  %v893_v31 = vadd.f32 %v4266_v0, %v633_v23  ;;  %v3719_v53 = vld [vmem:[%s5893_s0 + $0x290] sm:$0xff]  }
  0xff   :  { %2874 = vst.msk [vmem:[%s5896_s4 + $0x234] sm:$0xf] %vm2732_vm1, %v2617_v21  ;;  %v761_v27 = vmul.f32 %v4233_v54, %v3581_v15  ;;  %v3328_v62 = vunpack.c.l.bf16 %v3687_v52  ;;  %v3456_v7 = vunpack.c.l.bf16 %v3719_v53  ;;  %v3457_v8 = vunpack.c.h.bf16 %v3719_v53 }
 0x100   :  { %2938 = vst.msk [vmem:[%s5896_s4 + $0x334] sm:$0xf] %vm2732_vm1, %v2681_v4  ;;  %3044 = vmatmul.msk.bf16.gmra.mxu1 %vm1442_vm0, %v1353_v11  ;;  %v569_v4 = vmul.f32 %v4233_v54, %v3197_v1  ;;  %v892_v29 = vadd.f32 %v4266_v0, %v632_v22  ;;  %v1149_v46 = vmax.f32 %v893_v31, 0.0  ;;  %v570_v15 = vmul.f32 %v4233_v54, %v3200_v56 }
 0x101   :  { %2811 = vst.msk [vmem:[%s5896_s4 + $0x138] sm:$0xf] %vm2732_vm1, %v2554_v25  ;;  %3076 = vmatmul.msk.bf16.gmra.mxu2 %vm1442_vm0, %v1385_v12  ;;  %v697_v25 = vmul.f32 %v4233_v54, %v3453_v9  ;;  %v699_v20 = vmul.f32 %v4233_v54, %v3457_v8 }
 0x102   :  { %3108 = vmatmul.msk.bf16.gmra.mxu3 %vm1442_vm0, %v1417_v18  ;;  %v1873_v35 = vpop.f32.mrf.mxu0  ;;  %v829_v5 = vadd.f32 %v4266_v0, %v569_v4  ;;  %v830_v22 = vadd.f32 %v4266_v0, %v570_v15 }
 0x103   :  { %v2491_v40 = vpack.c.bf16 %v1873_v35, %v1873_v35  ;;  %v957_v33 = vadd.f32 %v4266_v0, %v697_v25 }
 0x104   :  { %v2191_v38 = vpop.f32.mrf.mxu2 }
 0x105   :  { %v2351_v39 = vpop.f32.mrf.mxu3  ;;  %v2618_v43 = vpack.c.bf16 %v2191_v38, %v2191_v38  ;;  %v2033_v45 = vpop.f32.mrf.mxu1  ;;  %2748 = vst.msk [vmem:[%s5896_s4 + $0x3c] sm:$0xf] %vm2732_vm1, %v2491_v40  ;;  %v1021_v38 = vadd.f32 %v4266_v0, %v761_v27 }
 0x106   :  { %v2682_v44 = vpack.c.bf16 %v2351_v39, %v2351_v39  ;;  %v2555_v48 = vpack.c.bf16 %v2033_v45, %v2033_v45  ;;  %v1148_v45 = vmax.f32 %v892_v29, 0.0 }
 0x107   :  { %2875 = vst.msk [vmem:[%s5896_s4 + $0x238] sm:$0xf] %vm2732_vm1, %v2618_v43  ;;  %v1084_v43 = vmax.f32 %v828_v28, 0.0  ;;  %v1277_v51 = vmax.f32 %v1021_v38, 0.0  ;;  %v3656_v38 = vld [vmem:[%s5893_s0 + $0x98] sm:$0xff]  }
 0x108   :  { %2939 = vst.msk [vmem:[%s5896_s4 + $0x338] sm:$0xf] %vm2732_vm1, %v2682_v44  ;;  %v1085_v44 = vmax.f32 %v829_v5, 0.0  ;;  %v1355_v60 = vpack.c.bf16 %v1149_v46, %v1148_v45  ;;  %v3204_v46 = vunpack.c.l.bf16 %v3656_v38  ;;  %v3205_v49 = vunpack.c.h.bf16 %v3656_v38 }
 0x109   :  { %2812 = vst.msk [vmem:[%s5896_s4 + $0x13c] sm:$0xf] %vm2732_vm1, %v2555_v48  ;;  %v1213_v48 = vmax.f32 %v957_v33, 0.0 }
 0x10a   :  { %v1876_v3 = vpop.f32.mrf.mxu0  ;;  %v1323_v55 = vpack.c.bf16 %v1085_v44, %v1084_v43  ;;  %v3720_v43 = vld [vmem:[%s5893_s0 + $0x298] sm:$0xff]  }
 0x10b   :  { %v2492_v12 = vpack.c.bf16 %v1876_v3, %v1876_v3  ;;  %v1387_v61 = vpack.c.bf16 %v1213_v48, %v1212_v47  ;;  %v3752_v47 = vld [vmem:[%s5893_s0 + $0x398] sm:$0xff]   ;;  %v3461_v56 = vunpack.c.h.bf16 %v3720_v43 }
 0x10c   :  { %v2193_v10 = vpop.f32.mrf.mxu2 }
 0x10d   :  { %v2353_v11 = vpop.f32.mrf.mxu3  ;;  %v2619_v16 = vpack.c.bf16 %v2193_v10, %v2193_v10  ;;  %v2036_v18 = vpop.f32.mrf.mxu1  ;;  %2749 = vst.msk [vmem:[%s5896_s4 + $0x40] sm:$0xf] %vm2732_vm1, %v2492_v12  ;;  %3013 = vmatmul.msk.bf16.gmra.mxu0 %vm1442_vm0, %v1322_v63  ;;  %v3329_v63 = vunpack.c.h.bf16 %v3687_v52  ;;  %v3584_v12 = vunpack.c.l.bf16 %v3751_v58 }
 0x10e   :  { %v2683_v17 = vpack.c.bf16 %v2353_v11, %v2353_v11  ;;  %v2556_v21 = vpack.c.bf16 %v2036_v18, %v2036_v18 }
 0x10f   :  { %2876 = vst.msk [vmem:[%s5896_s4 + $0x23c] sm:$0xf] %vm2732_vm1, %v2619_v16  ;;  %v571_v16 = vmul.f32 %v4233_v54, %v3201_v57  ;;  %v635_v18 = vmul.f32 %v4233_v54, %v3329_v63 }
 0x110   :  { %2940 = vst.msk [vmem:[%s5896_s4 + $0x33c] sm:$0xf] %vm2732_vm1, %v2683_v17  ;;  %3045 = vmatmul.msk.bf16.gmra.mxu1 %vm1442_vm0, %v1354_v6  ;;  %v1419_v6 = vpack.c.bf16 %v1277_v51, %v1276_v50  ;;  %v634_v17 = vmul.f32 %v4233_v54, %v3328_v62  ;;  %v3589_v62 = vunpack.c.h.bf16 %v3752_v47 }
 0x111   :  { %2813 = vst.msk [vmem:[%s5896_s4 + $0x140] sm:$0xf] %vm2732_vm1, %v2556_v21  ;;  %3077 = vmatmul.msk.bf16.gmra.mxu2 %vm1442_vm0, %v1386_v13  ;;  %v3585_v13 = vunpack.c.h.bf16 %v3751_v58  ;;  %v762_v21 = vmul.f32 %v4233_v54, %v3584_v12  ;;  %v831_v23 = vadd.f32 %v4266_v0, %v571_v16  ;;  %v895_v26 = vadd.f32 %v4266_v0, %v635_v18  ;;  %v4788_v16 = vld [vmem:[%s5895_s2] ss:$0 sm:$0xff] }
 0x112   :  { %3109 = vmatmul.msk.bf16.gmra.mxu3 %vm1442_vm0, %v1418_v19  ;;  %v1878_v30 = vpop.f32.mrf.mxu0  ;;  %v698_v19 = vmul.f32 %v4233_v54, %v3456_v7  ;;  %v894_v25 = vadd.f32 %v4266_v0, %v634_v17 }
 0x113   :  { %v2493_v36 = vpack.c.bf16 %v1878_v30, %v1878_v30  ;;  %v763_v4 = vmul.f32 %v4233_v54, %v3585_v13  ;;  %v959_v30 = vadd.f32 %v4266_v0, %v699_v20  ;;  %v1022_v54 = vadd.f32 %v4266_v0, %v762_v21 }
 0x114   :  { %v2196_v34 = vpop.f32.mrf.mxu2  ;;  %v958_v29 = vadd.f32 %v4266_v0, %v698_v19  ;;  %v1087_v37 = vmax.f32 %v831_v23, 0.0 }
 0x115   :  { %v2356_v35 = vpop.f32.mrf.mxu3  ;;  %v2620_v39 = vpack.c.bf16 %v2196_v34, %v2196_v34  ;;  %v2038_v41 = vpop.f32.mrf.mxu1  ;;  %2750 = vst.msk [vmem:[%s5896_s4 + $0x44] sm:$0xf] %vm2732_vm1, %v2493_v36  ;;  %v1023_v34 = vadd.f32 %v4266_v0, %v763_v4  ;;  %v1086_v36 = vmax.f32 %v830_v22, 0.0  ;;  %v3688_v0 = vld [vmem:[%s5893_s0 + $0x198] sm:$0xff]   ;;  %v1278_v44 = vmax.f32 %v1022_v54, 0.0 }
 0x116   :  { %v2684_v40 = vpack.c.bf16 %v2356_v35, %v2356_v35  ;;  %v2557_v42 = vpack.c.bf16 %v2038_v41, %v2038_v41  ;;  %v1214_v41 = vmax.f32 %v958_v29, 0.0  ;;  %v3332_v50 = vunpack.c.l.bf16 %v3688_v0 }
 0x117   :  { %2877 = vst.msk [vmem:[%s5896_s4 + $0x240] sm:$0xf] %vm2732_vm1, %v2620_v39  ;;  %v1150_v39 = vmax.f32 %v894_v25, 0.0  ;;  %v1279_v45 = vmax.f32 %v1023_v34, 0.0  ;;  %v1324_v48 = vpack.c.bf16 %v1087_v37, %v1086_v36  ;;  %v3333_v53 = vunpack.c.h.bf16 %v3688_v0  ;;  %v3657_v36 = vld [vmem:[%s5893_s0 + $0xa0] sm:$0xff]  }
 0x118   :  { %2941 = vst.msk [vmem:[%s5896_s4 + $0x340] sm:$0xf] %vm2732_vm1, %v2684_v40  ;;  %v1151_v40 = vmax.f32 %v895_v26, 0.0 }
 0x119   :  { %2814 = vst.msk [vmem:[%s5896_s4 + $0x144] sm:$0xf] %vm2732_vm1, %v2557_v42  ;;  %v1215_v42 = vmax.f32 %v959_v30, 0.0 }
 0x11a   :  { %v1881_v59 = vpop.f32.mrf.mxu0  ;;  %v1356_v52 = vpack.c.bf16 %v1151_v40, %v1150_v39  ;;  %v3689_v39 = vld [vmem:[%s5893_s0 + $0x1a0] sm:$0xff]  }
 0x11b   :  { %v2494_v3 = vpack.c.bf16 %v1881_v59, %v1881_v59  ;;  %v3721_v40 = vld [vmem:[%s5893_s0 + $0x2a0] sm:$0xff]  }
 0x11c   :  { %v2198_v1 = vpop.f32.mrf.mxu2 }
 0x11d   :  { %v2358_v2 = vpop.f32.mrf.mxu3  ;;  %v2621_v9 = vpack.c.bf16 %v2198_v1, %v2198_v1  ;;  %v2041_v11 = vpop.f32.mrf.mxu1  ;;  %2751 = vst.msk [vmem:[%s5896_s4 + $0x48] sm:$0xf] %vm2732_vm1, %v2494_v3  ;;  %3014 = vmatmul.msk.bf16.gmra.mxu0 %vm1442_vm0, %v1323_v55  ;;  %v3460_v55 = vunpack.c.l.bf16 %v3720_v43  ;;  %v1420_v3 = vpack.c.bf16 %v1279_v45, %v1278_v44  ;;  %v3753_v43 = vld [vmem:[%s5893_s0 + $0x3a0] sm:$0xff]  }
 0x11e   :  { %v2685_v10 = vpack.c.bf16 %v2358_v2, %v2358_v2  ;;  %v2558_v14 = vpack.c.bf16 %v2041_v11, %v2041_v11 }
 0x11f   :  { %2878 = vst.msk [vmem:[%s5896_s4 + $0x244] sm:$0xf] %vm2732_vm1, %v2621_v9 }
 0x120   :  { %2942 = vst.msk [vmem:[%s5896_s4 + $0x344] sm:$0xf] %vm2732_vm1, %v2685_v10  ;;  %3046 = vmatmul.msk.bf16.gmra.mxu1 %vm1442_vm0, %v1355_v60  ;;  %v1388_v60 = vpack.c.bf16 %v1215_v42, %v1214_v41  ;;  %v3208_v41 = vunpack.c.l.bf16 %v3657_v36  ;;  %v3209_v42 = vunpack.c.h.bf16 %v3657_v36  ;;  %v3754_v36 = vld [vmem:[%s5893_s0 + $0x3a8] sm:$0xff]  }
 0x121   :  { %2815 = vst.msk [vmem:[%s5896_s4 + $0x148] sm:$0xf] %vm2732_vm1, %v2558_v14  ;;  %3078 = vmatmul.msk.bf16.gmra.mxu2 %vm1442_vm0, %v1387_v61  ;;  %v3588_v61 = vunpack.c.l.bf16 %v3752_v47  ;;  %v3336_v47 = vunpack.c.l.bf16 %v3689_v39 }
 0x122   :  { %3110 = vmatmul.msk.bf16.gmra.mxu3 %vm1442_vm0, %v1419_v6  ;;  %v1883_v24 = vpop.f32.mrf.mxu0  ;;  %v4755_v6 = vld [vmem:[%s5894_s1] ss:$0 sm:$0xff] }
 0x123   :  { %v2495_v5 = vpack.c.bf16 %v1883_v24, %v1883_v24  ;;  %v572_v7 = vmul.f32 %v4755_v6, %v3204_v46  ;;  %v573_v9 = vmul.f32 %v4755_v6, %v3205_v49  ;;  %v636_v10 = vmul.f32 %v4755_v6, %v3332_v50 }
 0x124   :  { %v2201_v27 = vpop.f32.mrf.mxu2  ;;  %v637_v11 = vmul.f32 %v4755_v6, %v3333_v53  ;;  %v700_v12 = vmul.f32 %v4755_v6, %v3460_v55  ;;  %v701_v13 = vmul.f32 %v4755_v6, %v3461_v56  ;;  %v764_v14 = vmul.f32 %v4755_v6, %v3588_v61 }
 0x125   :  { %v2361_v28 = vpop.f32.mrf.mxu3  ;;  %v2622_v31 = vpack.c.bf16 %v2201_v27, %v2201_v27  ;;  %v2043_v33 = vpop.f32.mrf.mxu1  ;;  %2752 = vst.msk [vmem:[%s5896_s4 + $0x4c] sm:$0xf] %vm2732_vm1, %v2495_v5  ;;  %v765_v15 = vmul.f32 %v4755_v6, %v3589_v62  ;;  %v832_v17 = vadd.f32 %v4788_v16, %v572_v7  ;;  %v833_v18 = vadd.f32 %v4788_v16, %v573_v9 }
 0x126   :  { %v2686_v32 = vpack.c.bf16 %v2361_v28, %v2361_v28  ;;  %v2559_v35 = vpack.c.bf16 %v2043_v33, %v2043_v33  ;;  %v896_v19 = vadd.f32 %v4788_v16, %v636_v10  ;;  %v897_v21 = vadd.f32 %v4788_v16, %v637_v11 }
 0x127   :  { %2879 = vst.msk [vmem:[%s5896_s4 + $0x248] sm:$0xf] %vm2732_vm1, %v2622_v31  ;;  %v960_v4 = vadd.f32 %v4788_v16, %v700_v12  ;;  %v961_v22 = vadd.f32 %v4788_v16, %v701_v13  ;;  %v1024_v26 = vadd.f32 %v4788_v16, %v764_v14  ;;  %v1025_v27 = vadd.f32 %v4788_v16, %v765_v15 }
 0x128   :  { %2943 = vst.msk [vmem:[%s5896_s4 + $0x348] sm:$0xf] %vm2732_vm1, %v2686_v32  ;;  %v1088_v31 = vmax.f32 %v832_v17, 0.0  ;;  %v1089_v32 = vmax.f32 %v833_v18, 0.0  ;;  %v1152_v33 = vmax.f32 %v896_v19, 0.0  ;;  %v1153_v54 = vmax.f32 %v897_v21, 0.0 }
 0x129   :  { %2816 = vst.msk [vmem:[%s5896_s4 + $0x14c] sm:$0xf] %vm2732_vm1, %v2559_v35  ;;  %v1216_v34 = vmax.f32 %v960_v4, 0.0  ;;  %v1217_v35 = vmax.f32 %v961_v22, 0.0  ;;  %v1280_v37 = vmax.f32 %v1024_v26, 0.0  ;;  %v1281_v38 = vmax.f32 %v1025_v27, 0.0 }
 0x12a   :  { %v1886_v51 = vpop.f32.mrf.mxu0  ;;  %v1325_v0 = vpack.c.bf16 %v1089_v32, %v1088_v31  ;;  %v1357_v45 = vpack.c.bf16 %v1153_v54, %v1152_v33  ;;  %v3464_v53 = vunpack.c.l.bf16 %v3721_v40  ;;  %v3465_v55 = vunpack.c.h.bf16 %v3721_v40  ;;  %v3722_v33 = vld [vmem:[%s5893_s0 + $0x2a8] sm:$0xff]  }
 0x12b   :  { %v2496_v59 = vpack.c.bf16 %v1886_v51, %v1886_v51  ;;  %v1389_v46 = vpack.c.bf16 %v1217_v35, %v1216_v34  ;;  %v574_v62 = vmul.f32 %v4755_v6, %v3208_v41 }
 0x12c   :  { %v2203_v57 = vpop.f32.mrf.mxu2  ;;  %v703_v7 = vmul.f32 %v4755_v6, %v3465_v55 }
 0x12d   :  { %v2363_v58 = vpop.f32.mrf.mxu3  ;;  %v2623_v63 = vpack.c.bf16 %v2203_v57, %v2203_v57  ;;  %v2046_v2 = vpop.f32.mrf.mxu1  ;;  %2753 = vst.msk [vmem:[%s5896_s4 + $0x50] sm:$0xf] %vm2732_vm1, %v2496_v59  ;;  %3015 = vmatmul.msk.bf16.gmra.mxu0 %vm1442_vm0, %v1324_v48  ;;  %v3337_v48 = vunpack.c.h.bf16 %v3689_v39  ;;  %v3592_v59 = vunpack.c.l.bf16 %v3753_v43  ;;  %v834_v10 = vadd.f32 %v4788_v16, %v574_v62 }
 0x12e   :  { %v2687_v1 = vpack.c.bf16 %v2363_v58, %v2363_v58  ;;  %v2560_v8 = vpack.c.bf16 %v2046_v2, %v2046_v2 }
 0x12f   :  { %2880 = vst.msk [vmem:[%s5896_s4 + $0x24c] sm:$0xf] %vm2732_vm1, %v2623_v63  ;;  %v575_v63 = vmul.f32 %v4755_v6, %v3209_v42  ;;  %v639_v2 = vmul.f32 %v4755_v6, %v3337_v48  ;;  %v1090_v26 = vmax.f32 %v834_v10, 0.0  ;;  %v3468_v42 = vunpack.c.l.bf16 %v3722_v33 }
 0x130   :  { %2944 = vst.msk [vmem:[%s5896_s4 + $0x34c] sm:$0xf] %vm2732_vm1, %v2687_v1  ;;  %3047 = vmatmul.msk.bf16.gmra.mxu1 %vm1442_vm0, %v1356_v52  ;;  %v1421_v52 = vpack.c.bf16 %v1281_v38, %v1280_v37  ;;  %v638_v1 = vmul.f32 %v4755_v6, %v3336_v47  ;;  %v3596_v48 = vunpack.c.l.bf16 %v3754_v36 }
 0x131   :  { %2817 = vst.msk [vmem:[%s5896_s4 + $0x150] sm:$0xf] %vm2732_vm1, %v2560_v8  ;;  %3079 = vmatmul.msk.bf16.gmra.mxu2 %vm1442_vm0, %v1388_v60  ;;  %v3593_v60 = vunpack.c.h.bf16 %v3753_v43  ;;  %v766_v8 = vmul.f32 %v4755_v6, %v3592_v59  ;;  %v835_v11 = vadd.f32 %v4788_v16, %v575_v63  ;;  %v899_v14 = vadd.f32 %v4788_v16, %v639_v2 }
 0x132   :  { %3111 = vmatmul.msk.bf16.gmra.mxu3 %vm1442_vm0, %v1420_v3  ;;  %v1888_v20 = vpop.f32.mrf.mxu0  ;;  %v702_v3 = vmul.f32 %v4755_v6, %v3464_v53  ;;  %v898_v13 = vadd.f32 %v4788_v16, %v638_v1  ;;  %v3469_v43 = vunpack.c.h.bf16 %v3722_v33  ;;  %v768_v62 = vmul.f32 %v4755_v6, %v3596_v48  ;;  %v3755_v33 = vld [vmem:[%s5893_s0 + $0x3b0] sm:$0xff]  }
 0x133   :  { %v2497_v25 = vpack.c.bf16 %v1888_v20, %v1888_v20  ;;  %v767_v9 = vmul.f32 %v4755_v6, %v3593_v60  ;;  %v963_v20 = vadd.f32 %v4788_v16, %v703_v7  ;;  %v1091_v27 = vmax.f32 %v835_v11, 0.0 }
 0x134   :  { %v2206_v23 = vpop.f32.mrf.mxu2  ;;  %v962_v19 = vadd.f32 %v4788_v16, %v702_v3  ;;  %v704_v60 = vmul.f32 %v4755_v6, %v3468_v42 }
 0x135   :  { %v2366_v24 = vpop.f32.mrf.mxu3  ;;  %v2624_v28 = vpack.c.bf16 %v2206_v23, %v2206_v23  ;;  %v2048_v29 = vpop.f32.mrf.mxu1  ;;  %2754 = vst.msk [vmem:[%s5896_s4 + $0x54] sm:$0xf] %vm2732_vm1, %v2497_v25  ;;  %v1026_v23 = vadd.f32 %v4788_v16, %v766_v8  ;;  %v1219_v32 = vmax.f32 %v963_v20, 0.0  ;;  %v1326_v37 = vpack.c.bf16 %v1091_v27, %v1090_v26  ;;  %v3659_v26 = vld [vmem:[%s5893_s0 + $0xb0] sm:$0xff]  }
 0x136   :  { %v2688_v5 = vpack.c.bf16 %v2366_v24, %v2366_v24  ;;  %v2561_v30 = vpack.c.bf16 %v2048_v29, %v2048_v29  ;;  %v1027_v24 = vadd.f32 %v4788_v16, %v767_v9  ;;  %v1155_v29 = vmax.f32 %v899_v14, 0.0 }
 0x137   :  { %2881 = vst.msk [vmem:[%s5896_s4 + $0x250] sm:$0xf] %vm2732_vm1, %v2624_v28  ;;  %v3658_v28 = vld [vmem:[%s5893_s0 + $0xa8] sm:$0xff]   ;;  %v1218_v31 = vmax.f32 %v962_v19, 0.0  ;;  %v1282_v54 = vmax.f32 %v1026_v23, 0.0  ;;  %v964_v9 = vadd.f32 %v4788_v16, %v704_v60  ;;  %v1028_v14 = vadd.f32 %v4788_v16, %v768_v62 }
 0x138   :  { %2945 = vst.msk [vmem:[%s5896_s4 + $0x350] sm:$0xf] %vm2732_vm1, %v2688_v5  ;;  %v1154_v5 = vmax.f32 %v898_v13, 0.0  ;;  %v1283_v34 = vmax.f32 %v1027_v24, 0.0  ;;  %v3212_v35 = vunpack.c.l.bf16 %v3658_v28  ;;  %v3213_v38 = vunpack.c.h.bf16 %v3658_v28 }
 0x139   :  { %2818 = vst.msk [vmem:[%s5896_s4 + $0x154] sm:$0xf] %vm2732_vm1, %v2561_v30  ;;  %v3690_v30 = vld [vmem:[%s5893_s0 + $0x1a8] sm:$0xff]   ;;  %v1390_v47 = vpack.c.bf16 %v1219_v32, %v1218_v31  ;;  %v1220_v24 = vmax.f32 %v964_v9, 0.0  ;;  %v1284_v27 = vmax.f32 %v1028_v14, 0.0  ;;  %v3216_v31 = vunpack.c.l.bf16 %v3659_v26 }
 0x13a   :  { %v1891_v44 = vpop.f32.mrf.mxu0  ;;  %v3340_v39 = vunpack.c.l.bf16 %v3690_v30  ;;  %v3341_v41 = vunpack.c.h.bf16 %v3690_v30  ;;  %v1422_v53 = vpack.c.bf16 %v1283_v34, %v1282_v54  ;;  %v576_v55 = vmul.f32 %v4755_v6, %v3212_v35 }
 0x13b   :  { %v2498_v51 = vpack.c.bf16 %v1891_v44, %v1891_v44  ;;  %v3217_v32 = vunpack.c.h.bf16 %v3659_v26  ;;  %v3756_v26 = vld [vmem:[%s5893_s0 + $0x3b8] sm:$0xff]  }
 0x13c   :  { %v2208_v49 = vpop.f32.mrf.mxu2  ;;  %v641_v59 = vmul.f32 %v4755_v6, %v3341_v41  ;;  %v836_v1 = vadd.f32 %v4788_v16, %v576_v55 }
 0x13d   :  { %v2368_v50 = vpop.f32.mrf.mxu3  ;;  %v2625_v56 = vpack.c.bf16 %v2208_v49, %v2208_v49  ;;  %v2051_v58 = vpop.f32.mrf.mxu1  ;;  %2755 = vst.msk [vmem:[%s5896_s4 + $0x58] sm:$0xf] %vm2732_vm1, %v2498_v51  ;;  %3016 = vmatmul.msk.bf16.gmra.mxu0 %vm1442_vm0, %v1325_v0  ;;  %v1358_v0 = vpack.c.bf16 %v1155_v29, %v1154_v5  ;;  %v3597_v49 = vunpack.c.h.bf16 %v3754_v36  ;;  %v3691_v5 = vld [vmem:[%s5893_s0 + $0x1b0] sm:$0xff]  }
 0x13e   :  { %v2689_v57 = vpack.c.bf16 %v2368_v50, %v2368_v50  ;;  %v2562_v61 = vpack.c.bf16 %v2051_v58, %v2051_v58  ;;  %v640_v58 = vmul.f32 %v4755_v6, %v3340_v39  ;;  %v901_v8 = vadd.f32 %v4788_v16, %v641_v59  ;;  %v3723_v29 = vld [vmem:[%s5893_s0 + $0x2b0] sm:$0xff]  }
 0x13f   :  { %2882 = vst.msk [vmem:[%s5896_s4 + $0x254] sm:$0xf] %vm2732_vm1, %v2625_v56  ;;  %v769_v63 = vmul.f32 %v4755_v6, %v3597_v49  ;;  %v3344_v36 = vunpack.c.l.bf16 %v3691_v5  ;;  %v3472_v41 = vunpack.c.l.bf16 %v3723_v29  ;;  %v3473_v42 = vunpack.c.h.bf16 %v3723_v29 }
 0x140   :  { %2946 = vst.msk [vmem:[%s5896_s4 + $0x354] sm:$0xf] %vm2732_vm1, %v2689_v57  ;;  %3048 = vmatmul.msk.bf16.gmra.mxu1 %vm1442_vm0, %v1357_v45  ;;  %v577_v57 = vmul.f32 %v4755_v6, %v3213_v38  ;;  %v900_v3 = vadd.f32 %v4788_v16, %v640_v58  ;;  %v1157_v23 = vmax.f32 %v901_v8, 0.0  ;;  %v578_v49 = vmul.f32 %v4755_v6, %v3216_v31 }
 0x141   :  { %2819 = vst.msk [vmem:[%s5896_s4 + $0x158] sm:$0xf] %vm2732_vm1, %v2562_v61  ;;  %3080 = vmatmul.msk.bf16.gmra.mxu2 %vm1442_vm0, %v1389_v46  ;;  %v705_v61 = vmul.f32 %v4755_v6, %v3469_v43  ;;  %v707_v55 = vmul.f32 %v4755_v6, %v3473_v42 }
 0x142   :  { %3112 = vmatmul.msk.bf16.gmra.mxu3 %vm1442_vm0, %v1421_v52  ;;  %v1893_v12 = vpop.f32.mrf.mxu0  ;;  %v837_v2 = vadd.f32 %v4788_v16, %v577_v57  ;;  %v838_v58 = vadd.f32 %v4788_v16, %v578_v49 }
 0x143   :  { %v2499_v18 = vpack.c.bf16 %v1893_v12, %v1893_v12  ;;  %v965_v10 = vadd.f32 %v4788_v16, %v705_v61 }
 0x144   :  { %v2211_v15 = vpop.f32.mrf.mxu2  ;;  %v1094_v14 = vmax.f32 %v838_v58, 0.0 }
 0x145   :  { %v2371_v17 = vpop.f32.mrf.mxu3  ;;  %v2626_v21 = vpack.c.bf16 %v2211_v15, %v2211_v15  ;;  %v2053_v22 = vpop.f32.mrf.mxu1  ;;  %2756 = vst.msk [vmem:[%s5896_s4 + $0x5c] sm:$0xf] %vm2732_vm1, %v2499_v18  ;;  %v1029_v15 = vadd.f32 %v4788_v16, %v769_v63 }
 0x146   :  { %v2690_v4 = vpack.c.bf16 %v2371_v17, %v2371_v17  ;;  %v2563_v25 = vpack.c.bf16 %v2053_v22, %v2053_v22  ;;  %v1156_v22 = vmax.f32 %v900_v3, 0.0 }
 0x147   :  { %2883 = vst.msk [vmem:[%s5896_s4 + $0x258] sm:$0xf] %vm2732_vm1, %v2626_v21  ;;  %v1092_v21 = vmax.f32 %v836_v1, 0.0  ;;  %v1285_v28 = vmax.f32 %v1029_v15, 0.0 }
 0x148   :  { %2947 = vst.msk [vmem:[%s5896_s4 + $0x358] sm:$0xf] %vm2732_vm1, %v2690_v4  ;;  %v1093_v4 = vmax.f32 %v837_v2, 0.0  ;;  %v1359_v34 = vpack.c.bf16 %v1157_v23, %v1156_v22  ;;  %v3724_v22 = vld [vmem:[%s5893_s0 + $0x2b8] sm:$0xff]  }
 0x149   :  { %2820 = vst.msk [vmem:[%s5896_s4 + $0x15c] sm:$0xf] %vm2732_vm1, %v2563_v25  ;;  %v1221_v25 = vmax.f32 %v965_v10, 0.0 }
 0x14a   :  { %v1896_v40 = vpop.f32.mrf.mxu0  ;;  %v1327_v30 = vpack.c.bf16 %v1093_v4, %v1092_v21 }
 0x14b   :  { %v2500_v46 = vpack.c.bf16 %v1896_v40, %v1896_v40  ;;  %v1391_v35 = vpack.c.bf16 %v1221_v25, %v1220_v24 }
 0x14c   :  { %v2213_v44 = vpop.f32.mrf.mxu2 }
 0x14d   :  { %v2373_v45 = vpop.f32.mrf.mxu3  ;;  %v2627_v50 = vpack.c.bf16 %v2213_v44, %v2213_v44  ;;  %v2056_v52 = vpop.f32.mrf.mxu1  ;;  %2757 = vst.msk [vmem:[%s5896_s4 + $0x60] sm:$0xf] %vm2732_vm1, %v2500_v46  ;;  %3017 = vmatmul.msk.bf16.gmra.mxu0 %vm1442_vm0, %v1326_v37  ;;  %v3345_v37 = vunpack.c.h.bf16 %v3691_v5  ;;  %v3600_v46 = vunpack.c.l.bf16 %v3755_v33 }
 0x14e   :  { %v2691_v51 = vpack.c.bf16 %v2373_v45, %v2373_v45  ;;  %v2564_v56 = vpack.c.bf16 %v2056_v52, %v2056_v52 }
 0x14f   :  { %2884 = vst.msk [vmem:[%s5896_s4 + $0x25c] sm:$0xf] %vm2732_vm1, %v2627_v50  ;;  %v579_v50 = vmul.f32 %v4755_v6, %v3217_v32  ;;  %v643_v52 = vmul.f32 %v4755_v6, %v3345_v37  ;;  %v3476_v32 = vunpack.c.l.bf16 %v3724_v22  ;;  %v3604_v37 = vunpack.c.l.bf16 %v3756_v26 }
 0x150   :  { %2948 = vst.msk [vmem:[%s5896_s4 + $0x35c] sm:$0xf] %vm2732_vm1, %v2691_v51  ;;  %3049 = vmatmul.msk.bf16.gmra.mxu1 %vm1442_vm0, %v1358_v0  ;;  %v1423_v0 = vpack.c.bf16 %v1285_v28, %v1284_v27  ;;  %v642_v51 = vmul.f32 %v4755_v6, %v3344_v36 }
 0x151   :  { %2821 = vst.msk [vmem:[%s5896_s4 + $0x160] sm:$0xf] %vm2732_vm1, %v2564_v56  ;;  %3081 = vmatmul.msk.bf16.gmra.mxu2 %vm1442_vm0, %v1390_v47  ;;  %v3601_v47 = vunpack.c.h.bf16 %v3755_v33  ;;  %v770_v56 = vmul.f32 %v4755_v6, %v3600_v46  ;;  %v839_v59 = vadd.f32 %v4788_v16, %v579_v50  ;;  %v903_v62 = vadd.f32 %v4788_v16, %v643_v52 }
 0x152   :  { %3113 = vmatmul.msk.bf16.gmra.mxu3 %vm1442_vm0, %v1422_v53  ;;  %v1898_v7 = vpop.f32.mrf.mxu0  ;;  %v706_v53 = vmul.f32 %v4755_v6, %v3472_v41  ;;  %v902_v61 = vadd.f32 %v4788_v16, %v642_v51  ;;  %v3477_v33 = vunpack.c.h.bf16 %v3724_v22  ;;  %v772_v49 = vmul.f32 %v4755_v6, %v3604_v37  ;;  %v3757_v22 = vld [vmem:[%s5893_s0 + $0x3c0] sm:$0xff]  }
 0x153   :  { %v2501_v13 = vpack.c.bf16 %v1898_v7, %v1898_v7  ;;  %v771_v57 = vmul.f32 %v4755_v6, %v3601_v47  ;;  %v967_v7 = vadd.f32 %v4788_v16, %v707_v55  ;;  %v1095_v15 = vmax.f32 %v839_v59, 0.0 }
 0x154   :  { %v2216_v11 = vpop.f32.mrf.mxu2  ;;  %v966_v3 = vadd.f32 %v4788_v16, %v706_v53  ;;  %v708_v47 = vmul.f32 %v4755_v6, %v3476_v32 }
 0x155   :  { %v2376_v12 = vpop.f32.mrf.mxu3  ;;  %v2628_v17 = vpack.c.bf16 %v2216_v11, %v2216_v11  ;;  %v2058_v19 = vpop.f32.mrf.mxu1  ;;  %2758 = vst.msk [vmem:[%s5896_s4 + $0x64] sm:$0xf] %vm2732_vm1, %v2501_v13  ;;  %v1030_v11 = vadd.f32 %v4788_v16, %v770_v56  ;;  %v1223_v4 = vmax.f32 %v967_v7, 0.0  ;;  %v1328_v27 = vpack.c.bf16 %v1095_v15, %v1094_v14  ;;  %v3661_v14 = vld [vmem:[%s5893_s0 + $0xc0] sm:$0xff]  }
 0x156   :  { %v2692_v18 = vpack.c.bf16 %v2376_v12, %v2376_v12  ;;  %v2565_v20 = vpack.c.bf16 %v2058_v19, %v2058_v19  ;;  %v1031_v12 = vadd.f32 %v4788_v16, %v771_v57  ;;  %v1159_v19 = vmax.f32 %v903_v62, 0.0 }
 0x157   :  { %2885 = vst.msk [vmem:[%s5896_s4 + $0x260] sm:$0xf] %vm2732_vm1, %v2628_v17  ;;  %v3660_v17 = vld [vmem:[%s5893_s0 + $0xb8] sm:$0xff]   ;;  %v1222_v21 = vmax.f32 %v966_v3, 0.0  ;;  %v1286_v23 = vmax.f32 %v1030_v11, 0.0  ;;  %v968_v57 = vadd.f32 %v4788_v16, %v708_v47  ;;  %v1032_v62 = vadd.f32 %v4788_v16, %v772_v49 }
 0x158   :  { %2949 = vst.msk [vmem:[%s5896_s4 + $0x360] sm:$0xf] %vm2732_vm1, %v2692_v18  ;;  %v1158_v18 = vmax.f32 %v902_v61, 0.0  ;;  %v1287_v24 = vmax.f32 %v1031_v12, 0.0  ;;  %v3220_v25 = vunpack.c.l.bf16 %v3660_v17  ;;  %v3221_v28 = vunpack.c.h.bf16 %v3660_v17 }
 0x159   :  { %2822 = vst.msk [vmem:[%s5896_s4 + $0x164] sm:$0xf] %vm2732_vm1, %v2565_v20  ;;  %v3692_v20 = vld [vmem:[%s5893_s0 + $0x1b8] sm:$0xff]   ;;  %v1392_v36 = vpack.c.bf16 %v1223_v4, %v1222_v21  ;;  %v1224_v12 = vmax.f32 %v968_v57, 0.0  ;;  %v1288_v15 = vmax.f32 %v1032_v62, 0.0  ;;  %v3224_v21 = vunpack.c.l.bf16 %v3661_v14 }
 0x15a   :  { %v1901_v54 = vpop.f32.mrf.mxu0  ;;  %v3348_v5 = vunpack.c.l.bf16 %v3692_v20  ;;  %v3349_v31 = vunpack.c.h.bf16 %v3692_v20  ;;  %v1424_v41 = vpack.c.bf16 %v1287_v24, %v1286_v23  ;;  %v580_v42 = vmul.f32 %v4755_v6, %v3220_v25 }
 0x15b   :  { %v2502_v40 = vpack.c.bf16 %v1901_v54, %v1901_v54  ;;  %v3225_v4 = vunpack.c.h.bf16 %v3661_v14  ;;  %v3758_v14 = vld [vmem:[%s5893_s0 + $0x3c8] sm:$0xff]  }
 0x15c   :  { %v2218_v38 = vpop.f32.mrf.mxu2  ;;  %v645_v46 = vmul.f32 %v4755_v6, %v3349_v31  ;;  %v840_v51 = vadd.f32 %v4788_v16, %v580_v42 }
 0x15d   :  { %v2378_v39 = vpop.f32.mrf.mxu3  ;;  %v2629_v43 = vpack.c.bf16 %v2218_v38, %v2218_v38  ;;  %v2061_v45 = vpop.f32.mrf.mxu1  ;;  %2759 = vst.msk [vmem:[%s5896_s4 + $0x68] sm:$0xf] %vm2732_vm1, %v2502_v40  ;;  %3018 = vmatmul.msk.bf16.gmra.mxu0 %vm1442_vm0, %v1327_v30  ;;  %v1360_v30 = vpack.c.bf16 %v1159_v19, %v1158_v18  ;;  %v3605_v38 = vunpack.c.h.bf16 %v3756_v26  ;;  %v3693_v18 = vld [vmem:[%s5893_s0 + $0x1c0] sm:$0xff]  }
 0x15e   :  { %v2693_v44 = vpack.c.bf16 %v2378_v39, %v2378_v39  ;;  %v2566_v48 = vpack.c.bf16 %v2061_v45, %v2061_v45  ;;  %v644_v45 = vmul.f32 %v4755_v6, %v3348_v5  ;;  %v905_v56 = vadd.f32 %v4788_v16, %v645_v46  ;;  %v3725_v19 = vld [vmem:[%s5893_s0 + $0x2c0] sm:$0xff]  }
 0x15f   :  { %2886 = vst.msk [vmem:[%s5896_s4 + $0x264] sm:$0xf] %vm2732_vm1, %v2629_v43  ;;  %v773_v50 = vmul.f32 %v4755_v6, %v3605_v38  ;;  %v3352_v26 = vunpack.c.l.bf16 %v3693_v18  ;;  %v3480_v31 = vunpack.c.l.bf16 %v3725_v19  ;;  %v3481_v32 = vunpack.c.h.bf16 %v3725_v19 }
 0x160   :  { %2950 = vst.msk [vmem:[%s5896_s4 + $0x364] sm:$0xf] %vm2732_vm1, %v2693_v44  ;;  %3050 = vmatmul.msk.bf16.gmra.mxu1 %vm1442_vm0, %v1359_v34  ;;  %v581_v44 = vmul.f32 %v4755_v6, %v3221_v28  ;;  %v904_v53 = vadd.f32 %v4788_v16, %v644_v45  ;;  %v1161_v11 = vmax.f32 %v905_v56, 0.0  ;;  %v582_v38 = vmul.f32 %v4755_v6, %v3224_v21 }
 0x161   :  { %2823 = vst.msk [vmem:[%s5896_s4 + $0x168] sm:$0xf] %vm2732_vm1, %v2566_v48  ;;  %3082 = vmatmul.msk.bf16.gmra.mxu2 %vm1442_vm0, %v1391_v35  ;;  %v709_v48 = vmul.f32 %v4755_v6, %v3477_v33  ;;  %v711_v42 = vmul.f32 %v4755_v6, %v3481_v32 }
 0x162   :  { %3114 = vmatmul.msk.bf16.gmra.mxu3 %vm1442_vm0, %v1423_v0  ;;  %v1903_v60 = vpop.f32.mrf.mxu0  ;;  %v841_v52 = vadd.f32 %v4788_v16, %v581_v44  ;;  %v842_v45 = vadd.f32 %v4788_v16, %v582_v38 }
 0x163   :  { %v2503_v2 = vpack.c.bf16 %v1903_v60, %v1903_v60  ;;  %v969_v58 = vadd.f32 %v4788_v16, %v709_v48 }
 0x164   :  { %v2221_v63 = vpop.f32.mrf.mxu2  ;;  %v1098_v62 = vmax.f32 %v842_v45, 0.0 }
 0x165   :  { %v2381_v1 = vpop.f32.mrf.mxu3  ;;  %v2630_v8 = vpack.c.bf16 %v2221_v63, %v2221_v63  ;;  %v2063_v10 = vpop.f32.mrf.mxu1  ;;  %2760 = vst.msk [vmem:[%s5896_s4 + $0x6c] sm:$0xf] %vm2732_vm1, %v2503_v2  ;;  %v1033_v63 = vadd.f32 %v4788_v16, %v773_v50 }
 0x166   :  { %v2694_v9 = vpack.c.bf16 %v2381_v1, %v2381_v1  ;;  %v2567_v13 = vpack.c.bf16 %v2063_v10, %v2063_v10  ;;  %v1160_v10 = vmax.f32 %v904_v53, 0.0 }
 0x167   :  { %2887 = vst.msk [vmem:[%s5896_s4 + $0x268] sm:$0xf] %vm2732_vm1, %v2630_v8  ;;  %v1096_v8 = vmax.f32 %v840_v51, 0.0  ;;  %v1289_v17 = vmax.f32 %v1033_v63, 0.0 }
 0x168   :  { %2951 = vst.msk [vmem:[%s5896_s4 + $0x368] sm:$0xf] %vm2732_vm1, %v2694_v9  ;;  %v1097_v9 = vmax.f32 %v841_v52, 0.0  ;;  %v1361_v24 = vpack.c.bf16 %v1161_v11, %v1160_v10  ;;  %v3726_v10 = vld [vmem:[%s5893_s0 + $0x2c8] sm:$0xff]  }
 0x169   :  { %2824 = vst.msk [vmem:[%s5896_s4 + $0x16c] sm:$0xf] %vm2732_vm1, %v2567_v13  ;;  %v1225_v13 = vmax.f32 %v969_v58, 0.0 }
 0x16a   :  { %v1906_v29 = vpop.f32.mrf.mxu0  ;;  %v1329_v20 = vpack.c.bf16 %v1097_v9, %v1096_v8 }
 0x16b   :  { %v2504_v35 = vpack.c.bf16 %v1906_v29, %v1906_v29  ;;  %v1393_v25 = vpack.c.bf16 %v1225_v13, %v1224_v12 }
 0x16c   :  { %v2223_v54 = vpop.f32.mrf.mxu2 }
 0x16d   :  { %v2383_v34 = vpop.f32.mrf.mxu3  ;;  %v2631_v39 = vpack.c.bf16 %v2223_v54, %v2223_v54  ;;  %v2066_v0 = vpop.f32.mrf.mxu1  ;;  %2761 = vst.msk [vmem:[%s5896_s4 + $0x70] sm:$0xf] %vm2732_vm1, %v2504_v35  ;;  %3019 = vmatmul.msk.bf16.gmra.mxu0 %vm1442_vm0, %v1328_v27  ;;  %v3353_v27 = vunpack.c.h.bf16 %v3693_v18  ;;  %v3608_v35 = vunpack.c.l.bf16 %v3757_v22 }
 0x16e   :  { %v2695_v40 = vpack.c.bf16 %v2383_v34, %v2383_v34  ;;  %v2568_v43 = vpack.c.bf16 %v2066_v0, %v2066_v0 }
 0x16f   :  { %2888 = vst.msk [vmem:[%s5896_s4 + $0x26c] sm:$0xf] %vm2732_vm1, %v2631_v39  ;;  %v583_v39 = vmul.f32 %v4755_v6, %v3225_v4  ;;  %v647_v0 = vmul.f32 %v4755_v6, %v3353_v27  ;;  %v3484_v4 = vunpack.c.l.bf16 %v3726_v10  ;;  %v3612_v27 = vunpack.c.l.bf16 %v3758_v14 }
 0x170   :  { %2952 = vst.msk [vmem:[%s5896_s4 + $0x36c] sm:$0xf] %vm2732_vm1, %v2695_v40  ;;  %3051 = vmatmul.msk.bf16.gmra.mxu1 %vm1442_vm0, %v1360_v30  ;;  %v1425_v30 = vpack.c.bf16 %v1289_v17, %v1288_v15  ;;  %v646_v40 = vmul.f32 %v4755_v6, %v3352_v26 }
 0x171   :  { %2825 = vst.msk [vmem:[%s5896_s4 + $0x170] sm:$0xf] %vm2732_vm1, %v2568_v43  ;;  %3083 = vmatmul.msk.bf16.gmra.mxu2 %vm1442_vm0, %v1392_v36  ;;  %v3609_v36 = vunpack.c.h.bf16 %v3757_v22  ;;  %v774_v43 = vmul.f32 %v4755_v6, %v3608_v35  ;;  %v843_v46 = vadd.f32 %v4788_v16, %v583_v39  ;;  %v907_v49 = vadd.f32 %v4788_v16, %v647_v0 }
 0x172   :  { %3115 = vmatmul.msk.bf16.gmra.mxu3 %vm1442_vm0, %v1424_v41  ;;  %v1908_v55 = vpop.f32.mrf.mxu0  ;;  %v710_v41 = vmul.f32 %v4755_v6, %v3480_v31  ;;  %v906_v48 = vadd.f32 %v4788_v16, %v646_v40  ;;  %v3485_v22 = vunpack.c.h.bf16 %v3726_v10  ;;  %v776_v38 = vmul.f32 %v4755_v6, %v3612_v27  ;;  %v3759_v10 = vld [vmem:[%s5893_s0 + $0x3d0] sm:$0xff]  }
 0x173   :  { %v2505_v61 = vpack.c.bf16 %v1908_v55, %v1908_v55  ;;  %v775_v44 = vmul.f32 %v4755_v6, %v3609_v36  ;;  %v971_v55 = vadd.f32 %v4788_v16, %v711_v42  ;;  %v1099_v63 = vmax.f32 %v843_v46, 0.0 }
 0x174   :  { %v2226_v59 = vpop.f32.mrf.mxu2  ;;  %v970_v53 = vadd.f32 %v4788_v16, %v710_v41  ;;  %v712_v36 = vmul.f32 %v4755_v6, %v3484_v4 }
 0x175   :  { %v2386_v60 = vpop.f32.mrf.mxu3  ;;  %v2632_v1 = vpack.c.bf16 %v2226_v59, %v2226_v59  ;;  %v2068_v3 = vpop.f32.mrf.mxu1  ;;  %2762 = vst.msk [vmem:[%s5896_s4 + $0x74] sm:$0xf] %vm2732_vm1, %v2505_v61  ;;  %v1034_v59 = vadd.f32 %v4788_v16, %v774_v43  ;;  %v1227_v9 = vmax.f32 %v971_v55, 0.0  ;;  %v1330_v15 = vpack.c.bf16 %v1099_v63, %v1098_v62  ;;  %v3663_v62 = vld [vmem:[%s5893_s0 + $0xd0] sm:$0xff]  }
 0x176   :  { %v2696_v2 = vpack.c.bf16 %v2386_v60, %v2386_v60  ;;  %v2569_v7 = vpack.c.bf16 %v2068_v3, %v2068_v3  ;;  %v1035_v60 = vadd.f32 %v4788_v16, %v775_v44  ;;  %v1163_v3 = vmax.f32 %v907_v49, 0.0 }
 0x177   :  { %2889 = vst.msk [vmem:[%s5896_s4 + $0x270] sm:$0xf] %vm2732_vm1, %v2632_v1  ;;  %v3662_v1 = vld [vmem:[%s5893_s0 + $0xc8] sm:$0xff]   ;;  %v1226_v8 = vmax.f32 %v970_v53, 0.0  ;;  %v1290_v11 = vmax.f32 %v1034_v59, 0.0  ;;  %v972_v44 = vadd.f32 %v4788_v16, %v712_v36  ;;  %v1036_v49 = vadd.f32 %v4788_v16, %v776_v38 }
 0x178   :  { %2953 = vst.msk [vmem:[%s5896_s4 + $0x370] sm:$0xf] %vm2732_vm1, %v2696_v2  ;;  %v1162_v2 = vmax.f32 %v906_v48, 0.0  ;;  %v1291_v12 = vmax.f32 %v1035_v60, 0.0  ;;  %v3228_v13 = vunpack.c.l.bf16 %v3662_v1  ;;  %v3229_v17 = vunpack.c.h.bf16 %v3662_v1 }
 0x179   :  { %2826 = vst.msk [vmem:[%s5896_s4 + $0x174] sm:$0xf] %vm2732_vm1, %v2569_v7  ;;  %v3694_v7 = vld [vmem:[%s5893_s0 + $0x1c8] sm:$0xff]   ;;  %v1394_v26 = vpack.c.bf16 %v1227_v9, %v1226_v8  ;;  %v1228_v60 = vmax.f32 %v972_v44, 0.0  ;;  %v1292_v63 = vmax.f32 %v1036_v49, 0.0  ;;  %v3232_v8 = vunpack.c.l.bf16 %v3663_v62 }
 0x17a   :  { %v1911_v23 = vpop.f32.mrf.mxu0  ;;  %v3356_v18 = vunpack.c.l.bf16 %v3694_v7  ;;  %v3357_v21 = vunpack.c.h.bf16 %v3694_v7  ;;  %v1426_v31 = vpack.c.bf16 %v1291_v12, %v1290_v11  ;;  %v584_v32 = vmul.f32 %v4755_v6, %v3228_v13 }
 0x17b   :  { %v2506_v29 = vpack.c.bf16 %v1911_v23, %v1911_v23  ;;  %v3233_v9 = vunpack.c.h.bf16 %v3663_v62 }
 0x17c   :  { %v2228_v28 = vpop.f32.mrf.mxu2  ;;  %v649_v35 = vmul.f32 %v4755_v6, %v3357_v21  ;;  %v844_v40 = vadd.f32 %v4788_v16, %v584_v32 }
 0x17d   :  { %v2388_v5 = vpop.f32.mrf.mxu3  ;;  %v2633_v33 = vpack.c.bf16 %v2228_v28, %v2228_v28  ;;  %v2071_v34 = vpop.f32.mrf.mxu1  ;;  %2763 = vst.msk [vmem:[%s5896_s4 + $0x78] sm:$0xf] %vm2732_vm1, %v2506_v29  ;;  %3020 = vmatmul.msk.bf16.gmra.mxu0 %vm1442_vm0, %v1329_v20  ;;  %v1362_v20 = vpack.c.bf16 %v1163_v3, %v1162_v2  ;;  %v3613_v28 = vunpack.c.h.bf16 %v3758_v14  ;;  %v3695_v2 = vld [vmem:[%s5893_s0 + $0x1d0] sm:$0xff]  }
 0x17e   :  { %v2697_v54 = vpack.c.bf16 %v2388_v5, %v2388_v5  ;;  %v2570_v37 = vpack.c.bf16 %v2071_v34, %v2071_v34  ;;  %v648_v34 = vmul.f32 %v4755_v6, %v3356_v18  ;;  %v909_v43 = vadd.f32 %v4788_v16, %v649_v35  ;;  %v3727_v3 = vld [vmem:[%s5893_s0 + $0x2d0] sm:$0xff]  }
 0x17f   :  { %2890 = vst.msk [vmem:[%s5896_s4 + $0x274] sm:$0xf] %vm2732_vm1, %v2633_v33  ;;  %v777_v39 = vmul.f32 %v4755_v6, %v3613_v28  ;;  %v3360_v14 = vunpack.c.l.bf16 %v3695_v2  ;;  %v3488_v21 = vunpack.c.l.bf16 %v3727_v3  ;;  %v3489_v4 = vunpack.c.h.bf16 %v3727_v3 }
 0x180   :  { %2954 = vst.msk [vmem:[%s5896_s4 + $0x374] sm:$0xf] %vm2732_vm1, %v2697_v54  ;;  %3052 = vmatmul.msk.bf16.gmra.mxu1 %vm1442_vm0, %v1361_v24  ;;  %v585_v54 = vmul.f32 %v4755_v6, %v3229_v17  ;;  %v908_v41 = vadd.f32 %v4788_v16, %v648_v34  ;;  %v1165_v59 = vmax.f32 %v909_v43, 0.0  ;;  %v586_v28 = vmul.f32 %v4755_v6, %v3232_v8 }
 0x181   :  { %2827 = vst.msk [vmem:[%s5896_s4 + $0x178] sm:$0xf] %vm2732_vm1, %v2570_v37  ;;  %3084 = vmatmul.msk.bf16.gmra.mxu2 %vm1442_vm0, %v1393_v25  ;;  %v713_v37 = vmul.f32 %v4755_v6, %v3485_v22  ;;  %v715_v32 = vmul.f32 %v4755_v6, %v3489_v4 }
 0x182   :  { %3116 = vmatmul.msk.bf16.gmra.mxu3 %vm1442_vm0, %v1425_v30  ;;  %v1913_v47 = vpop.f32.mrf.mxu0  ;;  %v845_v0 = vadd.f32 %v4788_v16, %v585_v54  ;;  %v846_v34 = vadd.f32 %v4788_v16, %v586_v28 }
 0x183   :  { %v2507_v52 = vpack.c.bf16 %v1913_v47, %v1913_v47  ;;  %v973_v45 = vadd.f32 %v4788_v16, %v713_v37 }
 0x184   :  { %v2231_v50 = vpop.f32.mrf.mxu2 }
 0x185   :  { %v2391_v51 = vpop.f32.mrf.mxu3  ;;  %v2634_v56 = vpack.c.bf16 %v2231_v50, %v2231_v50  ;;  %v2073_v58 = vpop.f32.mrf.mxu1  ;;  %2764 = vst.msk [vmem:[%s5896_s4 + $0x7c] sm:$0xf] %vm2732_vm1, %v2507_v52  ;;  %v1037_v50 = vadd.f32 %v4788_v16, %v777_v39 }
 0x186   :  { %v2698_v57 = vpack.c.bf16 %v2391_v51, %v2391_v51  ;;  %v2571_v61 = vpack.c.bf16 %v2073_v58, %v2073_v58  ;;  %v1164_v58 = vmax.f32 %v908_v41, 0.0 }
 0x187   :  { %2891 = vst.msk [vmem:[%s5896_s4 + $0x278] sm:$0xf] %vm2732_vm1, %v2634_v56  ;;  %v1100_v56 = vmax.f32 %v844_v40, 0.0  ;;  %v1293_v1 = vmax.f32 %v1037_v50, 0.0  ;;  %v3664_v50 = vld [vmem:[%s5893_s0 + $0xd8] sm:$0xff]  }
 0x188   :  { %2955 = vst.msk [vmem:[%s5896_s4 + $0x378] sm:$0xf] %vm2732_vm1, %v2698_v57  ;;  %v1101_v57 = vmax.f32 %v845_v0, 0.0  ;;  %v1363_v12 = vpack.c.bf16 %v1165_v59, %v1164_v58  ;;  %v3236_v59 = vunpack.c.l.bf16 %v3664_v50  ;;  %v3237_v62 = vunpack.c.h.bf16 %v3664_v50 }
 0x189   :  { %2828 = vst.msk [vmem:[%s5896_s4 + $0x17c] sm:$0xf] %vm2732_vm1, %v2571_v61  ;;  %v1229_v61 = vmax.f32 %v973_v45, 0.0 }
 0x18a   :  { %v1916_v19 = vpop.f32.mrf.mxu0  ;;  %v1331_v7 = vpack.c.bf16 %v1101_v57, %v1100_v56  ;;  %v3728_v56 = vld [vmem:[%s5893_s0 + $0x2d8] sm:$0xff]  }
 0x18b   :  { %v2508_v25 = vpack.c.bf16 %v1916_v19, %v1916_v19  ;;  %v1395_v13 = vpack.c.bf16 %v1229_v61, %v1228_v60  ;;  %v3760_v60 = vld [vmem:[%s5893_s0 + $0x3d8] sm:$0xff]   ;;  %v3493_v8 = vunpack.c.h.bf16 %v3728_v56 }
 0x18c   :  { %v2233_v23 = vpop.f32.mrf.mxu2 }
 0x18d   :  { %v2393_v24 = vpop.f32.mrf.mxu3  ;;  %v2635_v5 = vpack.c.bf16 %v2233_v23, %v2233_v23  ;;  %v2076_v30 = vpop.f32.mrf.mxu1  ;;  %2765 = vst.msk [vmem:[%s5896_s4 + $0x80] sm:$0xf] %vm2732_vm1, %v2508_v25  ;;  %3021 = vmatmul.msk.bf16.gmra.mxu0 %vm1442_vm0, %v1330_v15  ;;  %v3361_v15 = vunpack.c.h.bf16 %v3695_v2  ;;  %v3616_v25 = vunpack.c.l.bf16 %v3759_v10 }
 0x18e   :  { %v2699_v29 = vpack.c.bf16 %v2393_v24, %v2393_v24  ;;  %v2572_v33 = vpack.c.bf16 %v2076_v30, %v2076_v30 }
 0x18f   :  { %2892 = vst.msk [vmem:[%s5896_s4 + $0x27c] sm:$0xf] %vm2732_vm1, %v2635_v5  ;;  %v587_v5 = vmul.f32 %v4755_v6, %v3233_v9  ;;  %v651_v30 = vmul.f32 %v4755_v6, %v3361_v15 }
 0x190   :  { %2956 = vst.msk [vmem:[%s5896_s4 + $0x37c] sm:$0xf] %vm2732_vm1, %v2699_v29  ;;  %3053 = vmatmul.msk.bf16.gmra.mxu1 %vm1442_vm0, %v1362_v20  ;;  %v1427_v20 = vpack.c.bf16 %v1293_v1, %v1292_v63  ;;  %v650_v29 = vmul.f32 %v4755_v6, %v3360_v14  ;;  %v3621_v14 = vunpack.c.h.bf16 %v3760_v60 }
 0x191   :  { %2829 = vst.msk [vmem:[%s5896_s4 + $0x180] sm:$0xf] %vm2732_vm1, %v2572_v33  ;;  %3085 = vmatmul.msk.bf16.gmra.mxu2 %vm1442_vm0, %v1394_v26  ;;  %v3617_v26 = vunpack.c.h.bf16 %v3759_v10  ;;  %v778_v33 = vmul.f32 %v4755_v6, %v3616_v25  ;;  %v847_v35 = vadd.f32 %v4788_v16, %v587_v5  ;;  %v911_v38 = vadd.f32 %v4788_v16, %v651_v30  ;;  %v5310_v5 = vld [vmem:[%s5895_s2] ss:$0 sm:$0xff] }
 0x192   :  { %3117 = vmatmul.msk.bf16.gmra.mxu3 %vm1442_vm0, %v1426_v31  ;;  %v1918_v42 = vpop.f32.mrf.mxu0  ;;  %v714_v31 = vmul.f32 %v4755_v6, %v3488_v21  ;;  %v910_v37 = vadd.f32 %v4788_v16, %v650_v29 }
 0x193   :  { %v2509_v48 = vpack.c.bf16 %v1918_v42, %v1918_v42  ;;  %v779_v54 = vmul.f32 %v4755_v6, %v3617_v26  ;;  %v975_v42 = vadd.f32 %v4788_v16, %v715_v32  ;;  %v1038_v6 = vadd.f32 %v4788_v16, %v778_v33 }
 0x194   :  { %v2236_v46 = vpop.f32.mrf.mxu2  ;;  %v974_v41 = vadd.f32 %v4788_v16, %v714_v31  ;;  %v1103_v49 = vmax.f32 %v847_v35, 0.0 }
 0x195   :  { %v2396_v47 = vpop.f32.mrf.mxu3  ;;  %v2636_v51 = vpack.c.bf16 %v2236_v46, %v2236_v46  ;;  %v2078_v53 = vpop.f32.mrf.mxu1  ;;  %2766 = vst.msk [vmem:[%s5896_s4 + $0x84] sm:$0xf] %vm2732_vm1, %v2509_v48  ;;  %v1039_v46 = vadd.f32 %v4788_v16, %v779_v54  ;;  %v1102_v48 = vmax.f32 %v846_v34, 0.0  ;;  %v3696_v16 = vld [vmem:[%s5893_s0 + $0x1d8] sm:$0xff]   ;;  %v1294_v57 = vmax.f32 %v1038_v6, 0.0 }
 0x196   :  { %v2700_v52 = vpack.c.bf16 %v2396_v47, %v2396_v47  ;;  %v2573_v55 = vpack.c.bf16 %v2078_v53, %v2078_v53  ;;  %v1230_v53 = vmax.f32 %v974_v41, 0.0  ;;  %v3364_v63 = vunpack.c.l.bf16 %v3696_v16 }
 0x197   :  { %2893 = vst.msk [vmem:[%s5896_s4 + $0x280] sm:$0xf] %vm2732_vm1, %v2636_v51  ;;  %v1166_v51 = vmax.f32 %v910_v37, 0.0  ;;  %v1295_v58 = vmax.f32 %v1039_v46, 0.0  ;;  %v1332_v61 = vpack.c.bf16 %v1103_v49, %v1102_v48  ;;  %v3365_v3 = vunpack.c.h.bf16 %v3696_v16  ;;  %v3665_v48 = vld [vmem:[%s5893_s0 + $0xe0] sm:$0xff]  }
 0x198   :  { %2957 = vst.msk [vmem:[%s5896_s4 + $0x380] sm:$0xf] %vm2732_vm1, %v2700_v52  ;;  %v1167_v52 = vmax.f32 %v911_v38, 0.0 }
 0x199   :  { %2830 = vst.msk [vmem:[%s5896_s4 + $0x184] sm:$0xf] %vm2732_vm1, %v2573_v55  ;;  %v1231_v55 = vmax.f32 %v975_v42, 0.0 }
 0x19a   :  { %v1921_v11 = vpop.f32.mrf.mxu0  ;;  %v1364_v2 = vpack.c.bf16 %v1167_v52, %v1166_v51  ;;  %v3697_v51 = vld [vmem:[%s5893_s0 + $0x1e0] sm:$0xff]  }
 0x19b   :  { %v2510_v19 = vpack.c.bf16 %v1921_v11, %v1921_v11  ;;  %v3729_v52 = vld [vmem:[%s5893_s0 + $0x2e0] sm:$0xff]  }
 0x19c   :  { %v2238_v17 = vpop.f32.mrf.mxu2 }
 0x19d   :  { %v2398_v18 = vpop.f32.mrf.mxu3  ;;  %v2637_v22 = vpack.c.bf16 %v2238_v17, %v2238_v17  ;;  %v2081_v24 = vpop.f32.mrf.mxu1  ;;  %2767 = vst.msk [vmem:[%s5896_s4 + $0x88] sm:$0xf] %vm2732_vm1, %v2510_v19  ;;  %3022 = vmatmul.msk.bf16.gmra.mxu0 %vm1442_vm0, %v1331_v7  ;;  %v3492_v7 = vunpack.c.l.bf16 %v3728_v56  ;;  %v1428_v19 = vpack.c.bf16 %v1295_v58, %v1294_v57  ;;  %v3761_v56 = vld [vmem:[%s5893_s0 + $0x3e0] sm:$0xff]  }
 0x19e   :  { %v2701_v23 = vpack.c.bf16 %v2398_v18, %v2398_v18  ;;  %v2574_v27 = vpack.c.bf16 %v2081_v24, %v2081_v24 }
 0x19f   :  { %2894 = vst.msk [vmem:[%s5896_s4 + $0x284] sm:$0xf] %vm2732_vm1, %v2637_v22 }
 0x1a0   :  { %2958 = vst.msk [vmem:[%s5896_s4 + $0x384] sm:$0xf] %vm2732_vm1, %v2701_v23  ;;  %3054 = vmatmul.msk.bf16.gmra.mxu1 %vm1442_vm0, %v1363_v12  ;;  %v1396_v12 = vpack.c.bf16 %v1231_v55, %v1230_v53  ;;  %v3240_v53 = vunpack.c.l.bf16 %v3665_v48  ;;  %v3241_v55 = vunpack.c.h.bf16 %v3665_v48 }
 0x1a1   :  { %2831 = vst.msk [vmem:[%s5896_s4 + $0x188] sm:$0xf] %vm2732_vm1, %v2574_v27  ;;  %3086 = vmatmul.msk.bf16.gmra.mxu2 %vm1442_vm0, %v1395_v13  ;;  %v3620_v13 = vunpack.c.l.bf16 %v3760_v60  ;;  %v3368_v60 = vunpack.c.l.bf16 %v3697_v51 }
 0x1a2   :  { %3118 = vmatmul.msk.bf16.gmra.mxu3 %vm1442_vm0, %v1427_v20  ;;  %v1923_v36 = vpop.f32.mrf.mxu0  ;;  %v5277_v20 = vld [vmem:[%s5894_s1] ss:$0 sm:$0xff] }
 0x1a3   :  { %v2511_v0 = vpack.c.bf16 %v1923_v36, %v1923_v36  ;;  %v588_v21 = vmul.f32 %v5277_v20, %v3236_v59  ;;  %v589_v22 = vmul.f32 %v5277_v20, %v3237_v62  ;;  %v652_v23 = vmul.f32 %v5277_v20, %v3364_v63 }
 0x1a4   :  { %v2241_v39 = vpop.f32.mrf.mxu2  ;;  %v653_v24 = vmul.f32 %v5277_v20, %v3365_v3  ;;  %v716_v25 = vmul.f32 %v5277_v20, %v3492_v7  ;;  %v717_v26 = vmul.f32 %v5277_v20, %v3493_v8  ;;  %v780_v27 = vmul.f32 %v5277_v20, %v3620_v13 }
 0x1a5   :  { %v2401_v40 = vpop.f32.mrf.mxu3  ;;  %v2638_v43 = vpack.c.bf16 %v2241_v39, %v2241_v39  ;;  %v2083_v45 = vpop.f32.mrf.mxu1  ;;  %2768 = vst.msk [vmem:[%s5896_s4 + $0x8c] sm:$0xf] %vm2732_vm1, %v2511_v0  ;;  %v781_v28 = vmul.f32 %v5277_v20, %v3621_v14  ;;  %v848_v29 = vadd.f32 %v5310_v5, %v588_v21  ;;  %v849_v30 = vadd.f32 %v5310_v5, %v589_v22 }
 0x1a6   :  { %v2702_v44 = vpack.c.bf16 %v2401_v40, %v2401_v40  ;;  %v2575_v47 = vpack.c.bf16 %v2083_v45, %v2083_v45  ;;  %v912_v31 = vadd.f32 %v5310_v5, %v652_v23  ;;  %v913_v33 = vadd.f32 %v5310_v5, %v653_v24 }
 0x1a7   :  { %2895 = vst.msk [vmem:[%s5896_s4 + $0x288] sm:$0xf] %vm2732_vm1, %v2638_v43  ;;  %v976_v54 = vadd.f32 %v5310_v5, %v716_v25  ;;  %v977_v34 = vadd.f32 %v5310_v5, %v717_v26  ;;  %v1040_v38 = vadd.f32 %v5310_v5, %v780_v27  ;;  %v1041_v39 = vadd.f32 %v5310_v5, %v781_v28 }
 0x1a8   :  { %2959 = vst.msk [vmem:[%s5896_s4 + $0x388] sm:$0xf] %vm2732_vm1, %v2702_v44  ;;  %v1104_v43 = vmax.f32 %v848_v29, 0.0  ;;  %v1105_v44 = vmax.f32 %v849_v30, 0.0  ;;  %v1168_v45 = vmax.f32 %v912_v31, 0.0  ;;  %v1169_v6 = vmax.f32 %v913_v33, 0.0 }
 0x1a9   :  { %2832 = vst.msk [vmem:[%s5896_s4 + $0x18c] sm:$0xf] %vm2732_vm1, %v2575_v47  ;;  %v1232_v46 = vmax.f32 %v976_v54, 0.0  ;;  %v1233_v47 = vmax.f32 %v977_v34, 0.0  ;;  %v1296_v49 = vmax.f32 %v1040_v38, 0.0  ;;  %v1297_v50 = vmax.f32 %v1041_v39, 0.0 }
 0x1aa   :  { %v1926_v1 = vpop.f32.mrf.mxu0  ;;  %v1333_v16 = vpack.c.bf16 %v1105_v44, %v1104_v43  ;;  %v1365_v58 = vpack.c.bf16 %v1169_v6, %v1168_v45  ;;  %v3496_v3 = vunpack.c.l.bf16 %v3729_v52  ;;  %v3497_v7 = vunpack.c.h.bf16 %v3729_v52  ;;  %v3698_v43 = vld [vmem:[%s5893_s0 + $0x1e8] sm:$0xff]  }
 0x1ab   :  { %v2512_v11 = vpack.c.bf16 %v1926_v1, %v1926_v1  ;;  %v1397_v59 = vpack.c.bf16 %v1233_v47, %v1232_v46  ;;  %v590_v14 = vmul.f32 %v5277_v20, %v3240_v53  ;;  %v3730_v44 = vld [vmem:[%s5893_s0 + $0x2e8] sm:$0xff]   ;;  %v3373_v53 = vunpack.c.h.bf16 %v3698_v43 }
 0x1ac   :  { %v2243_v9 = vpop.f32.mrf.mxu2  ;;  %v719_v21 = vmul.f32 %v5277_v20, %v3497_v7  ;;  %v3762_v47 = vld [vmem:[%s5893_s0 + $0x3e8] sm:$0xff]  }
 0x1ad   :  { %v2403_v10 = vpop.f32.mrf.mxu3  ;;  %v2639_v15 = vpack.c.bf16 %v2243_v9, %v2243_v9  ;;  %v2086_v18 = vpop.f32.mrf.mxu1  ;;  %2769 = vst.msk [vmem:[%s5896_s4 + $0x90] sm:$0xf] %vm2732_vm1, %v2512_v11  ;;  %3023 = vmatmul.msk.bf16.gmra.mxu0 %vm1442_vm0, %v1332_v61  ;;  %v3369_v61 = vunpack.c.h.bf16 %v3697_v51  ;;  %v3624_v11 = vunpack.c.l.bf16 %v3761_v56  ;;  %v850_v23 = vadd.f32 %v5310_v5, %v590_v14 }
 0x1ae   :  { %v2703_v17 = vpack.c.bf16 %v2403_v10, %v2403_v10  ;;  %v2576_v4 = vpack.c.bf16 %v2086_v18, %v2086_v18 }
 0x1af   :  { %2896 = vst.msk [vmem:[%s5896_s4 + $0x28c] sm:$0xf] %vm2732_vm1, %v2639_v15  ;;  %v591_v15 = vmul.f32 %v5277_v20, %v3241_v55  ;;  %v655_v18 = vmul.f32 %v5277_v20, %v3369_v61  ;;  %v1106_v38 = vmax.f32 %v850_v23, 0.0  ;;  %v3500_v55 = vunpack.c.l.bf16 %v3730_v44 }
 0x1b0   :  { %2960 = vst.msk [vmem:[%s5896_s4 + $0x38c] sm:$0xf] %vm2732_vm1, %v2703_v17  ;;  %3055 = vmatmul.msk.bf16.gmra.mxu1 %vm1442_vm0, %v1364_v2  ;;  %v1429_v2 = vpack.c.bf16 %v1297_v50, %v1296_v49  ;;  %v654_v17 = vmul.f32 %v5277_v20, %v3368_v60  ;;  %v3628_v60 = vunpack.c.l.bf16 %v3762_v47  ;;  %v3629_v61 = vunpack.c.h.bf16 %v3762_v47 }
 0x1b1   :  { %2833 = vst.msk [vmem:[%s5896_s4 + $0x190] sm:$0xf] %vm2732_vm1, %v2576_v4  ;;  %3087 = vmatmul.msk.bf16.gmra.mxu2 %vm1442_vm0, %v1396_v12  ;;  %v3625_v12 = vunpack.c.h.bf16 %v3761_v56  ;;  %v782_v4 = vmul.f32 %v5277_v20, %v3624_v11  ;;  %v851_v24 = vadd.f32 %v5310_v5, %v591_v15  ;;  %v915_v27 = vadd.f32 %v5310_v5, %v655_v18 }
 0x1b2   :  { %3119 = vmatmul.msk.bf16.gmra.mxu3 %vm1442_vm0, %v1428_v19  ;;  %v1928_v32 = vpop.f32.mrf.mxu0  ;;  %v718_v19 = vmul.f32 %v5277_v20, %v3496_v3  ;;  %v914_v26 = vadd.f32 %v5310_v5, %v654_v17  ;;  %v657_v11 = vmul.f32 %v5277_v20, %v3373_v53  ;;  %v784_v14 = vmul.f32 %v5277_v20, %v3628_v60 }
 0x1b3   :  { %v2513_v37 = vpack.c.bf16 %v1928_v32, %v1928_v32  ;;  %v783_v22 = vmul.f32 %v5277_v20, %v3625_v12  ;;  %v979_v32 = vadd.f32 %v5310_v5, %v719_v21  ;;  %v1107_v39 = vmax.f32 %v851_v24, 0.0 }
 0x1b4   :  { %v2246_v35 = vpop.f32.mrf.mxu2  ;;  %v978_v31 = vadd.f32 %v5310_v5, %v718_v19  ;;  %v720_v12 = vmul.f32 %v5277_v20, %v3500_v55  ;;  %v785_v15 = vmul.f32 %v5277_v20, %v3629_v61 }
 0x1b5   :  { %v2406_v36 = vpop.f32.mrf.mxu3  ;;  %v2640_v40 = vpack.c.bf16 %v2246_v35, %v2246_v35  ;;  %v2088_v41 = vpop.f32.mrf.mxu1  ;;  %2770 = vst.msk [vmem:[%s5896_s4 + $0x94] sm:$0xf] %vm2732_vm1, %v2513_v37  ;;  %v1042_v35 = vadd.f32 %v5310_v5, %v782_v4  ;;  %v1235_v45 = vmax.f32 %v979_v32, 0.0  ;;  %v1334_v48 = vpack.c.bf16 %v1107_v39, %v1106_v38  ;;  %v3667_v32 = vld [vmem:[%s5893_s0 + $0xf0] sm:$0xff]  }
 0x1b6   :  { %v2704_v0 = vpack.c.bf16 %v2406_v36, %v2406_v36  ;;  %v2577_v42 = vpack.c.bf16 %v2088_v41, %v2088_v41  ;;  %v1043_v36 = vadd.f32 %v5310_v5, %v783_v22  ;;  %v3666_v41 = vld [vmem:[%s5893_s0 + $0xe8] sm:$0xff]   ;;  %v917_v4 = vadd.f32 %v5310_v5, %v657_v11  ;;  %v3731_v39 = vld [vmem:[%s5893_s0 + $0x2f0] sm:$0xff]  }
 0x1b7   :  { %2897 = vst.msk [vmem:[%s5896_s4 + $0x290] sm:$0xf] %vm2732_vm1, %v2640_v40  ;;  %v1170_v40 = vmax.f32 %v914_v26, 0.0  ;;  %v1298_v6 = vmax.f32 %v1042_v35, 0.0  ;;  %v3244_v49 = vunpack.c.l.bf16 %v3666_v41  ;;  %v3245_v50 = vunpack.c.h.bf16 %v3666_v41  ;;  %v3699_v35 = vld [vmem:[%s5893_s0 + $0x1f0] sm:$0xff]  }
 0x1b8   :  { %2961 = vst.msk [vmem:[%s5896_s4 + $0x390] sm:$0xf] %vm2732_vm1, %v2704_v0  ;;  %v1171_v0 = vmax.f32 %v915_v27, 0.0  ;;  %v1299_v46 = vmax.f32 %v1043_v36, 0.0  ;;  %v980_v22 = vadd.f32 %v5310_v5, %v720_v12  ;;  %v1044_v27 = vadd.f32 %v5310_v5, %v784_v14 }
 0x1b9   :  { %2834 = vst.msk [vmem:[%s5896_s4 + $0x194] sm:$0xf] %vm2732_vm1, %v2577_v42  ;;  %v1234_v42 = vmax.f32 %v978_v31, 0.0  ;;  %v3504_v47 = vunpack.c.l.bf16 %v3731_v39 }
 0x1ba   :  { %v1931_v57 = vpop.f32.mrf.mxu0  ;;  %v1366_v52 = vpack.c.bf16 %v1171_v0, %v1170_v40  ;;  %v1430_v3 = vpack.c.bf16 %v1299_v46, %v1298_v6  ;;  %v1236_v38 = vmax.f32 %v980_v22, 0.0  ;;  %v1300_v0 = vmax.f32 %v1044_v27, 0.0 }
 0x1bb   :  { %v2514_v1 = vpack.c.bf16 %v1931_v57, %v1931_v57  ;;  %v3377_v46 = vunpack.c.h.bf16 %v3699_v35 }
 0x1bc   :  { %v2248_v62 = vpop.f32.mrf.mxu2 }
 0x1bd   :  { %v2408_v63 = vpop.f32.mrf.mxu3  ;;  %v2641_v8 = vpack.c.bf16 %v2248_v62, %v2248_v62  ;;  %v2091_v10 = vpop.f32.mrf.mxu1  ;;  %2771 = vst.msk [vmem:[%s5896_s4 + $0x98] sm:$0xf] %vm2732_vm1, %v2514_v1  ;;  %3024 = vmatmul.msk.bf16.gmra.mxu0 %vm1442_vm0, %v1333_v16  ;;  %v3372_v16 = vunpack.c.l.bf16 %v3698_v43  ;;  %v3763_v43 = vld [vmem:[%s5893_s0 + $0x3f0] sm:$0xff]  }
 0x1be   :  { %v2705_v9 = vpack.c.bf16 %v2408_v63, %v2408_v63  ;;  %v2578_v13 = vpack.c.bf16 %v2091_v10, %v2091_v10 }
 0x1bf   :  { %2898 = vst.msk [vmem:[%s5896_s4 + $0x294] sm:$0xf] %vm2732_vm1, %v2641_v8  ;;  %v592_v8 = vmul.f32 %v5277_v20, %v3244_v49  ;;  %v656_v10 = vmul.f32 %v5277_v20, %v3372_v16 }
 0x1c0   :  { %2962 = vst.msk [vmem:[%s5896_s4 + $0x394] sm:$0xf] %vm2732_vm1, %v2705_v9  ;;  %3056 = vmatmul.msk.bf16.gmra.mxu1 %vm1442_vm0, %v1365_v58  ;;  %v593_v9 = vmul.f32 %v5277_v20, %v3245_v50  ;;  %v3505_v50 = vunpack.c.h.bf16 %v3731_v39 }
 0x1c1   :  { %2835 = vst.msk [vmem:[%s5896_s4 + $0x198] sm:$0xf] %vm2732_vm1, %v2578_v13  ;;  %3088 = vmatmul.msk.bf16.gmra.mxu2 %vm1442_vm0, %v1397_v59  ;;  %v3501_v59 = vunpack.c.h.bf16 %v3730_v44  ;;  %v852_v17 = vadd.f32 %v5310_v5, %v592_v8  ;;  %v916_v21 = vadd.f32 %v5310_v5, %v656_v10  ;;  %v3249_v44 = vunpack.c.h.bf16 %v3667_v32 }
 0x1c2   :  { %3120 = vmatmul.msk.bf16.gmra.mxu3 %vm1442_vm0, %v1429_v2  ;;  %v1933_v25 = vpop.f32.mrf.mxu0  ;;  %v1398_v2 = vpack.c.bf16 %v1235_v45, %v1234_v42  ;;  %v853_v18 = vadd.f32 %v5310_v5, %v593_v9  ;;  %v3248_v42 = vunpack.c.l.bf16 %v3667_v32  ;;  %v3376_v45 = vunpack.c.l.bf16 %v3699_v35  ;;  %v3700_v35 = vld [vmem:[%s5893_s0 + $0x1f8] sm:$0xff]  }
 0x1c3   :  { %v2515_v30 = vpack.c.bf16 %v1933_v25, %v1933_v25  ;;  %v721_v13 = vmul.f32 %v5277_v20, %v3501_v59  ;;  %v1172_v36 = vmax.f32 %v916_v21, 0.0 }
 0x1c4   :  { %v2251_v28 = vpop.f32.mrf.mxu2 }
 0x1c5   :  { %v2411_v29 = vpop.f32.mrf.mxu3  ;;  %v2642_v33 = vpack.c.bf16 %v2251_v28, %v2251_v28  ;;  %v2093_v34 = vpop.f32.mrf.mxu1  ;;  %2772 = vst.msk [vmem:[%s5896_s4 + $0x9c] sm:$0xf] %vm2732_vm1, %v2515_v30  ;;  %v981_v26 = vadd.f32 %v5310_v5, %v721_v13  ;;  %v1045_v28 = vadd.f32 %v5310_v5, %v785_v15 }
 0x1c6   :  { %v2706_v54 = vpack.c.bf16 %v2411_v29, %v2411_v29  ;;  %v2579_v37 = vpack.c.bf16 %v2093_v34, %v2093_v34  ;;  %v1109_v34 = vmax.f32 %v853_v18, 0.0 }
 0x1c7   :  { %2899 = vst.msk [vmem:[%s5896_s4 + $0x298] sm:$0xf] %vm2732_vm1, %v2642_v33  ;;  %v1237_v40 = vmax.f32 %v981_v26, 0.0  ;;  %v1301_v41 = vmax.f32 %v1045_v28, 0.0 }
 0x1c8   :  { %2963 = vst.msk [vmem:[%s5896_s4 + $0x398] sm:$0xf] %vm2732_vm1, %v2706_v54  ;;  %v1108_v54 = vmax.f32 %v852_v17, 0.0 }
 0x1c9   :  { %2836 = vst.msk [vmem:[%s5896_s4 + $0x19c] sm:$0xf] %vm2732_vm1, %v2579_v37  ;;  %v1173_v37 = vmax.f32 %v917_v4, 0.0 }
 0x1ca   :  { %v1936_v51 = vpop.f32.mrf.mxu0  ;;  %v1335_v6 = vpack.c.bf16 %v1109_v34, %v1108_v54  ;;  %v3668_v34 = vld [vmem:[%s5893_s0 + $0xf8] sm:$0xff]  }
 0x1cb   :  { %v2516_v58 = vpack.c.bf16 %v1936_v51, %v1936_v51  ;;  %v1367_v49 = vpack.c.bf16 %v1173_v37, %v1172_v36  ;;  %v3632_v51 = vunpack.c.l.bf16 %v3763_v43  ;;  %v3732_v36 = vld [vmem:[%s5893_s0 + $0x2f8] sm:$0xff]   ;;  %v3253_v39 = vunpack.c.h.bf16 %v3668_v34 }
 0x1cc   :  { %v2253_v56 = vpop.f32.mrf.mxu2 }
 0x1cd   :  { %v2413_v57 = vpop.f32.mrf.mxu3  ;;  %v2643_v62 = vpack.c.bf16 %v2253_v56, %v2253_v56  ;;  %v2096_v1 = vpop.f32.mrf.mxu1  ;;  %2773 = vst.msk [vmem:[%s5896_s4 + $0xa0] sm:$0xf] %vm2732_vm1, %v2516_v58  ;;  %3025 = vmatmul.msk.bf16.gmra.mxu0 %vm1442_vm0, %v1334_v48  ;;  %v1399_v56 = vpack.c.bf16 %v1237_v40, %v1236_v38  ;;  %v594_v58 = vmul.f32 %v5277_v20, %v3248_v42  ;;  %v3252_v38 = vunpack.c.l.bf16 %v3668_v34  ;;  %v3764_v40 = vld [vmem:[%s5893_s0 + $0x3f8] sm:$0xff]  }
 0x1ce   :  { %v2707_v63 = vpack.c.bf16 %v2413_v57, %v2413_v57  ;;  %v2580_v7 = vpack.c.bf16 %v2096_v1, %v2096_v1  ;;  %v1431_v57 = vpack.c.bf16 %v1301_v41, %v1300_v0  ;;  %v786_v8 = vmul.f32 %v5277_v20, %v3632_v51 }
 0x1cf   :  { %2900 = vst.msk [vmem:[%s5896_s4 + $0x29c] sm:$0xf] %vm2732_vm1, %v2643_v62  ;;  %v595_v62 = vmul.f32 %v5277_v20, %v3249_v44  ;;  %v854_v10 = vadd.f32 %v5310_v5, %v594_v58  ;;  %v3380_v44 = vunpack.c.l.bf16 %v3700_v35 }
 0x1d0   :  { %2964 = vst.msk [vmem:[%s5896_s4 + $0x39c] sm:$0xf] %vm2732_vm1, %v2707_v63  ;;  %3057 = vmatmul.msk.bf16.gmra.mxu1 %vm1442_vm0, %v1366_v52  ;;  %v3633_v52 = vunpack.c.h.bf16 %v3763_v43  ;;  %v658_v63 = vmul.f32 %v5277_v20, %v3376_v45  ;;  %v1046_v18 = vadd.f32 %v5310_v5, %v786_v8 }
 0x1d1   :  { %2837 = vst.msk [vmem:[%s5896_s4 + $0x1a0] sm:$0xf] %vm2732_vm1, %v2580_v7  ;;  %3089 = vmatmul.msk.bf16.gmra.mxu2 %vm1442_vm0, %v1398_v2  ;;  %v659_v2 = vmul.f32 %v5277_v20, %v3377_v46  ;;  %v723_v7 = vmul.f32 %v5277_v20, %v3505_v50  ;;  %v855_v11 = vadd.f32 %v5310_v5, %v595_v62  ;;  %v1110_v26 = vmax.f32 %v854_v10, 0.0 }
 0x1d2   :  { %3121 = vmatmul.msk.bf16.gmra.mxu3 %vm1442_vm0, %v1430_v3  ;;  %v1938_v19 = vpop.f32.mrf.mxu0  ;;  %v722_v3 = vmul.f32 %v5277_v20, %v3504_v47  ;;  %v787_v9 = vmul.f32 %v5277_v20, %v3633_v52  ;;  %v918_v12 = vadd.f32 %v5310_v5, %v658_v63  ;;  %v3381_v47 = vunpack.c.h.bf16 %v3700_v35 }
 0x1d3   :  { %v2517_v25 = vpack.c.bf16 %v1938_v19, %v1938_v19  ;;  %v919_v13 = vadd.f32 %v5310_v5, %v659_v2  ;;  %v983_v17 = vadd.f32 %v5310_v5, %v723_v7  ;;  %v1111_v27 = vmax.f32 %v855_v11, 0.0 }
 0x1d4   :  { %v2256_v23 = vpop.f32.mrf.mxu2  ;;  %v982_v14 = vadd.f32 %v5310_v5, %v722_v3  ;;  %v1047_v19 = vadd.f32 %v5310_v5, %v787_v9  ;;  %v660_v58 = vmul.f32 %v5277_v20, %v3380_v44 }
 0x1d5   :  { %v2416_v24 = vpop.f32.mrf.mxu3  ;;  %v2644_v29 = vpack.c.bf16 %v2256_v23, %v2256_v23  ;;  %v2098_v31 = vpop.f32.mrf.mxu1  ;;  %2774 = vst.msk [vmem:[%s5896_s4 + $0xa4] sm:$0xf] %vm2732_vm1, %v2517_v25  ;;  %v1239_v32 = vmax.f32 %v983_v17, 0.0  ;;  %v1336_v37 = vpack.c.bf16 %v1111_v27, %v1110_v26 }
 0x1d6   :  { %v2708_v30 = vpack.c.bf16 %v2416_v24, %v2416_v24  ;;  %v2581_v33 = vpack.c.bf16 %v2098_v31, %v2098_v31  ;;  %v1238_v31 = vmax.f32 %v982_v14, 0.0  ;;  %v1303_v54 = vmax.f32 %v1047_v19, 0.0 }
 0x1d7   :  { %2901 = vst.msk [vmem:[%s5896_s4 + $0x2a0] sm:$0xf] %vm2732_vm1, %v2644_v29  ;;  %v1174_v29 = vmax.f32 %v918_v12, 0.0  ;;  %v920_v7 = vadd.f32 %v5310_v5, %v660_v58 }
 0x1d8   :  { %2965 = vst.msk [vmem:[%s5896_s4 + $0x3a0] sm:$0xf] %vm2732_vm1, %v2708_v30  ;;  %v1175_v30 = vmax.f32 %v919_v13, 0.0  ;;  %v1400_v42 = vpack.c.bf16 %v1239_v32, %v1238_v31 }
 0x1d9   :  { %2838 = vst.msk [vmem:[%s5896_s4 + $0x1a4] sm:$0xf] %vm2732_vm1, %v2581_v33  ;;  %v1302_v33 = vmax.f32 %v1046_v18, 0.0 }
 0x1da   :  { %v1941_v48 = vpop.f32.mrf.mxu0  ;;  %v1368_v41 = vpack.c.bf16 %v1175_v30, %v1174_v29 }
 0x1db   :  { %v2518_v55 = vpack.c.bf16 %v1941_v48, %v1941_v48  ;;  %v1432_v43 = vpack.c.bf16 %v1303_v54, %v1302_v33  ;;  %v3508_v48 = vunpack.c.l.bf16 %v3732_v36 }
 0x1dc   :  { %v2258_v16 = vpop.f32.mrf.mxu2 }
 0x1dd   :  { %v2418_v53 = vpop.f32.mrf.mxu3  ;;  %v2645_v59 = vpack.c.bf16 %v2258_v16, %v2258_v16  ;;  %v2101_v61 = vpop.f32.mrf.mxu1  ;;  %2775 = vst.msk [vmem:[%s5896_s4 + $0xa8] sm:$0xf] %vm2732_vm1, %v2518_v55  ;;  %3026 = vmatmul.msk.bf16.gmra.mxu0 %vm1442_vm0, %v1335_v6  ;;  %v3636_v16 = vunpack.c.l.bf16 %v3764_v40 }
 0x1de   :  { %v2709_v60 = vpack.c.bf16 %v2418_v53, %v2418_v53  ;;  %v2582_v1 = vpack.c.bf16 %v2101_v61, %v2101_v61  ;;  %v3637_v53 = vunpack.c.h.bf16 %v3764_v40 }
 0x1df   :  { %2902 = vst.msk [vmem:[%s5896_s4 + $0x2a4] sm:$0xf] %vm2732_vm1, %v2645_v59  ;;  %v661_v59 = vmul.f32 %v5277_v20, %v3381_v47  ;;  %v788_v62 = vmul.f32 %v5277_v20, %v3636_v16 }
 0x1e0   :  { %2966 = vst.msk [vmem:[%s5896_s4 + $0x3a4] sm:$0xf] %vm2732_vm1, %v2709_v60  ;;  %3058 = vmatmul.msk.bf16.gmra.mxu1 %vm1442_vm0, %v1367_v49  ;;  %v3509_v49 = vunpack.c.h.bf16 %v3732_v36  ;;  %v724_v60 = vmul.f32 %v5277_v20, %v3508_v48  ;;  %v789_v63 = vmul.f32 %v5277_v20, %v3637_v53 }
 0x1e1   :  { %2839 = vst.msk [vmem:[%s5896_s4 + $0x1a8] sm:$0xf] %vm2732_vm1, %v2582_v1  ;;  %3090 = vmatmul.msk.bf16.gmra.mxu2 %vm1442_vm0, %v1399_v56  ;;  %v596_v56 = vmul.f32 %v5277_v20, %v3252_v38  ;;  %v921_v11 = vadd.f32 %v5310_v5, %v661_v59 }
 0x1e2   :  { %3122 = vmatmul.msk.bf16.gmra.mxu3 %vm1442_vm0, %v1431_v57  ;;  %v1943_v15 = vpop.f32.mrf.mxu0  ;;  %v597_v57 = vmul.f32 %v5277_v20, %v3253_v39  ;;  %v725_v61 = vmul.f32 %v5277_v20, %v3509_v49  ;;  %v984_v12 = vadd.f32 %v5310_v5, %v724_v60  ;;  %v1048_v20 = vadd.f32 %v5310_v5, %v788_v62 }
 0x1e3   :  { %v2519_v22 = vpack.c.bf16 %v1943_v15, %v1943_v15  ;;  %v856_v1 = vadd.f32 %v5310_v5, %v596_v56  ;;  %v1049_v18 = vadd.f32 %v5310_v5, %v789_v63 }
 0x1e4   :  { %v2261_v21 = vpop.f32.mrf.mxu2  ;;  %v857_v2 = vadd.f32 %v5310_v5, %v597_v57  ;;  %v985_v13 = vadd.f32 %v5310_v5, %v725_v61  ;;  %v1177_v5 = vmax.f32 %v921_v11, 0.0 }
 0x1e5   :  { %v2421_v4 = vpop.f32.mrf.mxu3  ;;  %v2646_v23 = vpack.c.bf16 %v2261_v21, %v2261_v21  ;;  %v2103_v25 = vpop.f32.mrf.mxu1  ;;  %2776 = vst.msk [vmem:[%s5896_s4 + $0xac] sm:$0xf] %vm2732_vm1, %v2519_v22  ;;  %v1112_v21 = vmax.f32 %v856_v1, 0.0  ;;  %v1176_v22 = vmax.f32 %v920_v7, 0.0  ;;  %v1305_v26 = vmax.f32 %v1049_v18, 0.0 }
 0x1e6   :  { %v2710_v24 = vpack.c.bf16 %v2421_v4, %v2421_v4  ;;  %v2583_v28 = vpack.c.bf16 %v2103_v25, %v2103_v25  ;;  %v1113_v4 = vmax.f32 %v857_v2, 0.0  ;;  %v1304_v25 = vmax.f32 %v1048_v20, 0.0 }
 0x1e7   :  { %2903 = vst.msk [vmem:[%s5896_s4 + $0x2a8] sm:$0xf] %vm2732_vm1, %v2646_v23  ;;  %v1240_v23 = vmax.f32 %v984_v12, 0.0  ;;  %v1369_v32 = vpack.c.bf16 %v1177_v5, %v1176_v22 }
 0x1e8   :  { %2967 = vst.msk [vmem:[%s5896_s4 + $0x3a8] sm:$0xf] %vm2732_vm1, %v2710_v24  ;;  %v1241_v24 = vmax.f32 %v985_v13, 0.0  ;;  %v1337_v27 = vpack.c.bf16 %v1113_v4, %v1112_v21  ;;  %v1433_v36 = vpack.c.bf16 %v1305_v26, %v1304_v25 }
 0x1e9   :  { %2840 = vst.msk [vmem:[%s5896_s4 + $0x1ac] sm:$0xf] %vm2732_vm1, %v2583_v28 }
 0x1ea   :  { %v1946_v0 = vpop.f32.mrf.mxu0  ;;  %v1401_v35 = vpack.c.bf16 %v1241_v24, %v1240_v23 }
 0x1eb   :  { %v2520_v46 = vpack.c.bf16 %v1946_v0, %v1946_v0 }
 0x1ec   :  { %v2263_v45 = vpop.f32.mrf.mxu2 }
 0x1ed   :  { %v2423_v6 = vpop.f32.mrf.mxu3  ;;  %v2647_v50 = vpack.c.bf16 %v2263_v45, %v2263_v45  ;;  %v2106_v52 = vpop.f32.mrf.mxu1  ;;  %2777 = vst.msk [vmem:[%s5896_s4 + $0xb0] sm:$0xf] %vm2732_vm1, %v2520_v46  ;;  %3027 = vmatmul.msk.bf16.gmra.mxu0 %vm1442_vm0, %v1336_v37 }
 0x1ee   :  { %v2711_v51 = vpack.c.bf16 %v2423_v6, %v2423_v6  ;;  %v2584_v55 = vpack.c.bf16 %v2106_v52, %v2106_v52 }
 0x1ef   :  { %2904 = vst.msk [vmem:[%s5896_s4 + $0x2ac] sm:$0xf] %vm2732_vm1, %v2647_v50 }
 0x1f0   :  { %2968 = vst.msk [vmem:[%s5896_s4 + $0x3ac] sm:$0xf] %vm2732_vm1, %v2711_v51  ;;  %3059 = vmatmul.msk.bf16.gmra.mxu1 %vm1442_vm0, %v1368_v41 }
 0x1f1   :  { %2841 = vst.msk [vmem:[%s5896_s4 + $0x1b0] sm:$0xf] %vm2732_vm1, %v2584_v55  ;;  %3091 = vmatmul.msk.bf16.gmra.mxu2 %vm1442_vm0, %v1400_v42 }
 0x1f2   :  { %3123 = vmatmul.msk.bf16.gmra.mxu3 %vm1442_vm0, %v1432_v43  ;;  %v1948_v3 = vpop.f32.mrf.mxu0 }
 0x1f3   :  { %v2521_v10 = vpack.c.bf16 %v1948_v3, %v1948_v3 }
 0x1f4   :  { %v2266_v8 = vpop.f32.mrf.mxu2 }
 0x1f5   :  { %v2426_v9 = vpop.f32.mrf.mxu3  ;;  %v2648_v14 = vpack.c.bf16 %v2266_v8, %v2266_v8  ;;  %v2108_v17 = vpop.f32.mrf.mxu1  ;;  %2778 = vst.msk [vmem:[%s5896_s4 + $0xb4] sm:$0xf] %vm2732_vm1, %v2521_v10 }
 0x1f6   :  { %v2712_v15 = vpack.c.bf16 %v2426_v9, %v2426_v9  ;;  %v2585_v19 = vpack.c.bf16 %v2108_v17, %v2108_v17 }
 0x1f7   :  { %2905 = vst.msk [vmem:[%s5896_s4 + $0x2b0] sm:$0xf] %vm2732_vm1, %v2648_v14 }
 0x1f8   :  { %2969 = vst.msk [vmem:[%s5896_s4 + $0x3b0] sm:$0xf] %vm2732_vm1, %v2712_v15 }
 0x1f9   :  { %2842 = vst.msk [vmem:[%s5896_s4 + $0x1b4] sm:$0xf] %vm2732_vm1, %v2585_v19 }
 0x1fa   :  { %v1951_v28 = vpop.f32.mrf.mxu0 }
 0x1fb   :  { %v2522_v31 = vpack.c.bf16 %v1951_v28, %v1951_v28 }
 0x1fc   :  { %v2268_v29 = vpop.f32.mrf.mxu2 }
 0x1fd   :  { %v2428_v30 = vpop.f32.mrf.mxu3  ;;  %v2649_v33 = vpack.c.bf16 %v2268_v29, %v2268_v29  ;;  %v2111_v34 = vpop.f32.mrf.mxu1  ;;  %2779 = vst.msk [vmem:[%s5896_s4 + $0xb8] sm:$0xf] %vm2732_vm1, %v2522_v31  ;;  %3028 = vmatmul.msk.bf16.gmra.mxu0 %vm1442_vm0, %v1337_v27 }
 0x1fe   :  { %v2713_v54 = vpack.c.bf16 %v2428_v30, %v2428_v30  ;;  %v2586_v37 = vpack.c.bf16 %v2111_v34, %v2111_v34 }
 0x1ff   :  { %2906 = vst.msk [vmem:[%s5896_s4 + $0x2b4] sm:$0xf] %vm2732_vm1, %v2649_v33 }
 0x200   :  { %2970 = vst.msk [vmem:[%s5896_s4 + $0x3b4] sm:$0xf] %vm2732_vm1, %v2713_v54  ;;  %3060 = vmatmul.msk.bf16.gmra.mxu1 %vm1442_vm0, %v1369_v32 }
 0x201   :  { %2843 = vst.msk [vmem:[%s5896_s4 + $0x1b8] sm:$0xf] %vm2732_vm1, %v2586_v37  ;;  %3092 = vmatmul.msk.bf16.gmra.mxu2 %vm1442_vm0, %v1401_v35 }
 0x202   :  { %3124 = vmatmul.msk.bf16.gmra.mxu3 %vm1442_vm0, %v1433_v36  ;;  %v1953_v38 = vpop.f32.mrf.mxu0 }
 0x203   :  { %v2523_v0 = vpack.c.bf16 %v1953_v38, %v1953_v38 }
 0x204   :  { %v2271_v39 = vpop.f32.mrf.mxu2 }
 0x205   :  { %v2431_v40 = vpop.f32.mrf.mxu3  ;;  %v2650_v41 = vpack.c.bf16 %v2271_v39, %v2271_v39  ;;  %v2113_v43 = vpop.f32.mrf.mxu1  ;;  %2780 = vst.msk [vmem:[%s5896_s4 + $0xbc] sm:$0xf] %vm2732_vm1, %v2523_v0 }
 0x206   :  { %v2714_v42 = vpack.c.bf16 %v2431_v40, %v2431_v40  ;;  %v2587_v44 = vpack.c.bf16 %v2113_v43, %v2113_v43 }
 0x207   :  { %2907 = vst.msk [vmem:[%s5896_s4 + $0x2b8] sm:$0xf] %vm2732_vm1, %v2650_v41 }
 0x208   :  { %2971 = vst.msk [vmem:[%s5896_s4 + $0x3b8] sm:$0xf] %vm2732_vm1, %v2714_v42 }
 0x209   :  { %2844 = vst.msk [vmem:[%s5896_s4 + $0x1bc] sm:$0xf] %vm2732_vm1, %v2587_v44 }
 0x20a   :  { %v1956_v45 = vpop.f32.mrf.mxu0 }
 0x20b   :  { %v2524_v47 = vpack.c.bf16 %v1956_v45, %v1956_v45 }
 0x20c   :  { %v2273_v6 = vpop.f32.mrf.mxu2 }
 0x20d   :  { %v2433_v46 = vpop.f32.mrf.mxu3  ;;  %v2651_v48 = vpack.c.bf16 %v2273_v6, %v2273_v6  ;;  %v2116_v50 = vpop.f32.mrf.mxu1  ;;  %2781 = vst.msk [vmem:[%s5896_s4 + $0xc0] sm:$0xf] %vm2732_vm1, %v2524_v47 }
 0x20e   :  { %v2715_v49 = vpack.c.bf16 %v2433_v46, %v2433_v46  ;;  %v2588_v51 = vpack.c.bf16 %v2116_v50, %v2116_v50 }
 0x20f   :  { %2908 = vst.msk [vmem:[%s5896_s4 + $0x2bc] sm:$0xf] %vm2732_vm1, %v2651_v48 }
 0x210   :  { %2972 = vst.msk [vmem:[%s5896_s4 + $0x3bc] sm:$0xf] %vm2732_vm1, %v2715_v49 }
 0x211   :  { %2845 = vst.msk [vmem:[%s5896_s4 + $0x1c0] sm:$0xf] %vm2732_vm1, %v2588_v51 }
 0x212   :  { %v1958_v52 = vpop.f32.mrf.mxu0 }
 0x213   :  { %v2525_v55 = vpack.c.bf16 %v1958_v52, %v1958_v52 }
 0x214   :  { %v2276_v16 = vpop.f32.mrf.mxu2 }
 0x215   :  { %v2436_v53 = vpop.f32.mrf.mxu3  ;;  %v2652_v56 = vpack.c.bf16 %v2276_v16, %v2276_v16  ;;  %v2118_v58 = vpop.f32.mrf.mxu1  ;;  %2782 = vst.msk [vmem:[%s5896_s4 + $0xc4] sm:$0xf] %vm2732_vm1, %v2525_v55 }
 0x216   :  { %v2716_v57 = vpack.c.bf16 %v2436_v53, %v2436_v53  ;;  %v2589_v59 = vpack.c.bf16 %v2118_v58, %v2118_v58 }
 0x217   :  { %2909 = vst.msk [vmem:[%s5896_s4 + $0x2c0] sm:$0xf] %vm2732_vm1, %v2652_v56 }
 0x218   :  { %2973 = vst.msk [vmem:[%s5896_s4 + $0x3c0] sm:$0xf] %vm2732_vm1, %v2716_v57 }
 0x219   :  { %2846 = vst.msk [vmem:[%s5896_s4 + $0x1c4] sm:$0xf] %vm2732_vm1, %v2589_v59 }
 0x21a   :  { %v1961_v60 = vpop.f32.mrf.mxu0 }
 0x21b   :  { %v2526_v63 = vpack.c.bf16 %v1961_v60, %v1961_v60 }
 0x21c   :  { %v2278_v61 = vpop.f32.mrf.mxu2 }
 0x21d   :  { %v2438_v62 = vpop.f32.mrf.mxu3  ;;  %v2653_v1 = vpack.c.bf16 %v2278_v61, %v2278_v61  ;;  %v2121_v3 = vpop.f32.mrf.mxu1  ;;  %2783 = vst.msk [vmem:[%s5896_s4 + $0xc8] sm:$0xf] %vm2732_vm1, %v2526_v63 }
 0x21e   :  { %v2717_v2 = vpack.c.bf16 %v2438_v62, %v2438_v62  ;;  %v2590_v7 = vpack.c.bf16 %v2121_v3, %v2121_v3 }
 0x21f   :  { %2910 = vst.msk [vmem:[%s5896_s4 + $0x2c4] sm:$0xf] %vm2732_vm1, %v2653_v1 }
 0x220   :  { %2974 = vst.msk [vmem:[%s5896_s4 + $0x3c4] sm:$0xf] %vm2732_vm1, %v2717_v2 }
 0x221   :  { %2847 = vst.msk [vmem:[%s5896_s4 + $0x1c8] sm:$0xf] %vm2732_vm1, %v2590_v7 }
 0x222   :  { %v1963_v8 = vpop.f32.mrf.mxu0 }
 0x223   :  { %v2527_v11 = vpack.c.bf16 %v1963_v8, %v1963_v8 }
 0x224   :  { %v2281_v9 = vpop.f32.mrf.mxu2 }
 0x225   :  { %v2441_v10 = vpop.f32.mrf.mxu3  ;;  %v2654_v12 = vpack.c.bf16 %v2281_v9, %v2281_v9  ;;  %v2123_v14 = vpop.f32.mrf.mxu1  ;;  %2784 = vst.msk [vmem:[%s5896_s4 + $0xcc] sm:$0xf] %vm2732_vm1, %v2527_v11 }
 0x226   :  { %v2718_v13 = vpack.c.bf16 %v2441_v10, %v2441_v10  ;;  %v2591_v15 = vpack.c.bf16 %v2123_v14, %v2123_v14 }
 0x227   :  { %2911 = vst.msk [vmem:[%s5896_s4 + $0x2c8] sm:$0xf] %vm2732_vm1, %v2654_v12 }
 0x228   :  { %2975 = vst.msk [vmem:[%s5896_s4 + $0x3c8] sm:$0xf] %vm2732_vm1, %v2718_v13 }
 0x229   :  { %2848 = vst.msk [vmem:[%s5896_s4 + $0x1cc] sm:$0xf] %vm2732_vm1, %v2591_v15 }
 0x22a   :  { %v1966_v17 = vpop.f32.mrf.mxu0 }
 0x22b   :  { %v2528_v19 = vpack.c.bf16 %v1966_v17, %v1966_v17 }
 0x22c   :  { %v2283_v20 = vpop.f32.mrf.mxu2 }
 0x22d   :  { %v2443_v18 = vpop.f32.mrf.mxu3  ;;  %v2655_v21 = vpack.c.bf16 %v2283_v20, %v2283_v20  ;;  %v2126_v22 = vpop.f32.mrf.mxu1  ;;  %2785 = vst.msk [vmem:[%s5896_s4 + $0xd0] sm:$0xf] %vm2732_vm1, %v2528_v19 }
 0x22e   :  { %v2719_v4 = vpack.c.bf16 %v2443_v18, %v2443_v18  ;;  %v2592_v5 = vpack.c.bf16 %v2126_v22, %v2126_v22 }
 0x22f   :  { %2912 = vst.msk [vmem:[%s5896_s4 + $0x2cc] sm:$0xf] %vm2732_vm1, %v2655_v21 }
 0x230   :  { %2976 = vst.msk [vmem:[%s5896_s4 + $0x3cc] sm:$0xf] %vm2732_vm1, %v2719_v4 }
 0x231   :  { %2849 = vst.msk [vmem:[%s5896_s4 + $0x1d0] sm:$0xf] %vm2732_vm1, %v2592_v5 }
 0x232   :  { %v1968_v23 = vpop.f32.mrf.mxu0 }
 0x233   :  { %v2529_v26 = vpack.c.bf16 %v1968_v23, %v1968_v23 }
 0x234   :  { %v2286_v24 = vpop.f32.mrf.mxu2 }
 0x235   :  { %v2446_v25 = vpop.f32.mrf.mxu3  ;;  %v2656_v27 = vpack.c.bf16 %v2286_v24, %v2286_v24  ;;  %v2128_v29 = vpop.f32.mrf.mxu1  ;;  %2786 = vst.msk [vmem:[%s5896_s4 + $0xd4] sm:$0xf] %vm2732_vm1, %v2529_v26 }
 0x236   :  { %v2720_v28 = vpack.c.bf16 %v2446_v25, %v2446_v25  ;;  %v2593_v30 = vpack.c.bf16 %v2128_v29, %v2128_v29 }
 0x237   :  { %2913 = vst.msk [vmem:[%s5896_s4 + $0x2d0] sm:$0xf] %vm2732_vm1, %v2656_v27 }
 0x238   :  { %2977 = vst.msk [vmem:[%s5896_s4 + $0x3d0] sm:$0xf] %vm2732_vm1, %v2720_v28 }
 0x239   :  { %2850 = vst.msk [vmem:[%s5896_s4 + $0x1d4] sm:$0xf] %vm2732_vm1, %v2593_v30 }
 0x23a   :  { %v1971_v31 = vpop.f32.mrf.mxu0 }
 0x23b   :  { %v2530_v54 = vpack.c.bf16 %v1971_v31, %v1971_v31 }
 0x23c   :  { %v2288_v32 = vpop.f32.mrf.mxu2 }
 0x23d   :  { %v2448_v33 = vpop.f32.mrf.mxu3  ;;  %v2657_v34 = vpack.c.bf16 %v2288_v32, %v2288_v32  ;;  %v2131_v36 = vpop.f32.mrf.mxu1  ;;  %2787 = vst.msk [vmem:[%s5896_s4 + $0xd8] sm:$0xf] %vm2732_vm1, %v2530_v54 }
 0x23e   :  { %v2721_v35 = vpack.c.bf16 %v2448_v33, %v2448_v33  ;;  %v2594_v37 = vpack.c.bf16 %v2131_v36, %v2131_v36 }
 0x23f   :  { %2914 = vst.msk [vmem:[%s5896_s4 + $0x2d4] sm:$0xf] %vm2732_vm1, %v2657_v34 }
 0x240   :  { %2978 = vst.msk [vmem:[%s5896_s4 + $0x3d4] sm:$0xf] %vm2732_vm1, %v2721_v35 }
 0x241   :  { %2851 = vst.msk [vmem:[%s5896_s4 + $0x1d8] sm:$0xf] %vm2732_vm1, %v2594_v37 }
 0x242   :  { %v1973_v38 = vpop.f32.mrf.mxu0 }
 0x243   :  { %v2531_v0 = vpack.c.bf16 %v1973_v38, %v1973_v38 }
 0x244   :  { %v2291_v39 = vpop.f32.mrf.mxu2 }
 0x245   :  { %v2451_v40 = vpop.f32.mrf.mxu3  ;;  %v2658_v41 = vpack.c.bf16 %v2291_v39, %v2291_v39  ;;  %v2133_v43 = vpop.f32.mrf.mxu1  ;;  %2788 = vst.msk [vmem:[%s5896_s4 + $0xdc] sm:$0xf] %vm2732_vm1, %v2531_v0 }
 0x246   :  { %v2722_v42 = vpack.c.bf16 %v2451_v40, %v2451_v40  ;;  %v2595_v44 = vpack.c.bf16 %v2133_v43, %v2133_v43 }
 0x247   :  { %2915 = vst.msk [vmem:[%s5896_s4 + $0x2d8] sm:$0xf] %vm2732_vm1, %v2658_v41 }
 0x248   :  { %2979 = vst.msk [vmem:[%s5896_s4 + $0x3d8] sm:$0xf] %vm2732_vm1, %v2722_v42 }
 0x249   :  { %2852 = vst.msk [vmem:[%s5896_s4 + $0x1dc] sm:$0xf] %vm2732_vm1, %v2595_v44 }
 0x24a   :  { %v1976_v45 = vpop.f32.mrf.mxu0 }
 0x24b   :  { %v2532_v47 = vpack.c.bf16 %v1976_v45, %v1976_v45 }
 0x24c   :  { %v2293_v6 = vpop.f32.mrf.mxu2 }
 0x24d   :  { %v2453_v46 = vpop.f32.mrf.mxu3  ;;  %v2659_v48 = vpack.c.bf16 %v2293_v6, %v2293_v6  ;;  %v2136_v50 = vpop.f32.mrf.mxu1  ;;  %2789 = vst.msk [vmem:[%s5896_s4 + $0xe0] sm:$0xf] %vm2732_vm1, %v2532_v47 }
 0x24e   :  { %v2723_v49 = vpack.c.bf16 %v2453_v46, %v2453_v46  ;;  %v2596_v51 = vpack.c.bf16 %v2136_v50, %v2136_v50 }
 0x24f   :  { %2916 = vst.msk [vmem:[%s5896_s4 + $0x2dc] sm:$0xf] %vm2732_vm1, %v2659_v48 }
 0x250   :  { %2980 = vst.msk [vmem:[%s5896_s4 + $0x3dc] sm:$0xf] %vm2732_vm1, %v2723_v49 }
 0x251   :  { %2853 = vst.msk [vmem:[%s5896_s4 + $0x1e0] sm:$0xf] %vm2732_vm1, %v2596_v51 }
 0x252   :  { %v1978_v52 = vpop.f32.mrf.mxu0 }
 0x253   :  { %v2533_v55 = vpack.c.bf16 %v1978_v52, %v1978_v52 }
 0x254   :  { %v2296_v16 = vpop.f32.mrf.mxu2 }
 0x255   :  { %v2456_v53 = vpop.f32.mrf.mxu3  ;;  %v2660_v56 = vpack.c.bf16 %v2296_v16, %v2296_v16  ;;  %v2138_v58 = vpop.f32.mrf.mxu1  ;;  %2790 = vst.msk [vmem:[%s5896_s4 + $0xe4] sm:$0xf] %vm2732_vm1, %v2533_v55 }
 0x256   :  { %v2724_v57 = vpack.c.bf16 %v2456_v53, %v2456_v53  ;;  %v2597_v59 = vpack.c.bf16 %v2138_v58, %v2138_v58 }
 0x257   :  { %2917 = vst.msk [vmem:[%s5896_s4 + $0x2e0] sm:$0xf] %vm2732_vm1, %v2660_v56 }
 0x258   :  { %2981 = vst.msk [vmem:[%s5896_s4 + $0x3e0] sm:$0xf] %vm2732_vm1, %v2724_v57 }
 0x259   :  { %2854 = vst.msk [vmem:[%s5896_s4 + $0x1e4] sm:$0xf] %vm2732_vm1, %v2597_v59 }
 0x25a   :  { %v1981_v60 = vpop.f32.mrf.mxu0 }
 0x25b   :  { %v2534_v63 = vpack.c.bf16 %v1981_v60, %v1981_v60 }
 0x25c   :  { %v2298_v61 = vpop.f32.mrf.mxu2 }
 0x25d   :  { %v2458_v62 = vpop.f32.mrf.mxu3  ;;  %v2661_v1 = vpack.c.bf16 %v2298_v61, %v2298_v61  ;;  %v2141_v3 = vpop.f32.mrf.mxu1  ;;  %2791 = vst.msk [vmem:[%s5896_s4 + $0xe8] sm:$0xf] %vm2732_vm1, %v2534_v63 }
 0x25e   :  { %v2725_v2 = vpack.c.bf16 %v2458_v62, %v2458_v62  ;;  %v2598_v7 = vpack.c.bf16 %v2141_v3, %v2141_v3 }
 0x25f   :  { %2918 = vst.msk [vmem:[%s5896_s4 + $0x2e4] sm:$0xf] %vm2732_vm1, %v2661_v1 }
 0x260   :  { %2982 = vst.msk [vmem:[%s5896_s4 + $0x3e4] sm:$0xf] %vm2732_vm1, %v2725_v2 }
 0x261   :  { %2855 = vst.msk [vmem:[%s5896_s4 + $0x1e8] sm:$0xf] %vm2732_vm1, %v2598_v7 }
 0x262   :  { %v1983_v8 = vpop.f32.mrf.mxu0 }
 0x263   :  { %v2535_v11 = vpack.c.bf16 %v1983_v8, %v1983_v8 }
 0x264   :  { %v2301_v9 = vpop.f32.mrf.mxu2 }
 0x265   :  { %v2461_v10 = vpop.f32.mrf.mxu3  ;;  %v2662_v12 = vpack.c.bf16 %v2301_v9, %v2301_v9  ;;  %v2143_v14 = vpop.f32.mrf.mxu1  ;;  %2792 = vst.msk [vmem:[%s5896_s4 + $0xec] sm:$0xf] %vm2732_vm1, %v2535_v11 }
 0x266   :  { %v2726_v13 = vpack.c.bf16 %v2461_v10, %v2461_v10  ;;  %v2599_v15 = vpack.c.bf16 %v2143_v14, %v2143_v14 }
 0x267   :  { %2919 = vst.msk [vmem:[%s5896_s4 + $0x2e8] sm:$0xf] %vm2732_vm1, %v2662_v12 }
 0x268   :  { %2983 = vst.msk [vmem:[%s5896_s4 + $0x3e8] sm:$0xf] %vm2732_vm1, %v2726_v13 }
 0x269   :  { %2856 = vst.msk [vmem:[%s5896_s4 + $0x1ec] sm:$0xf] %vm2732_vm1, %v2599_v15 }
 0x26a   :  { %v1986_v17 = vpop.f32.mrf.mxu0 }
 0x26b   :  { %v2536_v19 = vpack.c.bf16 %v1986_v17, %v1986_v17 }
 0x26c   :  { %v2303_v20 = vpop.f32.mrf.mxu2 }
 0x26d   :  { %v2463_v18 = vpop.f32.mrf.mxu3  ;;  %v2663_v21 = vpack.c.bf16 %v2303_v20, %v2303_v20  ;;  %v2146_v22 = vpop.f32.mrf.mxu1  ;;  %2793 = vst.msk [vmem:[%s5896_s4 + $0xf0] sm:$0xf] %vm2732_vm1, %v2536_v19 }
 0x26e   :  { %v2727_v4 = vpack.c.bf16 %v2463_v18, %v2463_v18  ;;  %v2600_v5 = vpack.c.bf16 %v2146_v22, %v2146_v22 }
 0x26f   :  { %2920 = vst.msk [vmem:[%s5896_s4 + $0x2ec] sm:$0xf] %vm2732_vm1, %v2663_v21 }
 0x270   :  { %2984 = vst.msk [vmem:[%s5896_s4 + $0x3ec] sm:$0xf] %vm2732_vm1, %v2727_v4 }
 0x271   :  { %2857 = vst.msk [vmem:[%s5896_s4 + $0x1f0] sm:$0xf] %vm2732_vm1, %v2600_v5 }
 0x272   :  { %v1988_v23 = vpop.f32.mrf.mxu0 }
 0x273   :  { %v2537_v26 = vpack.c.bf16 %v1988_v23, %v1988_v23 }
 0x274   :  { %v2306_v24 = vpop.f32.mrf.mxu2 }
 0x275   :  { %v2466_v25 = vpop.f32.mrf.mxu3  ;;  %v2664_v27 = vpack.c.bf16 %v2306_v24, %v2306_v24  ;;  %v2148_v29 = vpop.f32.mrf.mxu1  ;;  %2794 = vst.msk [vmem:[%s5896_s4 + $0xf4] sm:$0xf] %vm2732_vm1, %v2537_v26 }
 0x276   :  { %v2728_v28 = vpack.c.bf16 %v2466_v25, %v2466_v25  ;;  %v2601_v30 = vpack.c.bf16 %v2148_v29, %v2148_v29 }
 0x277   :  { %2921 = vst.msk [vmem:[%s5896_s4 + $0x2f0] sm:$0xf] %vm2732_vm1, %v2664_v27 }
 0x278   :  { %2985 = vst.msk [vmem:[%s5896_s4 + $0x3f0] sm:$0xf] %vm2732_vm1, %v2728_v28 }
 0x279   :  { %2858 = vst.msk [vmem:[%s5896_s4 + $0x1f4] sm:$0xf] %vm2732_vm1, %v2601_v30 }
 0x27a   :  { %v1991_v31 = vpop.f32.mrf.mxu0 }
 0x27b   :  { %v2538_v54 = vpack.c.bf16 %v1991_v31, %v1991_v31 }
 0x27c   :  { %v2308_v32 = vpop.f32.mrf.mxu2 }
 0x27d   :  { %v2468_v33 = vpop.f32.mrf.mxu3  ;;  %v2665_v34 = vpack.c.bf16 %v2308_v32, %v2308_v32  ;;  %v2151_v36 = vpop.f32.mrf.mxu1  ;;  %2795 = vst.msk [vmem:[%s5896_s4 + $0xf8] sm:$0xf] %vm2732_vm1, %v2538_v54 }
 0x27e   :  { %v2729_v35 = vpack.c.bf16 %v2468_v33, %v2468_v33  ;;  %v2602_v37 = vpack.c.bf16 %v2151_v36, %v2151_v36 }
 0x27f   :  { %2922 = vst.msk [vmem:[%s5896_s4 + $0x2f4] sm:$0xf] %vm2732_vm1, %v2665_v34 }
 0x280   :  { %2986 = vst.msk [vmem:[%s5896_s4 + $0x3f4] sm:$0xf] %vm2732_vm1, %v2729_v35 }
 0x281   :  { %2859 = vst.msk [vmem:[%s5896_s4 + $0x1f8] sm:$0xf] %vm2732_vm1, %v2602_v37 }
 0x282   :  { %v1993_v38 = vpop.f32.mrf.mxu0 }
 0x283   :  { %v2539_v0 = vpack.c.bf16 %v1993_v38, %v1993_v38 }
 0x284   :  { %v2311_v39 = vpop.f32.mrf.mxu2 }
 0x285   :  { %v2471_v40 = vpop.f32.mrf.mxu3  ;;  %v2666_v41 = vpack.c.bf16 %v2311_v39, %v2311_v39  ;;  %v2153_v43 = vpop.f32.mrf.mxu1  ;;  %2796 = vst.msk [vmem:[%s5896_s4 + $0xfc] sm:$0xf] %vm2732_vm1, %v2539_v0 }
 0x286   :  { %v2730_v42 = vpack.c.bf16 %v2471_v40, %v2471_v40  ;;  %v2603_v44 = vpack.c.bf16 %v2153_v43, %v2153_v43 }
 0x287   :  { %2923 = vst.msk [vmem:[%s5896_s4 + $0x2f8] sm:$0xf] %vm2732_vm1, %v2666_v41 }
 0x288   :  { %2987 = vst.msk [vmem:[%s5896_s4 + $0x3f8] sm:$0xf] %vm2732_vm1, %v2730_v42 }
 0x289   :  { %2860 = vst.msk [vmem:[%s5896_s4 + $0x1fc] sm:$0xf] %vm2732_vm1, %v2603_v44 }
 0x28c   :  { %v2313_v45 = vpop.f32.mrf.mxu2 }
 0x28d   :  { %v2473_v6 = vpop.f32.mrf.mxu3  ;;  %v2667_v46 = vpack.c.bf16 %v2313_v45, %v2313_v45 }
 0x28e   :  { %v2731_v47 = vpack.c.bf16 %v2473_v6, %v2473_v6 }
 0x28f   :  { %2924 = vst.msk [vmem:[%s5896_s4 + $0x2fc] sm:$0xf] %vm2732_vm1, %v2667_v46 }
 0x290   :  { %2988 = vst.msk [vmem:[%s5896_s4 + $0x3fc] sm:$0xf] %vm2732_vm1, %v2731_v47 }

</bundles_post_ra>
